<compile_context>
chip_gen: v5e
topology: v5e:2x2
jax: 0.10.0
libtpu: 0.0.40
codegen_flags: <defaults>
</compile_context>

<pallas_src>
import numpy as np
import jax
import jax.numpy as jnp
from jax.experimental import pallas as pl
from jax.experimental.pallas import tpu as pltpu


# --------------------------------------------------------------------------
# Fused Pallas kernel: 4-layer bidirectional LSTM + heads, single invocation
# --------------------------------------------------------------------------

def _fused_lstm_kernel(x_ref, wih_ref, whh_ref, b_ref, h0c0_ref,
                       wheads_ref, bheads_ref, eps_ref,
                       heads_ref, hc_ref):
    TB, D = x_ref.shape                  # TB = T*B, D = 2H (layer-0 input zero-padded)
    L = wih_ref.shape[0]
    H = D // 2
    G = 4 * H                            # gates per direction
    O = eps_ref.shape[-1]
    B = h0c0_ref.shape[0] // L
    T = TB // B

    def half_cell(g, c):
        # g: (B, 4H) gate pre-activations for one direction (f32); c: (B, H) f32
        i = jax.nn.sigmoid(g[:, 0:H])
        f = jax.nn.sigmoid(g[:, H:2 * H])
        gg = jnp.tanh(g[:, 2 * H:3 * H])
        o = jax.nn.sigmoid(g[:, 3 * H:4 * H])
        c_new = f * c + i * gg
        h_new = o * jnp.tanh(c_new)
        return h_new, c_new

    bias = b_ref[...]                    # (L, 8H) f32
    h0c0 = h0c0_ref[...]                 # (L*B, 4H) f32, per layer: [h_f | h_b | c_f | c_b]

    x = x_ref[...]                       # (T*B, 2H) f32 — layer-0 input, value-resident
    hc_rows = []

    for l in range(L):                   # static, fully unrolled layer loop
        # Hoisted input projection for BOTH directions in one MXU call (bf16 operands,
        # f32 accumulate), bias folded in:  (T*B,2H) @ (2H,8H) -> (T*B,8H) [fwd | bwd].
        gx = (jnp.dot(x.astype(jnp.bfloat16), wih_ref[l],
                      preferred_element_type=jnp.float32)
              + bias[l:l + 1, :])                                    # (T*B, 8H) f32

        whh_blk = whh_ref[l]             # (2H, 8H) bf16, block-diag: [h_f|h_b] -> [fwd|bwd gates]

        slab = h0c0[l * B:(l + 1) * B, :]                            # (B, 4H)
        h_pk = slab[:, 0:2 * H]                                      # packed [h_f | h_b]
        c_f = slab[:, 2 * H:3 * H]
        c_b = slab[:, 3 * H:4 * H]

        ys_f = [None] * T
        ys_b = [None] * T
        for t in range(T):               # static, fully unrolled time loop (recurrent only)
            tb = T - 1 - t
            # Single fused recurrent matmul for both directions: (B,2H)@(2H,8H).
            gr = jnp.dot(h_pk.astype(jnp.bfloat16), whh_blk,
                         preferred_element_type=jnp.float32)         # (B, 8H)
            g_f = gr[:, 0:G] + gx[t * B:(t + 1) * B, 0:G]
            g_b = gr[:, G:2 * G] + gx[tb * B:(tb + 1) * B, G:2 * G]
            h_f, c_f = half_cell(g_f, c_f)
            h_b, c_b = half_cell(g_b, c_b)
            ys_f[t] = h_f
            ys_b[tb] = h_b
            h_pk = jnp.concatenate([h_f, h_b], axis=1)               # repack for next step

        # Final h/c of this layer (written to VMEM once, after the layer loop).
        hc_rows.append(jnp.concatenate([h_f, h_b, c_f, c_b], axis=1))  # (B, 4H)

        # Next-layer input, built once per layer as a value (never touches VMEM).
        x = jnp.concatenate(
            [jnp.concatenate([ys_f[t], ys_b[t]], axis=1) for t in range(T)],
            axis=0)                                                   # (T*B, 2H)

    hc_ref[...] = jnp.concatenate(hc_rows, axis=0)                    # (L*B, 4H) single store

    # ---------------- mu / logvar heads + reparameterized sample ----------------
    heads = (jnp.dot(x.astype(jnp.bfloat16), wheads_ref[...],
                     preferred_element_type=jnp.float32)
             + bheads_ref[...])                                       # (T*B, 2O) = [mu | logvar]
    mu = jnp.clip(heads[:, 0:O], -100.0, 100.0)
    logvar = jnp.clip(heads[:, O:2 * O], -20.0, 20.0)
    std = jnp.exp(0.5 * logvar)
    samp = mu + eps_ref[...] * std
    heads_ref[...] = jnp.concatenate([samp, mu, logvar], axis=1)      # (T*B, 3O) single store


# --------------------------------------------------------------------------
# Parameter init (deterministic, mimicking PyTorch default init shapes/scales)
# --------------------------------------------------------------------------

def init_params(key, vocab, E, H, n_layers):
    keys = iter(jax.random.split(key, 8 * n_layers * 6 + 8))
    u = lambda shp, k: jax.random.uniform(next(keys), shp, jnp.float32, -k, k)
    params = {
        "embedding": jax.random.normal(next(keys), (vocab, E), jnp.float32),
        "lstm": [],
    }
    kk = 1.0 / np.sqrt(H)
    for l in range(n_layers):
        in_dim = E if l == 0 else 2 * H
        layer = {}
        for d in ("f", "b"):
            layer[f"w_ih_{d}"] = u((4 * H, in_dim), kk)
            layer[f"w_hh_{d}"] = u((4 * H, H), kk)
            layer[f"b_{d}"] = u((4 * H,), kk) + u((4 * H,), kk)   # b_ih + b_hh
        params["lstm"].append(layer)
    kin = 1.0 / np.sqrt(2 * H)
    O = H // 2
    params["w_mu"] = u((O, 2 * H), kin)
    params["b_mu"] = u((O,), kin)
    params["w_sig"] = u((O, 2 * H), kin)
    params["b_sig"] = u((O,), kin)
    return params


def pack_params(params):
    """One-time weight repack into the MXU-friendly (bf16, block-diagonal) layout."""
    lstm = params["lstm"]
    H = lstm[0]["w_hh_f"].shape[1]
    O = params["w_mu"].shape[0]
    G = 4 * H
    wih_list, whh_list, b_list = [], [], []
    for lw in lstm:
        in_dim = lw["w_ih_f"].shape[1]
        assert in_dim <= 2 * H, "embedding_size must be <= 2*hidden_size"
        wih = jnp.concatenate([lw["w_ih_f"].T, lw["w_ih_b"].T], axis=1)   # (in_dim, 8H)
        if in_dim < 2 * H:
            wih = jnp.pad(wih, ((0, 2 * H - in_dim), (0, 0)))             # zero rows -> no-op
        wih_list.append(wih)
        # Block-diagonal recurrent weight: [h_f | h_b] @ whh_blk -> [fwd gates | bwd gates]
        whh_blk = jnp.zeros((2 * H, 2 * G), jnp.float32)
        whh_blk = whh_blk.at[0:H, 0:G].set(lw["w_hh_f"].T)
        whh_blk = whh_blk.at[H:2 * H, G:2 * G].set(lw["w_hh_b"].T)
        whh_list.append(whh_blk)
        b_list.append(jnp.concatenate([lw["b_f"], lw["b_b"]]))            # (8H,)
    return {
        "embedding": params["embedding"],
        "wih": jnp.stack(wih_list).astype(jnp.bfloat16),                  # (L, 2H, 8H) bf16
        "whh": jnp.stack(whh_list).astype(jnp.bfloat16),                  # (L, 2H, 8H) bf16
        "b": jnp.stack(b_list),                                           # (L, 8H)  f32
        "w_heads": jnp.concatenate([params["w_mu"].T, params["w_sig"].T],
                                   axis=1).astype(jnp.bfloat16),          # (2H, 2O) bf16
        "b_heads": jnp.concatenate([params["b_mu"],
                                    params["b_sig"]]).reshape(1, 2 * O),  # (1, 2O) f32
    }


# --------------------------------------------------------------------------
# Forward pass (single gridless Pallas call) and pure-JAX reference
# --------------------------------------------------------------------------

def _vmem_spec():
    return pl.BlockSpec(memory_space=pltpu.MemorySpace.VMEM)


def forward(packed, word_input, last_hidden, eps):
    """word_input: (B, T) int32; last_hidden: ((2L,B,H),(2L,B,H)); eps: (B,T,H//2)."""
    h0_all, c0_all = last_hidden
    B, T = word_input.shape
    H = h0_all.shape[-1]
    L = packed["wih"].shape[0]
    O = packed["w_heads"].shape[1] // 2

    # Embedding lookup (gather) kept in plain JAX glue (XLA handles the dynamic gather).
    emb = jnp.take(packed["embedding"], word_input, axis=0)       # (B, T, E)
    x = jnp.transpose(emb, (1, 0, 2)).astype(jnp.float32)         # (T, B, E)
    E = x.shape[-1]
    assert E <= 2 * H, "embedding_size must be <= 2*hidden_size for layer-0 zero padding"
    if E < 2 * H:                                                 # pad layer-0 features to 2H
        x = jnp.pad(x, ((0, 0), (0, 0), (0, 2 * H - E)))
    x2d = x.reshape(T * B, 2 * H)                                 # time-major flat, no 3-D tiles

    # Pack h0/c0 into one lane-dense slab (L*B, 4H): per layer rows [h_f | h_b | c_f | c_b].
    h0p = h0_all.reshape(L, 2, B, H)
    c0p = c0_all.reshape(L, 2, B, H)
    h0c0 = jnp.concatenate([h0p[:, 0], h0p[:, 1], c0p[:, 0], c0p[:, 1]],
                           axis=-1).reshape(L * B, 4 * H)

    eps2d = jnp.transpose(eps, (1, 0, 2)).reshape(T * B, O).astype(jnp.float32)

    # TODO(synk): inter-layer dropout(0.5) of nn.LSTM in train mode is omitted (eval semantics).
    heads_out, hc_out = pl.pallas_call(
        _fused_lstm_kernel,
        out_shape=(jax.ShapeDtypeStruct((T * B, 3 * O), jnp.float32),
                   jax.ShapeDtypeStruct((L * B, 4 * H), jnp.float32)),
        in_specs=[_vmem_spec()] * 8,
        out_specs=(_vmem_spec(), _vmem_spec()),
    )(x2d, packed["wih"], packed["whh"], packed["b"], h0c0,
      packed["w_heads"], packed["b_heads"], eps2d)

    # Layout plumbing back to the PyTorch shapes (wrapper side, outside the kernel).
    samp = heads_out[:, 0:O].reshape(T, B, O).transpose(1, 0, 2)       # (B, T, O)
    mu = heads_out[:, O:2 * O].reshape(T, B, O).transpose(1, 0, 2)
    logvar = heads_out[:, 2 * O:3 * O].reshape(T, B, O).transpose(1, 0, 2)

    hc4 = hc_out.reshape(L, B, 4, H)                                   # [h_f, h_b, c_f, c_b]
    h_n = jnp.transpose(hc4[:, :, 0:2, :], (0, 2, 1, 3)).reshape(2 * L, B, H)
    c_n = jnp.transpose(hc4[:, :, 2:4, :], (0, 2, 1, 3)).reshape(2 * L, B, H)
    return samp, (h_n, c_n), mu, logvar


def ref_forward(params, word_input, last_hidden, eps, matmul_dtype=jnp.float32):
    """Pure-JAX reference. matmul_dtype=bfloat16 mirrors the kernel's MXU operand cast."""
    def mm(a, b):
        return jnp.dot(a.astype(matmul_dtype), b.astype(matmul_dtype),
                       preferred_element_type=jnp.float32)

    h0_all, c0_all = last_hidden
    B, T = word_input.shape
    H = h0_all.shape[-1]
    emb = jnp.take(params["embedding"], word_input, axis=0)
    x = jnp.transpose(emb, (1, 0, 2)).astype(jnp.float32)

    def cell(xt, h, c, Wih, Whh, b):
        g = mm(xt, Wih.T) + mm(h, Whh.T) + b
        i = jax.nn.sigmoid(g[:, :H]); f = jax.nn.sigmoid(g[:, H:2 * H])
        gg = jnp.tanh(g[:, 2 * H:3 * H]); o = jax.nn.sigmoid(g[:, 3 * H:])
        c = f * c + i * gg
        return o * jnp.tanh(c), c

    h_fin, c_fin = [], []
    for l, lw in enumerate(params["lstm"]):
        outs = {}
        for d, rev, idx in (("f", False, 2 * l), ("b", True, 2 * l + 1)):
            h, c = h0_all[idx], c0_all[idx]
            ys = [None] * T
            order = range(T - 1, -1, -1) if rev else range(T)
            for t in order:
                h, c = cell(x[t], h, c, lw[f"w_ih_{d}"], lw[f"w_hh_{d}"], lw[f"b_{d}"])
                ys[t] = h
            outs[d] = jnp.stack(ys)
            h_fin.append(h); c_fin.append(c)
        x = jnp.concatenate([outs["f"], outs["b"]], axis=-1)

    rnn_out = jnp.transpose(x, (1, 0, 2))
    mu = mm(rnn_out, params["w_mu"].T) + params["b_mu"]
    logvar = jnp.clip(mm(rnn_out, params["w_sig"].T) + params["b_sig"], -20.0, 20.0)
    std = jnp.exp(0.5 * logvar)
    mu = jnp.clip(mu, -100.0, 100.0)
    return mu + eps * std, (jnp.stack(h_fin), jnp.stack(c_fin)), mu, logvar


# --------------------------------------------------------------------------

if __name__ == "__main__":
    B, T = 2, 8
    H, E, V = 32, 32, 50
    n_layers = 4

    key = jax.random.PRNGKey(0)
    k_param, k_tok, k_h, k_c, k_eps = jax.random.split(key, 5)
    params = init_params(k_param, V, E, H, n_layers)
    packed = pack_params(params)

    word_input = jax.random.randint(k_tok, (B, T), 0, V, dtype=jnp.int32)
    h0 = 0.1 * jax.random.normal(k_h, (2 * n_layers, B, H), jnp.float32)
    c0 = 0.1 * jax.random.normal(k_c, (2 * n_layers, B, H), jnp.float32)
    eps = jax.random.normal(k_eps, (B, T, H // 2), jnp.float32)

    fwd = jax.jit(forward)
    out, (h_n, c_n), mu, logvar = fwd(packed, word_input, (h0, c0), eps)
    jax.block_until_ready((out, h_n, c_n, mu, logvar))

    # Tight check: reference using the same bf16 MXU operands (f32 accumulation).
    ro, (rh, rc), rmu, rlv = ref_forward(params, word_input, (h0, c0), eps,
                                         matmul_dtype=jnp.bfloat16)
    for a, b_, name in ((out, ro, "sample"), (h_n, rh, "h_n"), (c_n, rc, "c_n"),
                        (mu, rmu, "mu"), (logvar, rlv, "logvar")):
        assert np.allclose(np.asarray(a), np.asarray(b_), atol=5e-3, rtol=5e-3), name

    # Looser sanity check against the full-f32 reference (bf16 MXU operands vs f32 model).
    fo, (fh, fc), fmu, flv = ref_forward(params, word_input, (h0, c0), eps,
                                         matmul_dtype=jnp.float32)
    for a, b_, name in ((out, fo, "sample"), (h_n, fh, "h_n"), (c_n, fc, "c_n"),
                        (mu, fmu, "mu"), (logvar, flv, "logvar")):
        assert np.allclose(np.asarray(a), np.asarray(b_), atol=5e-2, rtol=5e-2), name

    print("KERNEL_OK")
</pallas_src>

<mosaic_0001>
module attributes {stable_mosaic.version = 11 : i64} {
  func.func @_fused_lstm_kernel(%arg0: memref<16x64xf32, #tpu.memory_space<vmem>>, %arg1: memref<4x64x256xbf16, #tpu.memory_space<vmem>>, %arg2: memref<4x64x256xbf16, #tpu.memory_space<vmem>>, %arg3: memref<4x256xf32, #tpu.memory_space<vmem>>, %arg4: memref<8x128xf32, #tpu.memory_space<vmem>>, %arg5: memref<64x32xbf16, #tpu.memory_space<vmem>>, %arg6: memref<1x32xf32, #tpu.memory_space<vmem>>, %arg7: memref<16x16xf32, #tpu.memory_space<vmem>>, %arg8: memref<16x48xf32, #tpu.memory_space<vmem>>, %arg9: memref<8x128xf32, #tpu.memory_space<vmem>>) attributes {dimension_semantics = [], scalar_prefetch = 0 : i64, scratch_operands = 0 : i64, tpu.core_type = #tpu.core_type<tc>} {
    %c0 = arith.constant 0 : index
    %c0_0 = arith.constant 0 : index
    %0 = vector.load %arg3[%c0, %c0_0] : memref<4x256xf32, #tpu.memory_space<vmem>>, vector<4x256xf32>
    %c0_1 = arith.constant 0 : index
    %c0_2 = arith.constant 0 : index
    %1 = vector.load %arg4[%c0_1, %c0_2] : memref<8x128xf32, #tpu.memory_space<vmem>>, vector<8x128xf32>
    %c0_3 = arith.constant 0 : index
    %c0_4 = arith.constant 0 : index
    %2 = vector.load %arg0[%c0_3, %c0_4] : memref<16x64xf32, #tpu.memory_space<vmem>>, vector<16x64xf32>
    %3 = arith.truncf %2 : vector<16x64xf32> to vector<16x64xbf16>
    %c0_5 = arith.constant 0 : index
    %c0_6 = arith.constant 0 : index
    %c0_7 = arith.constant 0 : index
    %4 = vector.load %arg1[%c0_5, %c0_6, %c0_7] : memref<4x64x256xbf16, #tpu.memory_space<vmem>>, vector<1x64x256xbf16>
    %5 = vector.shape_cast %4 : vector<1x64x256xbf16> to vector<64x256xbf16>
    %cst = arith.constant dense<0.000000e+00> : vector<16x256xf32>
    %6 = tpu.matmul %3, %5, %cst {dimension_numbers = #tpu.dot_dimension_numbers<[1], [0], [0], [1], [0, 0, 1, 1], [], []>} : vector<16x64xbf16>, vector<64x256xbf16>, vector<16x256xf32> -> vector<16x256xf32>
    %7 = vector.extract_strided_slice %0 {offsets = [0, 0], sizes = [1, 256], strides = [1, 1]} : vector<4x256xf32> to vector<1x256xf32>
    %8 = vector.broadcast %7 : vector<1x256xf32> to vector<16x256xf32>
    %9 = arith.addf %6, %8 : vector<16x256xf32>
    %c0_8 = arith.constant 0 : index
    %c0_9 = arith.constant 0 : index
    %c0_10 = arith.constant 0 : index
    %10 = vector.load %arg2[%c0_8, %c0_9, %c0_10] : memref<4x64x256xbf16, #tpu.memory_space<vmem>>, vector<1x64x256xbf16>
    %11 = vector.shape_cast %10 : vector<1x64x256xbf16> to vector<64x256xbf16>
    %12 = vector.extract_strided_slice %1 {offsets = [0, 0], sizes = [2, 128], strides = [1, 1]} : vector<8x128xf32> to vector<2x128xf32>
    %13 = vector.extract_strided_slice %12 {offsets = [0, 0], sizes = [2, 64], strides = [1, 1]} : vector<2x128xf32> to vector<2x64xf32>
    %14 = vector.extract_strided_slice %12 {offsets = [0, 64], sizes = [2, 32], strides = [1, 1]} : vector<2x128xf32> to vector<2x32xf32>
    %15 = vector.extract_strided_slice %12 {offsets = [0, 96], sizes = [2, 32], strides = [1, 1]} : vector<2x128xf32> to vector<2x32xf32>
    %16 = arith.truncf %13 : vector<2x64xf32> to vector<2x64xbf16>
    %cst_11 = arith.constant dense<0.000000e+00> : vector<2x256xf32>
    %17 = tpu.matmul %16, %11, %cst_11 {dimension_numbers = #tpu.dot_dimension_numbers<[1], [0], [0], [1], [0, 0, 1, 1], [], []>} : vector<2x64xbf16>, vector<64x256xbf16>, vector<2x256xf32> -> vector<2x256xf32>
    %18 = vector.extract_strided_slice %17 {offsets = [0, 0], sizes = [2, 128], strides = [1, 1]} : vector<2x256xf32> to vector<2x128xf32>
    %19 = vector.extract_strided_slice %9 {offsets = [0, 0], sizes = [2, 128], strides = [1, 1]} : vector<16x256xf32> to vector<2x128xf32>
    %20 = arith.addf %18, %19 : vector<2x128xf32>
    %21 = vector.extract_strided_slice %17 {offsets = [0, 128], sizes = [2, 128], strides = [1, 1]} : vector<2x256xf32> to vector<2x128xf32>
    %22 = vector.extract_strided_slice %9 {offsets = [14, 128], sizes = [2, 128], strides = [1, 1]} : vector<16x256xf32> to vector<2x128xf32>
    %23 = arith.addf %21, %22 : vector<2x128xf32>
    %24 = vector.extract_strided_slice %20 {offsets = [0, 0], sizes = [2, 32], strides = [1, 1]} : vector<2x128xf32> to vector<2x32xf32>
    %25 = arith.negf %24 : vector<2x32xf32>
    %26 = math.exp %25 : vector<2x32xf32>
    %cst_12 = arith.constant 1.000000e+00 : f32
    %27 = vector.broadcast %cst_12 : f32 to vector<2x32xf32>
    %28 = arith.addf %27, %26 : vector<2x32xf32>
    %29 = arith.divf %27, %28 : vector<2x32xf32>
    %30 = vector.extract_strided_slice %20 {offsets = [0, 32], sizes = [2, 32], strides = [1, 1]} : vector<2x128xf32> to vector<2x32xf32>
    %31 = arith.negf %30 : vector<2x32xf32>
    %32 = math.exp %31 : vector<2x32xf32>
    %cst_13 = arith.constant 1.000000e+00 : f32
    %33 = vector.broadcast %cst_13 : f32 to vector<2x32xf32>
    %34 = arith.addf %33, %32 : vector<2x32xf32>
    %35 = arith.divf %33, %34 : vector<2x32xf32>
    %36 = vector.extract_strided_slice %20 {offsets = [0, 64], sizes = [2, 32], strides = [1, 1]} : vector<2x128xf32> to vector<2x32xf32>
    %37 = math.tanh %36 : vector<2x32xf32>
    %38 = vector.extract_strided_slice %20 {offsets = [0, 96], sizes = [2, 32], strides = [1, 1]} : vector<2x128xf32> to vector<2x32xf32>
    %39 = arith.negf %38 : vector<2x32xf32>
    %40 = math.exp %39 : vector<2x32xf32>
    %cst_14 = arith.constant 1.000000e+00 : f32
    %41 = vector.broadcast %cst_14 : f32 to vector<2x32xf32>
    %42 = arith.addf %41, %40 : vector<2x32xf32>
    %43 = arith.divf %41, %42 : vector<2x32xf32>
    %44 = arith.mulf %35, %14 : vector<2x32xf32>
    %45 = arith.mulf %29, %37 : vector<2x32xf32>
    %46 = arith.addf %44, %45 : vector<2x32xf32>
    %47 = math.tanh %46 : vector<2x32xf32>
    %48 = arith.mulf %43, %47 : vector<2x32xf32>
    %49 = vector.extract_strided_slice %23 {offsets = [0, 0], sizes = [2, 32], strides = [1, 1]} : vector<2x128xf32> to vector<2x32xf32>
    %50 = arith.negf %49 : vector<2x32xf32>
    %51 = math.exp %50 : vector<2x32xf32>
    %cst_15 = arith.constant 1.000000e+00 : f32
    %52 = vector.broadcast %cst_15 : f32 to vector<2x32xf32>
    %53 = arith.addf %52, %51 : vector<2x32xf32>
    %54 = arith.divf %52, %53 : vector<2x32xf32>
    %55 = vector.extract_strided_slice %23 {offsets = [0, 32], sizes = [2, 32], strides = [1, 1]} : vector<2x128xf32> to vector<2x32xf32>
    %56 = arith.negf %55 : vector<2x32xf32>
    %57 = math.exp %56 : vector<2x32xf32>
    %cst_16 = arith.constant 1.000000e+00 : f32
    %58 = vector.broadcast %cst_16 : f32 to vector<2x32xf32>
    %59 = arith.addf %58, %57 : vector<2x32xf32>
    %60 = arith.divf %58, %59 : vector<2x32xf32>
    %61 = vector.extract_strided_slice %23 {offsets = [0, 64], sizes = [2, 32], strides = [1, 1]} : vector<2x128xf32> to vector<2x32xf32>
    %62 = math.tanh %61 : vector<2x32xf32>
    %63 = vector.extract_strided_slice %23 {offsets = [0, 96], sizes = [2, 32], strides = [1, 1]} : vector<2x128xf32> to vector<2x32xf32>
    %64 = arith.negf %63 : vector<2x32xf32>
    %65 = math.exp %64 : vector<2x32xf32>
    %cst_17 = arith.constant 1.000000e+00 : f32
    %66 = vector.broadcast %cst_17 : f32 to vector<2x32xf32>
    %67 = arith.addf %66, %65 : vector<2x32xf32>
    %68 = arith.divf %66, %67 : vector<2x32xf32>
    %69 = arith.mulf %60, %15 : vector<2x32xf32>
    %70 = arith.mulf %54, %62 : vector<2x32xf32>
    %71 = arith.addf %69, %70 : vector<2x32xf32>
    %72 = math.tanh %71 : vector<2x32xf32>
    %73 = arith.mulf %68, %72 : vector<2x32xf32>
    %74 = tpu.concatenate %48, %73 in 1 : vector<2x32xf32>, vector<2x32xf32> -> vector<2x64xf32>
    %75 = arith.truncf %74 : vector<2x64xf32> to vector<2x64xbf16>
    %cst_18 = arith.constant dense<0.000000e+00> : vector<2x256xf32>
    %76 = tpu.matmul %75, %11, %cst_18 {dimension_numbers = #tpu.dot_dimension_numbers<[1], [0], [0], [1], [0, 0, 1, 1], [], []>} : vector<2x64xbf16>, vector<64x256xbf16>, vector<2x256xf32> -> vector<2x256xf32>
    %77 = vector.extract_strided_slice %76 {offsets = [0, 0], sizes = [2, 128], strides = [1, 1]} : vector<2x256xf32> to vector<2x128xf32>
    %78 = vector.extract_strided_slice %9 {offsets = [2, 0], sizes = [2, 128], strides = [1, 1]} : vector<16x256xf32> to vector<2x128xf32>
    %79 = arith.addf %77, %78 : vector<2x128xf32>
    %80 = vector.extract_strided_slice %76 {offsets = [0, 128], sizes = [2, 128], strides = [1, 1]} : vector<2x256xf32> to vector<2x128xf32>
    %81 = vector.extract_strided_slice %9 {offsets = [12, 128], sizes = [2, 128], strides = [1, 1]} : vector<16x256xf32> to vector<2x128xf32>
    %82 = arith.addf %80, %81 : vector<2x128xf32>
    %83 = vector.extract_strided_slice %79 {offsets = [0, 0], sizes = [2, 32], strides = [1, 1]} : vector<2x128xf32> to vector<2x32xf32>
    %84 = arith.negf %83 : vector<2x32xf32>
    %85 = math.exp %84 : vector<2x32xf32>
    %cst_19 = arith.constant 1.000000e+00 : f32
    %86 = vector.broadcast %cst_19 : f32 to vector<2x32xf32>
    %87 = arith.addf %86, %85 : vector<2x32xf32>
    %88 = arith.divf %86, %87 : vector<2x32xf32>
    %89 = vector.extract_strided_slice %79 {offsets = [0, 32], sizes = [2, 32], strides = [1, 1]} : vector<2x128xf32> to vector<2x32xf32>
    %90 = arith.negf %89 : vector<2x32xf32>
    %91 = math.exp %90 : vector<2x32xf32>
    %cst_20 = arith.constant 1.000000e+00 : f32
    %92 = vector.broadcast %cst_20 : f32 to vector<2x32xf32>
    %93 = arith.addf %92, %91 : vector<2x32xf32>
    %94 = arith.divf %92, %93 : vector<2x32xf32>
    %95 = vector.extract_strided_slice %79 {offsets = [0, 64], sizes = [2, 32], strides = [1, 1]} : vector<2x128xf32> to vector<2x32xf32>
    %96 = math.tanh %95 : vector<2x32xf32>
    %97 = vector.extract_strided_slice %79 {offsets = [0, 96], sizes = [2, 32], strides = [1, 1]} : vector<2x128xf32> to vector<2x32xf32>
    %98 = arith.negf %97 : vector<2x32xf32>
    %99 = math.exp %98 : vector<2x32xf32>
    %cst_21 = arith.constant 1.000000e+00 : f32
    %100 = vector.broadcast %cst_21 : f32 to vector<2x32xf32>
    %101 = arith.addf %100, %99 : vector<2x32xf32>
    %102 = arith.divf %100, %101 : vector<2x32xf32>
    %103 = arith.mulf %94, %46 : vector<2x32xf32>
    %104 = arith.mulf %88, %96 : vector<2x32xf32>
    %105 = arith.addf %103, %104 : vector<2x32xf32>
    %106 = math.tanh %105 : vector<2x32xf32>
    %107 = arith.mulf %102, %106 : vector<2x32xf32>
    %108 = vector.extract_strided_slice %82 {offsets = [0, 0], sizes = [2, 32], strides = [1, 1]} : vector<2x128xf32> to vector<2x32xf32>
    %109 = arith.negf %108 : vector<2x32xf32>
    %110 = math.exp %109 : vector<2x32xf32>
    %cst_22 = arith.constant 1.000000e+00 : f32
    %111 = vector.broadcast %cst_22 : f32 to vector<2x32xf32>
    %112 = arith.addf %111, %110 : vector<2x32xf32>
    %113 = arith.divf %111, %112 : vector<2x32xf32>
    %114 = vector.extract_strided_slice %82 {offsets = [0, 32], sizes = [2, 32], strides = [1, 1]} : vector<2x128xf32> to vector<2x32xf32>
    %115 = arith.negf %114 : vector<2x32xf32>
    %116 = math.exp %115 : vector<2x32xf32>
    %cst_23 = arith.constant 1.000000e+00 : f32
    %117 = vector.broadcast %cst_23 : f32 to vector<2x32xf32>
    %118 = arith.addf %117, %116 : vector<2x32xf32>
    %119 = arith.divf %117, %118 : vector<2x32xf32>
    %120 = vector.extract_strided_slice %82 {offsets = [0, 64], sizes = [2, 32], strides = [1, 1]} : vector<2x128xf32> to vector<2x32xf32>
    %121 = math.tanh %120 : vector<2x32xf32>
    %122 = vector.extract_strided_slice %82 {offsets = [0, 96], sizes = [2, 32], strides = [1, 1]} : vector<2x128xf32> to vector<2x32xf32>
    %123 = arith.negf %122 : vector<2x32xf32>
    %124 = math.exp %123 : vector<2x32xf32>
    %cst_24 = arith.constant 1.000000e+00 : f32
    %125 = vector.broadcast %cst_24 : f32 to vector<2x32xf32>
    %126 = arith.addf %125, %124 : vector<2x32xf32>
    %127 = arith.divf %125, %126 : vector<2x32xf32>
    %128 = arith.mulf %119, %71 : vector<2x32xf32>
    %129 = arith.mulf %113, %121 : vector<2x32xf32>
    %130 = arith.addf %128, %129 : vector<2x32xf32>
    %131 = math.tanh %130 : vector<2x32xf32>
    %132 = arith.mulf %127, %131 : vector<2x32xf32>
    %133 = tpu.concatenate %107, %132 in 1 : vector<2x32xf32>, vector<2x32xf32> -> vector<2x64xf32>
    %134 = arith.truncf %133 : vector<2x64xf32> to vector<2x64xbf16>
    %cst_25 = arith.constant dense<0.000000e+00> : vector<2x256xf32>
    %135 = tpu.matmul %134, %11, %cst_25 {dimension_numbers = #tpu.dot_dimension_numbers<[1], [0], [0], [1], [0, 0, 1, 1], [], []>} : vector<2x64xbf16>, vector<64x256xbf16>, vector<2x256xf32> -> vector<2x256xf32>
    %136 = vector.extract_strided_slice %135 {offsets = [0, 0], sizes = [2, 128], strides = [1, 1]} : vector<2x256xf32> to vector<2x128xf32>
    %137 = vector.extract_strided_slice %9 {offsets = [4, 0], sizes = [2, 128], strides = [1, 1]} : vector<16x256xf32> to vector<2x128xf32>
    %138 = arith.addf %136, %137 : vector<2x128xf32>
    %139 = vector.extract_strided_slice %135 {offsets = [0, 128], sizes = [2, 128], strides = [1, 1]} : vector<2x256xf32> to vector<2x128xf32>
    %140 = vector.extract_strided_slice %9 {offsets = [10, 128], sizes = [2, 128], strides = [1, 1]} : vector<16x256xf32> to vector<2x128xf32>
    %141 = arith.addf %139, %140 : vector<2x128xf32>
    %142 = vector.extract_strided_slice %138 {offsets = [0, 0], sizes = [2, 32], strides = [1, 1]} : vector<2x128xf32> to vector<2x32xf32>
    %143 = arith.negf %142 : vector<2x32xf32>
    %144 = math.exp %143 : vector<2x32xf32>
    %cst_26 = arith.constant 1.000000e+00 : f32
    %145 = vector.broadcast %cst_26 : f32 to vector<2x32xf32>
    %146 = arith.addf %145, %144 : vector<2x32xf32>
    %147 = arith.divf %145, %146 : vector<2x32xf32>
    %148 = vector.extract_strided_slice %138 {offsets = [0, 32], sizes = [2, 32], strides = [1, 1]} : vector<2x128xf32> to vector<2x32xf32>
    %149 = arith.negf %148 : vector<2x32xf32>
    %150 = math.exp %149 : vector<2x32xf32>
    %cst_27 = arith.constant 1.000000e+00 : f32
    %151 = vector.broadcast %cst_27 : f32 to vector<2x32xf32>
    %152 = arith.addf %151, %150 : vector<2x32xf32>
    %153 = arith.divf %151, %152 : vector<2x32xf32>
    %154 = vector.extract_strided_slice %138 {offsets = [0, 64], sizes = [2, 32], strides = [1, 1]} : vector<2x128xf32> to vector<2x32xf32>
    %155 = math.tanh %154 : vector<2x32xf32>
    %156 = vector.extract_strided_slice %138 {offsets = [0, 96], sizes = [2, 32], strides = [1, 1]} : vector<2x128xf32> to vector<2x32xf32>
    %157 = arith.negf %156 : vector<2x32xf32>
    %158 = math.exp %157 : vector<2x32xf32>
    %cst_28 = arith.constant 1.000000e+00 : f32
    %159 = vector.broadcast %cst_28 : f32 to vector<2x32xf32>
    %160 = arith.addf %159, %158 : vector<2x32xf32>
    %161 = arith.divf %159, %160 : vector<2x32xf32>
    %162 = arith.mulf %153, %105 : vector<2x32xf32>
    %163 = arith.mulf %147, %155 : vector<2x32xf32>
    %164 = arith.addf %162, %163 : vector<2x32xf32>
    %165 = math.tanh %164 : vector<2x32xf32>
    %166 = arith.mulf %161, %165 : vector<2x32xf32>
    %167 = vector.extract_strided_slice %141 {offsets = [0, 0], sizes = [2, 32], strides = [1, 1]} : vector<2x128xf32> to vector<2x32xf32>
    %168 = arith.negf %167 : vector<2x32xf32>
    %169 = math.exp %168 : vector<2x32xf32>
    %cst_29 = arith.constant 1.000000e+00 : f32
    %170 = vector.broadcast %cst_29 : f32 to vector<2x32xf32>
    %171 = arith.addf %170, %169 : vector<2x32xf32>
    %172 = arith.divf %170, %171 : vector<2x32xf32>
    %173 = vector.extract_strided_slice %141 {offsets = [0, 32], sizes = [2, 32], strides = [1, 1]} : vector<2x128xf32> to vector<2x32xf32>
    %174 = arith.negf %173 : vector<2x32xf32>
    %175 = math.exp %174 : vector<2x32xf32>
    %cst_30 = arith.constant 1.000000e+00 : f32
    %176 = vector.broadcast %cst_30 : f32 to vector<2x32xf32>
    %177 = arith.addf %176, %175 : vector<2x32xf32>
    %178 = arith.divf %176, %177 : vector<2x32xf32>
    %179 = vector.extract_strided_slice %141 {offsets = [0, 64], sizes = [2, 32], strides = [1, 1]} : vector<2x128xf32> to vector<2x32xf32>
    %180 = math.tanh %179 : vector<2x32xf32>
    %181 = vector.extract_strided_slice %141 {offsets = [0, 96], sizes = [2, 32], strides = [1, 1]} : vector<2x128xf32> to vector<2x32xf32>
    %182 = arith.negf %181 : vector<2x32xf32>
    %183 = math.exp %182 : vector<2x32xf32>
    %cst_31 = arith.constant 1.000000e+00 : f32
    %184 = vector.broadcast %cst_31 : f32 to vector<2x32xf32>
    %185 = arith.addf %184, %183 : vector<2x32xf32>
    %186 = arith.divf %184, %185 : vector<2x32xf32>
    %187 = arith.mulf %178, %130 : vector<2x32xf32>
    %188 = arith.mulf %172, %180 : vector<2x32xf32>
    %189 = arith.addf %187, %188 : vector<2x32xf32>
    %190 = math.tanh %189 : vector<2x32xf32>
    %191 = arith.mulf %186, %190 : vector<2x32xf32>
    %192 = tpu.concatenate %166, %191 in 1 : vector<2x32xf32>, vector<2x32xf32> -> vector<2x64xf32>
    %193 = arith.truncf %192 : vector<2x64xf32> to vector<2x64xbf16>
    %cst_32 = arith.constant dense<0.000000e+00> : vector<2x256xf32>
    %194 = tpu.matmul %193, %11, %cst_32 {dimension_numbers = #tpu.dot_dimension_numbers<[1], [0], [0], [1], [0, 0, 1, 1], [], []>} : vector<2x64xbf16>, vector<64x256xbf16>, vector<2x256xf32> -> vector<2x256xf32>
    %195 = vector.extract_strided_slice %194 {offsets = [0, 0], sizes = [2, 128], strides = [1, 1]} : vector<2x256xf32> to vector<2x128xf32>
    %196 = vector.extract_strided_slice %9 {offsets = [6, 0], sizes = [2, 128], strides = [1, 1]} : vector<16x256xf32> to vector<2x128xf32>
    %197 = arith.addf %195, %196 : vector<2x128xf32>
    %198 = vector.extract_strided_slice %194 {offsets = [0, 128], sizes = [2, 128], strides = [1, 1]} : vector<2x256xf32> to vector<2x128xf32>
    %199 = vector.extract_strided_slice %9 {offsets = [8, 128], sizes = [2, 128], strides = [1, 1]} : vector<16x256xf32> to vector<2x128xf32>
    %200 = arith.addf %198, %199 : vector<2x128xf32>
    %201 = vector.extract_strided_slice %197 {offsets = [0, 0], sizes = [2, 32], strides = [1, 1]} : vector<2x128xf32> to vector<2x32xf32>
    %202 = arith.negf %201 : vector<2x32xf32>
    %203 = math.exp %202 : vector<2x32xf32>
    %cst_33 = arith.constant 1.000000e+00 : f32
    %204 = vector.broadcast %cst_33 : f32 to vector<2x32xf32>
    %205 = arith.addf %204, %203 : vector<2x32xf32>
    %206 = arith.divf %204, %205 : vector<2x32xf32>
    %207 = vector.extract_strided_slice %197 {offsets = [0, 32], sizes = [2, 32], strides = [1, 1]} : vector<2x128xf32> to vector<2x32xf32>
    %208 = arith.negf %207 : vector<2x32xf32>
    %209 = math.exp %208 : vector<2x32xf32>
    %cst_34 = arith.constant 1.000000e+00 : f32
    %210 = vector.broadcast %cst_34 : f32 to vector<2x32xf32>
    %211 = arith.addf %210, %209 : vector<2x32xf32>
    %212 = arith.divf %210, %211 : vector<2x32xf32>
    %213 = vector.extract_strided_slice %197 {offsets = [0, 64], sizes = [2, 32], strides = [1, 1]} : vector<2x128xf32> to vector<2x32xf32>
    %214 = math.tanh %213 : vector<2x32xf32>
    %215 = vector.extract_strided_slice %197 {offsets = [0, 96], sizes = [2, 32], strides = [1, 1]} : vector<2x128xf32> to vector<2x32xf32>
    %216 = arith.negf %215 : vector<2x32xf32>
    %217 = math.exp %216 : vector<2x32xf32>
    %cst_35 = arith.constant 1.000000e+00 : f32
    %218 = vector.broadcast %cst_35 : f32 to vector<2x32xf32>
    %219 = arith.addf %218, %217 : vector<2x32xf32>
    %220 = arith.divf %218, %219 : vector<2x32xf32>
    %221 = arith.mulf %212, %164 : vector<2x32xf32>
    %222 = arith.mulf %206, %214 : vector<2x32xf32>
    %223 = arith.addf %221, %222 : vector<2x32xf32>
    %224 = math.tanh %223 : vector<2x32xf32>
    %225 = arith.mulf %220, %224 : vector<2x32xf32>
    %226 = vector.extract_strided_slice %200 {offsets = [0, 0], sizes = [2, 32], strides = [1, 1]} : vector<2x128xf32> to vector<2x32xf32>
    %227 = arith.negf %226 : vector<2x32xf32>
    %228 = math.exp %227 : vector<2x32xf32>
    %cst_36 = arith.constant 1.000000e+00 : f32
    %229 = vector.broadcast %cst_36 : f32 to vector<2x32xf32>
    %230 = arith.addf %229, %228 : vector<2x32xf32>
    %231 = arith.divf %229, %230 : vector<2x32xf32>
    %232 = vector.extract_strided_slice %200 {offsets = [0, 32], sizes = [2, 32], strides = [1, 1]} : vector<2x128xf32> to vector<2x32xf32>
    %233 = arith.negf %232 : vector<2x32xf32>
    %234 = math.exp %233 : vector<2x32xf32>
    %cst_37 = arith.constant 1.000000e+00 : f32
    %235 = vector.broadcast %cst_37 : f32 to vector<2x32xf32>
    %236 = arith.addf %235, %234 : vector<2x32xf32>
    %237 = arith.divf %235, %236 : vector<2x32xf32>
    %238 = vector.extract_strided_slice %200 {offsets = [0, 64], sizes = [2, 32], strides = [1, 1]} : vector<2x128xf32> to vector<2x32xf32>
    %239 = math.tanh %238 : vector<2x32xf32>
    %240 = vector.extract_strided_slice %200 {offsets = [0, 96], sizes = [2, 32], strides = [1, 1]} : vector<2x128xf32> to vector<2x32xf32>
    %241 = arith.negf %240 : vector<2x32xf32>
    %242 = math.exp %241 : vector<2x32xf32>
    %cst_38 = arith.constant 1.000000e+00 : f32
    %243 = vector.broadcast %cst_38 : f32 to vector<2x32xf32>
    %244 = arith.addf %243, %242 : vector<2x32xf32>
    %245 = arith.divf %243, %244 : vector<2x32xf32>
    %246 = arith.mulf %237, %189 : vector<2x32xf32>
    %247 = arith.mulf %231, %239 : vector<2x32xf32>
    %248 = arith.addf %246, %247 : vector<2x32xf32>
    %249 = math.tanh %248 : vector<2x32xf32>
    %250 = arith.mulf %245, %249 : vector<2x32xf32>
    %251 = tpu.concatenate %225, %250 in 1 : vector<2x32xf32>, vector<2x32xf32> -> vector<2x64xf32>
    %252 = arith.truncf %251 : vector<2x64xf32> to vector<2x64xbf16>
    %cst_39 = arith.constant dense<0.000000e+00> : vector<2x256xf32>
    %253 = tpu.matmul %252, %11, %cst_39 {dimension_numbers = #tpu.dot_dimension_numbers<[1], [0], [0], [1], [0, 0, 1, 1], [], []>} : vector<2x64xbf16>, vector<64x256xbf16>, vector<2x256xf32> -> vector<2x256xf32>
    %254 = vector.extract_strided_slice %253 {offsets = [0, 0], sizes = [2, 128], strides = [1, 1]} : vector<2x256xf32> to vector<2x128xf32>
    %255 = vector.extract_strided_slice %9 {offsets = [8, 0], sizes = [2, 128], strides = [1, 1]} : vector<16x256xf32> to vector<2x128xf32>
    %256 = arith.addf %254, %255 : vector<2x128xf32>
    %257 = vector.extract_strided_slice %253 {offsets = [0, 128], sizes = [2, 128], strides = [1, 1]} : vector<2x256xf32> to vector<2x128xf32>
    %258 = vector.extract_strided_slice %9 {offsets = [6, 128], sizes = [2, 128], strides = [1, 1]} : vector<16x256xf32> to vector<2x128xf32>
    %259 = arith.addf %257, %258 : vector<2x128xf32>
    %260 = vector.extract_strided_slice %256 {offsets = [0, 0], sizes = [2, 32], strides = [1, 1]} : vector<2x128xf32> to vector<2x32xf32>
    %261 = arith.negf %260 : vector<2x32xf32>
    %262 = math.exp %261 : vector<2x32xf32>
    %cst_40 = arith.constant 1.000000e+00 : f32
    %263 = vector.broadcast %cst_40 : f32 to vector<2x32xf32>
    %264 = arith.addf %263, %262 : vector<2x32xf32>
    %265 = arith.divf %263, %264 : vector<2x32xf32>
    %266 = vector.extract_strided_slice %256 {offsets = [0, 32], sizes = [2, 32], strides = [1, 1]} : vector<2x128xf32> to vector<2x32xf32>
    %267 = arith.negf %266 : vector<2x32xf32>
    %268 = math.exp %267 : vector<2x32xf32>
    %cst_41 = arith.constant 1.000000e+00 : f32
    %269 = vector.broadcast %cst_41 : f32 to vector<2x32xf32>
    %270 = arith.addf %269, %268 : vector<2x32xf32>
    %271 = arith.divf %269, %270 : vector<2x32xf32>
    %272 = vector.extract_strided_slice %256 {offsets = [0, 64], sizes = [2, 32], strides = [1, 1]} : vector<2x128xf32> to vector<2x32xf32>
    %273 = math.tanh %272 : vector<2x32xf32>
    %274 = vector.extract_strided_slice %256 {offsets = [0, 96], sizes = [2, 32], strides = [1, 1]} : vector<2x128xf32> to vector<2x32xf32>
    %275 = arith.negf %274 : vector<2x32xf32>
    %276 = math.exp %275 : vector<2x32xf32>
    %cst_42 = arith.constant 1.000000e+00 : f32
    %277 = vector.broadcast %cst_42 : f32 to vector<2x32xf32>
    %278 = arith.addf %277, %276 : vector<2x32xf32>
    %279 = arith.divf %277, %278 : vector<2x32xf32>
    %280 = arith.mulf %271, %223 : vector<2x32xf32>
    %281 = arith.mulf %265, %273 : vector<2x32xf32>
    %282 = arith.addf %280, %281 : vector<2x32xf32>
    %283 = math.tanh %282 : vector<2x32xf32>
    %284 = arith.mulf %279, %283 : vector<2x32xf32>
    %285 = vector.extract_strided_slice %259 {offsets = [0, 0], sizes = [2, 32], strides = [1, 1]} : vector<2x128xf32> to vector<2x32xf32>
    %286 = arith.negf %285 : vector<2x32xf32>
    %287 = math.exp %286 : vector<2x32xf32>
    %cst_43 = arith.constant 1.000000e+00 : f32
    %288 = vector.broadcast %cst_43 : f32 to vector<2x32xf32>
    %289 = arith.addf %288, %287 : vector<2x32xf32>
    %290 = arith.divf %288, %289 : vector<2x32xf32>
    %291 = vector.extract_strided_slice %259 {offsets = [0, 32], sizes = [2, 32], strides = [1, 1]} : vector<2x128xf32> to vector<2x32xf32>
    %292 = arith.negf %291 : vector<2x32xf32>
    %293 = math.exp %292 : vector<2x32xf32>
    %cst_44 = arith.constant 1.000000e+00 : f32
    %294 = vector.broadcast %cst_44 : f32 to vector<2x32xf32>
    %295 = arith.addf %294, %293 : vector<2x32xf32>
    %296 = arith.divf %294, %295 : vector<2x32xf32>
    %297 = vector.extract_strided_slice %259 {offsets = [0, 64], sizes = [2, 32], strides = [1, 1]} : vector<2x128xf32> to vector<2x32xf32>
    %298 = math.tanh %297 : vector<2x32xf32>
    %299 = vector.extract_strided_slice %259 {offsets = [0, 96], sizes = [2, 32], strides = [1, 1]} : vector<2x128xf32> to vector<2x32xf32>
    %300 = arith.negf %299 : vector<2x32xf32>
    %301 = math.exp %300 : vector<2x32xf32>
    %cst_45 = arith.constant 1.000000e+00 : f32
    %302 = vector.broadcast %cst_45 : f32 to vector<2x32xf32>
    %303 = arith.addf %302, %301 : vector<2x32xf32>
    %304 = arith.divf %302, %303 : vector<2x32xf32>
    %305 = arith.mulf %296, %248 : vector<2x32xf32>
    %306 = arith.mulf %290, %298 : vector<2x32xf32>
    %307 = arith.addf %305, %306 : vector<2x32xf32>
    %308 = math.tanh %307 : vector<2x32xf32>
    %309 = arith.mulf %304, %308 : vector<2x32xf32>
    %310 = tpu.concatenate %284, %309 in 1 : vector<2x32xf32>, vector<2x32xf32> -> vector<2x64xf32>
    %311 = arith.truncf %310 : vector<2x64xf32> to vector<2x64xbf16>
    %cst_46 = arith.constant dense<0.000000e+00> : vector<2x256xf32>
    %312 = tpu.matmul %311, %11, %cst_46 {dimension_numbers = #tpu.dot_dimension_numbers<[1], [0], [0], [1], [0, 0, 1, 1], [], []>} : vector<2x64xbf16>, vector<64x256xbf16>, vector<2x256xf32> -> vector<2x256xf32>
    %313 = vector.extract_strided_slice %312 {offsets = [0, 0], sizes = [2, 128], strides = [1, 1]} : vector<2x256xf32> to vector<2x128xf32>
    %314 = vector.extract_strided_slice %9 {offsets = [10, 0], sizes = [2, 128], strides = [1, 1]} : vector<16x256xf32> to vector<2x128xf32>
    %315 = arith.addf %313, %314 : vector<2x128xf32>
    %316 = vector.extract_strided_slice %312 {offsets = [0, 128], sizes = [2, 128], strides = [1, 1]} : vector<2x256xf32> to vector<2x128xf32>
    %317 = vector.extract_strided_slice %9 {offsets = [4, 128], sizes = [2, 128], strides = [1, 1]} : vector<16x256xf32> to vector<2x128xf32>
    %318 = arith.addf %316, %317 : vector<2x128xf32>
    %319 = vector.extract_strided_slice %315 {offsets = [0, 0], sizes = [2, 32], strides = [1, 1]} : vector<2x128xf32> to vector<2x32xf32>
    %320 = arith.negf %319 : vector<2x32xf32>
    %321 = math.exp %320 : vector<2x32xf32>
    %cst_47 = arith.constant 1.000000e+00 : f32
    %322 = vector.broadcast %cst_47 : f32 to vector<2x32xf32>
    %323 = arith.addf %322, %321 : vector<2x32xf32>
    %324 = arith.divf %322, %323 : vector<2x32xf32>
    %325 = vector.extract_strided_slice %315 {offsets = [0, 32], sizes = [2, 32], strides = [1, 1]} : vector<2x128xf32> to vector<2x32xf32>
    %326 = arith.negf %325 : vector<2x32xf32>
    %327 = math.exp %326 : vector<2x32xf32>
    %cst_48 = arith.constant 1.000000e+00 : f32
    %328 = vector.broadcast %cst_48 : f32 to vector<2x32xf32>
    %329 = arith.addf %328, %327 : vector<2x32xf32>
    %330 = arith.divf %328, %329 : vector<2x32xf32>
    %331 = vector.extract_strided_slice %315 {offsets = [0, 64], sizes = [2, 32], strides = [1, 1]} : vector<2x128xf32> to vector<2x32xf32>
    %332 = math.tanh %331 : vector<2x32xf32>
    %333 = vector.extract_strided_slice %315 {offsets = [0, 96], sizes = [2, 32], strides = [1, 1]} : vector<2x128xf32> to vector<2x32xf32>
    %334 = arith.negf %333 : vector<2x32xf32>
    %335 = math.exp %334 : vector<2x32xf32>
    %cst_49 = arith.constant 1.000000e+00 : f32
    %336 = vector.broadcast %cst_49 : f32 to vector<2x32xf32>
    %337 = arith.addf %336, %335 : vector<2x32xf32>
    %338 = arith.divf %336, %337 : vector<2x32xf32>
    %339 = arith.mulf %330, %282 : vector<2x32xf32>
    %340 = arith.mulf %324, %332 : vector<2x32xf32>
    %341 = arith.addf %339, %340 : vector<2x32xf32>
    %342 = math.tanh %341 : vector<2x32xf32>
    %343 = arith.mulf %338, %342 : vector<2x32xf32>
    %344 = vector.extract_strided_slice %318 {offsets = [0, 0], sizes = [2, 32], strides = [1, 1]} : vector<2x128xf32> to vector<2x32xf32>
    %345 = arith.negf %344 : vector<2x32xf32>
    %346 = math.exp %345 : vector<2x32xf32>
    %cst_50 = arith.constant 1.000000e+00 : f32
    %347 = vector.broadcast %cst_50 : f32 to vector<2x32xf32>
    %348 = arith.addf %347, %346 : vector<2x32xf32>
    %349 = arith.divf %347, %348 : vector<2x32xf32>
    %350 = vector.extract_strided_slice %318 {offsets = [0, 32], sizes = [2, 32], strides = [1, 1]} : vector<2x128xf32> to vector<2x32xf32>
    %351 = arith.negf %350 : vector<2x32xf32>
    %352 = math.exp %351 : vector<2x32xf32>
    %cst_51 = arith.constant 1.000000e+00 : f32
    %353 = vector.broadcast %cst_51 : f32 to vector<2x32xf32>
    %354 = arith.addf %353, %352 : vector<2x32xf32>
    %355 = arith.divf %353, %354 : vector<2x32xf32>
    %356 = vector.extract_strided_slice %318 {offsets = [0, 64], sizes = [2, 32], strides = [1, 1]} : vector<2x128xf32> to vector<2x32xf32>
    %357 = math.tanh %356 : vector<2x32xf32>
    %358 = vector.extract_strided_slice %318 {offsets = [0, 96], sizes = [2, 32], strides = [1, 1]} : vector<2x128xf32> to vector<2x32xf32>
    %359 = arith.negf %358 : vector<2x32xf32>
    %360 = math.exp %359 : vector<2x32xf32>
    %cst_52 = arith.constant 1.000000e+00 : f32
    %361 = vector.broadcast %cst_52 : f32 to vector<2x32xf32>
    %362 = arith.addf %361, %360 : vector<2x32xf32>
    %363 = arith.divf %361, %362 : vector<2x32xf32>
    %364 = arith.mulf %355, %307 : vector<2x32xf32>
    %365 = arith.mulf %349, %357 : vector<2x32xf32>
    %366 = arith.addf %364, %365 : vector<2x32xf32>
    %367 = math.tanh %366 : vector<2x32xf32>
    %368 = arith.mulf %363, %367 : vector<2x32xf32>
    %369 = tpu.concatenate %343, %368 in 1 : vector<2x32xf32>, vector<2x32xf32> -> vector<2x64xf32>
    %370 = arith.truncf %369 : vector<2x64xf32> to vector<2x64xbf16>
    %cst_53 = arith.constant dense<0.000000e+00> : vector<2x256xf32>
    %371 = tpu.matmul %370, %11, %cst_53 {dimension_numbers = #tpu.dot_dimension_numbers<[1], [0], [0], [1], [0, 0, 1, 1], [], []>} : vector<2x64xbf16>, vector<64x256xbf16>, vector<2x256xf32> -> vector<2x256xf32>
    %372 = vector.extract_strided_slice %371 {offsets = [0, 0], sizes = [2, 128], strides = [1, 1]} : vector<2x256xf32> to vector<2x128xf32>
    %373 = vector.extract_strided_slice %9 {offsets = [12, 0], sizes = [2, 128], strides = [1, 1]} : vector<16x256xf32> to vector<2x128xf32>
    %374 = arith.addf %372, %373 : vector<2x128xf32>
    %375 = vector.extract_strided_slice %371 {offsets = [0, 128], sizes = [2, 128], strides = [1, 1]} : vector<2x256xf32> to vector<2x128xf32>
    %376 = vector.extract_strided_slice %9 {offsets = [2, 128], sizes = [2, 128], strides = [1, 1]} : vector<16x256xf32> to vector<2x128xf32>
    %377 = arith.addf %375, %376 : vector<2x128xf32>
    %378 = vector.extract_strided_slice %374 {offsets = [0, 0], sizes = [2, 32], strides = [1, 1]} : vector<2x128xf32> to vector<2x32xf32>
    %379 = arith.negf %378 : vector<2x32xf32>
    %380 = math.exp %379 : vector<2x32xf32>
    %cst_54 = arith.constant 1.000000e+00 : f32
    %381 = vector.broadcast %cst_54 : f32 to vector<2x32xf32>
    %382 = arith.addf %381, %380 : vector<2x32xf32>
    %383 = arith.divf %381, %382 : vector<2x32xf32>
    %384 = vector.extract_strided_slice %374 {offsets = [0, 32], sizes = [2, 32], strides = [1, 1]} : vector<2x128xf32> to vector<2x32xf32>
    %385 = arith.negf %384 : vector<2x32xf32>
    %386 = math.exp %385 : vector<2x32xf32>
    %cst_55 = arith.constant 1.000000e+00 : f32
    %387 = vector.broadcast %cst_55 : f32 to vector<2x32xf32>
    %388 = arith.addf %387, %386 : vector<2x32xf32>
    %389 = arith.divf %387, %388 : vector<2x32xf32>
    %390 = vector.extract_strided_slice %374 {offsets = [0, 64], sizes = [2, 32], strides = [1, 1]} : vector<2x128xf32> to vector<2x32xf32>
    %391 = math.tanh %390 : vector<2x32xf32>
    %392 = vector.extract_strided_slice %374 {offsets = [0, 96], sizes = [2, 32], strides = [1, 1]} : vector<2x128xf32> to vector<2x32xf32>
    %393 = arith.negf %392 : vector<2x32xf32>
    %394 = math.exp %393 : vector<2x32xf32>
    %cst_56 = arith.constant 1.000000e+00 : f32
    %395 = vector.broadcast %cst_56 : f32 to vector<2x32xf32>
    %396 = arith.addf %395, %394 : vector<2x32xf32>
    %397 = arith.divf %395, %396 : vector<2x32xf32>
    %398 = arith.mulf %389, %341 : vector<2x32xf32>
    %399 = arith.mulf %383, %391 : vector<2x32xf32>
    %400 = arith.addf %398, %399 : vector<2x32xf32>
    %401 = math.tanh %400 : vector<2x32xf32>
    %402 = arith.mulf %397, %401 : vector<2x32xf32>
    %403 = vector.extract_strided_slice %377 {offsets = [0, 0], sizes = [2, 32], strides = [1, 1]} : vector<2x128xf32> to vector<2x32xf32>
    %404 = arith.negf %403 : vector<2x32xf32>
    %405 = math.exp %404 : vector<2x32xf32>
    %cst_57 = arith.constant 1.000000e+00 : f32
    %406 = vector.broadcast %cst_57 : f32 to vector<2x32xf32>
    %407 = arith.addf %406, %405 : vector<2x32xf32>
    %408 = arith.divf %406, %407 : vector<2x32xf32>
    %409 = vector.extract_strided_slice %377 {offsets = [0, 32], sizes = [2, 32], strides = [1, 1]} : vector<2x128xf32> to vector<2x32xf32>
    %410 = arith.negf %409 : vector<2x32xf32>
    %411 = math.exp %410 : vector<2x32xf32>
    %cst_58 = arith.constant 1.000000e+00 : f32
    %412 = vector.broadcast %cst_58 : f32 to vector<2x32xf32>
    %413 = arith.addf %412, %411 : vector<2x32xf32>
    %414 = arith.divf %412, %413 : vector<2x32xf32>
    %415 = vector.extract_strided_slice %377 {offsets = [0, 64], sizes = [2, 32], strides = [1, 1]} : vector<2x128xf32> to vector<2x32xf32>
    %416 = math.tanh %415 : vector<2x32xf32>
    %417 = vector.extract_strided_slice %377 {offsets = [0, 96], sizes = [2, 32], strides = [1, 1]} : vector<2x128xf32> to vector<2x32xf32>
    %418 = arith.negf %417 : vector<2x32xf32>
    %419 = math.exp %418 : vector<2x32xf32>
    %cst_59 = arith.constant 1.000000e+00 : f32
    %420 = vector.broadcast %cst_59 : f32 to vector<2x32xf32>
    %421 = arith.addf %420, %419 : vector<2x32xf32>
    %422 = arith.divf %420, %421 : vector<2x32xf32>
    %423 = arith.mulf %414, %366 : vector<2x32xf32>
    %424 = arith.mulf %408, %416 : vector<2x32xf32>
    %425 = arith.addf %423, %424 : vector<2x32xf32>
    %426 = math.tanh %425 : vector<2x32xf32>
    %427 = arith.mulf %422, %426 : vector<2x32xf32>
    %428 = tpu.concatenate %402, %427 in 1 : vector<2x32xf32>, vector<2x32xf32> -> vector<2x64xf32>
    %429 = arith.truncf %428 : vector<2x64xf32> to vector<2x64xbf16>
    %cst_60 = arith.constant dense<0.000000e+00> : vector<2x256xf32>
    %430 = tpu.matmul %429, %11, %cst_60 {dimension_numbers = #tpu.dot_dimension_numbers<[1], [0], [0], [1], [0, 0, 1, 1], [], []>} : vector<2x64xbf16>, vector<64x256xbf16>, vector<2x256xf32> -> vector<2x256xf32>
    %431 = vector.extract_strided_slice %430 {offsets = [0, 0], sizes = [2, 128], strides = [1, 1]} : vector<2x256xf32> to vector<2x128xf32>
    %432 = vector.extract_strided_slice %9 {offsets = [14, 0], sizes = [2, 128], strides = [1, 1]} : vector<16x256xf32> to vector<2x128xf32>
    %433 = arith.addf %431, %432 : vector<2x128xf32>
    %434 = vector.extract_strided_slice %430 {offsets = [0, 128], sizes = [2, 128], strides = [1, 1]} : vector<2x256xf32> to vector<2x128xf32>
    %435 = vector.extract_strided_slice %9 {offsets = [0, 128], sizes = [2, 128], strides = [1, 1]} : vector<16x256xf32> to vector<2x128xf32>
    %436 = arith.addf %434, %435 : vector<2x128xf32>
    %437 = vector.extract_strided_slice %433 {offsets = [0, 0], sizes = [2, 32], strides = [1, 1]} : vector<2x128xf32> to vector<2x32xf32>
    %438 = arith.negf %437 : vector<2x32xf32>
    %439 = math.exp %438 : vector<2x32xf32>
    %cst_61 = arith.constant 1.000000e+00 : f32
    %440 = vector.broadcast %cst_61 : f32 to vector<2x32xf32>
    %441 = arith.addf %440, %439 : vector<2x32xf32>
    %442 = arith.divf %440, %441 : vector<2x32xf32>
    %443 = vector.extract_strided_slice %433 {offsets = [0, 32], sizes = [2, 32], strides = [1, 1]} : vector<2x128xf32> to vector<2x32xf32>
    %444 = arith.negf %443 : vector<2x32xf32>
    %445 = math.exp %444 : vector<2x32xf32>
    %cst_62 = arith.constant 1.000000e+00 : f32
    %446 = vector.broadcast %cst_62 : f32 to vector<2x32xf32>
    %447 = arith.addf %446, %445 : vector<2x32xf32>
    %448 = arith.divf %446, %447 : vector<2x32xf32>
    %449 = vector.extract_strided_slice %433 {offsets = [0, 64], sizes = [2, 32], strides = [1, 1]} : vector<2x128xf32> to vector<2x32xf32>
    %450 = math.tanh %449 : vector<2x32xf32>
    %451 = vector.extract_strided_slice %433 {offsets = [0, 96], sizes = [2, 32], strides = [1, 1]} : vector<2x128xf32> to vector<2x32xf32>
    %452 = arith.negf %451 : vector<2x32xf32>
    %453 = math.exp %452 : vector<2x32xf32>
    %cst_63 = arith.constant 1.000000e+00 : f32
    %454 = vector.broadcast %cst_63 : f32 to vector<2x32xf32>
    %455 = arith.addf %454, %453 : vector<2x32xf32>
    %456 = arith.divf %454, %455 : vector<2x32xf32>
    %457 = arith.mulf %448, %400 : vector<2x32xf32>
    %458 = arith.mulf %442, %450 : vector<2x32xf32>
    %459 = arith.addf %457, %458 : vector<2x32xf32>
    %460 = math.tanh %459 : vector<2x32xf32>
    %461 = arith.mulf %456, %460 : vector<2x32xf32>
    %462 = vector.extract_strided_slice %436 {offsets = [0, 0], sizes = [2, 32], strides = [1, 1]} : vector<2x128xf32> to vector<2x32xf32>
    %463 = arith.negf %462 : vector<2x32xf32>
    %464 = math.exp %463 : vector<2x32xf32>
    %cst_64 = arith.constant 1.000000e+00 : f32
    %465 = vector.broadcast %cst_64 : f32 to vector<2x32xf32>
    %466 = arith.addf %465, %464 : vector<2x32xf32>
    %467 = arith.divf %465, %466 : vector<2x32xf32>
    %468 = vector.extract_strided_slice %436 {offsets = [0, 32], sizes = [2, 32], strides = [1, 1]} : vector<2x128xf32> to vector<2x32xf32>
    %469 = arith.negf %468 : vector<2x32xf32>
    %470 = math.exp %469 : vector<2x32xf32>
    %cst_65 = arith.constant 1.000000e+00 : f32
    %471 = vector.broadcast %cst_65 : f32 to vector<2x32xf32>
    %472 = arith.addf %471, %470 : vector<2x32xf32>
    %473 = arith.divf %471, %472 : vector<2x32xf32>
    %474 = vector.extract_strided_slice %436 {offsets = [0, 64], sizes = [2, 32], strides = [1, 1]} : vector<2x128xf32> to vector<2x32xf32>
    %475 = math.tanh %474 : vector<2x32xf32>
    %476 = vector.extract_strided_slice %436 {offsets = [0, 96], sizes = [2, 32], strides = [1, 1]} : vector<2x128xf32> to vector<2x32xf32>
    %477 = arith.negf %476 : vector<2x32xf32>
    %478 = math.exp %477 : vector<2x32xf32>
    %cst_66 = arith.constant 1.000000e+00 : f32
    %479 = vector.broadcast %cst_66 : f32 to vector<2x32xf32>
    %480 = arith.addf %479, %478 : vector<2x32xf32>
    %481 = arith.divf %479, %480 : vector<2x32xf32>
    %482 = arith.mulf %473, %425 : vector<2x32xf32>
    %483 = arith.mulf %467, %475 : vector<2x32xf32>
    %484 = arith.addf %482, %483 : vector<2x32xf32>
    %485 = math.tanh %484 : vector<2x32xf32>
    %486 = arith.mulf %481, %485 : vector<2x32xf32>
    %487 = tpu.concatenate %461, %486, %459, %484 in 1 : vector<2x32xf32>, vector<2x32xf32>, vector<2x32xf32>, vector<2x32xf32> -> vector<2x128xf32>
    %488 = tpu.concatenate %48, %486 in 1 : vector<2x32xf32>, vector<2x32xf32> -> vector<2x64xf32>
    %489 = tpu.concatenate %107, %427 in 1 : vector<2x32xf32>, vector<2x32xf32> -> vector<2x64xf32>
    %490 = tpu.concatenate %166, %368 in 1 : vector<2x32xf32>, vector<2x32xf32> -> vector<2x64xf32>
    %491 = tpu.concatenate %225, %309 in 1 : vector<2x32xf32>, vector<2x32xf32> -> vector<2x64xf32>
    %492 = tpu.concatenate %284, %250 in 1 : vector<2x32xf32>, vector<2x32xf32> -> vector<2x64xf32>
    %493 = tpu.concatenate %343, %191 in 1 : vector<2x32xf32>, vector<2x32xf32> -> vector<2x64xf32>
    %494 = tpu.concatenate %402, %132 in 1 : vector<2x32xf32>, vector<2x32xf32> -> vector<2x64xf32>
    %495 = tpu.concatenate %461, %73 in 1 : vector<2x32xf32>, vector<2x32xf32> -> vector<2x64xf32>
    %496 = tpu.concatenate %488, %489, %490, %491, %492, %493, %494, %495 in 0 : vector<2x64xf32>, vector<2x64xf32>, vector<2x64xf32>, vector<2x64xf32>, vector<2x64xf32>, vector<2x64xf32>, vector<2x64xf32>, vector<2x64xf32> -> vector<16x64xf32>
    %497 = arith.truncf %496 : vector<16x64xf32> to vector<16x64xbf16>
    %c1 = arith.constant 1 : index
    %c0_67 = arith.constant 0 : index
    %c0_68 = arith.constant 0 : index
    %498 = vector.load %arg1[%c1, %c0_67, %c0_68] : memref<4x64x256xbf16, #tpu.memory_space<vmem>>, vector<1x64x256xbf16>
    %499 = vector.shape_cast %498 : vector<1x64x256xbf16> to vector<64x256xbf16>
    %cst_69 = arith.constant dense<0.000000e+00> : vector<16x256xf32>
    %500 = tpu.matmul %497, %499, %cst_69 {dimension_numbers = #tpu.dot_dimension_numbers<[1], [0], [0], [1], [0, 0, 1, 1], [], []>} : vector<16x64xbf16>, vector<64x256xbf16>, vector<16x256xf32> -> vector<16x256xf32>
    %501 = vector.extract_strided_slice %0 {offsets = [1, 0], sizes = [1, 256], strides = [1, 1]} : vector<4x256xf32> to vector<1x256xf32>
    %502 = vector.broadcast %501 : vector<1x256xf32> to vector<16x256xf32>
    %503 = arith.addf %500, %502 : vector<16x256xf32>
    %c1_70 = arith.constant 1 : index
    %c0_71 = arith.constant 0 : index
    %c0_72 = arith.constant 0 : index
    %504 = vector.load %arg2[%c1_70, %c0_71, %c0_72] : memref<4x64x256xbf16, #tpu.memory_space<vmem>>, vector<1x64x256xbf16>
    %505 = vector.shape_cast %504 : vector<1x64x256xbf16> to vector<64x256xbf16>
    %506 = vector.extract_strided_slice %1 {offsets = [2, 0], sizes = [2, 128], strides = [1, 1]} : vector<8x128xf32> to vector<2x128xf32>
    %507 = vector.extract_strided_slice %506 {offsets = [0, 0], sizes = [2, 64], strides = [1, 1]} : vector<2x128xf32> to vector<2x64xf32>
    %508 = vector.extract_strided_slice %506 {offsets = [0, 64], sizes = [2, 32], strides = [1, 1]} : vector<2x128xf32> to vector<2x32xf32>
    %509 = vector.extract_strided_slice %506 {offsets = [0, 96], sizes = [2, 32], strides = [1, 1]} : vector<2x128xf32> to vector<2x32xf32>
    %510 = arith.truncf %507 : vector<2x64xf32> to vector<2x64xbf16>
    %cst_73 = arith.constant dense<0.000000e+00> : vector<2x256xf32>
    %511 = tpu.matmul %510, %505, %cst_73 {dimension_numbers = #tpu.dot_dimension_numbers<[1], [0], [0], [1], [0, 0, 1, 1], [], []>} : vector<2x64xbf16>, vector<64x256xbf16>, vector<2x256xf32> -> vector<2x256xf32>
    %512 = vector.extract_strided_slice %511 {offsets = [0, 0], sizes = [2, 128], strides = [1, 1]} : vector<2x256xf32> to vector<2x128xf32>
    %513 = vector.extract_strided_slice %503 {offsets = [0, 0], sizes = [2, 128], strides = [1, 1]} : vector<16x256xf32> to vector<2x128xf32>
    %514 = arith.addf %512, %513 : vector<2x128xf32>
    %515 = vector.extract_strided_slice %511 {offsets = [0, 128], sizes = [2, 128], strides = [1, 1]} : vector<2x256xf32> to vector<2x128xf32>
    %516 = vector.extract_strided_slice %503 {offsets = [14, 128], sizes = [2, 128], strides = [1, 1]} : vector<16x256xf32> to vector<2x128xf32>
    %517 = arith.addf %515, %516 : vector<2x128xf32>
    %518 = vector.extract_strided_slice %514 {offsets = [0, 0], sizes = [2, 32], strides = [1, 1]} : vector<2x128xf32> to vector<2x32xf32>
    %519 = arith.negf %518 : vector<2x32xf32>
    %520 = math.exp %519 : vector<2x32xf32>
    %cst_74 = arith.constant 1.000000e+00 : f32
    %521 = vector.broadcast %cst_74 : f32 to vector<2x32xf32>
    %522 = arith.addf %521, %520 : vector<2x32xf32>
    %523 = arith.divf %521, %522 : vector<2x32xf32>
    %524 = vector.extract_strided_slice %514 {offsets = [0, 32], sizes = [2, 32], strides = [1, 1]} : vector<2x128xf32> to vector<2x32xf32>
    %525 = arith.negf %524 : vector<2x32xf32>
    %526 = math.exp %525 : vector<2x32xf32>
    %cst_75 = arith.constant 1.000000e+00 : f32
    %527 = vector.broadcast %cst_75 : f32 to vector<2x32xf32>
    %528 = arith.addf %527, %526 : vector<2x32xf32>
    %529 = arith.divf %527, %528 : vector<2x32xf32>
    %530 = vector.extract_strided_slice %514 {offsets = [0, 64], sizes = [2, 32], strides = [1, 1]} : vector<2x128xf32> to vector<2x32xf32>
    %531 = math.tanh %530 : vector<2x32xf32>
    %532 = vector.extract_strided_slice %514 {offsets = [0, 96], sizes = [2, 32], strides = [1, 1]} : vector<2x128xf32> to vector<2x32xf32>
    %533 = arith.negf %532 : vector<2x32xf32>
    %534 = math.exp %533 : vector<2x32xf32>
    %cst_76 = arith.constant 1.000000e+00 : f32
    %535 = vector.broadcast %cst_76 : f32 to vector<2x32xf32>
    %536 = arith.addf %535, %534 : vector<2x32xf32>
    %537 = arith.divf %535, %536 : vector<2x32xf32>
    %538 = arith.mulf %529, %508 : vector<2x32xf32>
    %539 = arith.mulf %523, %531 : vector<2x32xf32>
    %540 = arith.addf %538, %539 : vector<2x32xf32>
    %541 = math.tanh %540 : vector<2x32xf32>
    %542 = arith.mulf %537, %541 : vector<2x32xf32>
    %543 = vector.extract_strided_slice %517 {offsets = [0, 0], sizes = [2, 32], strides = [1, 1]} : vector<2x128xf32> to vector<2x32xf32>
    %544 = arith.negf %543 : vector<2x32xf32>
    %545 = math.exp %544 : vector<2x32xf32>
    %cst_77 = arith.constant 1.000000e+00 : f32
    %546 = vector.broadcast %cst_77 : f32 to vector<2x32xf32>
    %547 = arith.addf %546, %545 : vector<2x32xf32>
    %548 = arith.divf %546, %547 : vector<2x32xf32>
    %549 = vector.extract_strided_slice %517 {offsets = [0, 32], sizes = [2, 32], strides = [1, 1]} : vector<2x128xf32> to vector<2x32xf32>
    %550 = arith.negf %549 : vector<2x32xf32>
    %551 = math.exp %550 : vector<2x32xf32>
    %cst_78 = arith.constant 1.000000e+00 : f32
    %552 = vector.broadcast %cst_78 : f32 to vector<2x32xf32>
    %553 = arith.addf %552, %551 : vector<2x32xf32>
    %554 = arith.divf %552, %553 : vector<2x32xf32>
    %555 = vector.extract_strided_slice %517 {offsets = [0, 64], sizes = [2, 32], strides = [1, 1]} : vector<2x128xf32> to vector<2x32xf32>
    %556 = math.tanh %555 : vector<2x32xf32>
    %557 = vector.extract_strided_slice %517 {offsets = [0, 96], sizes = [2, 32], strides = [1, 1]} : vector<2x128xf32> to vector<2x32xf32>
    %558 = arith.negf %557 : vector<2x32xf32>
    %559 = math.exp %558 : vector<2x32xf32>
    %cst_79 = arith.constant 1.000000e+00 : f32
    %560 = vector.broadcast %cst_79 : f32 to vector<2x32xf32>
    %561 = arith.addf %560, %559 : vector<2x32xf32>
    %562 = arith.divf %560, %561 : vector<2x32xf32>
    %563 = arith.mulf %554, %509 : vector<2x32xf32>
    %564 = arith.mulf %548, %556 : vector<2x32xf32>
    %565 = arith.addf %563, %564 : vector<2x32xf32>
    %566 = math.tanh %565 : vector<2x32xf32>
    %567 = arith.mulf %562, %566 : vector<2x32xf32>
    %568 = tpu.concatenate %542, %567 in 1 : vector<2x32xf32>, vector<2x32xf32> -> vector<2x64xf32>
    %569 = arith.truncf %568 : vector<2x64xf32> to vector<2x64xbf16>
    %cst_80 = arith.constant dense<0.000000e+00> : vector<2x256xf32>
    %570 = tpu.matmul %569, %505, %cst_80 {dimension_numbers = #tpu.dot_dimension_numbers<[1], [0], [0], [1], [0, 0, 1, 1], [], []>} : vector<2x64xbf16>, vector<64x256xbf16>, vector<2x256xf32> -> vector<2x256xf32>
    %571 = vector.extract_strided_slice %570 {offsets = [0, 0], sizes = [2, 128], strides = [1, 1]} : vector<2x256xf32> to vector<2x128xf32>
    %572 = vector.extract_strided_slice %503 {offsets = [2, 0], sizes = [2, 128], strides = [1, 1]} : vector<16x256xf32> to vector<2x128xf32>
    %573 = arith.addf %571, %572 : vector<2x128xf32>
    %574 = vector.extract_strided_slice %570 {offsets = [0, 128], sizes = [2, 128], strides = [1, 1]} : vector<2x256xf32> to vector<2x128xf32>
    %575 = vector.extract_strided_slice %503 {offsets = [12, 128], sizes = [2, 128], strides = [1, 1]} : vector<16x256xf32> to vector<2x128xf32>
    %576 = arith.addf %574, %575 : vector<2x128xf32>
    %577 = vector.extract_strided_slice %573 {offsets = [0, 0], sizes = [2, 32], strides = [1, 1]} : vector<2x128xf32> to vector<2x32xf32>
    %578 = arith.negf %577 : vector<2x32xf32>
    %579 = math.exp %578 : vector<2x32xf32>
    %cst_81 = arith.constant 1.000000e+00 : f32
    %580 = vector.broadcast %cst_81 : f32 to vector<2x32xf32>
    %581 = arith.addf %580, %579 : vector<2x32xf32>
    %582 = arith.divf %580, %581 : vector<2x32xf32>
    %583 = vector.extract_strided_slice %573 {offsets = [0, 32], sizes = [2, 32], strides = [1, 1]} : vector<2x128xf32> to vector<2x32xf32>
    %584 = arith.negf %583 : vector<2x32xf32>
    %585 = math.exp %584 : vector<2x32xf32>
    %cst_82 = arith.constant 1.000000e+00 : f32
    %586 = vector.broadcast %cst_82 : f32 to vector<2x32xf32>
    %587 = arith.addf %586, %585 : vector<2x32xf32>
    %588 = arith.divf %586, %587 : vector<2x32xf32>
    %589 = vector.extract_strided_slice %573 {offsets = [0, 64], sizes = [2, 32], strides = [1, 1]} : vector<2x128xf32> to vector<2x32xf32>
    %590 = math.tanh %589 : vector<2x32xf32>
    %591 = vector.extract_strided_slice %573 {offsets = [0, 96], sizes = [2, 32], strides = [1, 1]} : vector<2x128xf32> to vector<2x32xf32>
    %592 = arith.negf %591 : vector<2x32xf32>
    %593 = math.exp %592 : vector<2x32xf32>
    %cst_83 = arith.constant 1.000000e+00 : f32
    %594 = vector.broadcast %cst_83 : f32 to vector<2x32xf32>
    %595 = arith.addf %594, %593 : vector<2x32xf32>
    %596 = arith.divf %594, %595 : vector<2x32xf32>
    %597 = arith.mulf %588, %540 : vector<2x32xf32>
    %598 = arith.mulf %582, %590 : vector<2x32xf32>
    %599 = arith.addf %597, %598 : vector<2x32xf32>
    %600 = math.tanh %599 : vector<2x32xf32>
    %601 = arith.mulf %596, %600 : vector<2x32xf32>
    %602 = vector.extract_strided_slice %576 {offsets = [0, 0], sizes = [2, 32], strides = [1, 1]} : vector<2x128xf32> to vector<2x32xf32>
    %603 = arith.negf %602 : vector<2x32xf32>
    %604 = math.exp %603 : vector<2x32xf32>
    %cst_84 = arith.constant 1.000000e+00 : f32
    %605 = vector.broadcast %cst_84 : f32 to vector<2x32xf32>
    %606 = arith.addf %605, %604 : vector<2x32xf32>
    %607 = arith.divf %605, %606 : vector<2x32xf32>
    %608 = vector.extract_strided_slice %576 {offsets = [0, 32], sizes = [2, 32], strides = [1, 1]} : vector<2x128xf32> to vector<2x32xf32>
    %609 = arith.negf %608 : vector<2x32xf32>
    %610 = math.exp %609 : vector<2x32xf32>
    %cst_85 = arith.constant 1.000000e+00 : f32
    %611 = vector.broadcast %cst_85 : f32 to vector<2x32xf32>
    %612 = arith.addf %611, %610 : vector<2x32xf32>
    %613 = arith.divf %611, %612 : vector<2x32xf32>
    %614 = vector.extract_strided_slice %576 {offsets = [0, 64], sizes = [2, 32], strides = [1, 1]} : vector<2x128xf32> to vector<2x32xf32>
    %615 = math.tanh %614 : vector<2x32xf32>
    %616 = vector.extract_strided_slice %576 {offsets = [0, 96], sizes = [2, 32], strides = [1, 1]} : vector<2x128xf32> to vector<2x32xf32>
    %617 = arith.negf %616 : vector<2x32xf32>
    %618 = math.exp %617 : vector<2x32xf32>
    %cst_86 = arith.constant 1.000000e+00 : f32
    %619 = vector.broadcast %cst_86 : f32 to vector<2x32xf32>
    %620 = arith.addf %619, %618 : vector<2x32xf32>
    %621 = arith.divf %619, %620 : vector<2x32xf32>
    %622 = arith.mulf %613, %565 : vector<2x32xf32>
    %623 = arith.mulf %607, %615 : vector<2x32xf32>
    %624 = arith.addf %622, %623 : vector<2x32xf32>
    %625 = math.tanh %624 : vector<2x32xf32>
    %626 = arith.mulf %621, %625 : vector<2x32xf32>
    %627 = tpu.concatenate %601, %626 in 1 : vector<2x32xf32>, vector<2x32xf32> -> vector<2x64xf32>
    %628 = arith.truncf %627 : vector<2x64xf32> to vector<2x64xbf16>
    %cst_87 = arith.constant dense<0.000000e+00> : vector<2x256xf32>
    %629 = tpu.matmul %628, %505, %cst_87 {dimension_numbers = #tpu.dot_dimension_numbers<[1], [0], [0], [1], [0, 0, 1, 1], [], []>} : vector<2x64xbf16>, vector<64x256xbf16>, vector<2x256xf32> -> vector<2x256xf32>
    %630 = vector.extract_strided_slice %629 {offsets = [0, 0], sizes = [2, 128], strides = [1, 1]} : vector<2x256xf32> to vector<2x128xf32>
    %631 = vector.extract_strided_slice %503 {offsets = [4, 0], sizes = [2, 128], strides = [1, 1]} : vector<16x256xf32> to vector<2x128xf32>
    %632 = arith.addf %630, %631 : vector<2x128xf32>
    %633 = vector.extract_strided_slice %629 {offsets = [0, 128], sizes = [2, 128], strides = [1, 1]} : vector<2x256xf32> to vector<2x128xf32>
    %634 = vector.extract_strided_slice %503 {offsets = [10, 128], sizes = [2, 128], strides = [1, 1]} : vector<16x256xf32> to vector<2x128xf32>
    %635 = arith.addf %633, %634 : vector<2x128xf32>
    %636 = vector.extract_strided_slice %632 {offsets = [0, 0], sizes = [2, 32], strides = [1, 1]} : vector<2x128xf32> to vector<2x32xf32>
    %637 = arith.negf %636 : vector<2x32xf32>
    %638 = math.exp %637 : vector<2x32xf32>
    %cst_88 = arith.constant 1.000000e+00 : f32
    %639 = vector.broadcast %cst_88 : f32 to vector<2x32xf32>
    %640 = arith.addf %639, %638 : vector<2x32xf32>
    %641 = arith.divf %639, %640 : vector<2x32xf32>
    %642 = vector.extract_strided_slice %632 {offsets = [0, 32], sizes = [2, 32], strides = [1, 1]} : vector<2x128xf32> to vector<2x32xf32>
    %643 = arith.negf %642 : vector<2x32xf32>
    %644 = math.exp %643 : vector<2x32xf32>
    %cst_89 = arith.constant 1.000000e+00 : f32
    %645 = vector.broadcast %cst_89 : f32 to vector<2x32xf32>
    %646 = arith.addf %645, %644 : vector<2x32xf32>
    %647 = arith.divf %645, %646 : vector<2x32xf32>
    %648 = vector.extract_strided_slice %632 {offsets = [0, 64], sizes = [2, 32], strides = [1, 1]} : vector<2x128xf32> to vector<2x32xf32>
    %649 = math.tanh %648 : vector<2x32xf32>
    %650 = vector.extract_strided_slice %632 {offsets = [0, 96], sizes = [2, 32], strides = [1, 1]} : vector<2x128xf32> to vector<2x32xf32>
    %651 = arith.negf %650 : vector<2x32xf32>
    %652 = math.exp %651 : vector<2x32xf32>
    %cst_90 = arith.constant 1.000000e+00 : f32
    %653 = vector.broadcast %cst_90 : f32 to vector<2x32xf32>
    %654 = arith.addf %653, %652 : vector<2x32xf32>
    %655 = arith.divf %653, %654 : vector<2x32xf32>
    %656 = arith.mulf %647, %599 : vector<2x32xf32>
    %657 = arith.mulf %641, %649 : vector<2x32xf32>
    %658 = arith.addf %656, %657 : vector<2x32xf32>
    %659 = math.tanh %658 : vector<2x32xf32>
    %660 = arith.mulf %655, %659 : vector<2x32xf32>
    %661 = vector.extract_strided_slice %635 {offsets = [0, 0], sizes = [2, 32], strides = [1, 1]} : vector<2x128xf32> to vector<2x32xf32>
    %662 = arith.negf %661 : vector<2x32xf32>
    %663 = math.exp %662 : vector<2x32xf32>
    %cst_91 = arith.constant 1.000000e+00 : f32
    %664 = vector.broadcast %cst_91 : f32 to vector<2x32xf32>
    %665 = arith.addf %664, %663 : vector<2x32xf32>
    %666 = arith.divf %664, %665 : vector<2x32xf32>
    %667 = vector.extract_strided_slice %635 {offsets = [0, 32], sizes = [2, 32], strides = [1, 1]} : vector<2x128xf32> to vector<2x32xf32>
    %668 = arith.negf %667 : vector<2x32xf32>
    %669 = math.exp %668 : vector<2x32xf32>
    %cst_92 = arith.constant 1.000000e+00 : f32
    %670 = vector.broadcast %cst_92 : f32 to vector<2x32xf32>
    %671 = arith.addf %670, %669 : vector<2x32xf32>
    %672 = arith.divf %670, %671 : vector<2x32xf32>
    %673 = vector.extract_strided_slice %635 {offsets = [0, 64], sizes = [2, 32], strides = [1, 1]} : vector<2x128xf32> to vector<2x32xf32>
    %674 = math.tanh %673 : vector<2x32xf32>
    %675 = vector.extract_strided_slice %635 {offsets = [0, 96], sizes = [2, 32], strides = [1, 1]} : vector<2x128xf32> to vector<2x32xf32>
    %676 = arith.negf %675 : vector<2x32xf32>
    %677 = math.exp %676 : vector<2x32xf32>
    %cst_93 = arith.constant 1.000000e+00 : f32
    %678 = vector.broadcast %cst_93 : f32 to vector<2x32xf32>
    %679 = arith.addf %678, %677 : vector<2x32xf32>
    %680 = arith.divf %678, %679 : vector<2x32xf32>
    %681 = arith.mulf %672, %624 : vector<2x32xf32>
    %682 = arith.mulf %666, %674 : vector<2x32xf32>
    %683 = arith.addf %681, %682 : vector<2x32xf32>
    %684 = math.tanh %683 : vector<2x32xf32>
    %685 = arith.mulf %680, %684 : vector<2x32xf32>
    %686 = tpu.concatenate %660, %685 in 1 : vector<2x32xf32>, vector<2x32xf32> -> vector<2x64xf32>
    %687 = arith.truncf %686 : vector<2x64xf32> to vector<2x64xbf16>
    %cst_94 = arith.constant dense<0.000000e+00> : vector<2x256xf32>
    %688 = tpu.matmul %687, %505, %cst_94 {dimension_numbers = #tpu.dot_dimension_numbers<[1], [0], [0], [1], [0, 0, 1, 1], [], []>} : vector<2x64xbf16>, vector<64x256xbf16>, vector<2x256xf32> -> vector<2x256xf32>
    %689 = vector.extract_strided_slice %688 {offsets = [0, 0], sizes = [2, 128], strides = [1, 1]} : vector<2x256xf32> to vector<2x128xf32>
    %690 = vector.extract_strided_slice %503 {offsets = [6, 0], sizes = [2, 128], strides = [1, 1]} : vector<16x256xf32> to vector<2x128xf32>
    %691 = arith.addf %689, %690 : vector<2x128xf32>
    %692 = vector.extract_strided_slice %688 {offsets = [0, 128], sizes = [2, 128], strides = [1, 1]} : vector<2x256xf32> to vector<2x128xf32>
    %693 = vector.extract_strided_slice %503 {offsets = [8, 128], sizes = [2, 128], strides = [1, 1]} : vector<16x256xf32> to vector<2x128xf32>
    %694 = arith.addf %692, %693 : vector<2x128xf32>
    %695 = vector.extract_strided_slice %691 {offsets = [0, 0], sizes = [2, 32], strides = [1, 1]} : vector<2x128xf32> to vector<2x32xf32>
    %696 = arith.negf %695 : vector<2x32xf32>
    %697 = math.exp %696 : vector<2x32xf32>
    %cst_95 = arith.constant 1.000000e+00 : f32
    %698 = vector.broadcast %cst_95 : f32 to vector<2x32xf32>
    %699 = arith.addf %698, %697 : vector<2x32xf32>
    %700 = arith.divf %698, %699 : vector<2x32xf32>
    %701 = vector.extract_strided_slice %691 {offsets = [0, 32], sizes = [2, 32], strides = [1, 1]} : vector<2x128xf32> to vector<2x32xf32>
    %702 = arith.negf %701 : vector<2x32xf32>
    %703 = math.exp %702 : vector<2x32xf32>
    %cst_96 = arith.constant 1.000000e+00 : f32
    %704 = vector.broadcast %cst_96 : f32 to vector<2x32xf32>
    %705 = arith.addf %704, %703 : vector<2x32xf32>
    %706 = arith.divf %704, %705 : vector<2x32xf32>
    %707 = vector.extract_strided_slice %691 {offsets = [0, 64], sizes = [2, 32], strides = [1, 1]} : vector<2x128xf32> to vector<2x32xf32>
    %708 = math.tanh %707 : vector<2x32xf32>
    %709 = vector.extract_strided_slice %691 {offsets = [0, 96], sizes = [2, 32], strides = [1, 1]} : vector<2x128xf32> to vector<2x32xf32>
    %710 = arith.negf %709 : vector<2x32xf32>
    %711 = math.exp %710 : vector<2x32xf32>
    %cst_97 = arith.constant 1.000000e+00 : f32
    %712 = vector.broadcast %cst_97 : f32 to vector<2x32xf32>
    %713 = arith.addf %712, %711 : vector<2x32xf32>
    %714 = arith.divf %712, %713 : vector<2x32xf32>
    %715 = arith.mulf %706, %658 : vector<2x32xf32>
    %716 = arith.mulf %700, %708 : vector<2x32xf32>
    %717 = arith.addf %715, %716 : vector<2x32xf32>
    %718 = math.tanh %717 : vector<2x32xf32>
    %719 = arith.mulf %714, %718 : vector<2x32xf32>
    %720 = vector.extract_strided_slice %694 {offsets = [0, 0], sizes = [2, 32], strides = [1, 1]} : vector<2x128xf32> to vector<2x32xf32>
    %721 = arith.negf %720 : vector<2x32xf32>
    %722 = math.exp %721 : vector<2x32xf32>
    %cst_98 = arith.constant 1.000000e+00 : f32
    %723 = vector.broadcast %cst_98 : f32 to vector<2x32xf32>
    %724 = arith.addf %723, %722 : vector<2x32xf32>
    %725 = arith.divf %723, %724 : vector<2x32xf32>
    %726 = vector.extract_strided_slice %694 {offsets = [0, 32], sizes = [2, 32], strides = [1, 1]} : vector<2x128xf32> to vector<2x32xf32>
    %727 = arith.negf %726 : vector<2x32xf32>
    %728 = math.exp %727 : vector<2x32xf32>
    %cst_99 = arith.constant 1.000000e+00 : f32
    %729 = vector.broadcast %cst_99 : f32 to vector<2x32xf32>
    %730 = arith.addf %729, %728 : vector<2x32xf32>
    %731 = arith.divf %729, %730 : vector<2x32xf32>
    %732 = vector.extract_strided_slice %694 {offsets = [0, 64], sizes = [2, 32], strides = [1, 1]} : vector<2x128xf32> to vector<2x32xf32>
    %733 = math.tanh %732 : vector<2x32xf32>
    %734 = vector.extract_strided_slice %694 {offsets = [0, 96], sizes = [2, 32], strides = [1, 1]} : vector<2x128xf32> to vector<2x32xf32>
    %735 = arith.negf %734 : vector<2x32xf32>
    %736 = math.exp %735 : vector<2x32xf32>
    %cst_100 = arith.constant 1.000000e+00 : f32
    %737 = vector.broadcast %cst_100 : f32 to vector<2x32xf32>
    %738 = arith.addf %737, %736 : vector<2x32xf32>
    %739 = arith.divf %737, %738 : vector<2x32xf32>
    %740 = arith.mulf %731, %683 : vector<2x32xf32>
    %741 = arith.mulf %725, %733 : vector<2x32xf32>
    %742 = arith.addf %740, %741 : vector<2x32xf32>
    %743 = math.tanh %742 : vector<2x32xf32>
    %744 = arith.mulf %739, %743 : vector<2x32xf32>
    %745 = tpu.concatenate %719, %744 in 1 : vector<2x32xf32>, vector<2x32xf32> -> vector<2x64xf32>
    %746 = arith.truncf %745 : vector<2x64xf32> to vector<2x64xbf16>
    %cst_101 = arith.constant dense<0.000000e+00> : vector<2x256xf32>
    %747 = tpu.matmul %746, %505, %cst_101 {dimension_numbers = #tpu.dot_dimension_numbers<[1], [0], [0], [1], [0, 0, 1, 1], [], []>} : vector<2x64xbf16>, vector<64x256xbf16>, vector<2x256xf32> -> vector<2x256xf32>
    %748 = vector.extract_strided_slice %747 {offsets = [0, 0], sizes = [2, 128], strides = [1, 1]} : vector<2x256xf32> to vector<2x128xf32>
    %749 = vector.extract_strided_slice %503 {offsets = [8, 0], sizes = [2, 128], strides = [1, 1]} : vector<16x256xf32> to vector<2x128xf32>
    %750 = arith.addf %748, %749 : vector<2x128xf32>
    %751 = vector.extract_strided_slice %747 {offsets = [0, 128], sizes = [2, 128], strides = [1, 1]} : vector<2x256xf32> to vector<2x128xf32>
    %752 = vector.extract_strided_slice %503 {offsets = [6, 128], sizes = [2, 128], strides = [1, 1]} : vector<16x256xf32> to vector<2x128xf32>
    %753 = arith.addf %751, %752 : vector<2x128xf32>
    %754 = vector.extract_strided_slice %750 {offsets = [0, 0], sizes = [2, 32], strides = [1, 1]} : vector<2x128xf32> to vector<2x32xf32>
    %755 = arith.negf %754 : vector<2x32xf32>
    %756 = math.exp %755 : vector<2x32xf32>
    %cst_102 = arith.constant 1.000000e+00 : f32
    %757 = vector.broadcast %cst_102 : f32 to vector<2x32xf32>
    %758 = arith.addf %757, %756 : vector<2x32xf32>
    %759 = arith.divf %757, %758 : vector<2x32xf32>
    %760 = vector.extract_strided_slice %750 {offsets = [0, 32], sizes = [2, 32], strides = [1, 1]} : vector<2x128xf32> to vector<2x32xf32>
    %761 = arith.negf %760 : vector<2x32xf32>
    %762 = math.exp %761 : vector<2x32xf32>
    %cst_103 = arith.constant 1.000000e+00 : f32
    %763 = vector.broadcast %cst_103 : f32 to vector<2x32xf32>
    %764 = arith.addf %763, %762 : vector<2x32xf32>
    %765 = arith.divf %763, %764 : vector<2x32xf32>
    %766 = vector.extract_strided_slice %750 {offsets = [0, 64], sizes = [2, 32], strides = [1, 1]} : vector<2x128xf32> to vector<2x32xf32>
    %767 = math.tanh %766 : vector<2x32xf32>
    %768 = vector.extract_strided_slice %750 {offsets = [0, 96], sizes = [2, 32], strides = [1, 1]} : vector<2x128xf32> to vector<2x32xf32>
    %769 = arith.negf %768 : vector<2x32xf32>
    %770 = math.exp %769 : vector<2x32xf32>
    %cst_104 = arith.constant 1.000000e+00 : f32
    %771 = vector.broadcast %cst_104 : f32 to vector<2x32xf32>
    %772 = arith.addf %771, %770 : vector<2x32xf32>
    %773 = arith.divf %771, %772 : vector<2x32xf32>
    %774 = arith.mulf %765, %717 : vector<2x32xf32>
    %775 = arith.mulf %759, %767 : vector<2x32xf32>
    %776 = arith.addf %774, %775 : vector<2x32xf32>
    %777 = math.tanh %776 : vector<2x32xf32>
    %778 = arith.mulf %773, %777 : vector<2x32xf32>
    %779 = vector.extract_strided_slice %753 {offsets = [0, 0], sizes = [2, 32], strides = [1, 1]} : vector<2x128xf32> to vector<2x32xf32>
    %780 = arith.negf %779 : vector<2x32xf32>
    %781 = math.exp %780 : vector<2x32xf32>
    %cst_105 = arith.constant 1.000000e+00 : f32
    %782 = vector.broadcast %cst_105 : f32 to vector<2x32xf32>
    %783 = arith.addf %782, %781 : vector<2x32xf32>
    %784 = arith.divf %782, %783 : vector<2x32xf32>
    %785 = vector.extract_strided_slice %753 {offsets = [0, 32], sizes = [2, 32], strides = [1, 1]} : vector<2x128xf32> to vector<2x32xf32>
    %786 = arith.negf %785 : vector<2x32xf32>
    %787 = math.exp %786 : vector<2x32xf32>
    %cst_106 = arith.constant 1.000000e+00 : f32
    %788 = vector.broadcast %cst_106 : f32 to vector<2x32xf32>
    %789 = arith.addf %788, %787 : vector<2x32xf32>
    %790 = arith.divf %788, %789 : vector<2x32xf32>
    %791 = vector.extract_strided_slice %753 {offsets = [0, 64], sizes = [2, 32], strides = [1, 1]} : vector<2x128xf32> to vector<2x32xf32>
    %792 = math.tanh %791 : vector<2x32xf32>
    %793 = vector.extract_strided_slice %753 {offsets = [0, 96], sizes = [2, 32], strides = [1, 1]} : vector<2x128xf32> to vector<2x32xf32>
    %794 = arith.negf %793 : vector<2x32xf32>
    %795 = math.exp %794 : vector<2x32xf32>
    %cst_107 = arith.constant 1.000000e+00 : f32
    %796 = vector.broadcast %cst_107 : f32 to vector<2x32xf32>
    %797 = arith.addf %796, %795 : vector<2x32xf32>
    %798 = arith.divf %796, %797 : vector<2x32xf32>
    %799 = arith.mulf %790, %742 : vector<2x32xf32>
    %800 = arith.mulf %784, %792 : vector<2x32xf32>
    %801 = arith.addf %799, %800 : vector<2x32xf32>
    %802 = math.tanh %801 : vector<2x32xf32>
    %803 = arith.mulf %798, %802 : vector<2x32xf32>
    %804 = tpu.concatenate %778, %803 in 1 : vector<2x32xf32>, vector<2x32xf32> -> vector<2x64xf32>
    %805 = arith.truncf %804 : vector<2x64xf32> to vector<2x64xbf16>
    %cst_108 = arith.constant dense<0.000000e+00> : vector<2x256xf32>
    %806 = tpu.matmul %805, %505, %cst_108 {dimension_numbers = #tpu.dot_dimension_numbers<[1], [0], [0], [1], [0, 0, 1, 1], [], []>} : vector<2x64xbf16>, vector<64x256xbf16>, vector<2x256xf32> -> vector<2x256xf32>
    %807 = vector.extract_strided_slice %806 {offsets = [0, 0], sizes = [2, 128], strides = [1, 1]} : vector<2x256xf32> to vector<2x128xf32>
    %808 = vector.extract_strided_slice %503 {offsets = [10, 0], sizes = [2, 128], strides = [1, 1]} : vector<16x256xf32> to vector<2x128xf32>
    %809 = arith.addf %807, %808 : vector<2x128xf32>
    %810 = vector.extract_strided_slice %806 {offsets = [0, 128], sizes = [2, 128], strides = [1, 1]} : vector<2x256xf32> to vector<2x128xf32>
    %811 = vector.extract_strided_slice %503 {offsets = [4, 128], sizes = [2, 128], strides = [1, 1]} : vector<16x256xf32> to vector<2x128xf32>
    %812 = arith.addf %810, %811 : vector<2x128xf32>
    %813 = vector.extract_strided_slice %809 {offsets = [0, 0], sizes = [2, 32], strides = [1, 1]} : vector<2x128xf32> to vector<2x32xf32>
    %814 = arith.negf %813 : vector<2x32xf32>
    %815 = math.exp %814 : vector<2x32xf32>
    %cst_109 = arith.constant 1.000000e+00 : f32
    %816 = vector.broadcast %cst_109 : f32 to vector<2x32xf32>
    %817 = arith.addf %816, %815 : vector<2x32xf32>
    %818 = arith.divf %816, %817 : vector<2x32xf32>
    %819 = vector.extract_strided_slice %809 {offsets = [0, 32], sizes = [2, 32], strides = [1, 1]} : vector<2x128xf32> to vector<2x32xf32>
    %820 = arith.negf %819 : vector<2x32xf32>
    %821 = math.exp %820 : vector<2x32xf32>
    %cst_110 = arith.constant 1.000000e+00 : f32
    %822 = vector.broadcast %cst_110 : f32 to vector<2x32xf32>
    %823 = arith.addf %822, %821 : vector<2x32xf32>
    %824 = arith.divf %822, %823 : vector<2x32xf32>
    %825 = vector.extract_strided_slice %809 {offsets = [0, 64], sizes = [2, 32], strides = [1, 1]} : vector<2x128xf32> to vector<2x32xf32>
    %826 = math.tanh %825 : vector<2x32xf32>
    %827 = vector.extract_strided_slice %809 {offsets = [0, 96], sizes = [2, 32], strides = [1, 1]} : vector<2x128xf32> to vector<2x32xf32>
    %828 = arith.negf %827 : vector<2x32xf32>
    %829 = math.exp %828 : vector<2x32xf32>
    %cst_111 = arith.constant 1.000000e+00 : f32
    %830 = vector.broadcast %cst_111 : f32 to vector<2x32xf32>
    %831 = arith.addf %830, %829 : vector<2x32xf32>
    %832 = arith.divf %830, %831 : vector<2x32xf32>
    %833 = arith.mulf %824, %776 : vector<2x32xf32>
    %834 = arith.mulf %818, %826 : vector<2x32xf32>
    %835 = arith.addf %833, %834 : vector<2x32xf32>
    %836 = math.tanh %835 : vector<2x32xf32>
    %837 = arith.mulf %832, %836 : vector<2x32xf32>
    %838 = vector.extract_strided_slice %812 {offsets = [0, 0], sizes = [2, 32], strides = [1, 1]} : vector<2x128xf32> to vector<2x32xf32>
    %839 = arith.negf %838 : vector<2x32xf32>
    %840 = math.exp %839 : vector<2x32xf32>
    %cst_112 = arith.constant 1.000000e+00 : f32
    %841 = vector.broadcast %cst_112 : f32 to vector<2x32xf32>
    %842 = arith.addf %841, %840 : vector<2x32xf32>
    %843 = arith.divf %841, %842 : vector<2x32xf32>
    %844 = vector.extract_strided_slice %812 {offsets = [0, 32], sizes = [2, 32], strides = [1, 1]} : vector<2x128xf32> to vector<2x32xf32>
    %845 = arith.negf %844 : vector<2x32xf32>
    %846 = math.exp %845 : vector<2x32xf32>
    %cst_113 = arith.constant 1.000000e+00 : f32
    %847 = vector.broadcast %cst_113 : f32 to vector<2x32xf32>
    %848 = arith.addf %847, %846 : vector<2x32xf32>
    %849 = arith.divf %847, %848 : vector<2x32xf32>
    %850 = vector.extract_strided_slice %812 {offsets = [0, 64], sizes = [2, 32], strides = [1, 1]} : vector<2x128xf32> to vector<2x32xf32>
    %851 = math.tanh %850 : vector<2x32xf32>
    %852 = vector.extract_strided_slice %812 {offsets = [0, 96], sizes = [2, 32], strides = [1, 1]} : vector<2x128xf32> to vector<2x32xf32>
    %853 = arith.negf %852 : vector<2x32xf32>
    %854 = math.exp %853 : vector<2x32xf32>
    %cst_114 = arith.constant 1.000000e+00 : f32
    %855 = vector.broadcast %cst_114 : f32 to vector<2x32xf32>
    %856 = arith.addf %855, %854 : vector<2x32xf32>
    %857 = arith.divf %855, %856 : vector<2x32xf32>
    %858 = arith.mulf %849, %801 : vector<2x32xf32>
    %859 = arith.mulf %843, %851 : vector<2x32xf32>
    %860 = arith.addf %858, %859 : vector<2x32xf32>
    %861 = math.tanh %860 : vector<2x32xf32>
    %862 = arith.mulf %857, %861 : vector<2x32xf32>
    %863 = tpu.concatenate %837, %862 in 1 : vector<2x32xf32>, vector<2x32xf32> -> vector<2x64xf32>
    %864 = arith.truncf %863 : vector<2x64xf32> to vector<2x64xbf16>
    %cst_115 = arith.constant dense<0.000000e+00> : vector<2x256xf32>
    %865 = tpu.matmul %864, %505, %cst_115 {dimension_numbers = #tpu.dot_dimension_numbers<[1], [0], [0], [1], [0, 0, 1, 1], [], []>} : vector<2x64xbf16>, vector<64x256xbf16>, vector<2x256xf32> -> vector<2x256xf32>
    %866 = vector.extract_strided_slice %865 {offsets = [0, 0], sizes = [2, 128], strides = [1, 1]} : vector<2x256xf32> to vector<2x128xf32>
    %867 = vector.extract_strided_slice %503 {offsets = [12, 0], sizes = [2, 128], strides = [1, 1]} : vector<16x256xf32> to vector<2x128xf32>
    %868 = arith.addf %866, %867 : vector<2x128xf32>
    %869 = vector.extract_strided_slice %865 {offsets = [0, 128], sizes = [2, 128], strides = [1, 1]} : vector<2x256xf32> to vector<2x128xf32>
    %870 = vector.extract_strided_slice %503 {offsets = [2, 128], sizes = [2, 128], strides = [1, 1]} : vector<16x256xf32> to vector<2x128xf32>
    %871 = arith.addf %869, %870 : vector<2x128xf32>
    %872 = vector.extract_strided_slice %868 {offsets = [0, 0], sizes = [2, 32], strides = [1, 1]} : vector<2x128xf32> to vector<2x32xf32>
    %873 = arith.negf %872 : vector<2x32xf32>
    %874 = math.exp %873 : vector<2x32xf32>
    %cst_116 = arith.constant 1.000000e+00 : f32
    %875 = vector.broadcast %cst_116 : f32 to vector<2x32xf32>
    %876 = arith.addf %875, %874 : vector<2x32xf32>
    %877 = arith.divf %875, %876 : vector<2x32xf32>
    %878 = vector.extract_strided_slice %868 {offsets = [0, 32], sizes = [2, 32], strides = [1, 1]} : vector<2x128xf32> to vector<2x32xf32>
    %879 = arith.negf %878 : vector<2x32xf32>
    %880 = math.exp %879 : vector<2x32xf32>
    %cst_117 = arith.constant 1.000000e+00 : f32
    %881 = vector.broadcast %cst_117 : f32 to vector<2x32xf32>
    %882 = arith.addf %881, %880 : vector<2x32xf32>
    %883 = arith.divf %881, %882 : vector<2x32xf32>
    %884 = vector.extract_strided_slice %868 {offsets = [0, 64], sizes = [2, 32], strides = [1, 1]} : vector<2x128xf32> to vector<2x32xf32>
    %885 = math.tanh %884 : vector<2x32xf32>
    %886 = vector.extract_strided_slice %868 {offsets = [0, 96], sizes = [2, 32], strides = [1, 1]} : vector<2x128xf32> to vector<2x32xf32>
    %887 = arith.negf %886 : vector<2x32xf32>
    %888 = math.exp %887 : vector<2x32xf32>
    %cst_118 = arith.constant 1.000000e+00 : f32
    %889 = vector.broadcast %cst_118 : f32 to vector<2x32xf32>
    %890 = arith.addf %889, %888 : vector<2x32xf32>
    %891 = arith.divf %889, %890 : vector<2x32xf32>
    %892 = arith.mulf %883, %835 : vector<2x32xf32>
    %893 = arith.mulf %877, %885 : vector<2x32xf32>
    %894 = arith.addf %892, %893 : vector<2x32xf32>
    %895 = math.tanh %894 : vector<2x32xf32>
    %896 = arith.mulf %891, %895 : vector<2x32xf32>
    %897 = vector.extract_strided_slice %871 {offsets = [0, 0], sizes = [2, 32], strides = [1, 1]} : vector<2x128xf32> to vector<2x32xf32>
    %898 = arith.negf %897 : vector<2x32xf32>
    %899 = math.exp %898 : vector<2x32xf32>
    %cst_119 = arith.constant 1.000000e+00 : f32
    %900 = vector.broadcast %cst_119 : f32 to vector<2x32xf32>
    %901 = arith.addf %900, %899 : vector<2x32xf32>
    %902 = arith.divf %900, %901 : vector<2x32xf32>
    %903 = vector.extract_strided_slice %871 {offsets = [0, 32], sizes = [2, 32], strides = [1, 1]} : vector<2x128xf32> to vector<2x32xf32>
    %904 = arith.negf %903 : vector<2x32xf32>
    %905 = math.exp %904 : vector<2x32xf32>
    %cst_120 = arith.constant 1.000000e+00 : f32
    %906 = vector.broadcast %cst_120 : f32 to vector<2x32xf32>
    %907 = arith.addf %906, %905 : vector<2x32xf32>
    %908 = arith.divf %906, %907 : vector<2x32xf32>
    %909 = vector.extract_strided_slice %871 {offsets = [0, 64], sizes = [2, 32], strides = [1, 1]} : vector<2x128xf32> to vector<2x32xf32>
    %910 = math.tanh %909 : vector<2x32xf32>
    %911 = vector.extract_strided_slice %871 {offsets = [0, 96], sizes = [2, 32], strides = [1, 1]} : vector<2x128xf32> to vector<2x32xf32>
    %912 = arith.negf %911 : vector<2x32xf32>
    %913 = math.exp %912 : vector<2x32xf32>
    %cst_121 = arith.constant 1.000000e+00 : f32
    %914 = vector.broadcast %cst_121 : f32 to vector<2x32xf32>
    %915 = arith.addf %914, %913 : vector<2x32xf32>
    %916 = arith.divf %914, %915 : vector<2x32xf32>
    %917 = arith.mulf %908, %860 : vector<2x32xf32>
    %918 = arith.mulf %902, %910 : vector<2x32xf32>
    %919 = arith.addf %917, %918 : vector<2x32xf32>
    %920 = math.tanh %919 : vector<2x32xf32>
    %921 = arith.mulf %916, %920 : vector<2x32xf32>
    %922 = tpu.concatenate %896, %921 in 1 : vector<2x32xf32>, vector<2x32xf32> -> vector<2x64xf32>
    %923 = arith.truncf %922 : vector<2x64xf32> to vector<2x64xbf16>
    %cst_122 = arith.constant dense<0.000000e+00> : vector<2x256xf32>
    %924 = tpu.matmul %923, %505, %cst_122 {dimension_numbers = #tpu.dot_dimension_numbers<[1], [0], [0], [1], [0, 0, 1, 1], [], []>} : vector<2x64xbf16>, vector<64x256xbf16>, vector<2x256xf32> -> vector<2x256xf32>
    %925 = vector.extract_strided_slice %924 {offsets = [0, 0], sizes = [2, 128], strides = [1, 1]} : vector<2x256xf32> to vector<2x128xf32>
    %926 = vector.extract_strided_slice %503 {offsets = [14, 0], sizes = [2, 128], strides = [1, 1]} : vector<16x256xf32> to vector<2x128xf32>
    %927 = arith.addf %925, %926 : vector<2x128xf32>
    %928 = vector.extract_strided_slice %924 {offsets = [0, 128], sizes = [2, 128], strides = [1, 1]} : vector<2x256xf32> to vector<2x128xf32>
    %929 = vector.extract_strided_slice %503 {offsets = [0, 128], sizes = [2, 128], strides = [1, 1]} : vector<16x256xf32> to vector<2x128xf32>
    %930 = arith.addf %928, %929 : vector<2x128xf32>
    %931 = vector.extract_strided_slice %927 {offsets = [0, 0], sizes = [2, 32], strides = [1, 1]} : vector<2x128xf32> to vector<2x32xf32>
    %932 = arith.negf %931 : vector<2x32xf32>
    %933 = math.exp %932 : vector<2x32xf32>
    %cst_123 = arith.constant 1.000000e+00 : f32
    %934 = vector.broadcast %cst_123 : f32 to vector<2x32xf32>
    %935 = arith.addf %934, %933 : vector<2x32xf32>
    %936 = arith.divf %934, %935 : vector<2x32xf32>
    %937 = vector.extract_strided_slice %927 {offsets = [0, 32], sizes = [2, 32], strides = [1, 1]} : vector<2x128xf32> to vector<2x32xf32>
    %938 = arith.negf %937 : vector<2x32xf32>
    %939 = math.exp %938 : vector<2x32xf32>
    %cst_124 = arith.constant 1.000000e+00 : f32
    %940 = vector.broadcast %cst_124 : f32 to vector<2x32xf32>
    %941 = arith.addf %940, %939 : vector<2x32xf32>
    %942 = arith.divf %940, %941 : vector<2x32xf32>
    %943 = vector.extract_strided_slice %927 {offsets = [0, 64], sizes = [2, 32], strides = [1, 1]} : vector<2x128xf32> to vector<2x32xf32>
    %944 = math.tanh %943 : vector<2x32xf32>
    %945 = vector.extract_strided_slice %927 {offsets = [0, 96], sizes = [2, 32], strides = [1, 1]} : vector<2x128xf32> to vector<2x32xf32>
    %946 = arith.negf %945 : vector<2x32xf32>
    %947 = math.exp %946 : vector<2x32xf32>
    %cst_125 = arith.constant 1.000000e+00 : f32
    %948 = vector.broadcast %cst_125 : f32 to vector<2x32xf32>
    %949 = arith.addf %948, %947 : vector<2x32xf32>
    %950 = arith.divf %948, %949 : vector<2x32xf32>
    %951 = arith.mulf %942, %894 : vector<2x32xf32>
    %952 = arith.mulf %936, %944 : vector<2x32xf32>
    %953 = arith.addf %951, %952 : vector<2x32xf32>
    %954 = math.tanh %953 : vector<2x32xf32>
    %955 = arith.mulf %950, %954 : vector<2x32xf32>
    %956 = vector.extract_strided_slice %930 {offsets = [0, 0], sizes = [2, 32], strides = [1, 1]} : vector<2x128xf32> to vector<2x32xf32>
    %957 = arith.negf %956 : vector<2x32xf32>
    %958 = math.exp %957 : vector<2x32xf32>
    %cst_126 = arith.constant 1.000000e+00 : f32
    %959 = vector.broadcast %cst_126 : f32 to vector<2x32xf32>
    %960 = arith.addf %959, %958 : vector<2x32xf32>
    %961 = arith.divf %959, %960 : vector<2x32xf32>
    %962 = vector.extract_strided_slice %930 {offsets = [0, 32], sizes = [2, 32], strides = [1, 1]} : vector<2x128xf32> to vector<2x32xf32>
    %963 = arith.negf %962 : vector<2x32xf32>
    %964 = math.exp %963 : vector<2x32xf32>
    %cst_127 = arith.constant 1.000000e+00 : f32
    %965 = vector.broadcast %cst_127 : f32 to vector<2x32xf32>
    %966 = arith.addf %965, %964 : vector<2x32xf32>
    %967 = arith.divf %965, %966 : vector<2x32xf32>
    %968 = vector.extract_strided_slice %930 {offsets = [0, 64], sizes = [2, 32], strides = [1, 1]} : vector<2x128xf32> to vector<2x32xf32>
    %969 = math.tanh %968 : vector<2x32xf32>
    %970 = vector.extract_strided_slice %930 {offsets = [0, 96], sizes = [2, 32], strides = [1, 1]} : vector<2x128xf32> to vector<2x32xf32>
    %971 = arith.negf %970 : vector<2x32xf32>
    %972 = math.exp %971 : vector<2x32xf32>
    %cst_128 = arith.constant 1.000000e+00 : f32
    %973 = vector.broadcast %cst_128 : f32 to vector<2x32xf32>
    %974 = arith.addf %973, %972 : vector<2x32xf32>
    %975 = arith.divf %973, %974 : vector<2x32xf32>
    %976 = arith.mulf %967, %919 : vector<2x32xf32>
    %977 = arith.mulf %961, %969 : vector<2x32xf32>
    %978 = arith.addf %976, %977 : vector<2x32xf32>
    %979 = math.tanh %978 : vector<2x32xf32>
    %980 = arith.mulf %975, %979 : vector<2x32xf32>
    %981 = tpu.concatenate %955, %980, %953, %978 in 1 : vector<2x32xf32>, vector<2x32xf32>, vector<2x32xf32>, vector<2x32xf32> -> vector<2x128xf32>
    %982 = tpu.concatenate %542, %980 in 1 : vector<2x32xf32>, vector<2x32xf32> -> vector<2x64xf32>
    %983 = tpu.concatenate %601, %921 in 1 : vector<2x32xf32>, vector<2x32xf32> -> vector<2x64xf32>
    %984 = tpu.concatenate %660, %862 in 1 : vector<2x32xf32>, vector<2x32xf32> -> vector<2x64xf32>
    %985 = tpu.concatenate %719, %803 in 1 : vector<2x32xf32>, vector<2x32xf32> -> vector<2x64xf32>
    %986 = tpu.concatenate %778, %744 in 1 : vector<2x32xf32>, vector<2x32xf32> -> vector<2x64xf32>
    %987 = tpu.concatenate %837, %685 in 1 : vector<2x32xf32>, vector<2x32xf32> -> vector<2x64xf32>
    %988 = tpu.concatenate %896, %626 in 1 : vector<2x32xf32>, vector<2x32xf32> -> vector<2x64xf32>
    %989 = tpu.concatenate %955, %567 in 1 : vector<2x32xf32>, vector<2x32xf32> -> vector<2x64xf32>
    %990 = tpu.concatenate %982, %983, %984, %985, %986, %987, %988, %989 in 0 : vector<2x64xf32>, vector<2x64xf32>, vector<2x64xf32>, vector<2x64xf32>, vector<2x64xf32>, vector<2x64xf32>, vector<2x64xf32>, vector<2x64xf32> -> vector<16x64xf32>
    %991 = arith.truncf %990 : vector<16x64xf32> to vector<16x64xbf16>
    %c2 = arith.constant 2 : index
    %c0_129 = arith.constant 0 : index
    %c0_130 = arith.constant 0 : index
    %992 = vector.load %arg1[%c2, %c0_129, %c0_130] : memref<4x64x256xbf16, #tpu.memory_space<vmem>>, vector<1x64x256xbf16>
    %993 = vector.shape_cast %992 : vector<1x64x256xbf16> to vector<64x256xbf16>
    %cst_131 = arith.constant dense<0.000000e+00> : vector<16x256xf32>
    %994 = tpu.matmul %991, %993, %cst_131 {dimension_numbers = #tpu.dot_dimension_numbers<[1], [0], [0], [1], [0, 0, 1, 1], [], []>} : vector<16x64xbf16>, vector<64x256xbf16>, vector<16x256xf32> -> vector<16x256xf32>
    %995 = vector.extract_strided_slice %0 {offsets = [2, 0], sizes = [1, 256], strides = [1, 1]} : vector<4x256xf32> to vector<1x256xf32>
    %996 = vector.broadcast %995 : vector<1x256xf32> to vector<16x256xf32>
    %997 = arith.addf %994, %996 : vector<16x256xf32>
    %c2_132 = arith.constant 2 : index
    %c0_133 = arith.constant 0 : index
    %c0_134 = arith.constant 0 : index
    %998 = vector.load %arg2[%c2_132, %c0_133, %c0_134] : memref<4x64x256xbf16, #tpu.memory_space<vmem>>, vector<1x64x256xbf16>
    %999 = vector.shape_cast %998 : vector<1x64x256xbf16> to vector<64x256xbf16>
    %1000 = vector.extract_strided_slice %1 {offsets = [4, 0], sizes = [2, 128], strides = [1, 1]} : vector<8x128xf32> to vector<2x128xf32>
    %1001 = vector.extract_strided_slice %1000 {offsets = [0, 0], sizes = [2, 64], strides = [1, 1]} : vector<2x128xf32> to vector<2x64xf32>
    %1002 = vector.extract_strided_slice %1000 {offsets = [0, 64], sizes = [2, 32], strides = [1, 1]} : vector<2x128xf32> to vector<2x32xf32>
    %1003 = vector.extract_strided_slice %1000 {offsets = [0, 96], sizes = [2, 32], strides = [1, 1]} : vector<2x128xf32> to vector<2x32xf32>
    %1004 = arith.truncf %1001 : vector<2x64xf32> to vector<2x64xbf16>
    %cst_135 = arith.constant dense<0.000000e+00> : vector<2x256xf32>
    %1005 = tpu.matmul %1004, %999, %cst_135 {dimension_numbers = #tpu.dot_dimension_numbers<[1], [0], [0], [1], [0, 0, 1, 1], [], []>} : vector<2x64xbf16>, vector<64x256xbf16>, vector<2x256xf32> -> vector<2x256xf32>
    %1006 = vector.extract_strided_slice %1005 {offsets = [0, 0], sizes = [2, 128], strides = [1, 1]} : vector<2x256xf32> to vector<2x128xf32>
    %1007 = vector.extract_strided_slice %997 {offsets = [0, 0], sizes = [2, 128], strides = [1, 1]} : vector<16x256xf32> to vector<2x128xf32>
    %1008 = arith.addf %1006, %1007 : vector<2x128xf32>
    %1009 = vector.extract_strided_slice %1005 {offsets = [0, 128], sizes = [2, 128], strides = [1, 1]} : vector<2x256xf32> to vector<2x128xf32>
    %1010 = vector.extract_strided_slice %997 {offsets = [14, 128], sizes = [2, 128], strides = [1, 1]} : vector<16x256xf32> to vector<2x128xf32>
    %1011 = arith.addf %1009, %1010 : vector<2x128xf32>
    %1012 = vector.extract_strided_slice %1008 {offsets = [0, 0], sizes = [2, 32], strides = [1, 1]} : vector<2x128xf32> to vector<2x32xf32>
    %1013 = arith.negf %1012 : vector<2x32xf32>
    %1014 = math.exp %1013 : vector<2x32xf32>
    %cst_136 = arith.constant 1.000000e+00 : f32
    %1015 = vector.broadcast %cst_136 : f32 to vector<2x32xf32>
    %1016 = arith.addf %1015, %1014 : vector<2x32xf32>
    %1017 = arith.divf %1015, %1016 : vector<2x32xf32>
    %1018 = vector.extract_strided_slice %1008 {offsets = [0, 32], sizes = [2, 32], strides = [1, 1]} : vector<2x128xf32> to vector<2x32xf32>
    %1019 = arith.negf %1018 : vector<2x32xf32>
    %1020 = math.exp %1019 : vector<2x32xf32>
    %cst_137 = arith.constant 1.000000e+00 : f32
    %1021 = vector.broadcast %cst_137 : f32 to vector<2x32xf32>
    %1022 = arith.addf %1021, %1020 : vector<2x32xf32>
    %1023 = arith.divf %1021, %1022 : vector<2x32xf32>
    %1024 = vector.extract_strided_slice %1008 {offsets = [0, 64], sizes = [2, 32], strides = [1, 1]} : vector<2x128xf32> to vector<2x32xf32>
    %1025 = math.tanh %1024 : vector<2x32xf32>
    %1026 = vector.extract_strided_slice %1008 {offsets = [0, 96], sizes = [2, 32], strides = [1, 1]} : vector<2x128xf32> to vector<2x32xf32>
    %1027 = arith.negf %1026 : vector<2x32xf32>
    %1028 = math.exp %1027 : vector<2x32xf32>
    %cst_138 = arith.constant 1.000000e+00 : f32
    %1029 = vector.broadcast %cst_138 : f32 to vector<2x32xf32>
    %1030 = arith.addf %1029, %1028 : vector<2x32xf32>
    %1031 = arith.divf %1029, %1030 : vector<2x32xf32>
    %1032 = arith.mulf %1023, %1002 : vector<2x32xf32>
    %1033 = arith.mulf %1017, %1025 : vector<2x32xf32>
    %1034 = arith.addf %1032, %1033 : vector<2x32xf32>
    %1035 = math.tanh %1034 : vector<2x32xf32>
    %1036 = arith.mulf %1031, %1035 : vector<2x32xf32>
    %1037 = vector.extract_strided_slice %1011 {offsets = [0, 0], sizes = [2, 32], strides = [1, 1]} : vector<2x128xf32> to vector<2x32xf32>
    %1038 = arith.negf %1037 : vector<2x32xf32>
    %1039 = math.exp %1038 : vector<2x32xf32>
    %cst_139 = arith.constant 1.000000e+00 : f32
    %1040 = vector.broadcast %cst_139 : f32 to vector<2x32xf32>
    %1041 = arith.addf %1040, %1039 : vector<2x32xf32>
    %1042 = arith.divf %1040, %1041 : vector<2x32xf32>
    %1043 = vector.extract_strided_slice %1011 {offsets = [0, 32], sizes = [2, 32], strides = [1, 1]} : vector<2x128xf32> to vector<2x32xf32>
    %1044 = arith.negf %1043 : vector<2x32xf32>
    %1045 = math.exp %1044 : vector<2x32xf32>
    %cst_140 = arith.constant 1.000000e+00 : f32
    %1046 = vector.broadcast %cst_140 : f32 to vector<2x32xf32>
    %1047 = arith.addf %1046, %1045 : vector<2x32xf32>
    %1048 = arith.divf %1046, %1047 : vector<2x32xf32>
    %1049 = vector.extract_strided_slice %1011 {offsets = [0, 64], sizes = [2, 32], strides = [1, 1]} : vector<2x128xf32> to vector<2x32xf32>
    %1050 = math.tanh %1049 : vector<2x32xf32>
    %1051 = vector.extract_strided_slice %1011 {offsets = [0, 96], sizes = [2, 32], strides = [1, 1]} : vector<2x128xf32> to vector<2x32xf32>
    %1052 = arith.negf %1051 : vector<2x32xf32>
    %1053 = math.exp %1052 : vector<2x32xf32>
    %cst_141 = arith.constant 1.000000e+00 : f32
    %1054 = vector.broadcast %cst_141 : f32 to vector<2x32xf32>
    %1055 = arith.addf %1054, %1053 : vector<2x32xf32>
    %1056 = arith.divf %1054, %1055 : vector<2x32xf32>
    %1057 = arith.mulf %1048, %1003 : vector<2x32xf32>
    %1058 = arith.mulf %1042, %1050 : vector<2x32xf32>
    %1059 = arith.addf %1057, %1058 : vector<2x32xf32>
    %1060 = math.tanh %1059 : vector<2x32xf32>
    %1061 = arith.mulf %1056, %1060 : vector<2x32xf32>
    %1062 = tpu.concatenate %1036, %1061 in 1 : vector<2x32xf32>, vector<2x32xf32> -> vector<2x64xf32>
    %1063 = arith.truncf %1062 : vector<2x64xf32> to vector<2x64xbf16>
    %cst_142 = arith.constant dense<0.000000e+00> : vector<2x256xf32>
    %1064 = tpu.matmul %1063, %999, %cst_142 {dimension_numbers = #tpu.dot_dimension_numbers<[1], [0], [0], [1], [0, 0, 1, 1], [], []>} : vector<2x64xbf16>, vector<64x256xbf16>, vector<2x256xf32> -> vector<2x256xf32>
    %1065 = vector.extract_strided_slice %1064 {offsets = [0, 0], sizes = [2, 128], strides = [1, 1]} : vector<2x256xf32> to vector<2x128xf32>
    %1066 = vector.extract_strided_slice %997 {offsets = [2, 0], sizes = [2, 128], strides = [1, 1]} : vector<16x256xf32> to vector<2x128xf32>
    %1067 = arith.addf %1065, %1066 : vector<2x128xf32>
    %1068 = vector.extract_strided_slice %1064 {offsets = [0, 128], sizes = [2, 128], strides = [1, 1]} : vector<2x256xf32> to vector<2x128xf32>
    %1069 = vector.extract_strided_slice %997 {offsets = [12, 128], sizes = [2, 128], strides = [1, 1]} : vector<16x256xf32> to vector<2x128xf32>
    %1070 = arith.addf %1068, %1069 : vector<2x128xf32>
    %1071 = vector.extract_strided_slice %1067 {offsets = [0, 0], sizes = [2, 32], strides = [1, 1]} : vector<2x128xf32> to vector<2x32xf32>
    %1072 = arith.negf %1071 : vector<2x32xf32>
    %1073 = math.exp %1072 : vector<2x32xf32>
    %cst_143 = arith.constant 1.000000e+00 : f32
    %1074 = vector.broadcast %cst_143 : f32 to vector<2x32xf32>
    %1075 = arith.addf %1074, %1073 : vector<2x32xf32>
    %1076 = arith.divf %1074, %1075 : vector<2x32xf32>
    %1077 = vector.extract_strided_slice %1067 {offsets = [0, 32], sizes = [2, 32], strides = [1, 1]} : vector<2x128xf32> to vector<2x32xf32>
    %1078 = arith.negf %1077 : vector<2x32xf32>
    %1079 = math.exp %1078 : vector<2x32xf32>
    %cst_144 = arith.constant 1.000000e+00 : f32
    %1080 = vector.broadcast %cst_144 : f32 to vector<2x32xf32>
    %1081 = arith.addf %1080, %1079 : vector<2x32xf32>
    %1082 = arith.divf %1080, %1081 : vector<2x32xf32>
    %1083 = vector.extract_strided_slice %1067 {offsets = [0, 64], sizes = [2, 32], strides = [1, 1]} : vector<2x128xf32> to vector<2x32xf32>
    %1084 = math.tanh %1083 : vector<2x32xf32>
    %1085 = vector.extract_strided_slice %1067 {offsets = [0, 96], sizes = [2, 32], strides = [1, 1]} : vector<2x128xf32> to vector<2x32xf32>
    %1086 = arith.negf %1085 : vector<2x32xf32>
    %1087 = math.exp %1086 : vector<2x32xf32>
    %cst_145 = arith.constant 1.000000e+00 : f32
    %1088 = vector.broadcast %cst_145 : f32 to vector<2x32xf32>
    %1089 = arith.addf %1088, %1087 : vector<2x32xf32>
    %1090 = arith.divf %1088, %1089 : vector<2x32xf32>
    %1091 = arith.mulf %1082, %1034 : vector<2x32xf32>
    %1092 = arith.mulf %1076, %1084 : vector<2x32xf32>
    %1093 = arith.addf %1091, %1092 : vector<2x32xf32>
    %1094 = math.tanh %1093 : vector<2x32xf32>
    %1095 = arith.mulf %1090, %1094 : vector<2x32xf32>
    %1096 = vector.extract_strided_slice %1070 {offsets = [0, 0], sizes = [2, 32], strides = [1, 1]} : vector<2x128xf32> to vector<2x32xf32>
    %1097 = arith.negf %1096 : vector<2x32xf32>
    %1098 = math.exp %1097 : vector<2x32xf32>
    %cst_146 = arith.constant 1.000000e+00 : f32
    %1099 = vector.broadcast %cst_146 : f32 to vector<2x32xf32>
    %1100 = arith.addf %1099, %1098 : vector<2x32xf32>
    %1101 = arith.divf %1099, %1100 : vector<2x32xf32>
    %1102 = vector.extract_strided_slice %1070 {offsets = [0, 32], sizes = [2, 32], strides = [1, 1]} : vector<2x128xf32> to vector<2x32xf32>
    %1103 = arith.negf %1102 : vector<2x32xf32>
    %1104 = math.exp %1103 : vector<2x32xf32>
    %cst_147 = arith.constant 1.000000e+00 : f32
    %1105 = vector.broadcast %cst_147 : f32 to vector<2x32xf32>
    %1106 = arith.addf %1105, %1104 : vector<2x32xf32>
    %1107 = arith.divf %1105, %1106 : vector<2x32xf32>
    %1108 = vector.extract_strided_slice %1070 {offsets = [0, 64], sizes = [2, 32], strides = [1, 1]} : vector<2x128xf32> to vector<2x32xf32>
    %1109 = math.tanh %1108 : vector<2x32xf32>
    %1110 = vector.extract_strided_slice %1070 {offsets = [0, 96], sizes = [2, 32], strides = [1, 1]} : vector<2x128xf32> to vector<2x32xf32>
    %1111 = arith.negf %1110 : vector<2x32xf32>
    %1112 = math.exp %1111 : vector<2x32xf32>
    %cst_148 = arith.constant 1.000000e+00 : f32
    %1113 = vector.broadcast %cst_148 : f32 to vector<2x32xf32>
    %1114 = arith.addf %1113, %1112 : vector<2x32xf32>
    %1115 = arith.divf %1113, %1114 : vector<2x32xf32>
    %1116 = arith.mulf %1107, %1059 : vector<2x32xf32>
    %1117 = arith.mulf %1101, %1109 : vector<2x32xf32>
    %1118 = arith.addf %1116, %1117 : vector<2x32xf32>
    %1119 = math.tanh %1118 : vector<2x32xf32>
    %1120 = arith.mulf %1115, %1119 : vector<2x32xf32>
    %1121 = tpu.concatenate %1095, %1120 in 1 : vector<2x32xf32>, vector<2x32xf32> -> vector<2x64xf32>
    %1122 = arith.truncf %1121 : vector<2x64xf32> to vector<2x64xbf16>
    %cst_149 = arith.constant dense<0.000000e+00> : vector<2x256xf32>
    %1123 = tpu.matmul %1122, %999, %cst_149 {dimension_numbers = #tpu.dot_dimension_numbers<[1], [0], [0], [1], [0, 0, 1, 1], [], []>} : vector<2x64xbf16>, vector<64x256xbf16>, vector<2x256xf32> -> vector<2x256xf32>
    %1124 = vector.extract_strided_slice %1123 {offsets = [0, 0], sizes = [2, 128], strides = [1, 1]} : vector<2x256xf32> to vector<2x128xf32>
    %1125 = vector.extract_strided_slice %997 {offsets = [4, 0], sizes = [2, 128], strides = [1, 1]} : vector<16x256xf32> to vector<2x128xf32>
    %1126 = arith.addf %1124, %1125 : vector<2x128xf32>
    %1127 = vector.extract_strided_slice %1123 {offsets = [0, 128], sizes = [2, 128], strides = [1, 1]} : vector<2x256xf32> to vector<2x128xf32>
    %1128 = vector.extract_strided_slice %997 {offsets = [10, 128], sizes = [2, 128], strides = [1, 1]} : vector<16x256xf32> to vector<2x128xf32>
    %1129 = arith.addf %1127, %1128 : vector<2x128xf32>
    %1130 = vector.extract_strided_slice %1126 {offsets = [0, 0], sizes = [2, 32], strides = [1, 1]} : vector<2x128xf32> to vector<2x32xf32>
    %1131 = arith.negf %1130 : vector<2x32xf32>
    %1132 = math.exp %1131 : vector<2x32xf32>
    %cst_150 = arith.constant 1.000000e+00 : f32
    %1133 = vector.broadcast %cst_150 : f32 to vector<2x32xf32>
    %1134 = arith.addf %1133, %1132 : vector<2x32xf32>
    %1135 = arith.divf %1133, %1134 : vector<2x32xf32>
    %1136 = vector.extract_strided_slice %1126 {offsets = [0, 32], sizes = [2, 32], strides = [1, 1]} : vector<2x128xf32> to vector<2x32xf32>
    %1137 = arith.negf %1136 : vector<2x32xf32>
    %1138 = math.exp %1137 : vector<2x32xf32>
    %cst_151 = arith.constant 1.000000e+00 : f32
    %1139 = vector.broadcast %cst_151 : f32 to vector<2x32xf32>
    %1140 = arith.addf %1139, %1138 : vector<2x32xf32>
    %1141 = arith.divf %1139, %1140 : vector<2x32xf32>
    %1142 = vector.extract_strided_slice %1126 {offsets = [0, 64], sizes = [2, 32], strides = [1, 1]} : vector<2x128xf32> to vector<2x32xf32>
    %1143 = math.tanh %1142 : vector<2x32xf32>
    %1144 = vector.extract_strided_slice %1126 {offsets = [0, 96], sizes = [2, 32], strides = [1, 1]} : vector<2x128xf32> to vector<2x32xf32>
    %1145 = arith.negf %1144 : vector<2x32xf32>
    %1146 = math.exp %1145 : vector<2x32xf32>
    %cst_152 = arith.constant 1.000000e+00 : f32
    %1147 = vector.broadcast %cst_152 : f32 to vector<2x32xf32>
    %1148 = arith.addf %1147, %1146 : vector<2x32xf32>
    %1149 = arith.divf %1147, %1148 : vector<2x32xf32>
    %1150 = arith.mulf %1141, %1093 : vector<2x32xf32>
    %1151 = arith.mulf %1135, %1143 : vector<2x32xf32>
    %1152 = arith.addf %1150, %1151 : vector<2x32xf32>
    %1153 = math.tanh %1152 : vector<2x32xf32>
    %1154 = arith.mulf %1149, %1153 : vector<2x32xf32>
    %1155 = vector.extract_strided_slice %1129 {offsets = [0, 0], sizes = [2, 32], strides = [1, 1]} : vector<2x128xf32> to vector<2x32xf32>
    %1156 = arith.negf %1155 : vector<2x32xf32>
    %1157 = math.exp %1156 : vector<2x32xf32>
    %cst_153 = arith.constant 1.000000e+00 : f32
    %1158 = vector.broadcast %cst_153 : f32 to vector<2x32xf32>
    %1159 = arith.addf %1158, %1157 : vector<2x32xf32>
    %1160 = arith.divf %1158, %1159 : vector<2x32xf32>
    %1161 = vector.extract_strided_slice %1129 {offsets = [0, 32], sizes = [2, 32], strides = [1, 1]} : vector<2x128xf32> to vector<2x32xf32>
    %1162 = arith.negf %1161 : vector<2x32xf32>
    %1163 = math.exp %1162 : vector<2x32xf32>
    %cst_154 = arith.constant 1.000000e+00 : f32
    %1164 = vector.broadcast %cst_154 : f32 to vector<2x32xf32>
    %1165 = arith.addf %1164, %1163 : vector<2x32xf32>
    %1166 = arith.divf %1164, %1165 : vector<2x32xf32>
    %1167 = vector.extract_strided_slice %1129 {offsets = [0, 64], sizes = [2, 32], strides = [1, 1]} : vector<2x128xf32> to vector<2x32xf32>
    %1168 = math.tanh %1167 : vector<2x32xf32>
    %1169 = vector.extract_strided_slice %1129 {offsets = [0, 96], sizes = [2, 32], strides = [1, 1]} : vector<2x128xf32> to vector<2x32xf32>
    %1170 = arith.negf %1169 : vector<2x32xf32>
    %1171 = math.exp %1170 : vector<2x32xf32>
    %cst_155 = arith.constant 1.000000e+00 : f32
    %1172 = vector.broadcast %cst_155 : f32 to vector<2x32xf32>
    %1173 = arith.addf %1172, %1171 : vector<2x32xf32>
    %1174 = arith.divf %1172, %1173 : vector<2x32xf32>
    %1175 = arith.mulf %1166, %1118 : vector<2x32xf32>
    %1176 = arith.mulf %1160, %1168 : vector<2x32xf32>
    %1177 = arith.addf %1175, %1176 : vector<2x32xf32>
    %1178 = math.tanh %1177 : vector<2x32xf32>
    %1179 = arith.mulf %1174, %1178 : vector<2x32xf32>
    %1180 = tpu.concatenate %1154, %1179 in 1 : vector<2x32xf32>, vector<2x32xf32> -> vector<2x64xf32>
    %1181 = arith.truncf %1180 : vector<2x64xf32> to vector<2x64xbf16>
    %cst_156 = arith.constant dense<0.000000e+00> : vector<2x256xf32>
    %1182 = tpu.matmul %1181, %999, %cst_156 {dimension_numbers = #tpu.dot_dimension_numbers<[1], [0], [0], [1], [0, 0, 1, 1], [], []>} : vector<2x64xbf16>, vector<64x256xbf16>, vector<2x256xf32> -> vector<2x256xf32>
    %1183 = vector.extract_strided_slice %1182 {offsets = [0, 0], sizes = [2, 128], strides = [1, 1]} : vector<2x256xf32> to vector<2x128xf32>
    %1184 = vector.extract_strided_slice %997 {offsets = [6, 0], sizes = [2, 128], strides = [1, 1]} : vector<16x256xf32> to vector<2x128xf32>
    %1185 = arith.addf %1183, %1184 : vector<2x128xf32>
    %1186 = vector.extract_strided_slice %1182 {offsets = [0, 128], sizes = [2, 128], strides = [1, 1]} : vector<2x256xf32> to vector<2x128xf32>
    %1187 = vector.extract_strided_slice %997 {offsets = [8, 128], sizes = [2, 128], strides = [1, 1]} : vector<16x256xf32> to vector<2x128xf32>
    %1188 = arith.addf %1186, %1187 : vector<2x128xf32>
    %1189 = vector.extract_strided_slice %1185 {offsets = [0, 0], sizes = [2, 32], strides = [1, 1]} : vector<2x128xf32> to vector<2x32xf32>
    %1190 = arith.negf %1189 : vector<2x32xf32>
    %1191 = math.exp %1190 : vector<2x32xf32>
    %cst_157 = arith.constant 1.000000e+00 : f32
    %1192 = vector.broadcast %cst_157 : f32 to vector<2x32xf32>
    %1193 = arith.addf %1192, %1191 : vector<2x32xf32>
    %1194 = arith.divf %1192, %1193 : vector<2x32xf32>
    %1195 = vector.extract_strided_slice %1185 {offsets = [0, 32], sizes = [2, 32], strides = [1, 1]} : vector<2x128xf32> to vector<2x32xf32>
    %1196 = arith.negf %1195 : vector<2x32xf32>
    %1197 = math.exp %1196 : vector<2x32xf32>
    %cst_158 = arith.constant 1.000000e+00 : f32
    %1198 = vector.broadcast %cst_158 : f32 to vector<2x32xf32>
    %1199 = arith.addf %1198, %1197 : vector<2x32xf32>
    %1200 = arith.divf %1198, %1199 : vector<2x32xf32>
    %1201 = vector.extract_strided_slice %1185 {offsets = [0, 64], sizes = [2, 32], strides = [1, 1]} : vector<2x128xf32> to vector<2x32xf32>
    %1202 = math.tanh %1201 : vector<2x32xf32>
    %1203 = vector.extract_strided_slice %1185 {offsets = [0, 96], sizes = [2, 32], strides = [1, 1]} : vector<2x128xf32> to vector<2x32xf32>
    %1204 = arith.negf %1203 : vector<2x32xf32>
    %1205 = math.exp %1204 : vector<2x32xf32>
    %cst_159 = arith.constant 1.000000e+00 : f32
    %1206 = vector.broadcast %cst_159 : f32 to vector<2x32xf32>
    %1207 = arith.addf %1206, %1205 : vector<2x32xf32>
    %1208 = arith.divf %1206, %1207 : vector<2x32xf32>
    %1209 = arith.mulf %1200, %1152 : vector<2x32xf32>
    %1210 = arith.mulf %1194, %1202 : vector<2x32xf32>
    %1211 = arith.addf %1209, %1210 : vector<2x32xf32>
    %1212 = math.tanh %1211 : vector<2x32xf32>
    %1213 = arith.mulf %1208, %1212 : vector<2x32xf32>
    %1214 = vector.extract_strided_slice %1188 {offsets = [0, 0], sizes = [2, 32], strides = [1, 1]} : vector<2x128xf32> to vector<2x32xf32>
    %1215 = arith.negf %1214 : vector<2x32xf32>
    %1216 = math.exp %1215 : vector<2x32xf32>
    %cst_160 = arith.constant 1.000000e+00 : f32
    %1217 = vector.broadcast %cst_160 : f32 to vector<2x32xf32>
    %1218 = arith.addf %1217, %1216 : vector<2x32xf32>
    %1219 = arith.divf %1217, %1218 : vector<2x32xf32>
    %1220 = vector.extract_strided_slice %1188 {offsets = [0, 32], sizes = [2, 32], strides = [1, 1]} : vector<2x128xf32> to vector<2x32xf32>
    %1221 = arith.negf %1220 : vector<2x32xf32>
    %1222 = math.exp %1221 : vector<2x32xf32>
    %cst_161 = arith.constant 1.000000e+00 : f32
    %1223 = vector.broadcast %cst_161 : f32 to vector<2x32xf32>
    %1224 = arith.addf %1223, %1222 : vector<2x32xf32>
    %1225 = arith.divf %1223, %1224 : vector<2x32xf32>
    %1226 = vector.extract_strided_slice %1188 {offsets = [0, 64], sizes = [2, 32], strides = [1, 1]} : vector<2x128xf32> to vector<2x32xf32>
    %1227 = math.tanh %1226 : vector<2x32xf32>
    %1228 = vector.extract_strided_slice %1188 {offsets = [0, 96], sizes = [2, 32], strides = [1, 1]} : vector<2x128xf32> to vector<2x32xf32>
    %1229 = arith.negf %1228 : vector<2x32xf32>
    %1230 = math.exp %1229 : vector<2x32xf32>
    %cst_162 = arith.constant 1.000000e+00 : f32
    %1231 = vector.broadcast %cst_162 : f32 to vector<2x32xf32>
    %1232 = arith.addf %1231, %1230 : vector<2x32xf32>
    %1233 = arith.divf %1231, %1232 : vector<2x32xf32>
    %1234 = arith.mulf %1225, %1177 : vector<2x32xf32>
    %1235 = arith.mulf %1219, %1227 : vector<2x32xf32>
    %1236 = arith.addf %1234, %1235 : vector<2x32xf32>
    %1237 = math.tanh %1236 : vector<2x32xf32>
    %1238 = arith.mulf %1233, %1237 : vector<2x32xf32>
    %1239 = tpu.concatenate %1213, %1238 in 1 : vector<2x32xf32>, vector<2x32xf32> -> vector<2x64xf32>
    %1240 = arith.truncf %1239 : vector<2x64xf32> to vector<2x64xbf16>
    %cst_163 = arith.constant dense<0.000000e+00> : vector<2x256xf32>
    %1241 = tpu.matmul %1240, %999, %cst_163 {dimension_numbers = #tpu.dot_dimension_numbers<[1], [0], [0], [1], [0, 0, 1, 1], [], []>} : vector<2x64xbf16>, vector<64x256xbf16>, vector<2x256xf32> -> vector<2x256xf32>
    %1242 = vector.extract_strided_slice %1241 {offsets = [0, 0], sizes = [2, 128], strides = [1, 1]} : vector<2x256xf32> to vector<2x128xf32>
    %1243 = vector.extract_strided_slice %997 {offsets = [8, 0], sizes = [2, 128], strides = [1, 1]} : vector<16x256xf32> to vector<2x128xf32>
    %1244 = arith.addf %1242, %1243 : vector<2x128xf32>
    %1245 = vector.extract_strided_slice %1241 {offsets = [0, 128], sizes = [2, 128], strides = [1, 1]} : vector<2x256xf32> to vector<2x128xf32>
    %1246 = vector.extract_strided_slice %997 {offsets = [6, 128], sizes = [2, 128], strides = [1, 1]} : vector<16x256xf32> to vector<2x128xf32>
    %1247 = arith.addf %1245, %1246 : vector<2x128xf32>
    %1248 = vector.extract_strided_slice %1244 {offsets = [0, 0], sizes = [2, 32], strides = [1, 1]} : vector<2x128xf32> to vector<2x32xf32>
    %1249 = arith.negf %1248 : vector<2x32xf32>
    %1250 = math.exp %1249 : vector<2x32xf32>
    %cst_164 = arith.constant 1.000000e+00 : f32
    %1251 = vector.broadcast %cst_164 : f32 to vector<2x32xf32>
    %1252 = arith.addf %1251, %1250 : vector<2x32xf32>
    %1253 = arith.divf %1251, %1252 : vector<2x32xf32>
    %1254 = vector.extract_strided_slice %1244 {offsets = [0, 32], sizes = [2, 32], strides = [1, 1]} : vector<2x128xf32> to vector<2x32xf32>
    %1255 = arith.negf %1254 : vector<2x32xf32>
    %1256 = math.exp %1255 : vector<2x32xf32>
    %cst_165 = arith.constant 1.000000e+00 : f32
    %1257 = vector.broadcast %cst_165 : f32 to vector<2x32xf32>
    %1258 = arith.addf %1257, %1256 : vector<2x32xf32>
    %1259 = arith.divf %1257, %1258 : vector<2x32xf32>
    %1260 = vector.extract_strided_slice %1244 {offsets = [0, 64], sizes = [2, 32], strides = [1, 1]} : vector<2x128xf32> to vector<2x32xf32>
    %1261 = math.tanh %1260 : vector<2x32xf32>
    %1262 = vector.extract_strided_slice %1244 {offsets = [0, 96], sizes = [2, 32], strides = [1, 1]} : vector<2x128xf32> to vector<2x32xf32>
    %1263 = arith.negf %1262 : vector<2x32xf32>
    %1264 = math.exp %1263 : vector<2x32xf32>
    %cst_166 = arith.constant 1.000000e+00 : f32
    %1265 = vector.broadcast %cst_166 : f32 to vector<2x32xf32>
    %1266 = arith.addf %1265, %1264 : vector<2x32xf32>
    %1267 = arith.divf %1265, %1266 : vector<2x32xf32>
    %1268 = arith.mulf %1259, %1211 : vector<2x32xf32>
    %1269 = arith.mulf %1253, %1261 : vector<2x32xf32>
    %1270 = arith.addf %1268, %1269 : vector<2x32xf32>
    %1271 = math.tanh %1270 : vector<2x32xf32>
    %1272 = arith.mulf %1267, %1271 : vector<2x32xf32>
    %1273 = vector.extract_strided_slice %1247 {offsets = [0, 0], sizes = [2, 32], strides = [1, 1]} : vector<2x128xf32> to vector<2x32xf32>
    %1274 = arith.negf %1273 : vector<2x32xf32>
    %1275 = math.exp %1274 : vector<2x32xf32>
    %cst_167 = arith.constant 1.000000e+00 : f32
    %1276 = vector.broadcast %cst_167 : f32 to vector<2x32xf32>
    %1277 = arith.addf %1276, %1275 : vector<2x32xf32>
    %1278 = arith.divf %1276, %1277 : vector<2x32xf32>
    %1279 = vector.extract_strided_slice %1247 {offsets = [0, 32], sizes = [2, 32], strides = [1, 1]} : vector<2x128xf32> to vector<2x32xf32>
    %1280 = arith.negf %1279 : vector<2x32xf32>
    %1281 = math.exp %1280 : vector<2x32xf32>
    %cst_168 = arith.constant 1.000000e+00 : f32
    %1282 = vector.broadcast %cst_168 : f32 to vector<2x32xf32>
    %1283 = arith.addf %1282, %1281 : vector<2x32xf32>
    %1284 = arith.divf %1282, %1283 : vector<2x32xf32>
    %1285 = vector.extract_strided_slice %1247 {offsets = [0, 64], sizes = [2, 32], strides = [1, 1]} : vector<2x128xf32> to vector<2x32xf32>
    %1286 = math.tanh %1285 : vector<2x32xf32>
    %1287 = vector.extract_strided_slice %1247 {offsets = [0, 96], sizes = [2, 32], strides = [1, 1]} : vector<2x128xf32> to vector<2x32xf32>
    %1288 = arith.negf %1287 : vector<2x32xf32>
    %1289 = math.exp %1288 : vector<2x32xf32>
    %cst_169 = arith.constant 1.000000e+00 : f32
    %1290 = vector.broadcast %cst_169 : f32 to vector<2x32xf32>
    %1291 = arith.addf %1290, %1289 : vector<2x32xf32>
    %1292 = arith.divf %1290, %1291 : vector<2x32xf32>
    %1293 = arith.mulf %1284, %1236 : vector<2x32xf32>
    %1294 = arith.mulf %1278, %1286 : vector<2x32xf32>
    %1295 = arith.addf %1293, %1294 : vector<2x32xf32>
    %1296 = math.tanh %1295 : vector<2x32xf32>
    %1297 = arith.mulf %1292, %1296 : vector<2x32xf32>
    %1298 = tpu.concatenate %1272, %1297 in 1 : vector<2x32xf32>, vector<2x32xf32> -> vector<2x64xf32>
    %1299 = arith.truncf %1298 : vector<2x64xf32> to vector<2x64xbf16>
    %cst_170 = arith.constant dense<0.000000e+00> : vector<2x256xf32>
    %1300 = tpu.matmul %1299, %999, %cst_170 {dimension_numbers = #tpu.dot_dimension_numbers<[1], [0], [0], [1], [0, 0, 1, 1], [], []>} : vector<2x64xbf16>, vector<64x256xbf16>, vector<2x256xf32> -> vector<2x256xf32>
    %1301 = vector.extract_strided_slice %1300 {offsets = [0, 0], sizes = [2, 128], strides = [1, 1]} : vector<2x256xf32> to vector<2x128xf32>
    %1302 = vector.extract_strided_slice %997 {offsets = [10, 0], sizes = [2, 128], strides = [1, 1]} : vector<16x256xf32> to vector<2x128xf32>
    %1303 = arith.addf %1301, %1302 : vector<2x128xf32>
    %1304 = vector.extract_strided_slice %1300 {offsets = [0, 128], sizes = [2, 128], strides = [1, 1]} : vector<2x256xf32> to vector<2x128xf32>
    %1305 = vector.extract_strided_slice %997 {offsets = [4, 128], sizes = [2, 128], strides = [1, 1]} : vector<16x256xf32> to vector<2x128xf32>
    %1306 = arith.addf %1304, %1305 : vector<2x128xf32>
    %1307 = vector.extract_strided_slice %1303 {offsets = [0, 0], sizes = [2, 32], strides = [1, 1]} : vector<2x128xf32> to vector<2x32xf32>
    %1308 = arith.negf %1307 : vector<2x32xf32>
    %1309 = math.exp %1308 : vector<2x32xf32>
    %cst_171 = arith.constant 1.000000e+00 : f32
    %1310 = vector.broadcast %cst_171 : f32 to vector<2x32xf32>
    %1311 = arith.addf %1310, %1309 : vector<2x32xf32>
    %1312 = arith.divf %1310, %1311 : vector<2x32xf32>
    %1313 = vector.extract_strided_slice %1303 {offsets = [0, 32], sizes = [2, 32], strides = [1, 1]} : vector<2x128xf32> to vector<2x32xf32>
    %1314 = arith.negf %1313 : vector<2x32xf32>
    %1315 = math.exp %1314 : vector<2x32xf32>
    %cst_172 = arith.constant 1.000000e+00 : f32
    %1316 = vector.broadcast %cst_172 : f32 to vector<2x32xf32>
    %1317 = arith.addf %1316, %1315 : vector<2x32xf32>
    %1318 = arith.divf %1316, %1317 : vector<2x32xf32>
    %1319 = vector.extract_strided_slice %1303 {offsets = [0, 64], sizes = [2, 32], strides = [1, 1]} : vector<2x128xf32> to vector<2x32xf32>
    %1320 = math.tanh %1319 : vector<2x32xf32>
    %1321 = vector.extract_strided_slice %1303 {offsets = [0, 96], sizes = [2, 32], strides = [1, 1]} : vector<2x128xf32> to vector<2x32xf32>
    %1322 = arith.negf %1321 : vector<2x32xf32>
    %1323 = math.exp %1322 : vector<2x32xf32>
    %cst_173 = arith.constant 1.000000e+00 : f32
    %1324 = vector.broadcast %cst_173 : f32 to vector<2x32xf32>
    %1325 = arith.addf %1324, %1323 : vector<2x32xf32>
    %1326 = arith.divf %1324, %1325 : vector<2x32xf32>
    %1327 = arith.mulf %1318, %1270 : vector<2x32xf32>
    %1328 = arith.mulf %1312, %1320 : vector<2x32xf32>
    %1329 = arith.addf %1327, %1328 : vector<2x32xf32>
    %1330 = math.tanh %1329 : vector<2x32xf32>
    %1331 = arith.mulf %1326, %1330 : vector<2x32xf32>
    %1332 = vector.extract_strided_slice %1306 {offsets = [0, 0], sizes = [2, 32], strides = [1, 1]} : vector<2x128xf32> to vector<2x32xf32>
    %1333 = arith.negf %1332 : vector<2x32xf32>
    %1334 = math.exp %1333 : vector<2x32xf32>
    %cst_174 = arith.constant 1.000000e+00 : f32
    %1335 = vector.broadcast %cst_174 : f32 to vector<2x32xf32>
    %1336 = arith.addf %1335, %1334 : vector<2x32xf32>
    %1337 = arith.divf %1335, %1336 : vector<2x32xf32>
    %1338 = vector.extract_strided_slice %1306 {offsets = [0, 32], sizes = [2, 32], strides = [1, 1]} : vector<2x128xf32> to vector<2x32xf32>
    %1339 = arith.negf %1338 : vector<2x32xf32>
    %1340 = math.exp %1339 : vector<2x32xf32>
    %cst_175 = arith.constant 1.000000e+00 : f32
    %1341 = vector.broadcast %cst_175 : f32 to vector<2x32xf32>
    %1342 = arith.addf %1341, %1340 : vector<2x32xf32>
    %1343 = arith.divf %1341, %1342 : vector<2x32xf32>
    %1344 = vector.extract_strided_slice %1306 {offsets = [0, 64], sizes = [2, 32], strides = [1, 1]} : vector<2x128xf32> to vector<2x32xf32>
    %1345 = math.tanh %1344 : vector<2x32xf32>
    %1346 = vector.extract_strided_slice %1306 {offsets = [0, 96], sizes = [2, 32], strides = [1, 1]} : vector<2x128xf32> to vector<2x32xf32>
    %1347 = arith.negf %1346 : vector<2x32xf32>
    %1348 = math.exp %1347 : vector<2x32xf32>
    %cst_176 = arith.constant 1.000000e+00 : f32
    %1349 = vector.broadcast %cst_176 : f32 to vector<2x32xf32>
    %1350 = arith.addf %1349, %1348 : vector<2x32xf32>
    %1351 = arith.divf %1349, %1350 : vector<2x32xf32>
    %1352 = arith.mulf %1343, %1295 : vector<2x32xf32>
    %1353 = arith.mulf %1337, %1345 : vector<2x32xf32>
    %1354 = arith.addf %1352, %1353 : vector<2x32xf32>
    %1355 = math.tanh %1354 : vector<2x32xf32>
    %1356 = arith.mulf %1351, %1355 : vector<2x32xf32>
    %1357 = tpu.concatenate %1331, %1356 in 1 : vector<2x32xf32>, vector<2x32xf32> -> vector<2x64xf32>
    %1358 = arith.truncf %1357 : vector<2x64xf32> to vector<2x64xbf16>
    %cst_177 = arith.constant dense<0.000000e+00> : vector<2x256xf32>
    %1359 = tpu.matmul %1358, %999, %cst_177 {dimension_numbers = #tpu.dot_dimension_numbers<[1], [0], [0], [1], [0, 0, 1, 1], [], []>} : vector<2x64xbf16>, vector<64x256xbf16>, vector<2x256xf32> -> vector<2x256xf32>
    %1360 = vector.extract_strided_slice %1359 {offsets = [0, 0], sizes = [2, 128], strides = [1, 1]} : vector<2x256xf32> to vector<2x128xf32>
    %1361 = vector.extract_strided_slice %997 {offsets = [12, 0], sizes = [2, 128], strides = [1, 1]} : vector<16x256xf32> to vector<2x128xf32>
    %1362 = arith.addf %1360, %1361 : vector<2x128xf32>
    %1363 = vector.extract_strided_slice %1359 {offsets = [0, 128], sizes = [2, 128], strides = [1, 1]} : vector<2x256xf32> to vector<2x128xf32>
    %1364 = vector.extract_strided_slice %997 {offsets = [2, 128], sizes = [2, 128], strides = [1, 1]} : vector<16x256xf32> to vector<2x128xf32>
    %1365 = arith.addf %1363, %1364 : vector<2x128xf32>
    %1366 = vector.extract_strided_slice %1362 {offsets = [0, 0], sizes = [2, 32], strides = [1, 1]} : vector<2x128xf32> to vector<2x32xf32>
    %1367 = arith.negf %1366 : vector<2x32xf32>
    %1368 = math.exp %1367 : vector<2x32xf32>
    %cst_178 = arith.constant 1.000000e+00 : f32
    %1369 = vector.broadcast %cst_178 : f32 to vector<2x32xf32>
    %1370 = arith.addf %1369, %1368 : vector<2x32xf32>
    %1371 = arith.divf %1369, %1370 : vector<2x32xf32>
    %1372 = vector.extract_strided_slice %1362 {offsets = [0, 32], sizes = [2, 32], strides = [1, 1]} : vector<2x128xf32> to vector<2x32xf32>
    %1373 = arith.negf %1372 : vector<2x32xf32>
    %1374 = math.exp %1373 : vector<2x32xf32>
    %cst_179 = arith.constant 1.000000e+00 : f32
    %1375 = vector.broadcast %cst_179 : f32 to vector<2x32xf32>
    %1376 = arith.addf %1375, %1374 : vector<2x32xf32>
    %1377 = arith.divf %1375, %1376 : vector<2x32xf32>
    %1378 = vector.extract_strided_slice %1362 {offsets = [0, 64], sizes = [2, 32], strides = [1, 1]} : vector<2x128xf32> to vector<2x32xf32>
    %1379 = math.tanh %1378 : vector<2x32xf32>
    %1380 = vector.extract_strided_slice %1362 {offsets = [0, 96], sizes = [2, 32], strides = [1, 1]} : vector<2x128xf32> to vector<2x32xf32>
    %1381 = arith.negf %1380 : vector<2x32xf32>
    %1382 = math.exp %1381 : vector<2x32xf32>
    %cst_180 = arith.constant 1.000000e+00 : f32
    %1383 = vector.broadcast %cst_180 : f32 to vector<2x32xf32>
    %1384 = arith.addf %1383, %1382 : vector<2x32xf32>
    %1385 = arith.divf %1383, %1384 : vector<2x32xf32>
    %1386 = arith.mulf %1377, %1329 : vector<2x32xf32>
    %1387 = arith.mulf %1371, %1379 : vector<2x32xf32>
    %1388 = arith.addf %1386, %1387 : vector<2x32xf32>
    %1389 = math.tanh %1388 : vector<2x32xf32>
    %1390 = arith.mulf %1385, %1389 : vector<2x32xf32>
    %1391 = vector.extract_strided_slice %1365 {offsets = [0, 0], sizes = [2, 32], strides = [1, 1]} : vector<2x128xf32> to vector<2x32xf32>
    %1392 = arith.negf %1391 : vector<2x32xf32>
    %1393 = math.exp %1392 : vector<2x32xf32>
    %cst_181 = arith.constant 1.000000e+00 : f32
    %1394 = vector.broadcast %cst_181 : f32 to vector<2x32xf32>
    %1395 = arith.addf %1394, %1393 : vector<2x32xf32>
    %1396 = arith.divf %1394, %1395 : vector<2x32xf32>
    %1397 = vector.extract_strided_slice %1365 {offsets = [0, 32], sizes = [2, 32], strides = [1, 1]} : vector<2x128xf32> to vector<2x32xf32>
    %1398 = arith.negf %1397 : vector<2x32xf32>
    %1399 = math.exp %1398 : vector<2x32xf32>
    %cst_182 = arith.constant 1.000000e+00 : f32
    %1400 = vector.broadcast %cst_182 : f32 to vector<2x32xf32>
    %1401 = arith.addf %1400, %1399 : vector<2x32xf32>
    %1402 = arith.divf %1400, %1401 : vector<2x32xf32>
    %1403 = vector.extract_strided_slice %1365 {offsets = [0, 64], sizes = [2, 32], strides = [1, 1]} : vector<2x128xf32> to vector<2x32xf32>
    %1404 = math.tanh %1403 : vector<2x32xf32>
    %1405 = vector.extract_strided_slice %1365 {offsets = [0, 96], sizes = [2, 32], strides = [1, 1]} : vector<2x128xf32> to vector<2x32xf32>
    %1406 = arith.negf %1405 : vector<2x32xf32>
    %1407 = math.exp %1406 : vector<2x32xf32>
    %cst_183 = arith.constant 1.000000e+00 : f32
    %1408 = vector.broadcast %cst_183 : f32 to vector<2x32xf32>
    %1409 = arith.addf %1408, %1407 : vector<2x32xf32>
    %1410 = arith.divf %1408, %1409 : vector<2x32xf32>
    %1411 = arith.mulf %1402, %1354 : vector<2x32xf32>
    %1412 = arith.mulf %1396, %1404 : vector<2x32xf32>
    %1413 = arith.addf %1411, %1412 : vector<2x32xf32>
    %1414 = math.tanh %1413 : vector<2x32xf32>
    %1415 = arith.mulf %1410, %1414 : vector<2x32xf32>
    %1416 = tpu.concatenate %1390, %1415 in 1 : vector<2x32xf32>, vector<2x32xf32> -> vector<2x64xf32>
    %1417 = arith.truncf %1416 : vector<2x64xf32> to vector<2x64xbf16>
    %cst_184 = arith.constant dense<0.000000e+00> : vector<2x256xf32>
    %1418 = tpu.matmul %1417, %999, %cst_184 {dimension_numbers = #tpu.dot_dimension_numbers<[1], [0], [0], [1], [0, 0, 1, 1], [], []>} : vector<2x64xbf16>, vector<64x256xbf16>, vector<2x256xf32> -> vector<2x256xf32>
    %1419 = vector.extract_strided_slice %1418 {offsets = [0, 0], sizes = [2, 128], strides = [1, 1]} : vector<2x256xf32> to vector<2x128xf32>
    %1420 = vector.extract_strided_slice %997 {offsets = [14, 0], sizes = [2, 128], strides = [1, 1]} : vector<16x256xf32> to vector<2x128xf32>
    %1421 = arith.addf %1419, %1420 : vector<2x128xf32>
    %1422 = vector.extract_strided_slice %1418 {offsets = [0, 128], sizes = [2, 128], strides = [1, 1]} : vector<2x256xf32> to vector<2x128xf32>
    %1423 = vector.extract_strided_slice %997 {offsets = [0, 128], sizes = [2, 128], strides = [1, 1]} : vector<16x256xf32> to vector<2x128xf32>
    %1424 = arith.addf %1422, %1423 : vector<2x128xf32>
    %1425 = vector.extract_strided_slice %1421 {offsets = [0, 0], sizes = [2, 32], strides = [1, 1]} : vector<2x128xf32> to vector<2x32xf32>
    %1426 = arith.negf %1425 : vector<2x32xf32>
    %1427 = math.exp %1426 : vector<2x32xf32>
    %cst_185 = arith.constant 1.000000e+00 : f32
    %1428 = vector.broadcast %cst_185 : f32 to vector<2x32xf32>
    %1429 = arith.addf %1428, %1427 : vector<2x32xf32>
    %1430 = arith.divf %1428, %1429 : vector<2x32xf32>
    %1431 = vector.extract_strided_slice %1421 {offsets = [0, 32], sizes = [2, 32], strides = [1, 1]} : vector<2x128xf32> to vector<2x32xf32>
    %1432 = arith.negf %1431 : vector<2x32xf32>
    %1433 = math.exp %1432 : vector<2x32xf32>
    %cst_186 = arith.constant 1.000000e+00 : f32
    %1434 = vector.broadcast %cst_186 : f32 to vector<2x32xf32>
    %1435 = arith.addf %1434, %1433 : vector<2x32xf32>
    %1436 = arith.divf %1434, %1435 : vector<2x32xf32>
    %1437 = vector.extract_strided_slice %1421 {offsets = [0, 64], sizes = [2, 32], strides = [1, 1]} : vector<2x128xf32> to vector<2x32xf32>
    %1438 = math.tanh %1437 : vector<2x32xf32>
    %1439 = vector.extract_strided_slice %1421 {offsets = [0, 96], sizes = [2, 32], strides = [1, 1]} : vector<2x128xf32> to vector<2x32xf32>
    %1440 = arith.negf %1439 : vector<2x32xf32>
    %1441 = math.exp %1440 : vector<2x32xf32>
    %cst_187 = arith.constant 1.000000e+00 : f32
    %1442 = vector.broadcast %cst_187 : f32 to vector<2x32xf32>
    %1443 = arith.addf %1442, %1441 : vector<2x32xf32>
    %1444 = arith.divf %1442, %1443 : vector<2x32xf32>
    %1445 = arith.mulf %1436, %1388 : vector<2x32xf32>
    %1446 = arith.mulf %1430, %1438 : vector<2x32xf32>
    %1447 = arith.addf %1445, %1446 : vector<2x32xf32>
    %1448 = math.tanh %1447 : vector<2x32xf32>
    %1449 = arith.mulf %1444, %1448 : vector<2x32xf32>
    %1450 = vector.extract_strided_slice %1424 {offsets = [0, 0], sizes = [2, 32], strides = [1, 1]} : vector<2x128xf32> to vector<2x32xf32>
    %1451 = arith.negf %1450 : vector<2x32xf32>
    %1452 = math.exp %1451 : vector<2x32xf32>
    %cst_188 = arith.constant 1.000000e+00 : f32
    %1453 = vector.broadcast %cst_188 : f32 to vector<2x32xf32>
    %1454 = arith.addf %1453, %1452 : vector<2x32xf32>
    %1455 = arith.divf %1453, %1454 : vector<2x32xf32>
    %1456 = vector.extract_strided_slice %1424 {offsets = [0, 32], sizes = [2, 32], strides = [1, 1]} : vector<2x128xf32> to vector<2x32xf32>
    %1457 = arith.negf %1456 : vector<2x32xf32>
    %1458 = math.exp %1457 : vector<2x32xf32>
    %cst_189 = arith.constant 1.000000e+00 : f32
    %1459 = vector.broadcast %cst_189 : f32 to vector<2x32xf32>
    %1460 = arith.addf %1459, %1458 : vector<2x32xf32>
    %1461 = arith.divf %1459, %1460 : vector<2x32xf32>
    %1462 = vector.extract_strided_slice %1424 {offsets = [0, 64], sizes = [2, 32], strides = [1, 1]} : vector<2x128xf32> to vector<2x32xf32>
    %1463 = math.tanh %1462 : vector<2x32xf32>
    %1464 = vector.extract_strided_slice %1424 {offsets = [0, 96], sizes = [2, 32], strides = [1, 1]} : vector<2x128xf32> to vector<2x32xf32>
    %1465 = arith.negf %1464 : vector<2x32xf32>
    %1466 = math.exp %1465 : vector<2x32xf32>
    %cst_190 = arith.constant 1.000000e+00 : f32
    %1467 = vector.broadcast %cst_190 : f32 to vector<2x32xf32>
    %1468 = arith.addf %1467, %1466 : vector<2x32xf32>
    %1469 = arith.divf %1467, %1468 : vector<2x32xf32>
    %1470 = arith.mulf %1461, %1413 : vector<2x32xf32>
    %1471 = arith.mulf %1455, %1463 : vector<2x32xf32>
    %1472 = arith.addf %1470, %1471 : vector<2x32xf32>
    %1473 = math.tanh %1472 : vector<2x32xf32>
    %1474 = arith.mulf %1469, %1473 : vector<2x32xf32>
    %1475 = tpu.concatenate %1449, %1474, %1447, %1472 in 1 : vector<2x32xf32>, vector<2x32xf32>, vector<2x32xf32>, vector<2x32xf32> -> vector<2x128xf32>
    %1476 = tpu.concatenate %1036, %1474 in 1 : vector<2x32xf32>, vector<2x32xf32> -> vector<2x64xf32>
    %1477 = tpu.concatenate %1095, %1415 in 1 : vector<2x32xf32>, vector<2x32xf32> -> vector<2x64xf32>
    %1478 = tpu.concatenate %1154, %1356 in 1 : vector<2x32xf32>, vector<2x32xf32> -> vector<2x64xf32>
    %1479 = tpu.concatenate %1213, %1297 in 1 : vector<2x32xf32>, vector<2x32xf32> -> vector<2x64xf32>
    %1480 = tpu.concatenate %1272, %1238 in 1 : vector<2x32xf32>, vector<2x32xf32> -> vector<2x64xf32>
    %1481 = tpu.concatenate %1331, %1179 in 1 : vector<2x32xf32>, vector<2x32xf32> -> vector<2x64xf32>
    %1482 = tpu.concatenate %1390, %1120 in 1 : vector<2x32xf32>, vector<2x32xf32> -> vector<2x64xf32>
    %1483 = tpu.concatenate %1449, %1061 in 1 : vector<2x32xf32>, vector<2x32xf32> -> vector<2x64xf32>
    %1484 = tpu.concatenate %1476, %1477, %1478, %1479, %1480, %1481, %1482, %1483 in 0 : vector<2x64xf32>, vector<2x64xf32>, vector<2x64xf32>, vector<2x64xf32>, vector<2x64xf32>, vector<2x64xf32>, vector<2x64xf32>, vector<2x64xf32> -> vector<16x64xf32>
    %1485 = arith.truncf %1484 : vector<16x64xf32> to vector<16x64xbf16>
    %c3 = arith.constant 3 : index
    %c0_191 = arith.constant 0 : index
    %c0_192 = arith.constant 0 : index
    %1486 = vector.load %arg1[%c3, %c0_191, %c0_192] : memref<4x64x256xbf16, #tpu.memory_space<vmem>>, vector<1x64x256xbf16>
    %1487 = vector.shape_cast %1486 : vector<1x64x256xbf16> to vector<64x256xbf16>
    %cst_193 = arith.constant dense<0.000000e+00> : vector<16x256xf32>
    %1488 = tpu.matmul %1485, %1487, %cst_193 {dimension_numbers = #tpu.dot_dimension_numbers<[1], [0], [0], [1], [0, 0, 1, 1], [], []>} : vector<16x64xbf16>, vector<64x256xbf16>, vector<16x256xf32> -> vector<16x256xf32>
    %1489 = vector.extract_strided_slice %0 {offsets = [3, 0], sizes = [1, 256], strides = [1, 1]} : vector<4x256xf32> to vector<1x256xf32>
    %1490 = vector.broadcast %1489 : vector<1x256xf32> to vector<16x256xf32>
    %1491 = arith.addf %1488, %1490 : vector<16x256xf32>
    %c3_194 = arith.constant 3 : index
    %c0_195 = arith.constant 0 : index
    %c0_196 = arith.constant 0 : index
    %1492 = vector.load %arg2[%c3_194, %c0_195, %c0_196] : memref<4x64x256xbf16, #tpu.memory_space<vmem>>, vector<1x64x256xbf16>
    %1493 = vector.shape_cast %1492 : vector<1x64x256xbf16> to vector<64x256xbf16>
    %1494 = vector.extract_strided_slice %1 {offsets = [6, 0], sizes = [2, 128], strides = [1, 1]} : vector<8x128xf32> to vector<2x128xf32>
    %1495 = vector.extract_strided_slice %1494 {offsets = [0, 0], sizes = [2, 64], strides = [1, 1]} : vector<2x128xf32> to vector<2x64xf32>
    %1496 = vector.extract_strided_slice %1494 {offsets = [0, 64], sizes = [2, 32], strides = [1, 1]} : vector<2x128xf32> to vector<2x32xf32>
    %1497 = vector.extract_strided_slice %1494 {offsets = [0, 96], sizes = [2, 32], strides = [1, 1]} : vector<2x128xf32> to vector<2x32xf32>
    %1498 = arith.truncf %1495 : vector<2x64xf32> to vector<2x64xbf16>
    %cst_197 = arith.constant dense<0.000000e+00> : vector<2x256xf32>
    %1499 = tpu.matmul %1498, %1493, %cst_197 {dimension_numbers = #tpu.dot_dimension_numbers<[1], [0], [0], [1], [0, 0, 1, 1], [], []>} : vector<2x64xbf16>, vector<64x256xbf16>, vector<2x256xf32> -> vector<2x256xf32>
    %1500 = vector.extract_strided_slice %1499 {offsets = [0, 0], sizes = [2, 128], strides = [1, 1]} : vector<2x256xf32> to vector<2x128xf32>
    %1501 = vector.extract_strided_slice %1491 {offsets = [0, 0], sizes = [2, 128], strides = [1, 1]} : vector<16x256xf32> to vector<2x128xf32>
    %1502 = arith.addf %1500, %1501 : vector<2x128xf32>
    %1503 = vector.extract_strided_slice %1499 {offsets = [0, 128], sizes = [2, 128], strides = [1, 1]} : vector<2x256xf32> to vector<2x128xf32>
    %1504 = vector.extract_strided_slice %1491 {offsets = [14, 128], sizes = [2, 128], strides = [1, 1]} : vector<16x256xf32> to vector<2x128xf32>
    %1505 = arith.addf %1503, %1504 : vector<2x128xf32>
    %1506 = vector.extract_strided_slice %1502 {offsets = [0, 0], sizes = [2, 32], strides = [1, 1]} : vector<2x128xf32> to vector<2x32xf32>
    %1507 = arith.negf %1506 : vector<2x32xf32>
    %1508 = math.exp %1507 : vector<2x32xf32>
    %cst_198 = arith.constant 1.000000e+00 : f32
    %1509 = vector.broadcast %cst_198 : f32 to vector<2x32xf32>
    %1510 = arith.addf %1509, %1508 : vector<2x32xf32>
    %1511 = arith.divf %1509, %1510 : vector<2x32xf32>
    %1512 = vector.extract_strided_slice %1502 {offsets = [0, 32], sizes = [2, 32], strides = [1, 1]} : vector<2x128xf32> to vector<2x32xf32>
    %1513 = arith.negf %1512 : vector<2x32xf32>
    %1514 = math.exp %1513 : vector<2x32xf32>
    %cst_199 = arith.constant 1.000000e+00 : f32
    %1515 = vector.broadcast %cst_199 : f32 to vector<2x32xf32>
    %1516 = arith.addf %1515, %1514 : vector<2x32xf32>
    %1517 = arith.divf %1515, %1516 : vector<2x32xf32>
    %1518 = vector.extract_strided_slice %1502 {offsets = [0, 64], sizes = [2, 32], strides = [1, 1]} : vector<2x128xf32> to vector<2x32xf32>
    %1519 = math.tanh %1518 : vector<2x32xf32>
    %1520 = vector.extract_strided_slice %1502 {offsets = [0, 96], sizes = [2, 32], strides = [1, 1]} : vector<2x128xf32> to vector<2x32xf32>
    %1521 = arith.negf %1520 : vector<2x32xf32>
    %1522 = math.exp %1521 : vector<2x32xf32>
    %cst_200 = arith.constant 1.000000e+00 : f32
    %1523 = vector.broadcast %cst_200 : f32 to vector<2x32xf32>
    %1524 = arith.addf %1523, %1522 : vector<2x32xf32>
    %1525 = arith.divf %1523, %1524 : vector<2x32xf32>
    %1526 = arith.mulf %1517, %1496 : vector<2x32xf32>
    %1527 = arith.mulf %1511, %1519 : vector<2x32xf32>
    %1528 = arith.addf %1526, %1527 : vector<2x32xf32>
    %1529 = math.tanh %1528 : vector<2x32xf32>
    %1530 = arith.mulf %1525, %1529 : vector<2x32xf32>
    %1531 = vector.extract_strided_slice %1505 {offsets = [0, 0], sizes = [2, 32], strides = [1, 1]} : vector<2x128xf32> to vector<2x32xf32>
    %1532 = arith.negf %1531 : vector<2x32xf32>
    %1533 = math.exp %1532 : vector<2x32xf32>
    %cst_201 = arith.constant 1.000000e+00 : f32
    %1534 = vector.broadcast %cst_201 : f32 to vector<2x32xf32>
    %1535 = arith.addf %1534, %1533 : vector<2x32xf32>
    %1536 = arith.divf %1534, %1535 : vector<2x32xf32>
    %1537 = vector.extract_strided_slice %1505 {offsets = [0, 32], sizes = [2, 32], strides = [1, 1]} : vector<2x128xf32> to vector<2x32xf32>
    %1538 = arith.negf %1537 : vector<2x32xf32>
    %1539 = math.exp %1538 : vector<2x32xf32>
    %cst_202 = arith.constant 1.000000e+00 : f32
    %1540 = vector.broadcast %cst_202 : f32 to vector<2x32xf32>
    %1541 = arith.addf %1540, %1539 : vector<2x32xf32>
    %1542 = arith.divf %1540, %1541 : vector<2x32xf32>
    %1543 = vector.extract_strided_slice %1505 {offsets = [0, 64], sizes = [2, 32], strides = [1, 1]} : vector<2x128xf32> to vector<2x32xf32>
    %1544 = math.tanh %1543 : vector<2x32xf32>
    %1545 = vector.extract_strided_slice %1505 {offsets = [0, 96], sizes = [2, 32], strides = [1, 1]} : vector<2x128xf32> to vector<2x32xf32>
    %1546 = arith.negf %1545 : vector<2x32xf32>
    %1547 = math.exp %1546 : vector<2x32xf32>
    %cst_203 = arith.constant 1.000000e+00 : f32
    %1548 = vector.broadcast %cst_203 : f32 to vector<2x32xf32>
    %1549 = arith.addf %1548, %1547 : vector<2x32xf32>
    %1550 = arith.divf %1548, %1549 : vector<2x32xf32>
    %1551 = arith.mulf %1542, %1497 : vector<2x32xf32>
    %1552 = arith.mulf %1536, %1544 : vector<2x32xf32>
    %1553 = arith.addf %1551, %1552 : vector<2x32xf32>
    %1554 = math.tanh %1553 : vector<2x32xf32>
    %1555 = arith.mulf %1550, %1554 : vector<2x32xf32>
    %1556 = tpu.concatenate %1530, %1555 in 1 : vector<2x32xf32>, vector<2x32xf32> -> vector<2x64xf32>
    %1557 = arith.truncf %1556 : vector<2x64xf32> to vector<2x64xbf16>
    %cst_204 = arith.constant dense<0.000000e+00> : vector<2x256xf32>
    %1558 = tpu.matmul %1557, %1493, %cst_204 {dimension_numbers = #tpu.dot_dimension_numbers<[1], [0], [0], [1], [0, 0, 1, 1], [], []>} : vector<2x64xbf16>, vector<64x256xbf16>, vector<2x256xf32> -> vector<2x256xf32>
    %1559 = vector.extract_strided_slice %1558 {offsets = [0, 0], sizes = [2, 128], strides = [1, 1]} : vector<2x256xf32> to vector<2x128xf32>
    %1560 = vector.extract_strided_slice %1491 {offsets = [2, 0], sizes = [2, 128], strides = [1, 1]} : vector<16x256xf32> to vector<2x128xf32>
    %1561 = arith.addf %1559, %1560 : vector<2x128xf32>
    %1562 = vector.extract_strided_slice %1558 {offsets = [0, 128], sizes = [2, 128], strides = [1, 1]} : vector<2x256xf32> to vector<2x128xf32>
    %1563 = vector.extract_strided_slice %1491 {offsets = [12, 128], sizes = [2, 128], strides = [1, 1]} : vector<16x256xf32> to vector<2x128xf32>
    %1564 = arith.addf %1562, %1563 : vector<2x128xf32>
    %1565 = vector.extract_strided_slice %1561 {offsets = [0, 0], sizes = [2, 32], strides = [1, 1]} : vector<2x128xf32> to vector<2x32xf32>
    %1566 = arith.negf %1565 : vector<2x32xf32>
    %1567 = math.exp %1566 : vector<2x32xf32>
    %cst_205 = arith.constant 1.000000e+00 : f32
    %1568 = vector.broadcast %cst_205 : f32 to vector<2x32xf32>
    %1569 = arith.addf %1568, %1567 : vector<2x32xf32>
    %1570 = arith.divf %1568, %1569 : vector<2x32xf32>
    %1571 = vector.extract_strided_slice %1561 {offsets = [0, 32], sizes = [2, 32], strides = [1, 1]} : vector<2x128xf32> to vector<2x32xf32>
    %1572 = arith.negf %1571 : vector<2x32xf32>
    %1573 = math.exp %1572 : vector<2x32xf32>
    %cst_206 = arith.constant 1.000000e+00 : f32
    %1574 = vector.broadcast %cst_206 : f32 to vector<2x32xf32>
    %1575 = arith.addf %1574, %1573 : vector<2x32xf32>
    %1576 = arith.divf %1574, %1575 : vector<2x32xf32>
    %1577 = vector.extract_strided_slice %1561 {offsets = [0, 64], sizes = [2, 32], strides = [1, 1]} : vector<2x128xf32> to vector<2x32xf32>
    %1578 = math.tanh %1577 : vector<2x32xf32>
    %1579 = vector.extract_strided_slice %1561 {offsets = [0, 96], sizes = [2, 32], strides = [1, 1]} : vector<2x128xf32> to vector<2x32xf32>
    %1580 = arith.negf %1579 : vector<2x32xf32>
    %1581 = math.exp %1580 : vector<2x32xf32>
    %cst_207 = arith.constant 1.000000e+00 : f32
    %1582 = vector.broadcast %cst_207 : f32 to vector<2x32xf32>
    %1583 = arith.addf %1582, %1581 : vector<2x32xf32>
    %1584 = arith.divf %1582, %1583 : vector<2x32xf32>
    %1585 = arith.mulf %1576, %1528 : vector<2x32xf32>
    %1586 = arith.mulf %1570, %1578 : vector<2x32xf32>
    %1587 = arith.addf %1585, %1586 : vector<2x32xf32>
    %1588 = math.tanh %1587 : vector<2x32xf32>
    %1589 = arith.mulf %1584, %1588 : vector<2x32xf32>
    %1590 = vector.extract_strided_slice %1564 {offsets = [0, 0], sizes = [2, 32], strides = [1, 1]} : vector<2x128xf32> to vector<2x32xf32>
    %1591 = arith.negf %1590 : vector<2x32xf32>
    %1592 = math.exp %1591 : vector<2x32xf32>
    %cst_208 = arith.constant 1.000000e+00 : f32
    %1593 = vector.broadcast %cst_208 : f32 to vector<2x32xf32>
    %1594 = arith.addf %1593, %1592 : vector<2x32xf32>
    %1595 = arith.divf %1593, %1594 : vector<2x32xf32>
    %1596 = vector.extract_strided_slice %1564 {offsets = [0, 32], sizes = [2, 32], strides = [1, 1]} : vector<2x128xf32> to vector<2x32xf32>
    %1597 = arith.negf %1596 : vector<2x32xf32>
    %1598 = math.exp %1597 : vector<2x32xf32>
    %cst_209 = arith.constant 1.000000e+00 : f32
    %1599 = vector.broadcast %cst_209 : f32 to vector<2x32xf32>
    %1600 = arith.addf %1599, %1598 : vector<2x32xf32>
    %1601 = arith.divf %1599, %1600 : vector<2x32xf32>
    %1602 = vector.extract_strided_slice %1564 {offsets = [0, 64], sizes = [2, 32], strides = [1, 1]} : vector<2x128xf32> to vector<2x32xf32>
    %1603 = math.tanh %1602 : vector<2x32xf32>
    %1604 = vector.extract_strided_slice %1564 {offsets = [0, 96], sizes = [2, 32], strides = [1, 1]} : vector<2x128xf32> to vector<2x32xf32>
    %1605 = arith.negf %1604 : vector<2x32xf32>
    %1606 = math.exp %1605 : vector<2x32xf32>
    %cst_210 = arith.constant 1.000000e+00 : f32
    %1607 = vector.broadcast %cst_210 : f32 to vector<2x32xf32>
    %1608 = arith.addf %1607, %1606 : vector<2x32xf32>
    %1609 = arith.divf %1607, %1608 : vector<2x32xf32>
    %1610 = arith.mulf %1601, %1553 : vector<2x32xf32>
    %1611 = arith.mulf %1595, %1603 : vector<2x32xf32>
    %1612 = arith.addf %1610, %1611 : vector<2x32xf32>
    %1613 = math.tanh %1612 : vector<2x32xf32>
    %1614 = arith.mulf %1609, %1613 : vector<2x32xf32>
    %1615 = tpu.concatenate %1589, %1614 in 1 : vector<2x32xf32>, vector<2x32xf32> -> vector<2x64xf32>
    %1616 = arith.truncf %1615 : vector<2x64xf32> to vector<2x64xbf16>
    %cst_211 = arith.constant dense<0.000000e+00> : vector<2x256xf32>
    %1617 = tpu.matmul %1616, %1493, %cst_211 {dimension_numbers = #tpu.dot_dimension_numbers<[1], [0], [0], [1], [0, 0, 1, 1], [], []>} : vector<2x64xbf16>, vector<64x256xbf16>, vector<2x256xf32> -> vector<2x256xf32>
    %1618 = vector.extract_strided_slice %1617 {offsets = [0, 0], sizes = [2, 128], strides = [1, 1]} : vector<2x256xf32> to vector<2x128xf32>
    %1619 = vector.extract_strided_slice %1491 {offsets = [4, 0], sizes = [2, 128], strides = [1, 1]} : vector<16x256xf32> to vector<2x128xf32>
    %1620 = arith.addf %1618, %1619 : vector<2x128xf32>
    %1621 = vector.extract_strided_slice %1617 {offsets = [0, 128], sizes = [2, 128], strides = [1, 1]} : vector<2x256xf32> to vector<2x128xf32>
    %1622 = vector.extract_strided_slice %1491 {offsets = [10, 128], sizes = [2, 128], strides = [1, 1]} : vector<16x256xf32> to vector<2x128xf32>
    %1623 = arith.addf %1621, %1622 : vector<2x128xf32>
    %1624 = vector.extract_strided_slice %1620 {offsets = [0, 0], sizes = [2, 32], strides = [1, 1]} : vector<2x128xf32> to vector<2x32xf32>
    %1625 = arith.negf %1624 : vector<2x32xf32>
    %1626 = math.exp %1625 : vector<2x32xf32>
    %cst_212 = arith.constant 1.000000e+00 : f32
    %1627 = vector.broadcast %cst_212 : f32 to vector<2x32xf32>
    %1628 = arith.addf %1627, %1626 : vector<2x32xf32>
    %1629 = arith.divf %1627, %1628 : vector<2x32xf32>
    %1630 = vector.extract_strided_slice %1620 {offsets = [0, 32], sizes = [2, 32], strides = [1, 1]} : vector<2x128xf32> to vector<2x32xf32>
    %1631 = arith.negf %1630 : vector<2x32xf32>
    %1632 = math.exp %1631 : vector<2x32xf32>
    %cst_213 = arith.constant 1.000000e+00 : f32
    %1633 = vector.broadcast %cst_213 : f32 to vector<2x32xf32>
    %1634 = arith.addf %1633, %1632 : vector<2x32xf32>
    %1635 = arith.divf %1633, %1634 : vector<2x32xf32>
    %1636 = vector.extract_strided_slice %1620 {offsets = [0, 64], sizes = [2, 32], strides = [1, 1]} : vector<2x128xf32> to vector<2x32xf32>
    %1637 = math.tanh %1636 : vector<2x32xf32>
    %1638 = vector.extract_strided_slice %1620 {offsets = [0, 96], sizes = [2, 32], strides = [1, 1]} : vector<2x128xf32> to vector<2x32xf32>
    %1639 = arith.negf %1638 : vector<2x32xf32>
    %1640 = math.exp %1639 : vector<2x32xf32>
    %cst_214 = arith.constant 1.000000e+00 : f32
    %1641 = vector.broadcast %cst_214 : f32 to vector<2x32xf32>
    %1642 = arith.addf %1641, %1640 : vector<2x32xf32>
    %1643 = arith.divf %1641, %1642 : vector<2x32xf32>
    %1644 = arith.mulf %1635, %1587 : vector<2x32xf32>
    %1645 = arith.mulf %1629, %1637 : vector<2x32xf32>
    %1646 = arith.addf %1644, %1645 : vector<2x32xf32>
    %1647 = math.tanh %1646 : vector<2x32xf32>
    %1648 = arith.mulf %1643, %1647 : vector<2x32xf32>
    %1649 = vector.extract_strided_slice %1623 {offsets = [0, 0], sizes = [2, 32], strides = [1, 1]} : vector<2x128xf32> to vector<2x32xf32>
    %1650 = arith.negf %1649 : vector<2x32xf32>
    %1651 = math.exp %1650 : vector<2x32xf32>
    %cst_215 = arith.constant 1.000000e+00 : f32
    %1652 = vector.broadcast %cst_215 : f32 to vector<2x32xf32>
    %1653 = arith.addf %1652, %1651 : vector<2x32xf32>
    %1654 = arith.divf %1652, %1653 : vector<2x32xf32>
    %1655 = vector.extract_strided_slice %1623 {offsets = [0, 32], sizes = [2, 32], strides = [1, 1]} : vector<2x128xf32> to vector<2x32xf32>
    %1656 = arith.negf %1655 : vector<2x32xf32>
    %1657 = math.exp %1656 : vector<2x32xf32>
    %cst_216 = arith.constant 1.000000e+00 : f32
    %1658 = vector.broadcast %cst_216 : f32 to vector<2x32xf32>
    %1659 = arith.addf %1658, %1657 : vector<2x32xf32>
    %1660 = arith.divf %1658, %1659 : vector<2x32xf32>
    %1661 = vector.extract_strided_slice %1623 {offsets = [0, 64], sizes = [2, 32], strides = [1, 1]} : vector<2x128xf32> to vector<2x32xf32>
    %1662 = math.tanh %1661 : vector<2x32xf32>
    %1663 = vector.extract_strided_slice %1623 {offsets = [0, 96], sizes = [2, 32], strides = [1, 1]} : vector<2x128xf32> to vector<2x32xf32>
    %1664 = arith.negf %1663 : vector<2x32xf32>
    %1665 = math.exp %1664 : vector<2x32xf32>
    %cst_217 = arith.constant 1.000000e+00 : f32
    %1666 = vector.broadcast %cst_217 : f32 to vector<2x32xf32>
    %1667 = arith.addf %1666, %1665 : vector<2x32xf32>
    %1668 = arith.divf %1666, %1667 : vector<2x32xf32>
    %1669 = arith.mulf %1660, %1612 : vector<2x32xf32>
    %1670 = arith.mulf %1654, %1662 : vector<2x32xf32>
    %1671 = arith.addf %1669, %1670 : vector<2x32xf32>
    %1672 = math.tanh %1671 : vector<2x32xf32>
    %1673 = arith.mulf %1668, %1672 : vector<2x32xf32>
    %1674 = tpu.concatenate %1648, %1673 in 1 : vector<2x32xf32>, vector<2x32xf32> -> vector<2x64xf32>
    %1675 = arith.truncf %1674 : vector<2x64xf32> to vector<2x64xbf16>
    %cst_218 = arith.constant dense<0.000000e+00> : vector<2x256xf32>
    %1676 = tpu.matmul %1675, %1493, %cst_218 {dimension_numbers = #tpu.dot_dimension_numbers<[1], [0], [0], [1], [0, 0, 1, 1], [], []>} : vector<2x64xbf16>, vector<64x256xbf16>, vector<2x256xf32> -> vector<2x256xf32>
    %1677 = vector.extract_strided_slice %1676 {offsets = [0, 0], sizes = [2, 128], strides = [1, 1]} : vector<2x256xf32> to vector<2x128xf32>
    %1678 = vector.extract_strided_slice %1491 {offsets = [6, 0], sizes = [2, 128], strides = [1, 1]} : vector<16x256xf32> to vector<2x128xf32>
    %1679 = arith.addf %1677, %1678 : vector<2x128xf32>
    %1680 = vector.extract_strided_slice %1676 {offsets = [0, 128], sizes = [2, 128], strides = [1, 1]} : vector<2x256xf32> to vector<2x128xf32>
    %1681 = vector.extract_strided_slice %1491 {offsets = [8, 128], sizes = [2, 128], strides = [1, 1]} : vector<16x256xf32> to vector<2x128xf32>
    %1682 = arith.addf %1680, %1681 : vector<2x128xf32>
    %1683 = vector.extract_strided_slice %1679 {offsets = [0, 0], sizes = [2, 32], strides = [1, 1]} : vector<2x128xf32> to vector<2x32xf32>
    %1684 = arith.negf %1683 : vector<2x32xf32>
    %1685 = math.exp %1684 : vector<2x32xf32>
    %cst_219 = arith.constant 1.000000e+00 : f32
    %1686 = vector.broadcast %cst_219 : f32 to vector<2x32xf32>
    %1687 = arith.addf %1686, %1685 : vector<2x32xf32>
    %1688 = arith.divf %1686, %1687 : vector<2x32xf32>
    %1689 = vector.extract_strided_slice %1679 {offsets = [0, 32], sizes = [2, 32], strides = [1, 1]} : vector<2x128xf32> to vector<2x32xf32>
    %1690 = arith.negf %1689 : vector<2x32xf32>
    %1691 = math.exp %1690 : vector<2x32xf32>
    %cst_220 = arith.constant 1.000000e+00 : f32
    %1692 = vector.broadcast %cst_220 : f32 to vector<2x32xf32>
    %1693 = arith.addf %1692, %1691 : vector<2x32xf32>
    %1694 = arith.divf %1692, %1693 : vector<2x32xf32>
    %1695 = vector.extract_strided_slice %1679 {offsets = [0, 64], sizes = [2, 32], strides = [1, 1]} : vector<2x128xf32> to vector<2x32xf32>
    %1696 = math.tanh %1695 : vector<2x32xf32>
    %1697 = vector.extract_strided_slice %1679 {offsets = [0, 96], sizes = [2, 32], strides = [1, 1]} : vector<2x128xf32> to vector<2x32xf32>
    %1698 = arith.negf %1697 : vector<2x32xf32>
    %1699 = math.exp %1698 : vector<2x32xf32>
    %cst_221 = arith.constant 1.000000e+00 : f32
    %1700 = vector.broadcast %cst_221 : f32 to vector<2x32xf32>
    %1701 = arith.addf %1700, %1699 : vector<2x32xf32>
    %1702 = arith.divf %1700, %1701 : vector<2x32xf32>
    %1703 = arith.mulf %1694, %1646 : vector<2x32xf32>
    %1704 = arith.mulf %1688, %1696 : vector<2x32xf32>
    %1705 = arith.addf %1703, %1704 : vector<2x32xf32>
    %1706 = math.tanh %1705 : vector<2x32xf32>
    %1707 = arith.mulf %1702, %1706 : vector<2x32xf32>
    %1708 = vector.extract_strided_slice %1682 {offsets = [0, 0], sizes = [2, 32], strides = [1, 1]} : vector<2x128xf32> to vector<2x32xf32>
    %1709 = arith.negf %1708 : vector<2x32xf32>
    %1710 = math.exp %1709 : vector<2x32xf32>
    %cst_222 = arith.constant 1.000000e+00 : f32
    %1711 = vector.broadcast %cst_222 : f32 to vector<2x32xf32>
    %1712 = arith.addf %1711, %1710 : vector<2x32xf32>
    %1713 = arith.divf %1711, %1712 : vector<2x32xf32>
    %1714 = vector.extract_strided_slice %1682 {offsets = [0, 32], sizes = [2, 32], strides = [1, 1]} : vector<2x128xf32> to vector<2x32xf32>
    %1715 = arith.negf %1714 : vector<2x32xf32>
    %1716 = math.exp %1715 : vector<2x32xf32>
    %cst_223 = arith.constant 1.000000e+00 : f32
    %1717 = vector.broadcast %cst_223 : f32 to vector<2x32xf32>
    %1718 = arith.addf %1717, %1716 : vector<2x32xf32>
    %1719 = arith.divf %1717, %1718 : vector<2x32xf32>
    %1720 = vector.extract_strided_slice %1682 {offsets = [0, 64], sizes = [2, 32], strides = [1, 1]} : vector<2x128xf32> to vector<2x32xf32>
    %1721 = math.tanh %1720 : vector<2x32xf32>
    %1722 = vector.extract_strided_slice %1682 {offsets = [0, 96], sizes = [2, 32], strides = [1, 1]} : vector<2x128xf32> to vector<2x32xf32>
    %1723 = arith.negf %1722 : vector<2x32xf32>
    %1724 = math.exp %1723 : vector<2x32xf32>
    %cst_224 = arith.constant 1.000000e+00 : f32
    %1725 = vector.broadcast %cst_224 : f32 to vector<2x32xf32>
    %1726 = arith.addf %1725, %1724 : vector<2x32xf32>
    %1727 = arith.divf %1725, %1726 : vector<2x32xf32>
    %1728 = arith.mulf %1719, %1671 : vector<2x32xf32>
    %1729 = arith.mulf %1713, %1721 : vector<2x32xf32>
    %1730 = arith.addf %1728, %1729 : vector<2x32xf32>
    %1731 = math.tanh %1730 : vector<2x32xf32>
    %1732 = arith.mulf %1727, %1731 : vector<2x32xf32>
    %1733 = tpu.concatenate %1707, %1732 in 1 : vector<2x32xf32>, vector<2x32xf32> -> vector<2x64xf32>
    %1734 = arith.truncf %1733 : vector<2x64xf32> to vector<2x64xbf16>
    %cst_225 = arith.constant dense<0.000000e+00> : vector<2x256xf32>
    %1735 = tpu.matmul %1734, %1493, %cst_225 {dimension_numbers = #tpu.dot_dimension_numbers<[1], [0], [0], [1], [0, 0, 1, 1], [], []>} : vector<2x64xbf16>, vector<64x256xbf16>, vector<2x256xf32> -> vector<2x256xf32>
    %1736 = vector.extract_strided_slice %1735 {offsets = [0, 0], sizes = [2, 128], strides = [1, 1]} : vector<2x256xf32> to vector<2x128xf32>
    %1737 = vector.extract_strided_slice %1491 {offsets = [8, 0], sizes = [2, 128], strides = [1, 1]} : vector<16x256xf32> to vector<2x128xf32>
    %1738 = arith.addf %1736, %1737 : vector<2x128xf32>
    %1739 = vector.extract_strided_slice %1735 {offsets = [0, 128], sizes = [2, 128], strides = [1, 1]} : vector<2x256xf32> to vector<2x128xf32>
    %1740 = vector.extract_strided_slice %1491 {offsets = [6, 128], sizes = [2, 128], strides = [1, 1]} : vector<16x256xf32> to vector<2x128xf32>
    %1741 = arith.addf %1739, %1740 : vector<2x128xf32>
    %1742 = vector.extract_strided_slice %1738 {offsets = [0, 0], sizes = [2, 32], strides = [1, 1]} : vector<2x128xf32> to vector<2x32xf32>
    %1743 = arith.negf %1742 : vector<2x32xf32>
    %1744 = math.exp %1743 : vector<2x32xf32>
    %cst_226 = arith.constant 1.000000e+00 : f32
    %1745 = vector.broadcast %cst_226 : f32 to vector<2x32xf32>
    %1746 = arith.addf %1745, %1744 : vector<2x32xf32>
    %1747 = arith.divf %1745, %1746 : vector<2x32xf32>
    %1748 = vector.extract_strided_slice %1738 {offsets = [0, 32], sizes = [2, 32], strides = [1, 1]} : vector<2x128xf32> to vector<2x32xf32>
    %1749 = arith.negf %1748 : vector<2x32xf32>
    %1750 = math.exp %1749 : vector<2x32xf32>
    %cst_227 = arith.constant 1.000000e+00 : f32
    %1751 = vector.broadcast %cst_227 : f32 to vector<2x32xf32>
    %1752 = arith.addf %1751, %1750 : vector<2x32xf32>
    %1753 = arith.divf %1751, %1752 : vector<2x32xf32>
    %1754 = vector.extract_strided_slice %1738 {offsets = [0, 64], sizes = [2, 32], strides = [1, 1]} : vector<2x128xf32> to vector<2x32xf32>
    %1755 = math.tanh %1754 : vector<2x32xf32>
    %1756 = vector.extract_strided_slice %1738 {offsets = [0, 96], sizes = [2, 32], strides = [1, 1]} : vector<2x128xf32> to vector<2x32xf32>
    %1757 = arith.negf %1756 : vector<2x32xf32>
    %1758 = math.exp %1757 : vector<2x32xf32>
    %cst_228 = arith.constant 1.000000e+00 : f32
    %1759 = vector.broadcast %cst_228 : f32 to vector<2x32xf32>
    %1760 = arith.addf %1759, %1758 : vector<2x32xf32>
    %1761 = arith.divf %1759, %1760 : vector<2x32xf32>
    %1762 = arith.mulf %1753, %1705 : vector<2x32xf32>
    %1763 = arith.mulf %1747, %1755 : vector<2x32xf32>
    %1764 = arith.addf %1762, %1763 : vector<2x32xf32>
    %1765 = math.tanh %1764 : vector<2x32xf32>
    %1766 = arith.mulf %1761, %1765 : vector<2x32xf32>
    %1767 = vector.extract_strided_slice %1741 {offsets = [0, 0], sizes = [2, 32], strides = [1, 1]} : vector<2x128xf32> to vector<2x32xf32>
    %1768 = arith.negf %1767 : vector<2x32xf32>
    %1769 = math.exp %1768 : vector<2x32xf32>
    %cst_229 = arith.constant 1.000000e+00 : f32
    %1770 = vector.broadcast %cst_229 : f32 to vector<2x32xf32>
    %1771 = arith.addf %1770, %1769 : vector<2x32xf32>
    %1772 = arith.divf %1770, %1771 : vector<2x32xf32>
    %1773 = vector.extract_strided_slice %1741 {offsets = [0, 32], sizes = [2, 32], strides = [1, 1]} : vector<2x128xf32> to vector<2x32xf32>
    %1774 = arith.negf %1773 : vector<2x32xf32>
    %1775 = math.exp %1774 : vector<2x32xf32>
    %cst_230 = arith.constant 1.000000e+00 : f32
    %1776 = vector.broadcast %cst_230 : f32 to vector<2x32xf32>
    %1777 = arith.addf %1776, %1775 : vector<2x32xf32>
    %1778 = arith.divf %1776, %1777 : vector<2x32xf32>
    %1779 = vector.extract_strided_slice %1741 {offsets = [0, 64], sizes = [2, 32], strides = [1, 1]} : vector<2x128xf32> to vector<2x32xf32>
    %1780 = math.tanh %1779 : vector<2x32xf32>
    %1781 = vector.extract_strided_slice %1741 {offsets = [0, 96], sizes = [2, 32], strides = [1, 1]} : vector<2x128xf32> to vector<2x32xf32>
    %1782 = arith.negf %1781 : vector<2x32xf32>
    %1783 = math.exp %1782 : vector<2x32xf32>
    %cst_231 = arith.constant 1.000000e+00 : f32
    %1784 = vector.broadcast %cst_231 : f32 to vector<2x32xf32>
    %1785 = arith.addf %1784, %1783 : vector<2x32xf32>
    %1786 = arith.divf %1784, %1785 : vector<2x32xf32>
    %1787 = arith.mulf %1778, %1730 : vector<2x32xf32>
    %1788 = arith.mulf %1772, %1780 : vector<2x32xf32>
    %1789 = arith.addf %1787, %1788 : vector<2x32xf32>
    %1790 = math.tanh %1789 : vector<2x32xf32>
    %1791 = arith.mulf %1786, %1790 : vector<2x32xf32>
    %1792 = tpu.concatenate %1766, %1791 in 1 : vector<2x32xf32>, vector<2x32xf32> -> vector<2x64xf32>
    %1793 = arith.truncf %1792 : vector<2x64xf32> to vector<2x64xbf16>
    %cst_232 = arith.constant dense<0.000000e+00> : vector<2x256xf32>
    %1794 = tpu.matmul %1793, %1493, %cst_232 {dimension_numbers = #tpu.dot_dimension_numbers<[1], [0], [0], [1], [0, 0, 1, 1], [], []>} : vector<2x64xbf16>, vector<64x256xbf16>, vector<2x256xf32> -> vector<2x256xf32>
    %1795 = vector.extract_strided_slice %1794 {offsets = [0, 0], sizes = [2, 128], strides = [1, 1]} : vector<2x256xf32> to vector<2x128xf32>
    %1796 = vector.extract_strided_slice %1491 {offsets = [10, 0], sizes = [2, 128], strides = [1, 1]} : vector<16x256xf32> to vector<2x128xf32>
    %1797 = arith.addf %1795, %1796 : vector<2x128xf32>
    %1798 = vector.extract_strided_slice %1794 {offsets = [0, 128], sizes = [2, 128], strides = [1, 1]} : vector<2x256xf32> to vector<2x128xf32>
    %1799 = vector.extract_strided_slice %1491 {offsets = [4, 128], sizes = [2, 128], strides = [1, 1]} : vector<16x256xf32> to vector<2x128xf32>
    %1800 = arith.addf %1798, %1799 : vector<2x128xf32>
    %1801 = vector.extract_strided_slice %1797 {offsets = [0, 0], sizes = [2, 32], strides = [1, 1]} : vector<2x128xf32> to vector<2x32xf32>
    %1802 = arith.negf %1801 : vector<2x32xf32>
    %1803 = math.exp %1802 : vector<2x32xf32>
    %cst_233 = arith.constant 1.000000e+00 : f32
    %1804 = vector.broadcast %cst_233 : f32 to vector<2x32xf32>
    %1805 = arith.addf %1804, %1803 : vector<2x32xf32>
    %1806 = arith.divf %1804, %1805 : vector<2x32xf32>
    %1807 = vector.extract_strided_slice %1797 {offsets = [0, 32], sizes = [2, 32], strides = [1, 1]} : vector<2x128xf32> to vector<2x32xf32>
    %1808 = arith.negf %1807 : vector<2x32xf32>
    %1809 = math.exp %1808 : vector<2x32xf32>
    %cst_234 = arith.constant 1.000000e+00 : f32
    %1810 = vector.broadcast %cst_234 : f32 to vector<2x32xf32>
    %1811 = arith.addf %1810, %1809 : vector<2x32xf32>
    %1812 = arith.divf %1810, %1811 : vector<2x32xf32>
    %1813 = vector.extract_strided_slice %1797 {offsets = [0, 64], sizes = [2, 32], strides = [1, 1]} : vector<2x128xf32> to vector<2x32xf32>
    %1814 = math.tanh %1813 : vector<2x32xf32>
    %1815 = vector.extract_strided_slice %1797 {offsets = [0, 96], sizes = [2, 32], strides = [1, 1]} : vector<2x128xf32> to vector<2x32xf32>
    %1816 = arith.negf %1815 : vector<2x32xf32>
    %1817 = math.exp %1816 : vector<2x32xf32>
    %cst_235 = arith.constant 1.000000e+00 : f32
    %1818 = vector.broadcast %cst_235 : f32 to vector<2x32xf32>
    %1819 = arith.addf %1818, %1817 : vector<2x32xf32>
    %1820 = arith.divf %1818, %1819 : vector<2x32xf32>
    %1821 = arith.mulf %1812, %1764 : vector<2x32xf32>
    %1822 = arith.mulf %1806, %1814 : vector<2x32xf32>
    %1823 = arith.addf %1821, %1822 : vector<2x32xf32>
    %1824 = math.tanh %1823 : vector<2x32xf32>
    %1825 = arith.mulf %1820, %1824 : vector<2x32xf32>
    %1826 = vector.extract_strided_slice %1800 {offsets = [0, 0], sizes = [2, 32], strides = [1, 1]} : vector<2x128xf32> to vector<2x32xf32>
    %1827 = arith.negf %1826 : vector<2x32xf32>
    %1828 = math.exp %1827 : vector<2x32xf32>
    %cst_236 = arith.constant 1.000000e+00 : f32
    %1829 = vector.broadcast %cst_236 : f32 to vector<2x32xf32>
    %1830 = arith.addf %1829, %1828 : vector<2x32xf32>
    %1831 = arith.divf %1829, %1830 : vector<2x32xf32>
    %1832 = vector.extract_strided_slice %1800 {offsets = [0, 32], sizes = [2, 32], strides = [1, 1]} : vector<2x128xf32> to vector<2x32xf32>
    %1833 = arith.negf %1832 : vector<2x32xf32>
    %1834 = math.exp %1833 : vector<2x32xf32>
    %cst_237 = arith.constant 1.000000e+00 : f32
    %1835 = vector.broadcast %cst_237 : f32 to vector<2x32xf32>
    %1836 = arith.addf %1835, %1834 : vector<2x32xf32>
    %1837 = arith.divf %1835, %1836 : vector<2x32xf32>
    %1838 = vector.extract_strided_slice %1800 {offsets = [0, 64], sizes = [2, 32], strides = [1, 1]} : vector<2x128xf32> to vector<2x32xf32>
    %1839 = math.tanh %1838 : vector<2x32xf32>
    %1840 = vector.extract_strided_slice %1800 {offsets = [0, 96], sizes = [2, 32], strides = [1, 1]} : vector<2x128xf32> to vector<2x32xf32>
    %1841 = arith.negf %1840 : vector<2x32xf32>
    %1842 = math.exp %1841 : vector<2x32xf32>
    %cst_238 = arith.constant 1.000000e+00 : f32
    %1843 = vector.broadcast %cst_238 : f32 to vector<2x32xf32>
    %1844 = arith.addf %1843, %1842 : vector<2x32xf32>
    %1845 = arith.divf %1843, %1844 : vector<2x32xf32>
    %1846 = arith.mulf %1837, %1789 : vector<2x32xf32>
    %1847 = arith.mulf %1831, %1839 : vector<2x32xf32>
    %1848 = arith.addf %1846, %1847 : vector<2x32xf32>
    %1849 = math.tanh %1848 : vector<2x32xf32>
    %1850 = arith.mulf %1845, %1849 : vector<2x32xf32>
    %1851 = tpu.concatenate %1825, %1850 in 1 : vector<2x32xf32>, vector<2x32xf32> -> vector<2x64xf32>
    %1852 = arith.truncf %1851 : vector<2x64xf32> to vector<2x64xbf16>
    %cst_239 = arith.constant dense<0.000000e+00> : vector<2x256xf32>
    %1853 = tpu.matmul %1852, %1493, %cst_239 {dimension_numbers = #tpu.dot_dimension_numbers<[1], [0], [0], [1], [0, 0, 1, 1], [], []>} : vector<2x64xbf16>, vector<64x256xbf16>, vector<2x256xf32> -> vector<2x256xf32>
    %1854 = vector.extract_strided_slice %1853 {offsets = [0, 0], sizes = [2, 128], strides = [1, 1]} : vector<2x256xf32> to vector<2x128xf32>
    %1855 = vector.extract_strided_slice %1491 {offsets = [12, 0], sizes = [2, 128], strides = [1, 1]} : vector<16x256xf32> to vector<2x128xf32>
    %1856 = arith.addf %1854, %1855 : vector<2x128xf32>
    %1857 = vector.extract_strided_slice %1853 {offsets = [0, 128], sizes = [2, 128], strides = [1, 1]} : vector<2x256xf32> to vector<2x128xf32>
    %1858 = vector.extract_strided_slice %1491 {offsets = [2, 128], sizes = [2, 128], strides = [1, 1]} : vector<16x256xf32> to vector<2x128xf32>
    %1859 = arith.addf %1857, %1858 : vector<2x128xf32>
    %1860 = vector.extract_strided_slice %1856 {offsets = [0, 0], sizes = [2, 32], strides = [1, 1]} : vector<2x128xf32> to vector<2x32xf32>
    %1861 = arith.negf %1860 : vector<2x32xf32>
    %1862 = math.exp %1861 : vector<2x32xf32>
    %cst_240 = arith.constant 1.000000e+00 : f32
    %1863 = vector.broadcast %cst_240 : f32 to vector<2x32xf32>
    %1864 = arith.addf %1863, %1862 : vector<2x32xf32>
    %1865 = arith.divf %1863, %1864 : vector<2x32xf32>
    %1866 = vector.extract_strided_slice %1856 {offsets = [0, 32], sizes = [2, 32], strides = [1, 1]} : vector<2x128xf32> to vector<2x32xf32>
    %1867 = arith.negf %1866 : vector<2x32xf32>
    %1868 = math.exp %1867 : vector<2x32xf32>
    %cst_241 = arith.constant 1.000000e+00 : f32
    %1869 = vector.broadcast %cst_241 : f32 to vector<2x32xf32>
    %1870 = arith.addf %1869, %1868 : vector<2x32xf32>
    %1871 = arith.divf %1869, %1870 : vector<2x32xf32>
    %1872 = vector.extract_strided_slice %1856 {offsets = [0, 64], sizes = [2, 32], strides = [1, 1]} : vector<2x128xf32> to vector<2x32xf32>
    %1873 = math.tanh %1872 : vector<2x32xf32>
    %1874 = vector.extract_strided_slice %1856 {offsets = [0, 96], sizes = [2, 32], strides = [1, 1]} : vector<2x128xf32> to vector<2x32xf32>
    %1875 = arith.negf %1874 : vector<2x32xf32>
    %1876 = math.exp %1875 : vector<2x32xf32>
    %cst_242 = arith.constant 1.000000e+00 : f32
    %1877 = vector.broadcast %cst_242 : f32 to vector<2x32xf32>
    %1878 = arith.addf %1877, %1876 : vector<2x32xf32>
    %1879 = arith.divf %1877, %1878 : vector<2x32xf32>
    %1880 = arith.mulf %1871, %1823 : vector<2x32xf32>
    %1881 = arith.mulf %1865, %1873 : vector<2x32xf32>
    %1882 = arith.addf %1880, %1881 : vector<2x32xf32>
    %1883 = math.tanh %1882 : vector<2x32xf32>
    %1884 = arith.mulf %1879, %1883 : vector<2x32xf32>
    %1885 = vector.extract_strided_slice %1859 {offsets = [0, 0], sizes = [2, 32], strides = [1, 1]} : vector<2x128xf32> to vector<2x32xf32>
    %1886 = arith.negf %1885 : vector<2x32xf32>
    %1887 = math.exp %1886 : vector<2x32xf32>
    %cst_243 = arith.constant 1.000000e+00 : f32
    %1888 = vector.broadcast %cst_243 : f32 to vector<2x32xf32>
    %1889 = arith.addf %1888, %1887 : vector<2x32xf32>
    %1890 = arith.divf %1888, %1889 : vector<2x32xf32>
    %1891 = vector.extract_strided_slice %1859 {offsets = [0, 32], sizes = [2, 32], strides = [1, 1]} : vector<2x128xf32> to vector<2x32xf32>
    %1892 = arith.negf %1891 : vector<2x32xf32>
    %1893 = math.exp %1892 : vector<2x32xf32>
    %cst_244 = arith.constant 1.000000e+00 : f32
    %1894 = vector.broadcast %cst_244 : f32 to vector<2x32xf32>
    %1895 = arith.addf %1894, %1893 : vector<2x32xf32>
    %1896 = arith.divf %1894, %1895 : vector<2x32xf32>
    %1897 = vector.extract_strided_slice %1859 {offsets = [0, 64], sizes = [2, 32], strides = [1, 1]} : vector<2x128xf32> to vector<2x32xf32>
    %1898 = math.tanh %1897 : vector<2x32xf32>
    %1899 = vector.extract_strided_slice %1859 {offsets = [0, 96], sizes = [2, 32], strides = [1, 1]} : vector<2x128xf32> to vector<2x32xf32>
    %1900 = arith.negf %1899 : vector<2x32xf32>
    %1901 = math.exp %1900 : vector<2x32xf32>
    %cst_245 = arith.constant 1.000000e+00 : f32
    %1902 = vector.broadcast %cst_245 : f32 to vector<2x32xf32>
    %1903 = arith.addf %1902, %1901 : vector<2x32xf32>
    %1904 = arith.divf %1902, %1903 : vector<2x32xf32>
    %1905 = arith.mulf %1896, %1848 : vector<2x32xf32>
    %1906 = arith.mulf %1890, %1898 : vector<2x32xf32>
    %1907 = arith.addf %1905, %1906 : vector<2x32xf32>
    %1908 = math.tanh %1907 : vector<2x32xf32>
    %1909 = arith.mulf %1904, %1908 : vector<2x32xf32>
    %1910 = tpu.concatenate %1884, %1909 in 1 : vector<2x32xf32>, vector<2x32xf32> -> vector<2x64xf32>
    %1911 = arith.truncf %1910 : vector<2x64xf32> to vector<2x64xbf16>
    %cst_246 = arith.constant dense<0.000000e+00> : vector<2x256xf32>
    %1912 = tpu.matmul %1911, %1493, %cst_246 {dimension_numbers = #tpu.dot_dimension_numbers<[1], [0], [0], [1], [0, 0, 1, 1], [], []>} : vector<2x64xbf16>, vector<64x256xbf16>, vector<2x256xf32> -> vector<2x256xf32>
    %1913 = vector.extract_strided_slice %1912 {offsets = [0, 0], sizes = [2, 128], strides = [1, 1]} : vector<2x256xf32> to vector<2x128xf32>
    %1914 = vector.extract_strided_slice %1491 {offsets = [14, 0], sizes = [2, 128], strides = [1, 1]} : vector<16x256xf32> to vector<2x128xf32>
    %1915 = arith.addf %1913, %1914 : vector<2x128xf32>
    %1916 = vector.extract_strided_slice %1912 {offsets = [0, 128], sizes = [2, 128], strides = [1, 1]} : vector<2x256xf32> to vector<2x128xf32>
    %1917 = vector.extract_strided_slice %1491 {offsets = [0, 128], sizes = [2, 128], strides = [1, 1]} : vector<16x256xf32> to vector<2x128xf32>
    %1918 = arith.addf %1916, %1917 : vector<2x128xf32>
    %1919 = vector.extract_strided_slice %1915 {offsets = [0, 0], sizes = [2, 32], strides = [1, 1]} : vector<2x128xf32> to vector<2x32xf32>
    %1920 = arith.negf %1919 : vector<2x32xf32>
    %1921 = math.exp %1920 : vector<2x32xf32>
    %cst_247 = arith.constant 1.000000e+00 : f32
    %1922 = vector.broadcast %cst_247 : f32 to vector<2x32xf32>
    %1923 = arith.addf %1922, %1921 : vector<2x32xf32>
    %1924 = arith.divf %1922, %1923 : vector<2x32xf32>
    %1925 = vector.extract_strided_slice %1915 {offsets = [0, 32], sizes = [2, 32], strides = [1, 1]} : vector<2x128xf32> to vector<2x32xf32>
    %1926 = arith.negf %1925 : vector<2x32xf32>
    %1927 = math.exp %1926 : vector<2x32xf32>
    %cst_248 = arith.constant 1.000000e+00 : f32
    %1928 = vector.broadcast %cst_248 : f32 to vector<2x32xf32>
    %1929 = arith.addf %1928, %1927 : vector<2x32xf32>
    %1930 = arith.divf %1928, %1929 : vector<2x32xf32>
    %1931 = vector.extract_strided_slice %1915 {offsets = [0, 64], sizes = [2, 32], strides = [1, 1]} : vector<2x128xf32> to vector<2x32xf32>
    %1932 = math.tanh %1931 : vector<2x32xf32>
    %1933 = vector.extract_strided_slice %1915 {offsets = [0, 96], sizes = [2, 32], strides = [1, 1]} : vector<2x128xf32> to vector<2x32xf32>
    %1934 = arith.negf %1933 : vector<2x32xf32>
    %1935 = math.exp %1934 : vector<2x32xf32>
    %cst_249 = arith.constant 1.000000e+00 : f32
    %1936 = vector.broadcast %cst_249 : f32 to vector<2x32xf32>
    %1937 = arith.addf %1936, %1935 : vector<2x32xf32>
    %1938 = arith.divf %1936, %1937 : vector<2x32xf32>
    %1939 = arith.mulf %1930, %1882 : vector<2x32xf32>
    %1940 = arith.mulf %1924, %1932 : vector<2x32xf32>
    %1941 = arith.addf %1939, %1940 : vector<2x32xf32>
    %1942 = math.tanh %1941 : vector<2x32xf32>
    %1943 = arith.mulf %1938, %1942 : vector<2x32xf32>
    %1944 = vector.extract_strided_slice %1918 {offsets = [0, 0], sizes = [2, 32], strides = [1, 1]} : vector<2x128xf32> to vector<2x32xf32>
    %1945 = arith.negf %1944 : vector<2x32xf32>
    %1946 = math.exp %1945 : vector<2x32xf32>
    %cst_250 = arith.constant 1.000000e+00 : f32
    %1947 = vector.broadcast %cst_250 : f32 to vector<2x32xf32>
    %1948 = arith.addf %1947, %1946 : vector<2x32xf32>
    %1949 = arith.divf %1947, %1948 : vector<2x32xf32>
    %1950 = vector.extract_strided_slice %1918 {offsets = [0, 32], sizes = [2, 32], strides = [1, 1]} : vector<2x128xf32> to vector<2x32xf32>
    %1951 = arith.negf %1950 : vector<2x32xf32>
    %1952 = math.exp %1951 : vector<2x32xf32>
    %cst_251 = arith.constant 1.000000e+00 : f32
    %1953 = vector.broadcast %cst_251 : f32 to vector<2x32xf32>
    %1954 = arith.addf %1953, %1952 : vector<2x32xf32>
    %1955 = arith.divf %1953, %1954 : vector<2x32xf32>
    %1956 = vector.extract_strided_slice %1918 {offsets = [0, 64], sizes = [2, 32], strides = [1, 1]} : vector<2x128xf32> to vector<2x32xf32>
    %1957 = math.tanh %1956 : vector<2x32xf32>
    %1958 = vector.extract_strided_slice %1918 {offsets = [0, 96], sizes = [2, 32], strides = [1, 1]} : vector<2x128xf32> to vector<2x32xf32>
    %1959 = arith.negf %1958 : vector<2x32xf32>
    %1960 = math.exp %1959 : vector<2x32xf32>
    %cst_252 = arith.constant 1.000000e+00 : f32
    %1961 = vector.broadcast %cst_252 : f32 to vector<2x32xf32>
    %1962 = arith.addf %1961, %1960 : vector<2x32xf32>
    %1963 = arith.divf %1961, %1962 : vector<2x32xf32>
    %1964 = arith.mulf %1955, %1907 : vector<2x32xf32>
    %1965 = arith.mulf %1949, %1957 : vector<2x32xf32>
    %1966 = arith.addf %1964, %1965 : vector<2x32xf32>
    %1967 = math.tanh %1966 : vector<2x32xf32>
    %1968 = arith.mulf %1963, %1967 : vector<2x32xf32>
    %1969 = tpu.concatenate %1943, %1968, %1941, %1966 in 1 : vector<2x32xf32>, vector<2x32xf32>, vector<2x32xf32>, vector<2x32xf32> -> vector<2x128xf32>
    %1970 = tpu.concatenate %1530, %1968 in 1 : vector<2x32xf32>, vector<2x32xf32> -> vector<2x64xf32>
    %1971 = tpu.concatenate %1589, %1909 in 1 : vector<2x32xf32>, vector<2x32xf32> -> vector<2x64xf32>
    %1972 = tpu.concatenate %1648, %1850 in 1 : vector<2x32xf32>, vector<2x32xf32> -> vector<2x64xf32>
    %1973 = tpu.concatenate %1707, %1791 in 1 : vector<2x32xf32>, vector<2x32xf32> -> vector<2x64xf32>
    %1974 = tpu.concatenate %1766, %1732 in 1 : vector<2x32xf32>, vector<2x32xf32> -> vector<2x64xf32>
    %1975 = tpu.concatenate %1825, %1673 in 1 : vector<2x32xf32>, vector<2x32xf32> -> vector<2x64xf32>
    %1976 = tpu.concatenate %1884, %1614 in 1 : vector<2x32xf32>, vector<2x32xf32> -> vector<2x64xf32>
    %1977 = tpu.concatenate %1943, %1555 in 1 : vector<2x32xf32>, vector<2x32xf32> -> vector<2x64xf32>
    %1978 = tpu.concatenate %1970, %1971, %1972, %1973, %1974, %1975, %1976, %1977 in 0 : vector<2x64xf32>, vector<2x64xf32>, vector<2x64xf32>, vector<2x64xf32>, vector<2x64xf32>, vector<2x64xf32>, vector<2x64xf32>, vector<2x64xf32> -> vector<16x64xf32>
    %1979 = tpu.concatenate %487, %981, %1475, %1969 in 0 : vector<2x128xf32>, vector<2x128xf32>, vector<2x128xf32>, vector<2x128xf32> -> vector<8x128xf32>
    %c0_253 = arith.constant 0 : index
    %c0_254 = arith.constant 0 : index
    %1980 = vector.load %arg9[%c0_253, %c0_254] : memref<8x128xf32, #tpu.memory_space<vmem>>, vector<8x128xf32>
    tpu.vector_store %arg9[%c0_253, %c0_254], %1979 {strides = array<i32>} : memref<8x128xf32, #tpu.memory_space<vmem>>, vector<8x128xf32>,
    %1981 = arith.truncf %1978 : vector<16x64xf32> to vector<16x64xbf16>
    %c0_255 = arith.constant 0 : index
    %c0_256 = arith.constant 0 : index
    %1982 = vector.load %arg5[%c0_255, %c0_256] : memref<64x32xbf16, #tpu.memory_space<vmem>>, vector<64x32xbf16>
    %cst_257 = arith.constant dense<0.000000e+00> : vector<16x32xf32>
    %1983 = tpu.matmul %1981, %1982, %cst_257 {dimension_numbers = #tpu.dot_dimension_numbers<[1], [0], [0], [1], [0, 0, 1, 1], [], []>} : vector<16x64xbf16>, vector<64x32xbf16>, vector<16x32xf32> -> vector<16x32xf32>
    %c0_258 = arith.constant 0 : index
    %c0_259 = arith.constant 0 : index
    %1984 = vector.load %arg6[%c0_258, %c0_259] : memref<1x32xf32, #tpu.memory_space<vmem>>, vector<1x32xf32>
    %1985 = vector.broadcast %1984 : vector<1x32xf32> to vector<16x32xf32>
    %1986 = arith.addf %1983, %1985 : vector<16x32xf32>
    %1987 = vector.extract_strided_slice %1986 {offsets = [0, 0], sizes = [16, 16], strides = [1, 1]} : vector<16x32xf32> to vector<16x16xf32>
    %cst_260 = arith.constant -1.000000e+02 : f32
    %cst_261 = arith.constant 1.000000e+02 : f32
    %1988 = vector.broadcast %cst_260 : f32 to vector<16x16xf32>
    %1989 = arith.maximumf %1988, %1987 : vector<16x16xf32>
    %1990 = vector.broadcast %cst_261 : f32 to vector<16x16xf32>
    %1991 = arith.minimumf %1990, %1989 : vector<16x16xf32>
    %1992 = vector.extract_strided_slice %1986 {offsets = [0, 16], sizes = [16, 16], strides = [1, 1]} : vector<16x32xf32> to vector<16x16xf32>
    %cst_262 = arith.constant -2.000000e+01 : f32
    %cst_263 = arith.constant 2.000000e+01 : f32
    %1993 = vector.broadcast %cst_262 : f32 to vector<16x16xf32>
    %1994 = arith.maximumf %1993, %1992 : vector<16x16xf32>
    %1995 = vector.broadcast %cst_263 : f32 to vector<16x16xf32>
    %1996 = arith.minimumf %1995, %1994 : vector<16x16xf32>
    %cst_264 = arith.constant 5.000000e-01 : f32
    %1997 = vector.broadcast %cst_264 : f32 to vector<16x16xf32>
    %1998 = arith.mulf %1997, %1996 : vector<16x16xf32>
    %1999 = math.exp %1998 : vector<16x16xf32>
    %c0_265 = arith.constant 0 : index
    %c0_266 = arith.constant 0 : index
    %2000 = vector.load %arg7[%c0_265, %c0_266] : memref<16x16xf32, #tpu.memory_space<vmem>>, vector<16x16xf32>
    %2001 = arith.mulf %2000, %1999 : vector<16x16xf32>
    %2002 = arith.addf %1991, %2001 : vector<16x16xf32>
    %2003 = tpu.concatenate %2002, %1991, %1996 in 1 : vector<16x16xf32>, vector<16x16xf32>, vector<16x16xf32> -> vector<16x48xf32>
    %c0_267 = arith.constant 0 : index
    %c0_268 = arith.constant 0 : index
    %2004 = vector.load %arg8[%c0_267, %c0_268] : memref<16x48xf32, #tpu.memory_space<vmem>>, vector<16x48xf32>
    tpu.vector_store %arg8[%c0_267, %c0_268], %2003 {strides = array<i32>} : memref<16x48xf32, #tpu.memory_space<vmem>>, vector<16x48xf32>,
    return
  }
}

</mosaic_0001>

<bundles_post_ra>
// kernel: forward.1
= control target key start
LH: loop header
LB: loop body
LE: loop exit
PB: predicated region body
PF: predicated region fallthrough
CT: control target
= control target key end

     0   :  { %15 = vsyncpa [#allocation3], 0  ;;  %s5780_s12 = smov [#allocation2]   ;;  %s5781_s14 = smov 128   ;;  %s7507_s0 = inlined_call_operand.vmem [shape: f32[16,64], index: 0, kind: input, shape index: {}]   ;;  %s7508_s1 = inlined_call_operand.vmem [shape: bf16[4,64,256], index: 1, kind: input, shape index: {}]   ;;  %s7509_s2 = inlined_call_operand.hbm [shape: bf16[4,64,256], index: 2, kind: input, shape index: {}]   ;;  %s7510_s3 = inlined_call_operand.vmem [shape: f32[4,256], index: 3, kind: input, shape index: {}]   ;;  %s7511_s4 = inlined_call_operand.vmem [shape: f32[8,128], index: 4, kind: input, shape index: {}]   ;;  %s7512_s5 = inlined_call_operand.vmem [shape: bf16[64,32], index: 5, kind: input, shape index: {}]   ;;  %s7513_s6 = inlined_call_operand.vmem [shape: f32[1,32], index: 6, kind: input, shape index: {}]   ;;  %s7514_s7 = inlined_call_operand.vmem [shape: f32[16,16], index: 7, kind: input, shape index: {}]   ;;  %s7515_s8 = inlined_call_operand.vmem [shape: f32[16,48], index: 8, kind: output, shape index: {0}]   ;;  %s7516_s9 = inlined_call_operand.vmem [shape: f32[8,128], index: 9, kind: output, shape index: {1}]  }
   0x1   :  { %s24_s11 = sshll.u32 %s7509_s2, 4  ;;  %s26_s13 = sshll.u32 %s5780_s12, 4  ;;  %s25_s11 = int_to_ptr.hbm [resolvable:$true] %s24_s11  ;;  %s27_s13 = int_to_ptr.vmem [resolvable:$true] %s26_s13 }
   0x2   :  { %s5782_s15 = smov 8  }
   0x3   :  { %32 = dma.hbm_to_vmem [thread:$0]  %s25_s11, 4096, %s27_s13, [#allocation3], %s5781_s14, %s5781_s14, %s5782_s15  }
   0x4   :  { %5778 = dma.done.wait [#allocation3], 4096  }
   0x5   :  { %5779 = vsyncadd [#allocation3], 4294963200  ;;  %v4744_v0 = vld [vmem:[%s7508_s1 + $0x30] sm:$0xf]  ;;  %v5162_v1 = vld [vmem:[%s7508_s1 + $0x34] sm:$0xf0] }
   0x6   :  { %v5161_v2 = vld [vmem:[%s7508_s1 + $0x34] sm:$0xf]  ;;  %v4745_v3 = vor.u32 %v5162_v1, %v4744_v0  ;;  %v4746_v4 = vld [vmem:[%s7508_s1 + $0x38] sm:$0xf0]  ;;  %v4778_v5 = vld [vmem:[#allocation2 + $0x30] sm:$0xf] }
   0x7   :  { %v5170_v6 = vld [vmem:[#allocation2 + $0x34] sm:$0xf0]  ;;  %v4749_v7 = vor.u32 %v5161_v2, %v4746_v4  ;;  %v5169_v9 = vld [vmem:[#allocation2 + $0x34] sm:$0xf]  ;;  %v4780_v10 = vld [vmem:[#allocation2 + $0x38] sm:$0xf0] }
   0x8   :  { %v5853_v8 = vor.u32 %v5170_v6, %v4778_v5  ;;  %v4736_v11 = vld [vmem:[%s7508_s1 + $0x20] sm:$0xf]  ;;  %116 = vmatpush.bf16.msra.mxu0 %v4745_v3  ;;  %v5858_v12 = vor.u32 %v5169_v9, %v4780_v10  ;;  %v5160_v13 = vld [vmem:[%s7508_s1 + $0x24] sm:$0xf0]  ;;  %v5159_v14 = vld [vmem:[%s7508_s1 + $0x24] sm:$0xf] }
   0x9   :  { %v4738_v15 = vld [vmem:[%s7508_s1 + $0x28] sm:$0xf0]  ;;  %130 = vmatpush.bf16.msra.mxu1 %v4749_v7  ;;  %v4737_v16 = vor.u32 %v5160_v13, %v4736_v11  ;;  %v4770_v18 = vld [vmem:[#allocation2 + $0x20] sm:$0xf]  ;;  %v5168_v19 = vld [vmem:[#allocation2 + $0x24] sm:$0xf0] }
   0xa   :  { %196 = vmatpush.bf16.msra.mxu2 %v5853_v8  ;;  %v4741_v17 = vor.u32 %v5159_v14, %v4738_v15  ;;  %v5167_v20 = vld [vmem:[#allocation2 + $0x24] sm:$0xf]  ;;  %209 = vmatpush.bf16.msra.mxu3 %v5858_v12  ;;  %v5871_v21 = vor.u32 %v5168_v19, %v4770_v18  ;;  %v4772_v22 = vld [vmem:[#allocation2 + $0x28] sm:$0xf0]  ;;  %v4728_v23 = vld [vmem:[%s7508_s1 + $0x10] sm:$0xf] }
   0xb   :  { %v5158_v24 = vld [vmem:[%s7508_s1 + $0x14] sm:$0xf0]  ;;  %v5879_v25 = vor.u32 %v5167_v20, %v4772_v22  ;;  %v5157_v26 = vld [vmem:[%s7508_s1 + $0x14] sm:$0xf]  ;;  %v4730_v27 = vld [vmem:[%s7508_s1 + $0x18] sm:$0xf0] }
   0xc   :  { %v4762_v28 = vld [vmem:[#allocation2 + $0x10] sm:$0xf]  ;;  %117 = vmatpush.bf16.msra.mxu0 %v4737_v16  ;;  %v4729_v29 = vor.u32 %v5158_v24, %v4728_v23  ;;  %v5166_v30 = vld [vmem:[#allocation2 + $0x14] sm:$0xf0]  ;;  %v5165_v31 = vld [vmem:[#allocation2 + $0x14] sm:$0xf]  ;;  %v4733_v33 = vor.u32 %v5157_v26, %v4730_v27 }
   0xd   :  { %v4764_v32 = vld [vmem:[#allocation2 + $0x18] sm:$0xf0]  ;;  %131 = vmatpush.bf16.msra.mxu1 %v4741_v17  ;;  %v5888_v34 = vor.u32 %v5166_v30, %v4762_v28  ;;  %v4720_v35 = vld [vmem:[%s7508_s1] sm:$0xf]  ;;  %v5156_v36 = vld [vmem:[%s7508_s1 + $0x4] sm:$0xf0] }
   0xe   :  { %197 = vmatpush.bf16.msra.mxu2 %v5871_v21  ;;  %v5155_v37 = vld [vmem:[%s7508_s1 + $0x4] sm:$0xf]  ;;  %210 = vmatpush.bf16.msra.mxu3 %v5879_v25  ;;  %v5900_v38 = vor.u32 %v5165_v31, %v4764_v32  ;;  %v4722_v39 = vld [vmem:[%s7508_s1 + $0x8] sm:$0xf0]  ;;  %v4754_v40 = vld [vmem:[#allocation2] sm:$0xf]  ;;  %v4721_v44 = vor.u32 %v5156_v36, %v4720_v35 }
   0xf   :  { %v5164_v41 = vld [vmem:[#allocation2 + $0x4] sm:$0xf0]  ;;  %v5163_v42 = vld [vmem:[#allocation2 + $0x4] sm:$0xf]  ;;  %v4756_v43 = vld [vmem:[#allocation2 + $0x8] sm:$0xf0]  ;;  %v4725_v47 = vor.u32 %v5155_v37, %v4722_v39 }
  0x10   :  { %118 = vmatpush.bf16.msra.mxu0 %v4729_v29  ;;  %v50_v45 = vld [vmem:[%s7507_s0] sm:$0xff]  ;;  %v51_v46 = vld [vmem:[%s7507_s0 + $0x8] sm:$0xff]  ;;  %v5912_v48 = vor.u32 %v5164_v41, %v4754_v40  ;;  %v5918_v50 = vor.u32 %v5163_v42, %v4756_v43  ;;  %s5783_s10 = smov 96   ;;  %vm108_vm0 = vcmask 523264   ;;  %s5784_s0 = smov 64   ;;  %vm312_vm9 = vcmask 261120  }
  0x11   :  { %132 = vmatpush.bf16.msra.mxu1 %v4733_v33  ;;  %v49_v49 = vld [vmem:[%s7511_s4] sm:$0xff]  ;;  %v52_v51 = vpack.c.bf16 %v51_v46, %v50_v45  ;;  %s5785_s13 = smov 32   ;;  %s5786_s26 = smov 16  }
  0x12   :  { %198 = vmatpush.bf16.msra.mxu2 %v5888_v34  ;;  %211 = vmatpush.bf16.msra.mxu3 %v5900_v38  ;;  %v5921_v52 = vpack.c.bf16 %v49_v49, %v49_v49  ;;  %v48_v53 = vld [vmem:[%s7510_s3] sm:$0xff] }
  0x13   :  { %244 = vrot.lane.b32.xlu1 %v49_v49, %s5783_s10  ;;  %v63_v54 = vperm.slane %v48_v53, 4  ;;  %v62_v55 = vperm.slane %v48_v53, 0 }
  0x14   :  { %119 = vmatpush.bf16.msra.mxu0 %v4721_v44 }
  0x15   :  { %133 = vmatpush.bf16.msra.mxu1 %v4725_v47  ;;  %v67_v56 = vperm.slane %v63_v54, 0  ;;  %v5967_v57 = vperm.slane %v62_v55, 0 }
  0x16   :  { %199 = vmatpush.bf16.msra.mxu2 %v5912_v48  ;;  %212 = vmatpush.bf16.msra.mxu3 %v5918_v50 }
  0x17   :  { %4750 = vmatmul.msk.bf16.vlgmr.msra.gmra.mxu0 %vm108_vm0, %v52_v51 }
  0x18   :  { %322 = vmatpush.bf16.msrb.mxu0 %v5853_v8  ;;  %4751 = vmatmul.msk.bf16.vlgmr.msra.gmra.mxu1 %vm108_vm0, %v52_v51 }
  0x19   :  { %335 = vmatpush.bf16.msrb.mxu1 %v5858_v12  ;;  %4784 = vmatmul.msk.bf16.vlgmr.msra.gmra.mxu2 %vm108_vm0, %v5921_v52 }
  0x1a   :  { %4785 = vmatmul.msk.bf16.vlgmr.msra.gmra.mxu3 %vm108_vm0, %v5921_v52  ;;  %442 = vmatpush.bf16.msrb.mxu2 %v5853_v8 }
  0x1b   :  { %284 = vrot.lane.b32.xlu1 %v49_v49, %s5784_s0  ;;  %455 = vmatpush.bf16.msrb.mxu3 %v5858_v12 }
  0x1c   :  { %323 = vmatpush.bf16.msrb.mxu0 %v5871_v21 }
  0x1d   :  { %336 = vmatpush.bf16.msrb.mxu1 %v5879_v25 }
  0x1e   :  { %443 = vmatpush.bf16.msrb.mxu2 %v5871_v21 }
  0x1f   :  { %456 = vmatpush.bf16.msrb.mxu3 %v5879_v25 }
  0x20   :  { %324 = vmatpush.bf16.msrb.mxu0 %v5888_v34 }
  0x21   :  { %337 = vmatpush.bf16.msrb.mxu1 %v5900_v38 }
  0x22   :  { %444 = vmatpush.bf16.msrb.mxu2 %v5888_v34 }
  0x23   :  { %457 = vmatpush.bf16.msrb.mxu3 %v5900_v38 }
  0x24   :  { %325 = vmatpush.bf16.msrb.mxu0 %v5912_v48 }
  0x25   :  { %338 = vmatpush.bf16.msrb.mxu1 %v5918_v50 }
  0x26   :  { %445 = vmatpush.bf16.msrb.mxu2 %v5912_v48 }
  0x27   :  { %458 = vmatpush.bf16.msrb.mxu3 %v5918_v50 }
  0x28   :  { %561 = vmatpush.bf16.msra.mxu0 %v5853_v8 }
  0x29   :  { %574 = vmatpush.bf16.msra.mxu1 %v5858_v12 }
  0x2a   :  { %678 = vmatpush.bf16.msra.mxu2 %v5853_v8 }
  0x2b   :  { %691 = vmatpush.bf16.msra.mxu3 %v5858_v12 }
  0x2c   :  { %562 = vmatpush.bf16.msra.mxu0 %v5871_v21 }
  0x2d   :  { %575 = vmatpush.bf16.msra.mxu1 %v5879_v25 }
  0x2e   :  { %679 = vmatpush.bf16.msra.mxu2 %v5871_v21 }
  0x2f   :  { %692 = vmatpush.bf16.msra.mxu3 %v5879_v25 }
  0x30   :  { %563 = vmatpush.bf16.msra.mxu0 %v5888_v34 }
  0x31   :  { %576 = vmatpush.bf16.msra.mxu1 %v5900_v38 }
  0x32   :  { %680 = vmatpush.bf16.msra.mxu2 %v5888_v34 }
  0x33   :  { %693 = vmatpush.bf16.msra.mxu3 %v5900_v38 }
  0x34   :  { %564 = vmatpush.bf16.msra.mxu0 %v5912_v48 }
  0x35   :  { %577 = vmatpush.bf16.msra.mxu1 %v5918_v50 }
  0x36   :  { %681 = vmatpush.bf16.msra.mxu2 %v5912_v48 }
  0x37   :  { %694 = vmatpush.bf16.msra.mxu3 %v5918_v50 }
  0x85   :  { %v245_v45 = vpop.permute.xlu1 %244 }
  0x8d   :  { %v285_v51 = vpop.permute.xlu1 %284 }
  0x94   :  { %v121_v60 = vpop.f32.mrf.mxu0 }
  0x95   :  { %v135_v58 = vpop.f32.mrf.mxu1  ;;  %v5972_v61 = vadd.f32 %v121_v60, %v5967_v57 }
  0x96   :  { %v5969_v59 = vadd.f32 %v135_v58, %v67_v56 }
  0x9c   :  { %v201_v62 = vpop.f32.mrf.mxu2 }
  0x9d   :  { %v218_v63 = vadd.f32 %v201_v62, %v5972_v61  ;;  %v214_v0 = vpop.f32.mrf.mxu3  ;;  %v137_v1 = vpop.f32.mrf.mxu1 }
  0x9e   :  { %v5975_v2 = vadd.f32 %v137_v1, %v67_v56 }
  0x9f   :  { %5232 = vtanh.f32 %v218_v63  ;;  %v4786_v10 = vmul.f32 -1.442695, %v218_v63 }
  0xa0   :  { %v220_v3 = vrot.slane %v5975_v2, 6 }
  0xa2   :  { %v222_v4 = vadd.f32 %v220_v3, %v214_v0 }
  0xa4   :  { %v203_v5 = vpop.f32.mrf.mxu2  ;;  %5234 = vtanh.f32 %v222_v4  ;;  %v4787_v11 = vmul.f32 -1.442695, %v222_v4 }
  0xa5   :  { %v5233_v6 = vpop.eup %5232  ;;  %v216_v7 = vpop.f32.mrf.mxu3  ;;  %5236 = vpow2.f32 %v4786_v10 }
  0xa6   :  { %249 = vrot.lane.b32.xlu0 %v5233_v6, %s5784_s0  ;;  %5238 = vpow2.f32 %v4787_v11  ;;  %v6009_v6 = vpop.f32.mrf.mxu0  ;;  %v345_v7 = vrot.slane %v5972_v61, 2 }
  0xaa   :  { %v5235_v9 = vpop.eup %5234 }
  0xab   :  { %v5237_v13 = vpop.eup %5236 }
  0xac   :  { %v226_v14 = vadd.f32 1.0, %v5237_v13  ;;  %v5239_v15 = vpop.eup %5238 }
  0xad   :  { %v267_v16 = vadd.f32 1.0, %v5239_v15 }
  0xae   :  { %289 = vrot.lane.b32.xlu0 %v5235_v9, %s5784_s0  ;;  %5240 = vrcp.f32 %v226_v14  ;;  %v238_v27 = vand.u32 2147483648, %v226_v14  ;;  %vm232_vm2 = vweird.f32 %v226_v14  ;;  %v236_v28 = vand.u32 2147483647, %v226_v14 }
  0xaf   :  { %5242 = vrcp.f32 %v267_v16  ;;  %v279_v37 = vand.u32 2147483648, %v267_v16  ;;  %vm273_vm6 = vweird.f32 %v267_v16  ;;  %v277_v39 = vand.u32 2147483647, %v267_v16 }
  0xb0   :  { %v239_v31 = vor.u32 1.1754944e-38, %v238_v27  ;;  %vm237_vm4 = vcmp.eq.f32.partialorder %v236_v28, 8.507059e+37  ;;  %v348_v9 = vrot.slane %v5975_v2, 4 }
  0xb1   :  { %v280_v41 = vor.u32 1.1754944e-38, %v279_v37  ;;  %vm278_vm8 = vcmp.eq.f32.partialorder %v277_v39, 8.507059e+37 }
  0xb4   :  { %v5241_v17 = vpop.eup %5240 }
  0xb5   :  { %v228_v18 = vmul.f32 %v5241_v17, %v226_v14  ;;  %v5243_v20 = vpop.eup %5242  ;;  %vm233_vm1 = vweird.f32 %v5241_v17 }
  0xb6   :  { %v269_v23 = vmul.f32 %v5243_v20, %v267_v16  ;;  %vm234_vm3 = vmor %vm232_vm2, %vm233_vm1  ;;  %vm274_vm5 = vweird.f32 %v5243_v20 }
  0xb7   :  { %v229_v19 = vsub.f32 1.0, %v228_v18  ;;  %vm275_vm7 = vmor %vm273_vm6, %vm274_vm5 }
  0xb8   :  { %v270_v26 = vsub.f32 1.0, %v269_v23 }
  0xb9   :  { %v230_v22 = vmul.f32 %v5241_v17, %v229_v19 }
  0xba   :  { %v271_v30 = vmul.f32 %v5243_v20, %v270_v26 }
  0xbb   :  { %v231_v24 = vadd.f32 %v5241_v17, %v230_v22 }
  0xbc   :  { %v272_v35 = vadd.f32 %v5243_v20, %v271_v30 }
  0xbd   :  { %v235_v29 = vsel %vm234_vm3, %v5241_v17, %v231_v24 }
  0xbe   :  { %v240_v32 = vsel %vm237_vm4, %v239_v31, %v235_v29  ;;  %v276_v40 = vsel %vm275_vm7, %v5243_v20, %v272_v35 }
  0xbf   :  { %v281_v42 = vsel %vm278_vm8, %v280_v41, %v276_v40  ;;  %v247_v46 = vmul.f32 %v245_v45, %v240_v32 }
  0xc0   :  { %v287_v53 = vmul.f32 %v285_v51, %v281_v42 }
 0x118   :  { %v250_v33 = vpop.permute.xlu0 %249 }
 0x119   :  { %v252_v36 = vmul.f32 %v250_v33, %v240_v32 }
 0x11b   :  { %254 = vrot.lane.b32.xlu2 %v252_v36, %s5785_s13 }
 0x120   :  { %v290_v43 = vpop.permute.xlu0 %289 }
 0x121   :  { %v292_v44 = vmul.f32 %v290_v43, %v281_v42 }
 0x123   :  { %294 = vrot.lane.b32.xlu2 %v292_v44, %s5785_s13 }
 0x175   :  { %v255_v47 = vpop.permute.xlu2 %254 }
 0x176   :  { %v5982_v49 = vadd.f32 %v255_v47, %v247_v46 }
 0x178   :  { %5244 = vtanh.f32 %v5982_v49 }
 0x17d   :  { %v295_v54 = vpop.permute.xlu2 %294 }
 0x17e   :  { %v5245_v55 = vpop.eup %5244  ;;  %v5985_v56 = vadd.f32 %v295_v54, %v287_v53 }
 0x17f   :  { %260 = vrot.lane.b32.xlu0 %v5245_v55, %s5784_s0 }
 0x180   :  { %5246 = vtanh.f32 %v5985_v56 }
 0x186   :  { %v5247_v58 = vpop.eup %5246 }
 0x187   :  { %300 = vrot.lane.b32.xlu1 %v5247_v58, %s5784_s0 }
 0x1f1   :  { %v261_v60 = vpop.permute.xlu0 %260 }
 0x1f2   :  { %v263_v62 = vmul.f32 %v261_v60, %v240_v32 }
 0x1f4   :  { %305 = vrot.lane.b32.xlu2 %v263_v62, %s5785_s13 }
 0x1f9   :  { %v301_v63 = vpop.permute.xlu1 %300 }
 0x1fa   :  { %v303_v0 = vmul.f32 %v301_v63, %v281_v42 }
 0x1fc   :  { %309 = vrot.lane.b32.xlu0 %v303_v0, %s5784_s0 }
 0x24e   :  { %v5992_v1 = vpop.permute.xlu2 %305 }
 0x26e   :  { %v5994_v3 = vpop.permute.xlu0 %309 }
 0x26f   :  { %v313_v4 = vsel %vm312_vm9, %v5992_v1, %v5994_v3 }
 0x270   :  { %v314_v5 = vpack.c.bf16 %v313_v4, %v313_v4 }
 0x272   :  { %4788 = vmatmul.msk.bf16.vlgmr.msrb.gmra.mxu0 %vm108_vm0, %v314_v5  ;;  %4789 = vmatmul.msk.bf16.vlgmr.msrb.gmra.mxu1 %vm108_vm0, %v314_v5 }
 0x273   :  { %796 = vmatpush.bf16.msrb.mxu0 %v5853_v8  ;;  %809 = vmatpush.bf16.msrb.mxu1 %v5858_v12 }
 0x277   :  { %797 = vmatpush.bf16.msrb.mxu0 %v5871_v21  ;;  %810 = vmatpush.bf16.msrb.mxu1 %v5879_v25 }
 0x27b   :  { %798 = vmatpush.bf16.msrb.mxu0 %v5888_v34  ;;  %811 = vmatpush.bf16.msrb.mxu1 %v5900_v38 }
 0x27f   :  { %799 = vmatpush.bf16.msrb.mxu0 %v5912_v48  ;;  %812 = vmatpush.bf16.msrb.mxu1 %v5918_v50 }
 0x2ef   :  { %v327_v10 = vpop.f32.mrf.mxu0  ;;  %v340_v11 = vpop.f32.mrf.mxu1 }
 0x2f0   :  { %v347_v13 = vadd.f32 %v345_v7, %v327_v10  ;;  %v350_v14 = vadd.f32 %v348_v9, %v340_v11 }
 0x2f2   :  { %5248 = vtanh.f32 %v347_v13  ;;  %v4791_v19 = vmul.f32 -1.442695, %v350_v14  ;;  %v4790_v24 = vmul.f32 -1.442695, %v347_v13 }
 0x2f3   :  { %5250 = vtanh.f32 %v350_v14 }
 0x2f4   :  { %5252 = vpow2.f32 %v4791_v19 }
 0x2f7   :  { %v329_v15 = vpop.f32.mrf.mxu0  ;;  %v342_v16 = vpop.f32.mrf.mxu1 }
 0x2f8   :  { %v5249_v17 = vpop.eup %5248 }
 0x2f9   :  { %v5251_v18 = vpop.eup %5250  ;;  %373 = vrot.lane.b32.xlu1 %v5249_v17, %s5784_s0  ;;  %v464_v17 = vrot.slane %v5972_v61, 4 }
 0x2fa   :  { %410 = vrot.lane.b32.xlu2 %v5251_v18, %s5784_s0  ;;  %v5253_v20 = vpop.eup %5252  ;;  %v467_v18 = vrot.slane %v5975_v2, 2 }
 0x2fb   :  { %v391_v22 = vadd.f32 1.0, %v5253_v20 }
 0x2fd   :  { %5254 = vrcp.f32 %v391_v22  ;;  %v403_v32 = vand.u32 2147483648, %v391_v22  ;;  %vm397_vm11 = vweird.f32 %v391_v22  ;;  %v401_v33 = vand.u32 2147483647, %v391_v22 }
 0x2fe   :  { %5256 = vpow2.f32 %v4790_v24 }
 0x2ff   :  { %v404_v36 = vor.u32 1.1754944e-38, %v403_v32  ;;  %vm402_vm13 = vcmp.eq.f32.partialorder %v401_v33, 8.507059e+37 }
 0x303   :  { %v5255_v23 = vpop.eup %5254 }
 0x304   :  { %v393_v26 = vmul.f32 %v5255_v23, %v391_v22  ;;  %v5257_v28 = vpop.eup %5256  ;;  %vm398_vm10 = vweird.f32 %v5255_v23 }
 0x305   :  { %v354_v30 = vadd.f32 1.0, %v5257_v28  ;;  %vm399_vm12 = vmor %vm397_vm11, %vm398_vm10 }
 0x306   :  { %v394_v27 = vsub.f32 1.0, %v393_v26 }
 0x307   :  { %5258 = vrcp.f32 %v354_v30  ;;  %v366_v46 = vand.u32 2147483648, %v354_v30  ;;  %vm360_vm15 = vweird.f32 %v354_v30  ;;  %v364_v47 = vand.u32 2147483647, %v354_v30 }
 0x308   :  { %v395_v29 = vmul.f32 %v5255_v23, %v394_v27 }
 0x309   :  { %v367_v53 = vor.u32 1.1754944e-38, %v366_v46  ;;  %vm365_vm2 = vcmp.eq.f32.partialorder %v364_v47, 8.507059e+37 }
 0x30a   :  { %v396_v31 = vadd.f32 %v5255_v23, %v395_v29 }
 0x30c   :  { %v400_v35 = vsel %vm399_vm12, %v5255_v23, %v396_v31 }
 0x30d   :  { %v405_v39 = vsel %vm402_vm13, %v404_v36, %v400_v35  ;;  %v5259_v40 = vpop.eup %5258 }
 0x30e   :  { %v356_v42 = vmul.f32 %v5259_v40, %v354_v30  ;;  %vm361_vm14 = vweird.f32 %v5259_v40  ;;  %v408_v60 = vmul.f32 %v405_v39, %v5985_v56 }
 0x30f   :  { %vm362_vm1 = vmor %vm360_vm15, %vm361_vm14 }
 0x310   :  { %v357_v43 = vsub.f32 1.0, %v356_v42 }
 0x312   :  { %v358_v44 = vmul.f32 %v5259_v40, %v357_v43 }
 0x314   :  { %v359_v45 = vadd.f32 %v5259_v40, %v358_v44 }
 0x316   :  { %v363_v51 = vsel %vm362_vm1, %v5259_v40, %v359_v45 }
 0x317   :  { %v368_v55 = vsel %vm365_vm2, %v367_v53, %v363_v51 }
 0x318   :  { %v371_v4 = vmul.f32 %v368_v55, %v5982_v49 }
 0x354   :  { %v411_v37 = vpop.permute.xlu2 %410 }
 0x355   :  { %v413_v41 = vmul.f32 %v411_v37, %v405_v39 }
 0x357   :  { %415 = vrot.lane.b32.xlu1 %v413_v41, %s5785_s13 }
 0x36b   :  { %v374_v54 = vpop.permute.xlu1 %373 }
 0x36c   :  { %v376_v58 = vmul.f32 %v374_v54, %v368_v55 }
 0x36e   :  { %378 = vrot.lane.b32.xlu0 %v376_v58, %s5785_s13 }
 0x3c9   :  { %v416_v62 = vpop.permute.xlu1 %415 }
 0x3ca   :  { %v6018_v63 = vadd.f32 %v416_v62, %v408_v60 }
 0x3cc   :  { %5260 = vtanh.f32 %v6018_v63 }
 0x3d2   :  { %v5261_v0 = vpop.eup %5260 }
 0x3d3   :  { %421 = vrot.lane.b32.xlu0 %v5261_v0, %s5784_s0 }
 0x3e0   :  { %v379_v5 = vpop.permute.xlu0 %378 }
 0x3e1   :  { %v6023_v7 = vadd.f32 %v379_v5, %v371_v4 }
 0x3e3   :  { %5262 = vtanh.f32 %v6023_v7 }
 0x3e9   :  { %v5263_v9 = vpop.eup %5262 }
 0x3ea   :  { %384 = vrot.lane.b32.xlu2 %v5263_v9, %s5784_s0 }
 0x444   :  { %v385_v10 = vpop.permute.xlu2 %384 }
 0x445   :  { %v422_v56 = vpop.permute.xlu0 %421  ;;  %v387_v11 = vmul.f32 %v385_v10, %v368_v55 }
 0x446   :  { %v424_v13 = vmul.f32 %v422_v56, %v405_v39 }
 0x447   :  { %426 = vrot.lane.b32.xlu1 %v387_v11, %s5785_s13 }
 0x448   :  { %430 = vrot.lane.b32.xlu2 %v424_v13, %s5784_s0 }
 0x4a2   :  { %v6029_v14 = vpop.permute.xlu2 %430 }
 0x4b9   :  { %v6031_v15 = vpop.permute.xlu1 %426 }
 0x4ba   :  { %v433_v49 = vsel %vm312_vm9, %v6031_v15, %v6029_v14 }
 0x4bb   :  { %v434_v16 = vpack.c.bf16 %v433_v49, %v433_v49 }
 0x4bd   :  { %4792 = vmatmul.msk.bf16.vlgmr.msrb.gmra.mxu2 %vm108_vm0, %v434_v16  ;;  %4793 = vmatmul.msk.bf16.vlgmr.msrb.gmra.mxu3 %vm108_vm0, %v434_v16 }
 0x4be   :  { %929 = vmatpush.bf16.msrb.mxu3 %v5858_v12  ;;  %916 = vmatpush.bf16.msrb.mxu2 %v5853_v8 }
 0x4c2   :  { %930 = vmatpush.bf16.msrb.mxu3 %v5879_v25  ;;  %917 = vmatpush.bf16.msrb.mxu2 %v5871_v21 }
 0x4c6   :  { %931 = vmatpush.bf16.msrb.mxu3 %v5900_v38  ;;  %918 = vmatpush.bf16.msrb.mxu2 %v5888_v34 }
 0x4ca   :  { %932 = vmatpush.bf16.msrb.mxu3 %v5918_v50  ;;  %919 = vmatpush.bf16.msrb.mxu2 %v5912_v48 }
 0x540   :  { %v447_v19 = vpop.f32.mrf.mxu2  ;;  %v460_v20 = vpop.f32.mrf.mxu3 }
 0x541   :  { %v466_v22 = vadd.f32 %v464_v17, %v447_v19  ;;  %v469_v23 = vadd.f32 %v467_v18, %v460_v20 }
 0x543   :  { %5264 = vtanh.f32 %v466_v22  ;;  %v4794_v29 = vmul.f32 -1.442695, %v466_v22  ;;  %v4795_v30 = vmul.f32 -1.442695, %v469_v23 }
 0x544   :  { %5266 = vtanh.f32 %v469_v23 }
 0x545   :  { %5268 = vpow2.f32 %v4794_v29  ;;  %v583_v29 = vrot.slane %v5972_v61, 6 }
 0x546   :  { %5270 = vpow2.f32 %v4795_v30 }
 0x548   :  { %v449_v24 = vpop.f32.mrf.mxu2  ;;  %v462_v26 = vpop.f32.mrf.mxu3 }
 0x549   :  { %v5265_v27 = vpop.eup %5264 }
 0x54a   :  { %v5267_v28 = vpop.eup %5266  ;;  %492 = vrot.lane.b32.xlu0 %v5265_v27, %s5784_s0 }
 0x54b   :  { %529 = vrot.lane.b32.xlu1 %v5267_v28, %s5784_s0  ;;  %v5269_v31 = vpop.eup %5268 }
 0x54c   :  { %v5271_v32 = vpop.eup %5270  ;;  %v473_v33 = vadd.f32 1.0, %v5269_v31 }
 0x54d   :  { %v510_v35 = vadd.f32 1.0, %v5271_v32 }
 0x54e   :  { %5272 = vrcp.f32 %v473_v33  ;;  %v485_v47 = vand.u32 2147483648, %v473_v33  ;;  %vm479_vm5 = vweird.f32 %v473_v33  ;;  %v483_v53 = vand.u32 2147483647, %v473_v33 }
 0x54f   :  { %5274 = vrcp.f32 %v510_v35  ;;  %v522_v51 = vand.u32 2147483648, %v510_v35  ;;  %vm516_vm6 = vweird.f32 %v510_v35  ;;  %v520_v54 = vand.u32 2147483647, %v510_v35 }
 0x550   :  { %v486_v60 = vor.u32 1.1754944e-38, %v485_v47  ;;  %vm484_vm10 = vcmp.eq.f32.partialorder %v483_v53, 8.507059e+37 }
 0x551   :  { %v523_v62 = vor.u32 1.1754944e-38, %v522_v51  ;;  %vm521_vm11 = vcmp.eq.f32.partialorder %v520_v54, 8.507059e+37 }
 0x554   :  { %v5273_v36 = vpop.eup %5272 }
 0x555   :  { %v5275_v37 = vpop.eup %5274  ;;  %v475_v39 = vmul.f32 %v5273_v36, %v473_v33  ;;  %vm480_vm3 = vweird.f32 %v5273_v36 }
 0x556   :  { %v512_v40 = vmul.f32 %v5275_v37, %v510_v35  ;;  %vm517_vm4 = vweird.f32 %v5275_v37  ;;  %vm481_vm7 = vmor %vm479_vm5, %vm480_vm3 }
 0x557   :  { %v476_v41 = vsub.f32 1.0, %v475_v39  ;;  %vm518_vm8 = vmor %vm516_vm6, %vm517_vm4 }
 0x558   :  { %v513_v42 = vsub.f32 1.0, %v512_v40 }
 0x559   :  { %v477_v43 = vmul.f32 %v5273_v36, %v476_v41 }
 0x55a   :  { %v514_v44 = vmul.f32 %v5275_v37, %v513_v42 }
 0x55b   :  { %v478_v45 = vadd.f32 %v5273_v36, %v477_v43 }
 0x55c   :  { %v515_v46 = vadd.f32 %v5275_v37, %v514_v44 }
 0x55d   :  { %v482_v55 = vsel %vm481_vm7, %v5273_v36, %v478_v45 }
 0x55e   :  { %v519_v58 = vsel %vm518_vm8, %v5275_v37, %v515_v46  ;;  %v487_v4 = vsel %vm484_vm10, %v486_v60, %v482_v55 }
 0x55f   :  { %v524_v9 = vsel %vm521_vm11, %v523_v62, %v519_v58  ;;  %v490_v11 = vmul.f32 %v487_v4, %v6023_v7 }
 0x560   :  { %v527_v17 = vmul.f32 %v524_v9, %v6018_v63 }
 0x5bc   :  { %v493_v0 = vpop.permute.xlu0 %492 }
 0x5bd   :  { %v530_v5 = vpop.permute.xlu1 %529  ;;  %v495_v10 = vmul.f32 %v493_v0, %v487_v4 }
 0x5be   :  { %v532_v56 = vmul.f32 %v530_v5, %v524_v9 }
 0x5bf   :  { %497 = vrot.lane.b32.xlu2 %v495_v10, %s5785_s13 }
 0x5c0   :  { %534 = vrot.lane.b32.xlu0 %v532_v56, %s5785_s13 }
 0x619   :  { %v498_v13 = vpop.permute.xlu2 %497 }
 0x61a   :  { %v6053_v49 = vadd.f32 %v498_v13, %v490_v11 }
 0x61c   :  { %5276 = vtanh.f32 %v6053_v49 }
 0x622   :  { %v5277_v16 = vpop.eup %5276 }
 0x623   :  { %503 = vrot.lane.b32.xlu1 %v5277_v16, %s5784_s0 }
 0x632   :  { %v535_v18 = vpop.permute.xlu0 %534 }
 0x633   :  { %v6058_v19 = vadd.f32 %v535_v18, %v527_v17 }
 0x635   :  { %5278 = vtanh.f32 %v6058_v19 }
 0x63b   :  { %v5279_v20 = vpop.eup %5278 }
 0x63c   :  { %540 = vrot.lane.b32.xlu2 %v5279_v20, %s5784_s0 }
 0x695   :  { %v504_v22 = vpop.permute.xlu1 %503 }
 0x696   :  { %v541_v7 = vpop.permute.xlu2 %540  ;;  %v506_v23 = vmul.f32 %v504_v22, %v487_v4 }
 0x697   :  { %v543_v24 = vmul.f32 %v541_v7, %v524_v9 }
 0x698   :  { %545 = vrot.lane.b32.xlu0 %v506_v23, %s5785_s13 }
 0x699   :  { %549 = vrot.lane.b32.xlu1 %v543_v24, %s5784_s0 }
 0x70a   :  { %v6064_v26 = vpop.permute.xlu0 %545 }
 0x70b   :  { %v6066_v27 = vpop.permute.xlu1 %549 }
 0x70c   :  { %v552_v63 = vsel %vm312_vm9, %v6064_v26, %v6066_v27 }
 0x70d   :  { %v553_v28 = vpack.c.bf16 %v552_v63, %v552_v63 }
 0x70f   :  { %4796 = vmatmul.msk.bf16.vlgmr.msra.gmra.mxu0 %vm108_vm0, %v553_v28  ;;  %4797 = vmatmul.msk.bf16.vlgmr.msra.gmra.mxu1 %vm108_vm0, %v553_v28 }
 0x710   :  { %1035 = vmatpush.bf16.msra.mxu0 %v5853_v8  ;;  %1048 = vmatpush.bf16.msra.mxu1 %v5858_v12 }
 0x714   :  { %1036 = vmatpush.bf16.msra.mxu0 %v5871_v21  ;;  %1049 = vmatpush.bf16.msra.mxu1 %v5879_v25 }
 0x718   :  { %1037 = vmatpush.bf16.msra.mxu0 %v5888_v34  ;;  %1050 = vmatpush.bf16.msra.mxu1 %v5900_v38 }
 0x71c   :  { %1038 = vmatpush.bf16.msra.mxu0 %v5912_v48  ;;  %1051 = vmatpush.bf16.msra.mxu1 %v5918_v50 }
 0x78c   :  { %v566_v30 = vpop.f32.mrf.mxu0  ;;  %v579_v31 = vpop.f32.mrf.mxu1 }
 0x78d   :  { %v585_v32 = vadd.f32 %v583_v29, %v566_v30  ;;  %v586_v8 = vadd.f32 %v579_v31, %v5975_v2  ;;  %v6110_v30 = vadd.f32 %v6009_v6, %v5967_v57  ;;  %v702_v31 = vrot.slane %v5969_v59, 6 }
 0x78f   :  { %5280 = vtanh.f32 %v585_v32  ;;  %v4798_v34 = vmul.f32 -1.442695, %v585_v32  ;;  %v4799_v61 = vmul.f32 -1.442695, %v586_v8 }
 0x790   :  { %5282 = vtanh.f32 %v586_v8 }
 0x791   :  { %5284 = vpow2.f32 %v4798_v34 }
 0x794   :  { %v568_v12 = vpop.f32.mrf.mxu0  ;;  %v581_v21 = vpop.f32.mrf.mxu1 }
 0x795   :  { %v5281_v25 = vpop.eup %5280 }
 0x796   :  { %v5283_v33 = vpop.eup %5282  ;;  %609 = vrot.lane.b32.xlu2 %v5281_v25, %s5784_s0 }
 0x797   :  { %646 = vrot.lane.b32.xlu0 %v5283_v33, %s5784_s0  ;;  %v5285_v38 = vpop.eup %5284 }
 0x798   :  { %v590_v48 = vadd.f32 1.0, %v5285_v38 }
 0x79a   :  { %5286 = vrcp.f32 %v590_v48  ;;  %v602_v41 = vand.u32 2147483648, %v590_v48  ;;  %vm596_vm13 = vweird.f32 %v590_v48  ;;  %v600_v42 = vand.u32 2147483647, %v590_v48 }
 0x79b   :  { %5288 = vpow2.f32 %v4799_v61 }
 0x79c   :  { %v603_v44 = vor.u32 1.1754944e-38, %v602_v41  ;;  %vm601_vm15 = vcmp.eq.f32.partialorder %v600_v42, 8.507059e+37 }
 0x7a0   :  { %v5287_v50 = vpop.eup %5286 }
 0x7a1   :  { %v592_v35 = vmul.f32 %v5287_v50, %v590_v48  ;;  %v5289_v37 = vpop.eup %5288  ;;  %vm597_vm12 = vweird.f32 %v5287_v50 }
 0x7a2   :  { %v627_v39 = vadd.f32 1.0, %v5289_v37  ;;  %vm598_vm14 = vmor %vm596_vm13, %vm597_vm12 }
 0x7a3   :  { %v593_v2 = vsub.f32 1.0, %v592_v35 }
 0x7a4   :  { %5290 = vrcp.f32 %v627_v39  ;;  %v639_v60 = vand.u32 2147483648, %v627_v39  ;;  %vm633_vm2 = vweird.f32 %v627_v39  ;;  %v637_v62 = vand.u32 2147483647, %v627_v39 }
 0x7a5   :  { %v594_v36 = vmul.f32 %v5287_v50, %v593_v2 }
 0x7a6   :  { %v640_v4 = vor.u32 1.1754944e-38, %v639_v60  ;;  %vm638_vm4 = vcmp.eq.f32.partialorder %v637_v62, 8.507059e+37 }
 0x7a7   :  { %v595_v40 = vadd.f32 %v5287_v50, %v594_v36 }
 0x7a9   :  { %v599_v43 = vsel %vm598_vm14, %v5287_v50, %v595_v40 }
 0x7aa   :  { %v604_v46 = vsel %vm601_vm15, %v603_v44, %v599_v43  ;;  %v5291_v51 = vpop.eup %5290 }
 0x7ab   :  { %v629_v53 = vmul.f32 %v5291_v51, %v627_v39  ;;  %vm634_vm1 = vweird.f32 %v5291_v51  ;;  %v607_v56 = vmul.f32 %v604_v46, %v6053_v49 }
 0x7ac   :  { %vm635_vm3 = vmor %vm633_vm2, %vm634_vm1 }
 0x7ad   :  { %v630_v54 = vsub.f32 1.0, %v629_v53 }
 0x7af   :  { %v631_v55 = vmul.f32 %v5291_v51, %v630_v54 }
 0x7b1   :  { %v632_v58 = vadd.f32 %v5291_v51, %v631_v55 }
 0x7b3   :  { %v636_v0 = vsel %vm635_vm3, %v5291_v51, %v632_v58 }
 0x7b4   :  { %v641_v9 = vsel %vm638_vm4, %v640_v4, %v636_v0 }
 0x7b5   :  { %v644_v11 = vmul.f32 %v641_v9, %v6058_v19 }
 0x7f0   :  { %v610_v45 = vpop.permute.xlu2 %609 }
 0x7f1   :  { %v612_v47 = vmul.f32 %v610_v45, %v604_v46 }
 0x7f3   :  { %614 = vrot.lane.b32.xlu1 %v612_v47, %s5785_s13 }
 0x809   :  { %v647_v5 = vpop.permute.xlu0 %646 }
 0x80a   :  { %v649_v10 = vmul.f32 %v647_v5, %v641_v9 }
 0x80c   :  { %651 = vrot.lane.b32.xlu2 %v649_v10, %s5785_s13 }
 0x865   :  { %v615_v13 = vpop.permute.xlu1 %614 }
 0x866   :  { %v652_v16 = vpop.permute.xlu2 %651  ;;  %v6089_v17 = vadd.f32 %v615_v13, %v607_v56 }
 0x867   :  { %v6091_v18 = vadd.f32 %v652_v16, %v644_v11 }
 0x868   :  { %5292 = vtanh.f32 %v6089_v17 }
 0x869   :  { %5294 = vtanh.f32 %v6091_v18 }
 0x86e   :  { %v5293_v20 = vpop.eup %5292 }
 0x86f   :  { %v5295_v22 = vpop.eup %5294  ;;  %620 = vrot.lane.b32.xlu0 %v5293_v20, %s5784_s0 }
 0x870   :  { %657 = vrot.lane.b32.xlu1 %v5295_v22, %s5784_s0 }
 0x8e1   :  { %v621_v7 = vpop.permute.xlu0 %620 }
 0x8e2   :  { %v658_v49 = vpop.permute.xlu1 %657  ;;  %v623_v23 = vmul.f32 %v621_v7, %v604_v46 }
 0x8e3   :  { %v660_v19 = vmul.f32 %v658_v49, %v641_v9 }
 0x8e4   :  { %662 = vrot.lane.b32.xlu2 %v623_v23, %s5785_s13 }
 0x8e5   :  { %666 = vrot.lane.b32.xlu0 %v660_v19, %s5784_s0 }
 0x93e   :  { %v6099_v24 = vpop.permute.xlu2 %662 }
 0x957   :  { %v6101_v63 = vpop.permute.xlu0 %666 }
 0x958   :  { %v669_v28 = vsel %vm312_vm9, %v6099_v24, %v6101_v63 }
 0x959   :  { %v670_v29 = vpack.c.bf16 %v669_v28, %v669_v28 }
 0x95b   :  { %4800 = vmatmul.msk.bf16.vlgmr.msra.gmra.mxu2 %vm108_vm0, %v670_v29  ;;  %4801 = vmatmul.msk.bf16.vlgmr.msra.gmra.mxu3 %vm108_vm0, %v670_v29 }
 0x9de   :  { %v683_v32 = vpop.f32.mrf.mxu2  ;;  %v696_v8 = vpop.f32.mrf.mxu3 }
 0x9df   :  { %v700_v12 = vadd.f32 %v683_v32, %v6110_v30  ;;  %v704_v21 = vadd.f32 %v702_v31, %v696_v8  ;;  %v819_v8 = vrot.slane %v6110_v30, 2 }
 0x9e1   :  { %5296 = vtanh.f32 %v700_v12  ;;  %v4803_v48 = vmul.f32 -1.442695, %v704_v21  ;;  %v4802_v61 = vmul.f32 -1.442695, %v700_v12  ;;  %v822_v12 = vrot.slane %v5969_v59, 4 }
 0x9e2   :  { %5298 = vtanh.f32 %v704_v21 }
 0x9e3   :  { %5300 = vpow2.f32 %v4803_v48 }
 0x9e6   :  { %v685_v25 = vpop.f32.mrf.mxu2  ;;  %v698_v33 = vpop.f32.mrf.mxu3 }
 0x9e7   :  { %v5297_v34 = vpop.eup %5296 }
 0x9e8   :  { %v5299_v38 = vpop.eup %5298  ;;  %727 = vrot.lane.b32.xlu1 %v5297_v34, %s5784_s0 }
 0x9e9   :  { %764 = vrot.lane.b32.xlu2 %v5299_v38, %s5784_s0  ;;  %v5301_v57 = vpop.eup %5300 }
 0x9ea   :  { %v745_v6 = vadd.f32 1.0, %v5301_v57 }
 0x9ec   :  { %5302 = vrcp.f32 %v745_v6  ;;  %v757_v41 = vand.u32 2147483648, %v745_v6  ;;  %vm751_vm6 = vweird.f32 %v745_v6  ;;  %v755_v42 = vand.u32 2147483647, %v745_v6 }
 0x9ed   :  { %5304 = vpow2.f32 %v4802_v61 }
 0x9ee   :  { %v758_v44 = vor.u32 1.1754944e-38, %v757_v41  ;;  %vm756_vm8 = vcmp.eq.f32.partialorder %v755_v42, 8.507059e+37 }
 0x9f2   :  { %v5303_v50 = vpop.eup %5302 }
 0x9f3   :  { %v747_v35 = vmul.f32 %v5303_v50, %v745_v6  ;;  %v5305_v36 = vpop.eup %5304  ;;  %vm752_vm5 = vweird.f32 %v5303_v50 }
 0x9f4   :  { %v708_v39 = vadd.f32 1.0, %v5305_v36  ;;  %vm753_vm7 = vmor %vm751_vm6, %vm752_vm5 }
 0x9f5   :  { %v748_v2 = vsub.f32 1.0, %v747_v35 }
 0x9f6   :  { %5306 = vrcp.f32 %v708_v39  ;;  %v720_v60 = vand.u32 2147483648, %v708_v39  ;;  %vm714_vm11 = vweird.f32 %v708_v39  ;;  %v718_v62 = vand.u32 2147483647, %v708_v39 }
 0x9f7   :  { %v749_v37 = vmul.f32 %v5303_v50, %v748_v2 }
 0x9f8   :  { %v721_v4 = vor.u32 1.1754944e-38, %v720_v60  ;;  %vm719_vm13 = vcmp.eq.f32.partialorder %v718_v62, 8.507059e+37 }
 0x9f9   :  { %v750_v40 = vadd.f32 %v5303_v50, %v749_v37 }
 0x9fb   :  { %v754_v43 = vsel %vm753_vm7, %v5303_v50, %v750_v40 }
 0x9fc   :  { %v759_v46 = vsel %vm756_vm8, %v758_v44, %v754_v43  ;;  %v5307_v47 = vpop.eup %5306 }
 0x9fd   :  { %v710_v53 = vmul.f32 %v5307_v47, %v708_v39  ;;  %vm715_vm10 = vweird.f32 %v5307_v47  ;;  %v762_v56 = vmul.f32 %v759_v46, %v6091_v18 }
 0x9fe   :  { %vm716_vm12 = vmor %vm714_vm11, %vm715_vm10 }
 0x9ff   :  { %v711_v54 = vsub.f32 1.0, %v710_v53 }
 0xa01   :  { %v712_v55 = vmul.f32 %v5307_v47, %v711_v54 }
 0xa03   :  { %v713_v58 = vadd.f32 %v5307_v47, %v712_v55 }
 0xa05   :  { %v717_v0 = vsel %vm716_vm12, %v5307_v47, %v713_v58 }
 0xa06   :  { %v722_v9 = vsel %vm719_vm13, %v721_v4, %v717_v0 }
 0xa07   :  { %v725_v20 = vmul.f32 %v722_v9, %v6089_v17 }
 0xa43   :  { %v765_v45 = vpop.permute.xlu2 %764 }
 0xa44   :  { %v767_v51 = vmul.f32 %v765_v45, %v759_v46 }
 0xa46   :  { %769 = vrot.lane.b32.xlu1 %v767_v51, %s5785_s13 }
 0xa5a   :  { %v728_v5 = vpop.permute.xlu1 %727 }
 0xa5b   :  { %v730_v10 = vmul.f32 %v728_v5, %v722_v9 }
 0xa5d   :  { %732 = vrot.lane.b32.xlu0 %v730_v10, %s5785_s13 }
 0xab8   :  { %v770_v11 = vpop.permute.xlu1 %769 }
 0xab9   :  { %v6119_v13 = vadd.f32 %v770_v11, %v762_v56 }
 0xabb   :  { %5308 = vtanh.f32 %v6119_v13 }
 0xac1   :  { %v5309_v16 = vpop.eup %5308 }
 0xac2   :  { %775 = vrot.lane.b32.xlu0 %v5309_v16, %s5784_s0 }
 0xacf   :  { %v733_v22 = vpop.permute.xlu0 %732 }
 0xad0   :  { %v6124_v7 = vadd.f32 %v733_v22, %v725_v20 }
 0xad2   :  { %5310 = vtanh.f32 %v6124_v7 }
 0xad8   :  { %v5311_v49 = vpop.eup %5310 }
 0xad9   :  { %738 = vrot.lane.b32.xlu2 %v5311_v49, %s5784_s0 }
 0xb33   :  { %v739_v23 = vpop.permute.xlu2 %738 }
 0xb34   :  { %v776_v18 = vpop.permute.xlu0 %775  ;;  %v741_v19 = vmul.f32 %v739_v23, %v722_v9 }
 0xb35   :  { %v778_v28 = vmul.f32 %v776_v18, %v759_v46 }
 0xb36   :  { %780 = vrot.lane.b32.xlu1 %v741_v19, %s5785_s13 }
 0xb37   :  { %784 = vrot.lane.b32.xlu2 %v778_v28, %s5784_s0 }
 0xb91   :  { %v6130_v29 = vpop.permute.xlu2 %784 }
 0xba8   :  { %v6132_v31 = vpop.permute.xlu1 %780 }
 0xba9   :  { %v787_v17 = vsel %vm312_vm9, %v6132_v31, %v6130_v29 }
 0xbaa   :  { %v788_v32 = vpack.c.bf16 %v787_v17, %v787_v17 }
 0xbac   :  { %4804 = vmatmul.msk.bf16.vlgmr.msrb.gmra.mxu0 %vm108_vm0, %v788_v32  ;;  %4805 = vmatmul.msk.bf16.vlgmr.msrb.gmra.mxu1 %vm108_vm0, %v788_v32 }
 0xc29   :  { %v801_v21 = vpop.f32.mrf.mxu0  ;;  %v814_v25 = vpop.f32.mrf.mxu1 }
 0xc2a   :  { %v821_v33 = vadd.f32 %v819_v8, %v801_v21  ;;  %v824_v34 = vadd.f32 %v822_v12, %v814_v25 }
 0xc2c   :  { %5312 = vtanh.f32 %v821_v33  ;;  %v4806_v50 = vmul.f32 -1.442695, %v821_v33  ;;  %v4807_v61 = vmul.f32 -1.442695, %v824_v34 }
 0xc2d   :  { %5314 = vtanh.f32 %v824_v34  ;;  %v938_v34 = vrot.slane %v6110_v30, 4 }
 0xc2e   :  { %5316 = vpow2.f32 %v4806_v50 }
 0xc2f   :  { %5318 = vpow2.f32 %v4807_v61 }
 0xc31   :  { %v803_v38 = vpop.f32.mrf.mxu0  ;;  %v816_v48 = vpop.f32.mrf.mxu1 }
 0xc32   :  { %v5313_v57 = vpop.eup %5312  ;;  %v941_v38 = vrot.slane %v5969_v59, 2 }
 0xc33   :  { %v5315_v6 = vpop.eup %5314  ;;  %847 = vrot.lane.b32.xlu0 %v5313_v57, %s5784_s0 }
 0xc34   :  { %884 = vrot.lane.b32.xlu1 %v5315_v6, %s5784_s0  ;;  %v5317_v35 = vpop.eup %5316 }
 0xc35   :  { %v5319_v2 = vpop.eup %5318  ;;  %v828_v36 = vadd.f32 1.0, %v5317_v35 }
 0xc36   :  { %v865_v37 = vadd.f32 1.0, %v5319_v2 }
 0xc37   :  { %5320 = vrcp.f32 %v828_v36  ;;  %v840_v53 = vand.u32 2147483648, %v828_v36  ;;  %vm834_vm1 = vweird.f32 %v828_v36  ;;  %v838_v55 = vand.u32 2147483647, %v828_v36 }
 0xc38   :  { %5322 = vrcp.f32 %v865_v37  ;;  %v877_v54 = vand.u32 2147483648, %v865_v37  ;;  %vm871_vm2 = vweird.f32 %v865_v37  ;;  %v875_v58 = vand.u32 2147483647, %v865_v37 }
 0xc39   :  { %v841_v0 = vor.u32 1.1754944e-38, %v840_v53  ;;  %vm839_vm5 = vcmp.eq.f32.partialorder %v838_v55, 8.507059e+37 }
 0xc3a   :  { %v878_v4 = vor.u32 1.1754944e-38, %v877_v54  ;;  %vm876_vm6 = vcmp.eq.f32.partialorder %v875_v58, 8.507059e+37 }
 0xc3d   :  { %v5321_v39 = vpop.eup %5320 }
 0xc3e   :  { %v5323_v40 = vpop.eup %5322  ;;  %v830_v41 = vmul.f32 %v5321_v39, %v828_v36  ;;  %vm835_vm14 = vweird.f32 %v5321_v39 }
 0xc3f   :  { %v867_v42 = vmul.f32 %v5323_v40, %v865_v37  ;;  %vm872_vm15 = vweird.f32 %v5323_v40  ;;  %vm836_vm3 = vmor %vm834_vm1, %vm835_vm14 }
 0xc40   :  { %v831_v43 = vsub.f32 1.0, %v830_v41  ;;  %vm873_vm4 = vmor %vm871_vm2, %vm872_vm15 }
 0xc41   :  { %v868_v44 = vsub.f32 1.0, %v867_v42 }
 0xc42   :  { %v832_v45 = vmul.f32 %v5321_v39, %v831_v43 }
 0xc43   :  { %v869_v46 = vmul.f32 %v5323_v40, %v868_v44 }
 0xc44   :  { %v833_v47 = vadd.f32 %v5321_v39, %v832_v45 }
 0xc45   :  { %v870_v51 = vadd.f32 %v5323_v40, %v869_v46 }
 0xc46   :  { %v837_v60 = vsel %vm836_vm3, %v5321_v39, %v833_v47 }
 0xc47   :  { %v874_v62 = vsel %vm873_vm4, %v5323_v40, %v870_v51  ;;  %v842_v9 = vsel %vm839_vm5, %v841_v0, %v837_v60 }
 0xc48   :  { %v879_v56 = vsel %vm876_vm6, %v878_v4, %v874_v62  ;;  %v845_v20 = vmul.f32 %v842_v9, %v6124_v7 }
 0xc49   :  { %v882_v18 = vmul.f32 %v879_v56, %v6119_v13 }
 0xca5   :  { %v848_v5 = vpop.permute.xlu0 %847 }
 0xca6   :  { %v885_v10 = vpop.permute.xlu1 %884  ;;  %v850_v11 = vmul.f32 %v848_v5, %v842_v9 }
 0xca7   :  { %v887_v16 = vmul.f32 %v885_v10, %v879_v56 }
 0xca8   :  { %852 = vrot.lane.b32.xlu2 %v850_v11, %s5785_s13 }
 0xca9   :  { %889 = vrot.lane.b32.xlu0 %v887_v16, %s5785_s13 }
 0xd02   :  { %v853_v22 = vpop.permute.xlu2 %852 }
 0xd03   :  { %v6146_v49 = vadd.f32 %v853_v22, %v845_v20 }
 0xd05   :  { %5324 = vtanh.f32 %v6146_v49 }
 0xd0b   :  { %v5325_v23 = vpop.eup %5324 }
 0xd0c   :  { %858 = vrot.lane.b32.xlu1 %v5325_v23, %s5784_s0 }
 0xd1b   :  { %v890_v19 = vpop.permute.xlu0 %889 }
 0xd1c   :  { %v6151_v28 = vadd.f32 %v890_v19, %v882_v18 }
 0xd1e   :  { %5326 = vtanh.f32 %v6151_v28 }
 0xd24   :  { %v5327_v17 = vpop.eup %5326 }
 0xd25   :  { %895 = vrot.lane.b32.xlu2 %v5327_v17, %s5784_s0 }
 0xd7e   :  { %v859_v32 = vpop.permute.xlu1 %858 }
 0xd7f   :  { %v896_v7 = vpop.permute.xlu2 %895  ;;  %v861_v8 = vmul.f32 %v859_v32, %v842_v9 }
 0xd80   :  { %v898_v12 = vmul.f32 %v896_v7, %v879_v56 }
 0xd81   :  { %900 = vrot.lane.b32.xlu0 %v861_v8, %s5785_s13 }
 0xd82   :  { %904 = vrot.lane.b32.xlu1 %v898_v12, %s5784_s0 }
 0xdf3   :  { %v6157_v21 = vpop.permute.xlu0 %900 }
 0xdf4   :  { %v6159_v25 = vpop.permute.xlu1 %904 }
 0xdf5   :  { %v907_v13 = vsel %vm312_vm9, %v6157_v21, %v6159_v25 }
 0xdf6   :  { %v908_v33 = vpack.c.bf16 %v907_v13, %v907_v13 }
 0xdf8   :  { %4808 = vmatmul.msk.bf16.vlgmr.msrb.gmra.mxu2 %vm108_vm0, %v908_v33  ;;  %4809 = vmatmul.msk.bf16.vlgmr.msrb.gmra.mxu3 %vm108_vm0, %v908_v33 }
 0xe7b   :  { %v921_v48 = vpop.f32.mrf.mxu2  ;;  %v934_v57 = vpop.f32.mrf.mxu3 }
 0xe7c   :  { %v940_v6 = vadd.f32 %v938_v34, %v921_v48  ;;  %v943_v50 = vadd.f32 %v941_v38, %v934_v57 }
 0xe7e   :  { %5328 = vtanh.f32 %v940_v6  ;;  %v4810_v37 = vmul.f32 -1.442695, %v940_v6  ;;  %v4811_v42 = vmul.f32 -1.442695, %v943_v50 }
 0xe7f   :  { %5330 = vtanh.f32 %v943_v50 }
 0xe80   :  { %5332 = vpow2.f32 %v4810_v37 }
 0xe83   :  { %v923_v61 = vpop.f32.mrf.mxu2  ;;  %v936_v35 = vpop.f32.mrf.mxu3 }
 0xe84   :  { %v5329_v2 = vpop.eup %5328  ;;  %v1057_v35 = vrot.slane %v6110_v30, 6 }
 0xe85   :  { %v5331_v36 = vpop.eup %5330  ;;  %966 = vrot.lane.b32.xlu2 %v5329_v2, %s5784_s0 }
 0xe86   :  { %1003 = vrot.lane.b32.xlu0 %v5331_v36, %s5784_s0  ;;  %v5333_v39 = vpop.eup %5332 }
 0xe87   :  { %v947_v40 = vadd.f32 1.0, %v5333_v39 }
 0xe89   :  { %5334 = vrcp.f32 %v947_v40  ;;  %v959_v53 = vand.u32 2147483648, %v947_v40  ;;  %vm953_vm8 = vweird.f32 %v947_v40  ;;  %v957_v54 = vand.u32 2147483647, %v947_v40 }
 0xe8a   :  { %5336 = vpow2.f32 %v4811_v42 }
 0xe8b   :  { %v960_v58 = vor.u32 1.1754944e-38, %v959_v53  ;;  %vm958_vm11 = vcmp.eq.f32.partialorder %v957_v54, 8.507059e+37 }
 0xe8f   :  { %v5335_v41 = vpop.eup %5334 }
 0xe90   :  { %v949_v43 = vmul.f32 %v5335_v41, %v947_v40  ;;  %v5337_v46 = vpop.eup %5336  ;;  %vm954_vm7 = vweird.f32 %v5335_v41 }
 0xe91   :  { %v984_v47 = vadd.f32 1.0, %v5337_v46  ;;  %vm955_vm10 = vmor %vm953_vm8, %vm954_vm7 }
 0xe92   :  { %v950_v44 = vsub.f32 1.0, %v949_v43 }
 0xe93   :  { %5338 = vrcp.f32 %v984_v47  ;;  %v996_v11 = vand.u32 2147483648, %v984_v47  ;;  %vm990_vm13 = vweird.f32 %v984_v47  ;;  %v994_v16 = vand.u32 2147483647, %v984_v47 }
 0xe94   :  { %v951_v45 = vmul.f32 %v5335_v41, %v950_v44 }
 0xe95   :  { %v997_v22 = vor.u32 1.1754944e-38, %v996_v11  ;;  %vm995_vm15 = vcmp.eq.f32.partialorder %v994_v16, 8.507059e+37 }
 0xe96   :  { %v952_v51 = vadd.f32 %v5335_v41, %v951_v45 }
 0xe98   :  { %v956_v55 = vsel %vm955_vm10, %v5335_v41, %v952_v51  ;;  %vm1181_vm10 = vcmask 1041408  }
 0xe99   :  { %v961_v62 = vsel %vm958_vm11, %v960_v58, %v956_v55  ;;  %v5339_v4 = vpop.eup %5338  ;;  %vm1183_vm11 = vcmask 1043456  }
 0xe9a   :  { %v986_v5 = vmul.f32 %v5339_v4, %v984_v47  ;;  %vm991_vm12 = vweird.f32 %v5339_v4  ;;  %v964_v17 = vmul.f32 %v961_v62, %v6146_v49 }
 0xe9b   :  { %vm992_vm14 = vmor %vm990_vm13, %vm991_vm12  ;;  %vm1185_vm12 = vcmask 1045504  }
 0xe9c   :  { %v987_v9 = vsub.f32 1.0, %v986_v5 }
 0xe9e   :  { %v988_v10 = vmul.f32 %v5339_v4, %v987_v9 }
 0xea0   :  { %v989_v56 = vadd.f32 %v5339_v4, %v988_v10 }
 0xea2   :  { %v993_v20 = vsel %vm992_vm14, %v5339_v4, %v989_v56 }
 0xea3   :  { %v998_v18 = vsel %vm995_vm15, %v997_v22, %v993_v20 }
 0xea4   :  { %v1001_v32 = vmul.f32 %v998_v18, %v6151_v28 }
 0xedf   :  { %v967_v60 = vpop.permute.xlu2 %966 }
 0xee0   :  { %v969_v0 = vmul.f32 %v967_v60, %v961_v62 }
 0xee2   :  { %971 = vrot.lane.b32.xlu1 %v969_v0, %s5785_s13 }
 0xef8   :  { %v1004_v23 = vpop.permute.xlu0 %1003 }
 0xef9   :  { %v1006_v19 = vmul.f32 %v1004_v23, %v998_v18 }
 0xefb   :  { %1008 = vrot.lane.b32.xlu2 %v1006_v19, %s5785_s13 }
 0xf54   :  { %v972_v7 = vpop.permute.xlu1 %971 }
 0xf55   :  { %v1009_v8 = vpop.permute.xlu2 %1008  ;;  %v6174_v12 = vadd.f32 %v972_v7, %v964_v17 }
 0xf56   :  { %v6176_v13 = vadd.f32 %v1009_v8, %v1001_v32 }
 0xf57   :  { %5340 = vtanh.f32 %v6174_v12 }
 0xf58   :  { %5342 = vtanh.f32 %v6176_v13 }
 0xf5d   :  { %v5341_v33 = vpop.eup %5340 }
 0xf5e   :  { %v5343_v34 = vpop.eup %5342  ;;  %977 = vrot.lane.b32.xlu0 %v5341_v33, %s5784_s0 }
 0xf5f   :  { %1014 = vrot.lane.b32.xlu1 %v5343_v34, %s5784_s0 }
 0xfd0   :  { %v978_v38 = vpop.permute.xlu0 %977 }
 0xfd1   :  { %v1015_v49 = vpop.permute.xlu1 %1014  ;;  %v980_v48 = vmul.f32 %v978_v38, %v961_v62 }
 0xfd2   :  { %v1017_v28 = vmul.f32 %v1015_v49, %v998_v18 }
 0xfd3   :  { %1019 = vrot.lane.b32.xlu2 %v980_v48, %s5785_s13 }
 0xfd4   :  { %1023 = vrot.lane.b32.xlu0 %v1017_v28, %s5784_s0 }
0x102d   :  { %v6184_v57 = vpop.permute.xlu2 %1019 }
0x1046   :  { %v6186_v6 = vpop.permute.xlu0 %1023 }
0x1047   :  { %v1026_v50 = vsel %vm312_vm9, %v6184_v57, %v6186_v6 }
0x1048   :  { %v1027_v61 = vpack.c.bf16 %v1026_v50, %v1026_v50 }
0x104a   :  { %4812 = vmatmul.msk.bf16.vlgmr.msra.gmra.mxu0 %vm108_vm0, %v1027_v61  ;;  %4813 = vmatmul.msk.bf16.vlgmr.msra.gmra.mxu1 %vm108_vm0, %v1027_v61 }
0x10c7   :  { %v1040_v2 = vpop.f32.mrf.mxu0  ;;  %v1053_v36 = vpop.f32.mrf.mxu1 }
0x10c8   :  { %v1059_v37 = vadd.f32 %v1057_v35, %v1040_v2  ;;  %v1060_v39 = vadd.f32 %v1053_v36, %v5969_v59 }
0x10ca   :  { %5344 = vtanh.f32 %v1059_v37  ;;  %v4815_v44 = vmul.f32 -1.442695, %v1060_v39  ;;  %v4814_v47 = vmul.f32 -1.442695, %v1059_v37  ;;  %v4852_v37 = vld [vmem:[%s7508_s1 + $0x78] sm:$0xf0] }
0x10cb   :  { %5346 = vtanh.f32 %v1060_v39  ;;  %v4850_v39 = vld [vmem:[%s7508_s1 + $0x70] sm:$0xf] }
0x10cc   :  { %5348 = vpow2.f32 %v4815_v44 }
0x10cf   :  { %v1042_v40 = vpop.f32.mrf.mxu0  ;;  %v1055_v41 = vpop.f32.mrf.mxu1 }
0x10d0   :  { %v5345_v42 = vpop.eup %5344  ;;  %v5178_v41 = vld [vmem:[%s7508_s1 + $0x74] sm:$0xf0] }
0x10d1   :  { %v5347_v43 = vpop.eup %5346  ;;  %1083 = vrot.lane.b32.xlu1 %v5345_v42, %s5784_s0  ;;  %v5175_v42 = vld [vmem:[%s7508_s1 + $0x64] sm:$0xf]  ;;  %v4851_v44 = vor.u32 %v5178_v41, %v4850_v39 }
0x10d2   :  { %1120 = vrot.lane.b32.xlu2 %v5347_v43, %s5784_s0  ;;  %v5349_v45 = vpop.eup %5348  ;;  %v4844_v43 = vld [vmem:[%s7508_s1 + $0x68] sm:$0xf0] }
0x10d3   :  { %v1101_v46 = vadd.f32 1.0, %v5349_v45  ;;  %v4842_v45 = vld [vmem:[%s7508_s1 + $0x60] sm:$0xf]  ;;  %1253 = vmatpush.bf16.msra.mxu2 %v4851_v44 }
0x10d5   :  { %5350 = vrcp.f32 %v1101_v46  ;;  %v1113_v60 = vand.u32 2147483648, %v1101_v46  ;;  %vm1107_vm2 = vweird.f32 %v1101_v46  ;;  %v1111_v62 = vand.u32 2147483647, %v1101_v46 }
0x10d6   :  { %5352 = vpow2.f32 %v4814_v47  ;;  %v5173_v47 = vld [vmem:[%s7508_s1 + $0x54] sm:$0xf] }
0x10d7   :  { %v1114_v4 = vor.u32 1.1754944e-38, %v1113_v60  ;;  %vm1112_vm4 = vcmp.eq.f32.partialorder %v1111_v62, 8.507059e+37 }
0x10db   :  { %v5351_v30 = vpop.eup %5350 }
0x10dc   :  { %v1103_v51 = vmul.f32 %v5351_v30, %v1101_v46  ;;  %v5353_v53 = vpop.eup %5352  ;;  %vm1108_vm1 = vweird.f32 %v5351_v30  ;;  %v5176_v46 = vld [vmem:[%s7508_s1 + $0x64] sm:$0xf0] }
0x10dd   :  { %v1064_v55 = vadd.f32 1.0, %v5353_v53  ;;  %vm1109_vm3 = vmor %vm1107_vm2, %vm1108_vm1  ;;  %v4884_v53 = vld [vmem:[#allocation2 + $0x70] sm:$0xf] }
0x10de   :  { %v1104_v59 = vsub.f32 1.0, %v1103_v51  ;;  %v4843_v51 = vor.u32 %v5176_v46, %v4842_v45  ;;  %v1157_v45 = vsel %vm312_vm9, %v6064_v26, %v6159_v25 }
0x10df   :  { %5354 = vrcp.f32 %v1064_v55  ;;  %v1076_v23 = vand.u32 2147483648, %v1064_v55  ;;  %vm1070_vm6 = vweird.f32 %v1064_v55  ;;  %v1074_v18 = vand.u32 2147483647, %v1064_v55 }
0x10e0   :  { %v1105_v54 = vmul.f32 %v5351_v30, %v1104_v59  ;;  %v4836_v59 = vld [vmem:[%s7508_s1 + $0x58] sm:$0xf0]  ;;  %1254 = vmatpush.bf16.msra.mxu2 %v4843_v51  ;;  %v1167_v26 = vrot.slane %v1157_v45, 4 }
0x10e1   :  { %v1077_v17 = vor.u32 1.1754944e-38, %v1076_v23  ;;  %vm1075_vm8 = vcmp.eq.f32.partialorder %v1074_v18, 8.507059e+37  ;;  %v4839_v62 = vor.u32 %v5173_v47, %v4836_v59  ;;  %v5184_v23 = vld [vmem:[#allocation2 + $0x64] sm:$0xf0] }
0x10e2   :  { %v1106_v58 = vadd.f32 %v5351_v30, %v1105_v54  ;;  %v5186_v54 = vld [vmem:[#allocation2 + $0x74] sm:$0xf0] }
0x10e3   :  { %v6247_v60 = vor.u32 %v5186_v54, %v4884_v53 }
0x10e4   :  { %v1110_v0 = vsel %vm1109_vm3, %v5351_v30, %v1106_v58  ;;  %v4847_v30 = vor.u32 %v5175_v42, %v4844_v43  ;;  %v5174_v58 = vld [vmem:[%s7508_s1 + $0x54] sm:$0xf0]  ;;  %v1156_v42 = vsel %vm312_vm9, %v6031_v15, %v6186_v6  ;;  %v1160_v43 = vsel %vm312_vm9, %v6157_v21, %v6066_v27 }
0x10e5   :  { %v1115_v9 = vsel %vm1112_vm4, %v1114_v4, %v1110_v0  ;;  %v5355_v10 = vpop.eup %5354  ;;  %1335 = vmatpush.bf16.msrb.mxu0 %v6247_v60  ;;  %v5185_v4 = vld [vmem:[#allocation2 + $0x74] sm:$0xf]  ;;  %v1161_v15 = vsel %vm312_vm9, %v6184_v57, %v6029_v14  ;;  %v1164_v6 = vrot.slane %v1156_v42, 6  ;;  %v1173_v27 = vrot.slane %v1160_v43, 6 }
0x10e6   :  { %v1066_v11 = vmul.f32 %v5355_v10, %v1064_v55  ;;  %vm1071_vm5 = vweird.f32 %v5355_v10  ;;  %v1118_v33 = vmul.f32 %v1115_v9, %v6176_v13  ;;  %v4834_v55 = vld [vmem:[%s7508_s1 + $0x50] sm:$0xf]  ;;  %v1176_v25 = vrot.slane %v1161_v15, 4 }
0x10e7   :  { %vm1072_vm7 = vmor %vm1070_vm6, %vm1071_vm5  ;;  %v4835_v0 = vor.u32 %v5174_v58, %v4834_v55  ;;  %v1159_v14 = vsel %vm312_vm9, %v6132_v31, %v6101_v63  ;;  %v5749_v58 = vld [vmem:[%s7510_s3] sm:$0xff] }
0x10e8   :  { %v1067_v16 = vsub.f32 1.0, %v1066_v11  ;;  %v4826_v11 = vld [vmem:[%s7508_s1 + $0x40] sm:$0xf] }
0x10e9   :  { %1255 = vmatpush.bf16.msra.mxu2 %v4835_v0  ;;  %v1201_v0 = vperm.slane %v5749_v58, 5 }
0x10ea   :  { %v1068_v20 = vmul.f32 %v5355_v10, %v1067_v16 }
0x10ec   :  { %v1069_v22 = vadd.f32 %v5355_v10, %v1068_v20  ;;  %v5172_v20 = vld [vmem:[%s7508_s1 + $0x44] sm:$0xf0] }
0x10ed   :  { %v4827_v18 = vor.u32 %v5172_v20, %v4826_v11 }
0x10ee   :  { %v1073_v19 = vsel %vm1072_vm7, %v5355_v10, %v1069_v22  ;;  %v5171_v10 = vld [vmem:[%s7508_s1 + $0x44] sm:$0xf]  ;;  %v4876_v22 = vld [vmem:[#allocation2 + $0x60] sm:$0xf] }
0x10ef   :  { %v1078_v7 = vsel %vm1075_vm8, %v1077_v17, %v1073_v19  ;;  %v6265_v19 = vor.u32 %v5184_v23, %v4876_v22  ;;  %v5183_v17 = vld [vmem:[#allocation2 + $0x64] sm:$0xf]  ;;  %1256 = vmatpush.bf16.msra.mxu2 %v4827_v18 }
0x10f0   :  { %v1081_v48 = vmul.f32 %v1078_v7, %v6174_v12  ;;  %v5177_v12 = vld [vmem:[%s7508_s1 + $0x74] sm:$0xf] }
0x10f1   :  { %v4855_v40 = vor.u32 %v5177_v12, %v4852_v37  ;;  %1336 = vmatpush.bf16.msrb.mxu0 %v6265_v19 }
0x10f3   :  { %1267 = vmatpush.bf16.msra.mxu3 %v4855_v40  ;;  %1460 = vmatpush.bf16.msrb.mxu2 %v6247_v60  ;;  %v1287_v40 = vrot.slane %v5921_v52, 1 }
0x10f7   :  { %1268 = vmatpush.bf16.msra.mxu3 %v4847_v30  ;;  %1461 = vmatpush.bf16.msrb.mxu2 %v6265_v19 }
0x10fb   :  { %1269 = vmatpush.bf16.msra.mxu3 %v4839_v62  ;;  %v1200_v62 = vperm.slane %v5749_v58, 1 }
0x112c   :  { %v1121_v5 = vpop.permute.xlu2 %1120 }
0x112d   :  { %v1123_v56 = vmul.f32 %v1121_v5, %v1115_v9  ;;  %v4886_v5 = vld [vmem:[#allocation2 + $0x78] sm:$0xf0] }
0x112f   :  { %1125 = vrot.lane.b32.xlu1 %v1123_v56, %s5785_s13  ;;  %v4828_v56 = vld [vmem:[%s7508_s1 + $0x48] sm:$0xf0] }
0x1130   :  { %v4831_v16 = vor.u32 %v5171_v10, %v4828_v56 }
0x1132   :  { %1270 = vmatpush.bf16.msra.mxu3 %v4831_v16 }
0x1143   :  { %v1084_v32 = vpop.permute.xlu1 %1083 }
0x1144   :  { %v1086_v8 = vmul.f32 %v1084_v32, %v1078_v7  ;;  %v4878_v32 = vld [vmem:[#allocation2 + $0x68] sm:$0xf0] }
0x1146   :  { %1088 = vrot.lane.b32.xlu0 %v1086_v8, %s5785_s13  ;;  %v4868_v8 = vld [vmem:[#allocation2 + $0x50] sm:$0xf] }
0x11a1   :  { %v1126_v34 = vpop.permute.xlu1 %1125 }
0x11a2   :  { %v6200_v38 = vadd.f32 %v1126_v34, %v1118_v33  ;;  %v5182_v33 = vld [vmem:[#allocation2 + $0x54] sm:$0xf0] }
0x11a3   :  { %v6271_v34 = vor.u32 %v5182_v33, %v4868_v8 }
0x11a4   :  { %5356 = vtanh.f32 %v6200_v38 }
0x11a5   :  { %1337 = vmatpush.bf16.msrb.mxu0 %v6271_v34  ;;  %1462 = vmatpush.bf16.msrb.mxu2 %v6271_v34 }
0x11aa   :  { %v5357_v49 = vpop.eup %5356 }
0x11ab   :  { %1131 = vrot.lane.b32.xlu0 %v5357_v49, %s5784_s0  ;;  %v5181_v49 = vld [vmem:[#allocation2 + $0x54] sm:$0xf] }
0x11b8   :  { %v1089_v28 = vpop.permute.xlu0 %1088 }
0x11b9   :  { %v6205_v50 = vadd.f32 %v1089_v28, %v1081_v48  ;;  %v4870_v48 = vld [vmem:[#allocation2 + $0x58] sm:$0xf0]  ;;  %v4860_v28 = vld [vmem:[#allocation2 + $0x40] sm:$0xf] }
0x11bb   :  { %5358 = vtanh.f32 %v6205_v50 }
0x11c1   :  { %v5359_v61 = vpop.eup %5358 }
0x11c2   :  { %1094 = vrot.lane.b32.xlu2 %v5359_v61, %s5784_s0  ;;  %v6274_v61 = vor.u32 %v5181_v49, %v4870_v48 }
0x121c   :  { %v1095_v35 = vpop.permute.xlu2 %1094 }
0x121d   :  { %v1132_v13 = vpop.permute.xlu0 %1131  ;;  %v1097_v2 = vmul.f32 %v1095_v35, %v1078_v7  ;;  %v6267_v7 = vor.u32 %v5183_v17, %v4878_v32  ;;  %v5180_v35 = vld [vmem:[#allocation2 + $0x44] sm:$0xf0] }
0x121e   :  { %v1134_v36 = vmul.f32 %v1132_v13, %v1115_v9  ;;  %v6250_v9 = vor.u32 %v5185_v4, %v4886_v5  ;;  %v5179_v13 = vld [vmem:[#allocation2 + $0x44] sm:$0xf]  ;;  %v6284_v37 = vor.u32 %v5180_v35, %v4860_v28  ;;  %v6366_v4 = vperm.slane %v1200_v62, 1 }
0x121f   :  { %1136 = vrot.lane.b32.xlu1 %v1097_v2, %s5785_s13  ;;  %v4862_v2 = vld [vmem:[#allocation2 + $0x48] sm:$0xf0]  ;;  %v1205_v5 = vperm.slane %v1201_v0, 1 }
0x1220   :  { %1140 = vrot.lane.b32.xlu2 %v1134_v36, %s5784_s0  ;;  %1348 = vmatpush.bf16.msrb.mxu1 %v6250_v9  ;;  %v6280_v36 = vld [vmem:[%s7511_s4] sm:$0xff]  ;;  %v6287_v39 = vor.u32 %v5179_v13, %v4862_v2 }
0x1221   :  { %1473 = vmatpush.bf16.msrb.mxu3 %v6250_v9  ;;  %v1382_v12 = vrot.slane %v6280_v36, 2  ;;  %1338 = vmatpush.bf16.msrb.mxu0 %v6284_v37 }
0x1222   :  { %1463 = vmatpush.bf16.msrb.mxu2 %v6284_v37 }
0x1224   :  { %1349 = vmatpush.bf16.msrb.mxu1 %v6267_v7  ;;  %4890 = vmatmul.msk.bf16.vlgmr.msrb.gmra.mxu0 %vm108_vm0, %v1287_v40 }
0x1225   :  { %1474 = vmatpush.bf16.msrb.mxu3 %v6267_v7  ;;  %1580 = vmatpush.bf16.msra.mxu0 %v6247_v60 }
0x1228   :  { %1350 = vmatpush.bf16.msrb.mxu1 %v6274_v61  ;;  %1383 = vrot.lane.b32.xlu2 %v1382_v12, %s5783_s10 }
0x1229   :  { %1475 = vmatpush.bf16.msrb.mxu3 %v6274_v61  ;;  %1581 = vmatpush.bf16.msra.mxu0 %v6265_v19 }
0x122c   :  { %1351 = vmatpush.bf16.msrb.mxu1 %v6287_v39 }
0x122d   :  { %1476 = vmatpush.bf16.msrb.mxu3 %v6287_v39  ;;  %1582 = vmatpush.bf16.msra.mxu0 %v6271_v34 }
0x122f   :  { %4891 = vmatmul.msk.bf16.vlgmr.msrb.gmra.mxu1 %vm108_vm0, %v1287_v40 }
0x1230   :  { %1593 = vmatpush.bf16.msra.mxu1 %v6250_v9 }
0x1231   :  { %1583 = vmatpush.bf16.msra.mxu0 %v6284_v37 }
0x1234   :  { %1594 = vmatpush.bf16.msra.mxu1 %v6267_v7 }
0x1235   :  { %1816 = vmatpush.bf16.msrb.mxu0 %v6247_v60 }
0x1238   :  { %1595 = vmatpush.bf16.msra.mxu1 %v6274_v61 }
0x1239   :  { %1817 = vmatpush.bf16.msrb.mxu0 %v6265_v19 }
0x123c   :  { %1596 = vmatpush.bf16.msra.mxu1 %v6287_v39 }
0x123d   :  { %1818 = vmatpush.bf16.msrb.mxu0 %v6271_v34 }
0x1240   :  { %1829 = vmatpush.bf16.msrb.mxu1 %v6250_v9 }
0x1241   :  { %1819 = vmatpush.bf16.msrb.mxu0 %v6284_v37 }
0x1244   :  { %1830 = vmatpush.bf16.msrb.mxu1 %v6267_v7 }
0x1248   :  { %1831 = vmatpush.bf16.msrb.mxu1 %v6274_v61 }
0x124c   :  { %1832 = vmatpush.bf16.msrb.mxu1 %v6287_v39 }
0x127a   :  { %v6308_v41 = vpop.permute.xlu2 %1140 }
0x127b   :  { %v1155_v44 = vsel %vm312_vm9, %v5992_v1, %v6308_v41  ;;  %v1158_v1 = vsel %vm312_vm9, %v6099_v24, %v6130_v29  ;;  %v1187_v24 = vsel %vm1181_vm10, %v1159_v14, %v1173_v27 }
0x127c   :  { %v1182_v21 = vsel %vm1181_vm10, %v1155_v44, %v1164_v6  ;;  %v1170_v47 = vrot.slane %v1158_v1, 2  ;;  %v1188_v51 = vsel %vm1183_vm11, %v1187_v24, %v1176_v25 }
0x127d   :  { %v1184_v57 = vsel %vm1183_vm11, %v1182_v21, %v1167_v26 }
0x127e   :  { %v1186_v59 = vsel %vm1185_vm12, %v1184_v57, %v1170_v47 }
0x1291   :  { %v6334_v46 = vpop.permute.xlu1 %1136 }
0x1292   :  { %v1162_v30 = vsel %vm312_vm9, %v6334_v46, %v5994_v3 }
0x1293   :  { %v1179_v29 = vrot.slane %v1162_v30, 2 }
0x1295   :  { %v1189_v53 = vsel %vm1185_vm12, %v1188_v51, %v1179_v29 }
0x1296   :  { %v1190_v63 = vpack.c.bf16 %v1189_v53, %v1186_v59 }
0x1298   :  { %4856 = vmatmul.msk.bf16.vlgmr.msra.gmra.mxu2 %vm108_vm0, %v1190_v63  ;;  %4857 = vmatmul.msk.bf16.vlgmr.msra.gmra.mxu3 %vm108_vm0, %v1190_v63  ;;  %v1384_v63 = vpop.permute.xlu2 %1383 }
0x1299   :  { %1712 = vmatpush.bf16.msra.mxu3 %v6250_v9  ;;  %1699 = vmatpush.bf16.msra.mxu2 %v6247_v60 }
0x129d   :  { %1713 = vmatpush.bf16.msra.mxu3 %v6267_v7  ;;  %1700 = vmatpush.bf16.msra.mxu2 %v6265_v19 }
0x12a1   :  { %1714 = vmatpush.bf16.msra.mxu3 %v6274_v61  ;;  %1701 = vmatpush.bf16.msra.mxu2 %v6271_v34  ;;  %v1340_v3 = vpop.f32.mrf.mxu0 }
0x12a5   :  { %1715 = vmatpush.bf16.msra.mxu3 %v6287_v39  ;;  %1702 = vmatpush.bf16.msra.mxu2 %v6284_v37 }
0x12a9   :  { %v1342_v54 = vpop.f32.mrf.mxu0 }
0x12ac   :  { %v1353_v31 = vpop.f32.mrf.mxu1 }
0x12b4   :  { %v1355_v55 = vpop.f32.mrf.mxu1 }
0x131b   :  { %v1258_v10 = vpop.f32.mrf.mxu2  ;;  %v1272_v56 = vpop.f32.mrf.mxu3 }
0x131c   :  { %v6369_v11 = vadd.f32 %v1258_v10, %v6366_v4  ;;  %v6371_v16 = vadd.f32 %v1272_v56, %v1205_v5 }
0x131e   :  { %v1357_v20 = vadd.f32 %v1340_v3, %v6369_v11 }
0x1320   :  { %5360 = vtanh.f32 %v1357_v20  ;;  %v4892_v33 = vmul.f32 -1.442695, %v1357_v20 }
0x1323   :  { %v1274_v22 = vpop.f32.mrf.mxu3 }
0x1324   :  { %v6374_v23 = vadd.f32 %v1274_v22, %v1205_v5 }
0x1326   :  { %v5361_v18 = vpop.eup %5360  ;;  %v1359_v17 = vrot.slane %v6374_v23, 6 }
0x1327   :  { %1388 = vrot.lane.b32.xlu0 %v5361_v18, %s5784_s0 }
0x1328   :  { %v1361_v32 = vadd.f32 %v1359_v17, %v1353_v31 }
0x132a   :  { %5362 = vtanh.f32 %v1361_v32  ;;  %v4893_v48 = vmul.f32 -1.442695, %v1361_v32 }
0x132b   :  { %5364 = vpow2.f32 %v4892_v33 }
0x132c   :  { %5366 = vpow2.f32 %v4893_v48  ;;  %v1483_v48 = vrot.slane %v6369_v11, 2 }
0x132f   :  { %1423 = vrot.lane.b32.xlu0 %v1382_v12, %s5784_s0 }
0x1330   :  { %v5363_v8 = vpop.eup %5362 }
0x1331   :  { %1428 = vrot.lane.b32.xlu1 %v5363_v8, %s5784_s0  ;;  %v5365_v49 = vpop.eup %5364 }
0x1332   :  { %v1365_v28 = vadd.f32 1.0, %v5365_v49  ;;  %v5367_v35 = vpop.eup %5366  ;;  %v6411_v49 = vpop.f32.mrf.mxu2 }
0x1333   :  { %v1406_v2 = vadd.f32 1.0, %v5367_v35 }
0x1334   :  { %5368 = vrcp.f32 %v1365_v28  ;;  %v1377_v45 = vand.u32 2147483648, %v1365_v28  ;;  %vm1371_vm14 = vweird.f32 %v1365_v28  ;;  %v1375_v15 = vand.u32 2147483647, %v1365_v28 }
0x1335   :  { %5370 = vrcp.f32 %v1406_v2  ;;  %v1418_v30 = vand.u32 2147483648, %v1406_v2  ;;  %vm1412_vm3 = vweird.f32 %v1406_v2  ;;  %v1416_v47 = vand.u32 2147483647, %v1406_v2 }
0x1336   :  { %v1378_v21 = vor.u32 1.1754944e-38, %v1377_v45  ;;  %vm1376_vm1 = vcmp.eq.f32.partialorder %v1375_v15, 8.507059e+37 }
0x1337   :  { %v1419_v29 = vor.u32 1.1754944e-38, %v1418_v30  ;;  %vm1417_vm5 = vcmp.eq.f32.partialorder %v1416_v47, 8.507059e+37 }
0x133a   :  { %v5369_v13 = vpop.eup %5368 }
0x133b   :  { %v1367_v40 = vmul.f32 %v5369_v13, %v1365_v28  ;;  %v5371_v43 = vpop.eup %5370  ;;  %vm1372_vm13 = vweird.f32 %v5369_v13  ;;  %v1486_v28 = vrot.slane %v6374_v23, 4 }
0x133c   :  { %v1408_v36 = vmul.f32 %v5371_v43, %v1406_v2  ;;  %vm1373_vm15 = vmor %vm1371_vm14, %vm1372_vm13  ;;  %vm1413_vm2 = vweird.f32 %v5371_v43 }
0x133d   :  { %v1368_v42 = vsub.f32 1.0, %v1367_v40  ;;  %vm1414_vm4 = vmor %vm1412_vm3, %vm1413_vm2 }
0x133e   :  { %v1409_v6 = vsub.f32 1.0, %v1408_v36 }
0x133f   :  { %v1369_v44 = vmul.f32 %v5369_v13, %v1368_v42 }
0x1340   :  { %v1410_v1 = vmul.f32 %v5371_v43, %v1409_v6 }
0x1341   :  { %v1370_v12 = vadd.f32 %v5369_v13, %v1369_v44 }
0x1342   :  { %v1411_v57 = vadd.f32 %v5371_v43, %v1410_v1 }
0x1343   :  { %v1374_v27 = vsel %vm1373_vm15, %v5369_v13, %v1370_v12 }
0x1344   :  { %v1379_v26 = vsel %vm1376_vm1, %v1378_v21, %v1374_v27  ;;  %v1415_v24 = vsel %vm1414_vm4, %v5371_v43, %v1411_v57 }
0x1345   :  { %v1420_v51 = vsel %vm1417_vm5, %v1419_v29, %v1415_v24  ;;  %v1386_v62 = vmul.f32 %v1384_v63, %v1379_v26 }
0x1399   :  { %v1389_v25 = vpop.permute.xlu0 %1388 }
0x139a   :  { %v1391_v14 = vmul.f32 %v1389_v25, %v1379_v26 }
0x139c   :  { %1393 = vrot.lane.b32.xlu1 %v1391_v14, %s5785_s13 }
0x13a1   :  { %v1424_v3 = vpop.permute.xlu0 %1423 }
0x13a2   :  { %v1426_v31 = vmul.f32 %v1424_v3, %v1420_v51 }
0x13a3   :  { %v1429_v59 = vpop.permute.xlu1 %1428 }
0x13a4   :  { %v1431_v53 = vmul.f32 %v1429_v59, %v1420_v51 }
0x13a6   :  { %1433 = vrot.lane.b32.xlu2 %v1431_v53, %s5785_s13 }
0x1400   :  { %v1434_v54 = vpop.permute.xlu2 %1433 }
0x1401   :  { %v6384_v55 = vadd.f32 %v1434_v54, %v1426_v31 }
0x1403   :  { %5372 = vtanh.f32 %v6384_v55 }
0x1409   :  { %v5373_v58 = vpop.eup %5372 }
0x140a   :  { %1439 = vrot.lane.b32.xlu1 %v5373_v58, %s5784_s0 }
0x140e   :  { %v1394_v0 = vpop.permute.xlu1 %1393 }
0x140f   :  { %v6388_v5 = vadd.f32 %v1394_v0, %v1386_v62 }
0x1411   :  { %5374 = vtanh.f32 %v6388_v5 }
0x1417   :  { %v5375_v10 = vpop.eup %5374 }
0x1418   :  { %1399 = vrot.lane.b32.xlu0 %v5375_v10, %s5784_s0 }
0x147c   :  { %v1440_v56 = vpop.permute.xlu1 %1439 }
0x147d   :  { %v1442_v20 = vmul.f32 %v1440_v56, %v1420_v51 }
0x147f   :  { %1448 = vrot.lane.b32.xlu0 %v1442_v20, %s5784_s0 }
0x148a   :  { %v1400_v22 = vpop.permute.xlu0 %1399 }
0x148b   :  { %v1402_v18 = vmul.f32 %v1400_v22, %v1379_v26 }
0x148d   :  { %1444 = vrot.lane.b32.xlu2 %v1402_v18, %s5785_s13 }
0x14e7   :  { %v6394_v17 = vpop.permute.xlu2 %1444 }
0x14f1   :  { %v6396_v32 = vpop.permute.xlu0 %1448 }
0x14f2   :  { %v1451_v8 = vsel %vm312_vm9, %v6394_v17, %v6396_v32 }
0x14f3   :  { %v1452_v33 = vpack.c.bf16 %v1451_v8, %v1451_v8 }
0x14f5   :  { %4894 = vmatmul.msk.bf16.vlgmr.msrb.gmra.mxu2 %vm108_vm0, %v1452_v33  ;;  %4895 = vmatmul.msk.bf16.vlgmr.msrb.gmra.mxu3 %vm108_vm0, %v1452_v33 }
0x14f6   :  { %1934 = vmatpush.bf16.msrb.mxu2 %v6247_v60  ;;  %1947 = vmatpush.bf16.msrb.mxu3 %v6250_v9 }
0x14fa   :  { %1935 = vmatpush.bf16.msrb.mxu2 %v6265_v19  ;;  %1948 = vmatpush.bf16.msrb.mxu3 %v6267_v7 }
0x14fe   :  { %1936 = vmatpush.bf16.msrb.mxu2 %v6271_v34  ;;  %1949 = vmatpush.bf16.msrb.mxu3 %v6274_v61 }
0x1502   :  { %1937 = vmatpush.bf16.msrb.mxu2 %v6284_v37  ;;  %1950 = vmatpush.bf16.msrb.mxu3 %v6287_v39 }
0x1578   :  { %v1465_v35 = vpop.f32.mrf.mxu2  ;;  %v1478_v13 = vpop.f32.mrf.mxu3 }
0x1579   :  { %v1485_v2 = vadd.f32 %v1483_v48, %v1465_v35  ;;  %v1488_v40 = vadd.f32 %v1486_v28, %v1478_v13 }
0x157b   :  { %5376 = vtanh.f32 %v1485_v2  ;;  %v4897_v12 = vmul.f32 -1.442695, %v1488_v40  ;;  %v4896_v27 = vmul.f32 -1.442695, %v1485_v2 }
0x157c   :  { %5378 = vtanh.f32 %v1488_v40 }
0x157d   :  { %5380 = vpow2.f32 %v4897_v12 }
0x1580   :  { %v1467_v42 = vpop.f32.mrf.mxu2  ;;  %v1480_v43 = vpop.f32.mrf.mxu3 }
0x1581   :  { %v5377_v44 = vpop.eup %5376 }
0x1582   :  { %v5379_v36 = vpop.eup %5378  ;;  %1511 = vrot.lane.b32.xlu1 %v5377_v44, %s5784_s0 }
0x1583   :  { %1548 = vrot.lane.b32.xlu2 %v5379_v36, %s5784_s0  ;;  %v5381_v45 = vpop.eup %5380 }
0x1584   :  { %v1529_v15 = vadd.f32 1.0, %v5381_v45 }
0x1586   :  { %5382 = vrcp.f32 %v1529_v15  ;;  %v1541_v30 = vand.u32 2147483648, %v1529_v15  ;;  %vm1535_vm7 = vweird.f32 %v1529_v15  ;;  %v1539_v47 = vand.u32 2147483647, %v1529_v15 }
0x1587   :  { %5384 = vpow2.f32 %v4896_v27 }
0x1588   :  { %v1542_v29 = vor.u32 1.1754944e-38, %v1541_v30  ;;  %vm1540_vm13 = vcmp.eq.f32.partialorder %v1539_v47, 8.507059e+37 }
0x158c   :  { %v5383_v6 = vpop.eup %5382 }
0x158d   :  { %v1531_v21 = vmul.f32 %v5383_v6, %v1529_v15  ;;  %v5385_v26 = vpop.eup %5384  ;;  %vm1536_vm6 = vweird.f32 %v5383_v6  ;;  %v1602_v15 = vrot.slane %v6369_v11, 4 }
0x158e   :  { %v1492_v14 = vadd.f32 1.0, %v5385_v26  ;;  %vm1537_vm8 = vmor %vm1535_vm7, %vm1536_vm6 }
0x158f   :  { %v1532_v1 = vsub.f32 1.0, %v1531_v21 }
0x1590   :  { %5386 = vrcp.f32 %v1492_v14  ;;  %v1504_v62 = vand.u32 2147483648, %v1492_v14  ;;  %vm1498_vm15 = vweird.f32 %v1492_v14  ;;  %v1502_v0 = vand.u32 2147483647, %v1492_v14 }
0x1591   :  { %v1533_v25 = vmul.f32 %v5383_v6, %v1532_v1 }
0x1592   :  { %v1505_v56 = vor.u32 1.1754944e-38, %v1504_v62  ;;  %vm1503_vm2 = vcmp.eq.f32.partialorder %v1502_v0, 8.507059e+37 }
0x1593   :  { %v1534_v57 = vadd.f32 %v5383_v6, %v1533_v25 }
0x1595   :  { %v1538_v24 = vsel %vm1537_vm8, %v5383_v6, %v1534_v57  ;;  %v1605_v6 = vrot.slane %v6374_v23, 2 }
0x1596   :  { %v1543_v59 = vsel %vm1540_vm13, %v1542_v29, %v1538_v24  ;;  %v5387_v53 = vpop.eup %5386 }
0x1597   :  { %v1494_v3 = vmul.f32 %v5387_v53, %v1492_v14  ;;  %vm1499_vm14 = vweird.f32 %v5387_v53  ;;  %v1546_v8 = vmul.f32 %v1543_v59, %v6384_v55 }
0x1598   :  { %vm1500_vm1 = vmor %vm1498_vm15, %vm1499_vm14 }
0x1599   :  { %v1495_v31 = vsub.f32 1.0, %v1494_v3 }
0x159b   :  { %v1496_v54 = vmul.f32 %v5387_v53, %v1495_v31 }
0x159d   :  { %v1497_v58 = vadd.f32 %v5387_v53, %v1496_v54 }
0x159f   :  { %v1501_v10 = vsel %vm1500_vm1, %v5387_v53, %v1497_v58 }
0x15a0   :  { %v1506_v22 = vsel %vm1503_vm2, %v1505_v56, %v1501_v10 }
0x15a1   :  { %v1509_v35 = vmul.f32 %v1506_v22, %v6388_v5 }
0x15dd   :  { %v1549_v51 = vpop.permute.xlu2 %1548 }
0x15de   :  { %v1551_v63 = vmul.f32 %v1549_v51, %v1543_v59 }
0x15e0   :  { %1553 = vrot.lane.b32.xlu1 %v1551_v63, %s5785_s13 }
0x15f4   :  { %v1512_v20 = vpop.permute.xlu1 %1511 }
0x15f5   :  { %v1514_v18 = vmul.f32 %v1512_v20, %v1506_v22 }
0x15f7   :  { %1516 = vrot.lane.b32.xlu0 %v1514_v18, %s5785_s13 }
0x1652   :  { %v1554_v33 = vpop.permute.xlu1 %1553 }
0x1653   :  { %v6420_v48 = vadd.f32 %v1554_v33, %v1546_v8 }
0x1655   :  { %5388 = vtanh.f32 %v6420_v48 }
0x165b   :  { %v5389_v28 = vpop.eup %5388 }
0x165c   :  { %1559 = vrot.lane.b32.xlu0 %v5389_v28, %s5784_s0 }
0x1669   :  { %v1517_v13 = vpop.permute.xlu0 %1516 }
0x166a   :  { %v6425_v2 = vadd.f32 %v1517_v13, %v1509_v35 }
0x166c   :  { %5390 = vtanh.f32 %v6425_v2 }
0x1672   :  { %v5391_v40 = vpop.eup %5390 }
0x1673   :  { %1522 = vrot.lane.b32.xlu2 %v5391_v40, %s5784_s0 }
0x16cd   :  { %v1523_v42 = vpop.permute.xlu2 %1522 }
0x16ce   :  { %v1560_v55 = vpop.permute.xlu0 %1559  ;;  %v1525_v43 = vmul.f32 %v1523_v42, %v1506_v22 }
0x16cf   :  { %v1562_v44 = vmul.f32 %v1560_v55, %v1543_v59 }
0x16d0   :  { %1564 = vrot.lane.b32.xlu1 %v1525_v43, %s5785_s13 }
0x16d1   :  { %1568 = vrot.lane.b32.xlu2 %v1562_v44, %s5784_s0 }
0x172b   :  { %v6431_v36 = vpop.permute.xlu2 %1568 }
0x1742   :  { %v6433_v12 = vpop.permute.xlu1 %1564 }
0x1743   :  { %v1571_v5 = vsel %vm312_vm9, %v6433_v12, %v6431_v36 }
0x1744   :  { %v1572_v45 = vpack.c.bf16 %v1571_v5, %v1571_v5 }
0x1746   :  { %4898 = vmatmul.msk.bf16.vlgmr.msra.gmra.mxu0 %vm108_vm0, %v1572_v45  ;;  %4899 = vmatmul.msk.bf16.vlgmr.msra.gmra.mxu1 %vm108_vm0, %v1572_v45 }
0x1747   :  { %2067 = vmatpush.bf16.msra.mxu1 %v6250_v9  ;;  %2054 = vmatpush.bf16.msra.mxu0 %v6247_v60 }
0x174b   :  { %2068 = vmatpush.bf16.msra.mxu1 %v6267_v7  ;;  %2055 = vmatpush.bf16.msra.mxu0 %v6265_v19 }
0x174f   :  { %2069 = vmatpush.bf16.msra.mxu1 %v6274_v61  ;;  %2056 = vmatpush.bf16.msra.mxu0 %v6271_v34 }
0x1753   :  { %2070 = vmatpush.bf16.msra.mxu1 %v6287_v39  ;;  %2057 = vmatpush.bf16.msra.mxu0 %v6284_v37 }
0x17c3   :  { %v1585_v27 = vpop.f32.mrf.mxu0  ;;  %v1598_v21 = vpop.f32.mrf.mxu1 }
0x17c4   :  { %v1604_v1 = vadd.f32 %v1602_v15, %v1585_v27  ;;  %v1607_v26 = vadd.f32 %v1605_v6, %v1598_v21 }
0x17c6   :  { %5392 = vtanh.f32 %v1604_v1  ;;  %v4900_v47 = vmul.f32 -1.442695, %v1604_v1  ;;  %v4901_v24 = vmul.f32 -1.442695, %v1607_v26 }
0x17c7   :  { %5394 = vtanh.f32 %v1607_v26 }
0x17c8   :  { %5396 = vpow2.f32 %v4900_v47 }
0x17c9   :  { %5398 = vpow2.f32 %v4901_v24 }
0x17cb   :  { %v1587_v25 = vpop.f32.mrf.mxu0  ;;  %v1600_v14 = vpop.f32.mrf.mxu1 }
0x17cc   :  { %v5393_v57 = vpop.eup %5392 }
0x17cd   :  { %v5395_v30 = vpop.eup %5394  ;;  %1630 = vrot.lane.b32.xlu0 %v5393_v57, %s5784_s0 }
0x17ce   :  { %1667 = vrot.lane.b32.xlu1 %v5395_v30, %s5784_s0  ;;  %v5397_v29 = vpop.eup %5396 }
0x17cf   :  { %v5399_v51 = vpop.eup %5398  ;;  %v1611_v59 = vadd.f32 1.0, %v5397_v29 }
0x17d0   :  { %v1648_v53 = vadd.f32 1.0, %v5399_v51 }
0x17d1   :  { %5400 = vrcp.f32 %v1611_v59  ;;  %v1623_v22 = vand.u32 2147483648, %v1611_v59  ;;  %vm1617_vm5 = vweird.f32 %v1611_v59  ;;  %v1621_v8 = vand.u32 2147483647, %v1611_v59 }
0x17d2   :  { %5402 = vrcp.f32 %v1648_v53  ;;  %v1660_v18 = vand.u32 2147483648, %v1648_v53  ;;  %vm1654_vm6 = vweird.f32 %v1648_v53  ;;  %v1658_v33 = vand.u32 2147483647, %v1648_v53 }
0x17d3   :  { %v1624_v13 = vor.u32 1.1754944e-38, %v1623_v22  ;;  %vm1622_vm13 = vcmp.eq.f32.partialorder %v1621_v8, 8.507059e+37 }
0x17d4   :  { %v1661_v40 = vor.u32 1.1754944e-38, %v1660_v18  ;;  %vm1659_vm14 = vcmp.eq.f32.partialorder %v1658_v33, 8.507059e+37 }
0x17d7   :  { %v5401_v63 = vpop.eup %5400 }
0x17d8   :  { %v5403_v3 = vpop.eup %5402  ;;  %v1613_v31 = vmul.f32 %v5401_v63, %v1611_v59  ;;  %vm1618_vm3 = vweird.f32 %v5401_v63  ;;  %v1721_v59 = vrot.slane %v6369_v11, 6 }
0x17d9   :  { %v1650_v54 = vmul.f32 %v5403_v3, %v1648_v53  ;;  %vm1655_vm4 = vweird.f32 %v5403_v3  ;;  %vm1619_vm7 = vmor %vm1617_vm5, %vm1618_vm3 }
0x17da   :  { %v1614_v58 = vsub.f32 1.0, %v1613_v31  ;;  %vm1656_vm8 = vmor %vm1654_vm6, %vm1655_vm4 }
0x17db   :  { %v1651_v62 = vsub.f32 1.0, %v1650_v54 }
0x17dc   :  { %v1615_v0 = vmul.f32 %v5401_v63, %v1614_v58 }
0x17dd   :  { %v1652_v10 = vmul.f32 %v5403_v3, %v1651_v62 }
0x17de   :  { %v1616_v56 = vadd.f32 %v5401_v63, %v1615_v0 }
0x17df   :  { %v1653_v20 = vadd.f32 %v5403_v3, %v1652_v10 }
0x17e0   :  { %v1620_v28 = vsel %vm1619_vm7, %v5401_v63, %v1616_v56 }
0x17e1   :  { %v1657_v35 = vsel %vm1656_vm8, %v5403_v3, %v1653_v20  ;;  %v1625_v55 = vsel %vm1622_vm13, %v1624_v13, %v1620_v28 }
0x17e2   :  { %v1662_v44 = vsel %vm1659_vm14, %v1661_v40, %v1657_v35  ;;  %v1628_v15 = vmul.f32 %v1625_v55, %v6425_v2 }
0x17e3   :  { %v1665_v1 = vmul.f32 %v1662_v44, %v6420_v48 }
0x183f   :  { %v1631_v42 = vpop.permute.xlu0 %1630 }
0x1840   :  { %v1668_v43 = vpop.permute.xlu1 %1667  ;;  %v1633_v5 = vmul.f32 %v1631_v42, %v1625_v55 }
0x1841   :  { %v1670_v45 = vmul.f32 %v1668_v43, %v1662_v44 }
0x1842   :  { %1635 = vrot.lane.b32.xlu2 %v1633_v5, %s5785_s13 }
0x1843   :  { %1672 = vrot.lane.b32.xlu0 %v1670_v45, %s5785_s13 }
0x189c   :  { %v1636_v6 = vpop.permute.xlu2 %1635 }
0x189d   :  { %v6455_v27 = vadd.f32 %v1636_v6, %v1628_v15 }
0x189f   :  { %5404 = vtanh.f32 %v6455_v27 }
0x18a5   :  { %v5405_v21 = vpop.eup %5404 }
0x18a6   :  { %1641 = vrot.lane.b32.xlu1 %v5405_v21, %s5784_s0 }
0x18b5   :  { %v1673_v26 = vpop.permute.xlu0 %1672 }
0x18b6   :  { %v6460_v25 = vadd.f32 %v1673_v26, %v1665_v1 }
0x18b8   :  { %5406 = vtanh.f32 %v6460_v25 }
0x18be   :  { %v5407_v14 = vpop.eup %5406 }
0x18bf   :  { %1678 = vrot.lane.b32.xlu2 %v5407_v14, %s5784_s0 }
0x1918   :  { %v1642_v57 = vpop.permute.xlu1 %1641 }
0x1919   :  { %v1679_v2 = vpop.permute.xlu2 %1678  ;;  %v1644_v30 = vmul.f32 %v1642_v57, %v1625_v55 }
0x191a   :  { %v1681_v47 = vmul.f32 %v1679_v2, %v1662_v44 }
0x191b   :  { %1683 = vrot.lane.b32.xlu0 %v1644_v30, %s5785_s13 }
0x191c   :  { %1687 = vrot.lane.b32.xlu1 %v1681_v47, %s5784_s0 }
0x198d   :  { %v6466_v24 = vpop.permute.xlu0 %1683 }
0x198e   :  { %v6468_v29 = vpop.permute.xlu1 %1687 }
0x198f   :  { %v1690_v48 = vsel %vm312_vm9, %v6466_v24, %v6468_v29 }
0x1990   :  { %v1691_v51 = vpack.c.bf16 %v1690_v48, %v1690_v48 }
0x1992   :  { %4902 = vmatmul.msk.bf16.vlgmr.msra.gmra.mxu2 %vm108_vm0, %v1691_v51  ;;  %4903 = vmatmul.msk.bf16.vlgmr.msra.gmra.mxu3 %vm108_vm0, %v1691_v51 }
0x1993   :  { %2173 = vmatpush.bf16.msra.mxu2 %v6247_v60  ;;  %2186 = vmatpush.bf16.msra.mxu3 %v6250_v9 }
0x1997   :  { %2174 = vmatpush.bf16.msra.mxu2 %v6265_v19  ;;  %2187 = vmatpush.bf16.msra.mxu3 %v6267_v7 }
0x199b   :  { %2175 = vmatpush.bf16.msra.mxu2 %v6271_v34  ;;  %2188 = vmatpush.bf16.msra.mxu3 %v6274_v61 }
0x199f   :  { %2176 = vmatpush.bf16.msra.mxu2 %v6284_v37  ;;  %2189 = vmatpush.bf16.msra.mxu3 %v6287_v39 }
0x1a15   :  { %v1704_v53 = vpop.f32.mrf.mxu2  ;;  %v1717_v63 = vpop.f32.mrf.mxu3 }
0x1a16   :  { %v1723_v3 = vadd.f32 %v1721_v59, %v1704_v53  ;;  %v1724_v60 = vadd.f32 %v1717_v63, %v6374_v23 }
0x1a18   :  { %5408 = vtanh.f32 %v1723_v3  ;;  %v4904_v34 = vmul.f32 -1.442695, %v1723_v3  ;;  %v4905_v11 = vmul.f32 -1.442695, %v1724_v60 }
0x1a19   :  { %5410 = vtanh.f32 %v1724_v60 }
0x1a1a   :  { %5412 = vpow2.f32 %v4904_v34 }
0x1a1d   :  { %v1706_v9 = vpop.f32.mrf.mxu2  ;;  %v1719_v19 = vpop.f32.mrf.mxu3 }
0x1a1e   :  { %v5409_v7 = vpop.eup %5408  ;;  %v6512_v9 = vadd.f32 %v6411_v49, %v6366_v4  ;;  %v1840_v19 = vrot.slane %v6371_v16, 6 }
0x1a1f   :  { %v5411_v31 = vpop.eup %5410  ;;  %1747 = vrot.lane.b32.xlu2 %v5409_v7, %s5784_s0 }
0x1a20   :  { %1784 = vrot.lane.b32.xlu0 %v5411_v31, %s5784_s0  ;;  %v5413_v61 = vpop.eup %5412 }
0x1a21   :  { %v1728_v37 = vadd.f32 1.0, %v5413_v61 }
0x1a23   :  { %5414 = vrcp.f32 %v1728_v37  ;;  %v1740_v56 = vand.u32 2147483648, %v1728_v37  ;;  %vm1734_vm1 = vweird.f32 %v1728_v37  ;;  %v1738_v20 = vand.u32 2147483647, %v1728_v37 }
0x1a24   :  { %5416 = vpow2.f32 %v4905_v11 }
0x1a25   :  { %v1741_v18 = vor.u32 1.1754944e-38, %v1740_v56  ;;  %vm1739_vm3 = vcmp.eq.f32.partialorder %v1738_v20, 8.507059e+37 }
0x1a29   :  { %v5415_v39 = vpop.eup %5414 }
0x1a2a   :  { %v1730_v54 = vmul.f32 %v5415_v39, %v1728_v37  ;;  %v5417_v62 = vpop.eup %5416  ;;  %vm1735_vm15 = vweird.f32 %v5415_v39 }
0x1a2b   :  { %v1765_v0 = vadd.f32 1.0, %v5417_v62  ;;  %vm1736_vm2 = vmor %vm1734_vm1, %vm1735_vm15 }
0x1a2c   :  { %v1731_v23 = vsub.f32 1.0, %v1730_v54 }
0x1a2d   :  { %5418 = vrcp.f32 %v1765_v0  ;;  %v1777_v43 = vand.u32 2147483648, %v1765_v0  ;;  %vm1771_vm5 = vweird.f32 %v1765_v0  ;;  %v1775_v44 = vand.u32 2147483647, %v1765_v0 }
0x1a2e   :  { %v1732_v58 = vmul.f32 %v5415_v39, %v1731_v23 }
0x1a2f   :  { %v1778_v45 = vor.u32 1.1754944e-38, %v1777_v43  ;;  %vm1776_vm7 = vcmp.eq.f32.partialorder %v1775_v44, 8.507059e+37 }
0x1a30   :  { %v1733_v10 = vadd.f32 %v5415_v39, %v1732_v58 }
0x1a32   :  { %v1737_v22 = vsel %vm1736_vm2, %v5415_v39, %v1733_v10 }
0x1a33   :  { %v1742_v33 = vsel %vm1739_vm3, %v1741_v18, %v1737_v22  ;;  %v5419_v35 = vpop.eup %5418 }
0x1a34   :  { %v1767_v13 = vmul.f32 %v5419_v35, %v1765_v0  ;;  %vm1772_vm4 = vweird.f32 %v5419_v35  ;;  %v1745_v1 = vmul.f32 %v1742_v33, %v6455_v27 }
0x1a35   :  { %vm1773_vm6 = vmor %vm1771_vm5, %vm1772_vm4 }
0x1a36   :  { %v1768_v40 = vsub.f32 1.0, %v1767_v13 }
0x1a38   :  { %v1769_v42 = vmul.f32 %v5419_v35, %v1768_v40 }
0x1a3a   :  { %v1770_v55 = vadd.f32 %v5419_v35, %v1769_v42 }
0x1a3c   :  { %v1774_v5 = vsel %vm1773_vm6, %v5419_v35, %v1770_v55 }
0x1a3d   :  { %v1779_v6 = vsel %vm1776_vm7, %v1778_v45, %v1774_v5 }
0x1a3e   :  { %v1782_v26 = vmul.f32 %v1779_v6, %v6460_v25 }
0x1a79   :  { %v1748_v8 = vpop.permute.xlu2 %1747 }
0x1a7a   :  { %v1750_v28 = vmul.f32 %v1748_v8, %v1742_v33 }
0x1a7c   :  { %1752 = vrot.lane.b32.xlu1 %v1750_v28, %s5785_s13 }
0x1a92   :  { %v1785_v15 = vpop.permute.xlu0 %1784 }
0x1a93   :  { %v1787_v21 = vmul.f32 %v1785_v15, %v1779_v6 }
0x1a95   :  { %1789 = vrot.lane.b32.xlu2 %v1787_v21, %s5785_s13 }
0x1aee   :  { %v1753_v14 = vpop.permute.xlu1 %1752 }
0x1aef   :  { %v1790_v57 = vpop.permute.xlu2 %1789  ;;  %v6491_v2 = vadd.f32 %v1753_v14, %v1745_v1 }
0x1af0   :  { %v6493_v30 = vadd.f32 %v1790_v57, %v1782_v26 }
0x1af1   :  { %5420 = vtanh.f32 %v6491_v2 }
0x1af2   :  { %5422 = vtanh.f32 %v6493_v30 }
0x1af7   :  { %v5421_v47 = vpop.eup %5420 }
0x1af8   :  { %v5423_v48 = vpop.eup %5422  ;;  %1758 = vrot.lane.b32.xlu0 %v5421_v47, %s5784_s0 }
0x1af9   :  { %1795 = vrot.lane.b32.xlu1 %v5423_v48, %s5784_s0 }
0x1b6a   :  { %v1759_v51 = vpop.permute.xlu0 %1758 }
0x1b6b   :  { %v1796_v27 = vpop.permute.xlu1 %1795  ;;  %v1761_v59 = vmul.f32 %v1759_v51, %v1742_v33 }
0x1b6c   :  { %v1798_v25 = vmul.f32 %v1796_v27, %v1779_v6 }
0x1b6d   :  { %1800 = vrot.lane.b32.xlu2 %v1761_v59, %s5785_s13 }
0x1b6e   :  { %1804 = vrot.lane.b32.xlu0 %v1798_v25, %s5784_s0 }
0x1bc7   :  { %v6501_v53 = vpop.permute.xlu2 %1800 }
0x1be0   :  { %v6503_v63 = vpop.permute.xlu0 %1804 }
0x1be1   :  { %v1807_v3 = vsel %vm312_vm9, %v6501_v53, %v6503_v63 }
0x1be2   :  { %v1808_v60 = vpack.c.bf16 %v1807_v3, %v1807_v3 }
0x1be4   :  { %4906 = vmatmul.msk.bf16.vlgmr.msrb.gmra.mxu0 %vm108_vm0, %v1808_v60  ;;  %4907 = vmatmul.msk.bf16.vlgmr.msrb.gmra.mxu1 %vm108_vm0, %v1808_v60 }
0x1c61   :  { %v1821_v7 = vpop.f32.mrf.mxu0  ;;  %v1834_v31 = vpop.f32.mrf.mxu1 }
0x1c62   :  { %v1838_v34 = vadd.f32 %v1821_v7, %v6512_v9  ;;  %v1842_v61 = vadd.f32 %v1840_v19, %v1834_v31 }
0x1c64   :  { %5424 = vtanh.f32 %v1838_v34  ;;  %v4909_v23 = vmul.f32 -1.442695, %v1842_v61  ;;  %v4908_v62 = vmul.f32 -1.442695, %v1838_v34 }
0x1c65   :  { %5426 = vtanh.f32 %v1842_v61 }
0x1c66   :  { %5428 = vpow2.f32 %v4909_v23 }
0x1c69   :  { %v1823_v37 = vpop.f32.mrf.mxu0  ;;  %v1836_v39 = vpop.f32.mrf.mxu1 }
0x1c6a   :  { %v5425_v11 = vpop.eup %5424  ;;  %v1957_v39 = vrot.slane %v6512_v9, 2 }
0x1c6b   :  { %v5427_v54 = vpop.eup %5426  ;;  %1865 = vrot.lane.b32.xlu1 %v5425_v11, %s5784_s0  ;;  %v1960_v11 = vrot.slane %v6371_v16, 4 }
0x1c6c   :  { %1902 = vrot.lane.b32.xlu2 %v5427_v54, %s5784_s0  ;;  %v5429_v4 = vpop.eup %5428 }
0x1c6d   :  { %v1883_v49 = vadd.f32 1.0, %v5429_v4 }
0x1c6f   :  { %5430 = vrcp.f32 %v1883_v49  ;;  %v1895_v8 = vand.u32 2147483648, %v1883_v49  ;;  %vm1889_vm13 = vweird.f32 %v1883_v49  ;;  %v1893_v33 = vand.u32 2147483647, %v1883_v49 }
0x1c70   :  { %5432 = vpow2.f32 %v4908_v62 }
0x1c71   :  { %v1896_v35 = vor.u32 1.1754944e-38, %v1895_v8  ;;  %vm1894_vm15 = vcmp.eq.f32.partialorder %v1893_v33, 8.507059e+37 }
0x1c75   :  { %v5431_v58 = vpop.eup %5430 }
0x1c76   :  { %v1885_v0 = vmul.f32 %v5431_v58, %v1883_v49  ;;  %v5433_v56 = vpop.eup %5432  ;;  %vm1890_vm8 = vweird.f32 %v5431_v58 }
0x1c77   :  { %v1846_v22 = vadd.f32 1.0, %v5433_v56  ;;  %vm1891_vm14 = vmor %vm1889_vm13, %vm1890_vm8 }
0x1c78   :  { %v1886_v10 = vsub.f32 1.0, %v1885_v0 }
0x1c79   :  { %5434 = vrcp.f32 %v1846_v22  ;;  %v1858_v15 = vand.u32 2147483648, %v1846_v22  ;;  %vm1852_vm2 = vweird.f32 %v1846_v22  ;;  %v1856_v6 = vand.u32 2147483647, %v1846_v22 }
0x1c7a   :  { %v1887_v20 = vmul.f32 %v5431_v58, %v1886_v10 }
0x1c7b   :  { %v1859_v1 = vor.u32 1.1754944e-38, %v1858_v15  ;;  %vm1857_vm4 = vcmp.eq.f32.partialorder %v1856_v6, 8.507059e+37 }
0x1c7c   :  { %v1888_v18 = vadd.f32 %v5431_v58, %v1887_v20 }
0x1c7e   :  { %v1892_v28 = vsel %vm1891_vm14, %v5431_v58, %v1888_v18 }
0x1c7f   :  { %v1897_v40 = vsel %vm1894_vm15, %v1896_v35, %v1892_v28  ;;  %v5435_v42 = vpop.eup %5434 }
0x1c80   :  { %v1848_v43 = vmul.f32 %v5435_v42, %v1846_v22  ;;  %vm1853_vm1 = vweird.f32 %v5435_v42  ;;  %v1900_v47 = vmul.f32 %v1897_v40, %v6493_v30 }
0x1c81   :  { %vm1854_vm3 = vmor %vm1852_vm2, %vm1853_vm1 }
0x1c82   :  { %v1849_v44 = vsub.f32 1.0, %v1848_v43 }
0x1c84   :  { %v1850_v5 = vmul.f32 %v5435_v42, %v1849_v44 }
0x1c86   :  { %v1851_v45 = vadd.f32 %v5435_v42, %v1850_v5 }
0x1c88   :  { %v1855_v21 = vsel %vm1854_vm3, %v5435_v42, %v1851_v45 }
0x1c89   :  { %v1860_v14 = vsel %vm1857_vm4, %v1859_v1, %v1855_v21 }
0x1c8a   :  { %v1863_v59 = vmul.f32 %v1860_v14, %v6491_v2 }
0x1cc6   :  { %v1903_v13 = vpop.permute.xlu2 %1902 }
0x1cc7   :  { %v1905_v55 = vmul.f32 %v1903_v13, %v1897_v40 }
0x1cc9   :  { %1907 = vrot.lane.b32.xlu1 %v1905_v55, %s5785_s13 }
0x1cdd   :  { %v1866_v26 = vpop.permute.xlu1 %1865 }
0x1cde   :  { %v1868_v57 = vmul.f32 %v1866_v26, %v1860_v14 }
0x1ce0   :  { %1870 = vrot.lane.b32.xlu0 %v1868_v57, %s5785_s13 }
0x1d3b   :  { %v1908_v48 = vpop.permute.xlu1 %1907 }
0x1d3c   :  { %v6521_v51 = vadd.f32 %v1908_v48, %v1900_v47 }
0x1d3e   :  { %5436 = vtanh.f32 %v6521_v51 }
0x1d44   :  { %v5437_v27 = vpop.eup %5436 }
0x1d45   :  { %1913 = vrot.lane.b32.xlu0 %v5437_v27, %s5784_s0 }
0x1d52   :  { %v1871_v25 = vpop.permute.xlu0 %1870 }
0x1d53   :  { %v6526_v3 = vadd.f32 %v1871_v25, %v1863_v59 }
0x1d55   :  { %5438 = vtanh.f32 %v6526_v3 }
0x1d5b   :  { %v5439_v60 = vpop.eup %5438 }
0x1d5c   :  { %1876 = vrot.lane.b32.xlu2 %v5439_v60, %s5784_s0 }
0x1db6   :  { %v1877_v19 = vpop.permute.xlu2 %1876 }
0x1db7   :  { %v1914_v30 = vpop.permute.xlu0 %1913  ;;  %v1879_v7 = vmul.f32 %v1877_v19, %v1860_v14 }
0x1db8   :  { %v1916_v31 = vmul.f32 %v1914_v30, %v1897_v40 }
0x1db9   :  { %1918 = vrot.lane.b32.xlu1 %v1879_v7, %s5785_s13 }
0x1dba   :  { %1922 = vrot.lane.b32.xlu2 %v1916_v31, %s5784_s0 }
0x1e14   :  { %v6532_v34 = vpop.permute.xlu2 %1922 }
0x1e2b   :  { %v6534_v61 = vpop.permute.xlu1 %1918 }
0x1e2c   :  { %v1925_v2 = vsel %vm312_vm9, %v6534_v61, %v6532_v34 }
0x1e2d   :  { %v1926_v37 = vpack.c.bf16 %v1925_v2, %v1925_v2 }
0x1e2f   :  { %4910 = vmatmul.msk.bf16.vlgmr.msrb.gmra.mxu2 %vm108_vm0, %v1926_v37  ;;  %4911 = vmatmul.msk.bf16.vlgmr.msrb.gmra.mxu3 %vm108_vm0, %v1926_v37 }
0x1eb2   :  { %v1939_v54 = vpop.f32.mrf.mxu2  ;;  %v1952_v23 = vpop.f32.mrf.mxu3 }
0x1eb3   :  { %v1959_v4 = vadd.f32 %v1957_v39, %v1939_v54  ;;  %v1962_v49 = vadd.f32 %v1960_v11, %v1952_v23 }
0x1eb5   :  { %5440 = vtanh.f32 %v1959_v4  ;;  %v4912_v56 = vmul.f32 -1.442695, %v1959_v4  ;;  %v4913_v20 = vmul.f32 -1.442695, %v1962_v49 }
0x1eb6   :  { %5442 = vtanh.f32 %v1962_v49 }
0x1eb7   :  { %5444 = vpow2.f32 %v4912_v56  ;;  %v2079_v56 = vrot.slane %v6371_v16, 2 }
0x1eb8   :  { %5446 = vpow2.f32 %v4913_v20 }
0x1eba   :  { %v1941_v58 = vpop.f32.mrf.mxu2  ;;  %v1954_v62 = vpop.f32.mrf.mxu3 }
0x1ebb   :  { %v5441_v0 = vpop.eup %5440 }
0x1ebc   :  { %v5443_v10 = vpop.eup %5442  ;;  %1985 = vrot.lane.b32.xlu0 %v5441_v0, %s5784_s0 }
0x1ebd   :  { %2022 = vrot.lane.b32.xlu1 %v5443_v10, %s5784_s0  ;;  %v5445_v22 = vpop.eup %5444  ;;  %v2076_v10 = vrot.slane %v6512_v9, 4 }
0x1ebe   :  { %v5447_v18 = vpop.eup %5446  ;;  %v1966_v8 = vadd.f32 1.0, %v5445_v22 }
0x1ebf   :  { %v2003_v33 = vadd.f32 1.0, %v5447_v18 }
0x1ec0   :  { %5448 = vrcp.f32 %v1966_v8  ;;  %v1978_v15 = vand.u32 2147483648, %v1966_v8  ;;  %vm1972_vm7 = vweird.f32 %v1966_v8  ;;  %v1976_v21 = vand.u32 2147483647, %v1966_v8 }
0x1ec1   :  { %5450 = vrcp.f32 %v2003_v33  ;;  %v2015_v6 = vand.u32 2147483648, %v2003_v33  ;;  %vm2009_vm8 = vweird.f32 %v2003_v33  ;;  %v2013_v1 = vand.u32 2147483647, %v2003_v33 }
0x1ec2   :  { %v1979_v57 = vor.u32 1.1754944e-38, %v1978_v15  ;;  %vm1977_vm15 = vcmp.eq.f32.partialorder %v1976_v21, 8.507059e+37 }
0x1ec3   :  { %v2016_v47 = vor.u32 1.1754944e-38, %v2015_v6  ;;  %vm2014_vm1 = vcmp.eq.f32.partialorder %v2013_v1, 8.507059e+37 }
0x1ec6   :  { %v5449_v28 = vpop.eup %5448 }
0x1ec7   :  { %v5451_v35 = vpop.eup %5450  ;;  %v1968_v13 = vmul.f32 %v5449_v28, %v1966_v8  ;;  %vm1973_vm5 = vweird.f32 %v5449_v28 }
0x1ec8   :  { %v2005_v40 = vmul.f32 %v5451_v35, %v2003_v33  ;;  %vm2010_vm6 = vweird.f32 %v5451_v35  ;;  %vm1974_vm13 = vmor %vm1972_vm7, %vm1973_vm5 }
0x1ec9   :  { %v1969_v42 = vsub.f32 1.0, %v1968_v13  ;;  %vm2011_vm14 = vmor %vm2009_vm8, %vm2010_vm6 }
0x1eca   :  { %v2006_v55 = vsub.f32 1.0, %v2005_v40 }
0x1ecb   :  { %v1970_v43 = vmul.f32 %v5449_v28, %v1969_v42 }
0x1ecc   :  { %v2007_v44 = vmul.f32 %v5451_v35, %v2006_v55 }
0x1ecd   :  { %v1971_v5 = vadd.f32 %v5449_v28, %v1970_v43 }
0x1ece   :  { %v2008_v45 = vadd.f32 %v5451_v35, %v2007_v44 }
0x1ecf   :  { %v1975_v26 = vsel %vm1974_vm13, %v5449_v28, %v1971_v5 }
0x1ed0   :  { %v2012_v14 = vsel %vm2011_vm14, %v5451_v35, %v2008_v45  ;;  %v1980_v27 = vsel %vm1977_vm15, %v1979_v57, %v1975_v26 }
0x1ed1   :  { %v2017_v25 = vsel %vm2014_vm1, %v2016_v47, %v2012_v14  ;;  %v1983_v30 = vmul.f32 %v1980_v27, %v6526_v3 }
0x1ed2   :  { %v2020_v37 = vmul.f32 %v2017_v25, %v6521_v51 }
0x1f2e   :  { %v1986_v48 = vpop.permute.xlu0 %1985 }
0x1f2f   :  { %v2023_v59 = vpop.permute.xlu1 %2022  ;;  %v1988_v60 = vmul.f32 %v1986_v48, %v1980_v27 }
0x1f30   :  { %v2025_v19 = vmul.f32 %v2023_v59, %v2017_v25 }
0x1f31   :  { %1990 = vrot.lane.b32.xlu2 %v1988_v60, %s5785_s13 }
0x1f32   :  { %2027 = vrot.lane.b32.xlu0 %v2025_v19, %s5785_s13 }
0x1f8b   :  { %v1991_v7 = vpop.permute.xlu2 %1990 }
0x1f8c   :  { %v6548_v31 = vadd.f32 %v1991_v7, %v1983_v30 }
0x1f8e   :  { %5452 = vtanh.f32 %v6548_v31 }
0x1f94   :  { %v5453_v2 = vpop.eup %5452 }
0x1f95   :  { %1996 = vrot.lane.b32.xlu1 %v5453_v2, %s5784_s0 }
0x1fa4   :  { %v2028_v39 = vpop.permute.xlu0 %2027 }
0x1fa5   :  { %v6553_v11 = vadd.f32 %v2028_v39, %v2020_v37 }
0x1fa7   :  { %5454 = vtanh.f32 %v6553_v11 }
0x1fad   :  { %v5455_v54 = vpop.eup %5454 }
0x1fae   :  { %2033 = vrot.lane.b32.xlu2 %v5455_v54, %s5784_s0 }
0x2007   :  { %v1997_v23 = vpop.permute.xlu1 %1996 }
0x2008   :  { %v2034_v3 = vpop.permute.xlu2 %2033  ;;  %v1999_v4 = vmul.f32 %v1997_v23, %v1980_v27 }
0x2009   :  { %v2036_v49 = vmul.f32 %v2034_v3, %v2017_v25 }
0x200a   :  { %2038 = vrot.lane.b32.xlu0 %v1999_v4, %s5785_s13 }
0x200b   :  { %2042 = vrot.lane.b32.xlu1 %v2036_v49, %s5784_s0 }
0x207c   :  { %v6559_v58 = vpop.permute.xlu0 %2038 }
0x207d   :  { %v6561_v62 = vpop.permute.xlu1 %2042 }
0x207e   :  { %v2045_v51 = vsel %vm312_vm9, %v6559_v58, %v6561_v62 }
0x207f   :  { %v2046_v0 = vpack.c.bf16 %v2045_v51, %v2045_v51 }
0x2081   :  { %4914 = vmatmul.msk.bf16.vlgmr.msra.gmra.mxu0 %vm108_vm0, %v2046_v0  ;;  %4915 = vmatmul.msk.bf16.vlgmr.msra.gmra.mxu1 %vm108_vm0, %v2046_v0 }
0x20fe   :  { %v2059_v20 = vpop.f32.mrf.mxu0  ;;  %v2072_v22 = vpop.f32.mrf.mxu1 }
0x20ff   :  { %v2078_v18 = vadd.f32 %v2076_v10, %v2059_v20  ;;  %v2081_v8 = vadd.f32 %v2079_v56, %v2072_v22 }
0x2101   :  { %5456 = vtanh.f32 %v2078_v18  ;;  %v4916_v40 = vmul.f32 -1.442695, %v2078_v18  ;;  %v4917_v44 = vmul.f32 -1.442695, %v2081_v8 }
0x2102   :  { %5458 = vtanh.f32 %v2081_v8 }
0x2103   :  { %5460 = vpow2.f32 %v4916_v40 }
0x2106   :  { %v2061_v33 = vpop.f32.mrf.mxu0  ;;  %v2074_v28 = vpop.f32.mrf.mxu1 }
0x2107   :  { %v5457_v35 = vpop.eup %5456 }
0x2108   :  { %v5459_v13 = vpop.eup %5458  ;;  %2104 = vrot.lane.b32.xlu2 %v5457_v35, %s5784_s0 }
0x2109   :  { %2141 = vrot.lane.b32.xlu0 %v5459_v13, %s5784_s0  ;;  %v5461_v42 = vpop.eup %5460 }
0x210a   :  { %v2085_v55 = vadd.f32 1.0, %v5461_v42  ;;  %v2195_v42 = vrot.slane %v6512_v9, 6 }
0x210c   :  { %5462 = vrcp.f32 %v2085_v55  ;;  %v2097_v26 = vand.u32 2147483648, %v2085_v55  ;;  %vm2091_vm3 = vweird.f32 %v2085_v55  ;;  %v2095_v14 = vand.u32 2147483647, %v2085_v55 }
0x210d   :  { %5464 = vpow2.f32 %v4917_v44 }
0x210e   :  { %v2098_v47 = vor.u32 1.1754944e-38, %v2097_v26  ;;  %vm2096_vm5 = vcmp.eq.f32.partialorder %v2095_v14, 8.507059e+37 }
0x2112   :  { %v5463_v43 = vpop.eup %5462 }
0x2113   :  { %v2087_v5 = vmul.f32 %v5463_v43, %v2085_v55  ;;  %v5465_v6 = vpop.eup %5464  ;;  %vm2092_vm2 = vweird.f32 %v5463_v43 }
0x2114   :  { %v2122_v21 = vadd.f32 1.0, %v5465_v6  ;;  %vm2093_vm4 = vmor %vm2091_vm3, %vm2092_vm2 }
0x2115   :  { %v2088_v45 = vsub.f32 1.0, %v2087_v5 }
0x2116   :  { %5466 = vrcp.f32 %v2122_v21  ;;  %v2134_v2 = vand.u32 2147483648, %v2122_v21  ;;  %vm2128_vm7 = vweird.f32 %v2122_v21  ;;  %v2132_v37 = vand.u32 2147483647, %v2122_v21 }
0x2117   :  { %v2089_v15 = vmul.f32 %v5463_v43, %v2088_v45 }
0x2118   :  { %v2135_v54 = vor.u32 1.1754944e-38, %v2134_v2  ;;  %vm2133_vm13 = vcmp.eq.f32.partialorder %v2132_v37, 8.507059e+37 }
0x2119   :  { %v2090_v1 = vadd.f32 %v5463_v43, %v2089_v15 }
0x211b   :  { %v2094_v57 = vsel %vm2093_vm4, %v5463_v43, %v2090_v1 }
0x211c   :  { %v2099_v27 = vsel %vm2096_vm5, %v2098_v47, %v2094_v57  ;;  %v5467_v25 = vpop.eup %5466 }
0x211d   :  { %v2124_v60 = vmul.f32 %v5467_v25, %v2122_v21  ;;  %vm2129_vm6 = vweird.f32 %v5467_v25  ;;  %v2102_v49 = vmul.f32 %v2099_v27, %v6548_v31 }
0x211e   :  { %vm2130_vm8 = vmor %vm2128_vm7, %vm2129_vm6 }
0x211f   :  { %v2125_v19 = vsub.f32 1.0, %v2124_v60 }
0x2121   :  { %v2126_v30 = vmul.f32 %v5467_v25, %v2125_v19 }
0x2123   :  { %v2127_v7 = vadd.f32 %v5467_v25, %v2126_v30 }
0x2125   :  { %v2131_v39 = vsel %vm2130_vm8, %v5467_v25, %v2127_v7 }
0x2126   :  { %v2136_v3 = vsel %vm2133_vm13, %v2135_v54, %v2131_v39 }
0x2127   :  { %v2139_v51 = vmul.f32 %v2136_v3, %v6553_v11 }
0x2162   :  { %v2105_v48 = vpop.permute.xlu2 %2104 }
0x2163   :  { %v2107_v59 = vmul.f32 %v2105_v48, %v2099_v27 }
0x2165   :  { %2109 = vrot.lane.b32.xlu1 %v2107_v59, %s5785_s13 }
0x217b   :  { %v2142_v23 = vpop.permute.xlu0 %2141 }
0x217c   :  { %v2144_v4 = vmul.f32 %v2142_v23, %v2136_v3 }
0x217e   :  { %2146 = vrot.lane.b32.xlu2 %v2144_v4, %s5785_s13 }
0x21d7   :  { %v2110_v0 = vpop.permute.xlu1 %2109 }
0x21d8   :  { %v2147_v10 = vpop.permute.xlu2 %2146  ;;  %v6576_v56 = vadd.f32 %v2110_v0, %v2102_v49 }
0x21d9   :  { %v6578_v20 = vadd.f32 %v2147_v10, %v2139_v51 }
0x21da   :  { %5468 = vtanh.f32 %v6576_v56 }
0x21db   :  { %5470 = vtanh.f32 %v6578_v20 }
0x21e0   :  { %v5469_v22 = vpop.eup %5468 }
0x21e1   :  { %v5471_v18 = vpop.eup %5470  ;;  %2115 = vrot.lane.b32.xlu0 %v5469_v22, %s5784_s0 }
0x21e2   :  { %2152 = vrot.lane.b32.xlu1 %v5471_v18, %s5784_s0 }
0x2253   :  { %v2116_v8 = vpop.permute.xlu0 %2115 }
0x2254   :  { %v2153_v31 = vpop.permute.xlu1 %2152  ;;  %v2118_v33 = vmul.f32 %v2116_v8, %v2099_v27 }
0x2255   :  { %v2155_v11 = vmul.f32 %v2153_v31, %v2136_v3 }
0x2256   :  { %2157 = vrot.lane.b32.xlu2 %v2118_v33, %s5785_s13 }
0x2257   :  { %2161 = vrot.lane.b32.xlu0 %v2155_v11, %s5784_s0 }
0x22b0   :  { %v6586_v28 = vpop.permute.xlu2 %2157 }
0x22c9   :  { %v6588_v35 = vpop.permute.xlu0 %2161 }
0x22ca   :  { %v2164_v13 = vsel %vm312_vm9, %v6586_v28, %v6588_v35 }
0x22cb   :  { %v2165_v40 = vpack.c.bf16 %v2164_v13, %v2164_v13 }
0x22cd   :  { %4918 = vmatmul.msk.bf16.vlgmr.msra.gmra.mxu2 %vm108_vm0, %v2165_v40  ;;  %4919 = vmatmul.msk.bf16.vlgmr.msra.gmra.mxu3 %vm108_vm0, %v2165_v40 }
0x2350   :  { %v2178_v55 = vpop.f32.mrf.mxu2  ;;  %v2191_v43 = vpop.f32.mrf.mxu3 }
0x2351   :  { %v2197_v44 = vadd.f32 %v2195_v42, %v2178_v55  ;;  %v2198_v5 = vadd.f32 %v2191_v43, %v6371_v16 }
0x2353   :  { %5472 = vtanh.f32 %v2197_v44  ;;  %v4921_v1 = vmul.f32 -1.442695, %v2198_v5  ;;  %v4920_v57 = vmul.f32 -1.442695, %v2197_v44 }
0x2354   :  { %5474 = vtanh.f32 %v2198_v5 }
0x2355   :  { %5476 = vpow2.f32 %v4921_v1  ;;  %v5201_v1 = vld [vmem:[#allocation2 + $0xb4] sm:$0xf] }
0x2358   :  { %v2180_v45 = vpop.f32.mrf.mxu2  ;;  %v2193_v15 = vpop.f32.mrf.mxu3 }
0x2359   :  { %v5473_v6 = vpop.eup %5472 }
0x235a   :  { %v5475_v21 = vpop.eup %5474  ;;  %2221 = vrot.lane.b32.xlu1 %v5473_v6, %s5784_s0  ;;  %v4990_v6 = vld [vmem:[#allocation2 + $0xb0] sm:$0xf] }
0x235b   :  { %2258 = vrot.lane.b32.xlu2 %v5475_v21, %s5784_s0  ;;  %v5477_v26 = vpop.eup %5476  ;;  %v5202_v21 = vld [vmem:[#allocation2 + $0xb4] sm:$0xf0] }
0x235c   :  { %v2239_v14 = vadd.f32 1.0, %v5477_v26  ;;  %v4992_v26 = vld [vmem:[#allocation2 + $0xb8] sm:$0xf0] }
0x235e   :  { %5478 = vrcp.f32 %v2239_v14  ;;  %v2251_v60 = vand.u32 2147483648, %v2239_v14  ;;  %vm2245_vm15 = vweird.f32 %v2239_v14  ;;  %v2249_v19 = vand.u32 2147483647, %v2239_v14 }
0x235f   :  { %5480 = vpow2.f32 %v4920_v57  ;;  %v6621_v57 = vor.u32 %v5201_v1, %v4992_v26  ;;  %v4932_v26 = vld [vmem:[%s7508_s1 + $0x80] sm:$0xf] }
0x2360   :  { %v2252_v7 = vor.u32 1.1754944e-38, %v2251_v60  ;;  %vm2250_vm2 = vcmp.eq.f32.partialorder %v2249_v19, 8.507059e+37  ;;  %v5199_v60 = vld [vmem:[#allocation2 + $0xa4] sm:$0xf]  ;;  %v4984_v19 = vld [vmem:[#allocation2 + $0xa8] sm:$0xf0] }
0x2361   :  { %2481 = vmatpush.bf16.msrb.mxu3 %v6621_v57 }
0x2364   :  { %v5479_v9 = vpop.eup %5478 }
0x2365   :  { %v2241_v47 = vmul.f32 %v5479_v9, %v2239_v14  ;;  %v5481_v48 = vpop.eup %5480  ;;  %vm2246_vm14 = vweird.f32 %v5479_v9  ;;  %v5193_v14 = vld [vmem:[%s7508_s1 + $0xb4] sm:$0xf] }
0x2366   :  { %v2202_v59 = vadd.f32 1.0, %v5481_v48  ;;  %vm2247_vm1 = vmor %vm2245_vm15, %vm2246_vm14  ;;  %v5194_v48 = vld [vmem:[%s7508_s1 + $0xb4] sm:$0xf0] }
0x2367   :  { %v2242_v16 = vsub.f32 1.0, %v2241_v47 }
0x2368   :  { %5482 = vrcp.f32 %v2202_v59  ;;  %v2214_v51 = vand.u32 2147483648, %v2202_v59  ;;  %vm2208_vm4 = vweird.f32 %v2202_v59  ;;  %v2212_v0 = vand.u32 2147483647, %v2202_v59 }
0x2369   :  { %v2243_v27 = vmul.f32 %v5479_v9, %v2242_v16  ;;  %v4956_v16 = vld [vmem:[%s7508_s1 + $0xb0] sm:$0xf] }
0x236a   :  { %v2215_v22 = vor.u32 1.1754944e-38, %v2214_v51  ;;  %vm2213_vm6 = vcmp.eq.f32.partialorder %v2212_v0, 8.507059e+37  ;;  %v5197_v51 = vld [vmem:[#allocation2 + $0x94] sm:$0xf]  ;;  %v4976_v0 = vld [vmem:[#allocation2 + $0x98] sm:$0xf0] }
0x236b   :  { %v2244_v25 = vadd.f32 %v5479_v9, %v2243_v27  ;;  %v4982_v27 = vld [vmem:[#allocation2 + $0xa0] sm:$0xf] }
0x236d   :  { %v2248_v30 = vsel %vm2247_vm1, %v5479_v9, %v2244_v25  ;;  %v4958_v9 = vld [vmem:[%s7508_s1 + $0xb8] sm:$0xf0]  ;;  %v5200_v25 = vld [vmem:[#allocation2 + $0xa4] sm:$0xf0] }
0x236e   :  { %v2253_v37 = vsel %vm2250_vm2, %v2252_v7, %v2248_v30  ;;  %v5483_v39 = vpop.eup %5482  ;;  %v4961_v47 = vor.u32 %v5193_v14, %v4958_v9  ;;  %v6631_v30 = vor.u32 %v5200_v25, %v4982_v27  ;;  %v6633_v7 = vor.u32 %v5199_v60, %v4984_v19  ;;  %v5188_v14 = vld [vmem:[%s7508_s1 + $0x84] sm:$0xf0] }
0x236f   :  { %v2204_v23 = vmul.f32 %v5483_v39, %v2202_v59  ;;  %vm2209_vm3 = vweird.f32 %v5483_v39  ;;  %v2256_v33 = vmul.f32 %v2253_v37, %v6578_v20  ;;  %v4957_v59 = vor.u32 %v5194_v48, %v4956_v16 }
0x2370   :  { %vm2210_vm5 = vmor %vm2208_vm4, %vm2209_vm3  ;;  %2401 = vmatpush.bf16.msrb.mxu1 %v4961_v47  ;;  %2482 = vmatpush.bf16.msrb.mxu3 %v6633_v7  ;;  %v4933_v9 = vor.u32 %v5188_v14, %v4932_v26  ;;  %v6695_v47 = vld [vmem:[%s7511_s4] sm:$0xff]  ;;  %v2293_v27 = vsel %vm312_vm9, %v6433_v12, %v6588_v35  ;;  %v2294_v60 = vsel %vm312_vm9, %v6466_v24, %v6561_v62 }
0x2371   :  { %v2205_v3 = vsub.f32 1.0, %v2204_v23  ;;  %2387 = vmatpush.bf16.msrb.mxu0 %v4957_v59  ;;  %v5192_v23 = vld [vmem:[%s7508_s1 + $0xa4] sm:$0xf0]  ;;  %v2515_v16 = vrot.slane %v6695_v47, 4  ;;  %v2297_v59 = vsel %vm312_vm9, %v6559_v58, %v6468_v29  ;;  %v2298_v19 = vsel %vm312_vm9, %v6586_v28, %v6431_v36 }
0x2372   :  { %v2310_v12 = vrot.slane %v2297_v59, 6  ;;  %v2295_v29 = vsel %vm312_vm9, %v6501_v53, %v6532_v34  ;;  %v2304_v58 = vrot.slane %v2294_v60, 4  ;;  %v2296_v24 = vsel %vm312_vm9, %v6534_v61, %v6503_v63 }
0x2373   :  { %v2206_v4 = vmul.f32 %v5483_v39, %v2205_v3  ;;  %v4974_v3 = vld [vmem:[#allocation2 + $0x90] sm:$0xf]  ;;  %v2307_v28 = vrot.slane %v2295_v29, 2 }
0x2375   :  { %v2207_v49 = vadd.f32 %v5483_v39, %v2206_v4  ;;  %v5198_v4 = vld [vmem:[#allocation2 + $0x94] sm:$0xf0] }
0x2377   :  { %v2211_v10 = vsel %vm2210_vm5, %v5483_v39, %v2207_v49  ;;  %v4948_v39 = vld [vmem:[%s7508_s1 + $0xa0] sm:$0xf] }
0x2378   :  { %v2216_v8 = vsel %vm2213_vm6, %v2215_v22, %v2211_v10  ;;  %v4949_v49 = vor.u32 %v5192_v23, %v4948_v39  ;;  %v5189_v10 = vld [vmem:[%s7508_s1 + $0x94] sm:$0xf]  ;;  %v6651_v22 = vor.u32 %v5198_v4, %v4974_v3  ;;  %v2321_v39 = vsel %vm1181_vm10, %v2296_v24, %v2310_v12 }
0x2379   :  { %v2219_v42 = vmul.f32 %v2216_v8, %v6576_v56  ;;  %v6613_v56 = vor.u32 %v5202_v21, %v4990_v6  ;;  %v4934_v6 = vld [vmem:[%s7508_s1 + $0x88] sm:$0xf0]  ;;  %v2420_v21 = vrot.slane %v5921_v52, 2 }
0x237a   :  { %2388 = vmatpush.bf16.msrb.mxu0 %v4949_v49  ;;  %v5751_v49 = vld [vmem:[%s7510_s3] sm:$0xff] }
0x237b   :  { %2468 = vmatpush.bf16.msrb.mxu2 %v6613_v56 }
0x237f   :  { %2469 = vmatpush.bf16.msrb.mxu2 %v6631_v30 }
0x2383   :  { %2470 = vmatpush.bf16.msrb.mxu2 %v6651_v22 }
0x23b5   :  { %v2259_v2 = vpop.permute.xlu2 %2258 }
0x23b6   :  { %v2261_v54 = vmul.f32 %v2259_v2, %v2253_v37  ;;  %v5191_v2 = vld [vmem:[%s7508_s1 + $0xa4] sm:$0xf] }
0x23b8   :  { %2263 = vrot.lane.b32.xlu1 %v2261_v54, %s5785_s13 }
0x23cc   :  { %v2222_v18 = vpop.permute.xlu1 %2221 }
0x23cd   :  { %v2224_v31 = vmul.f32 %v2222_v18, %v2216_v8  ;;  %v4942_v18 = vld [vmem:[%s7508_s1 + $0x98] sm:$0xf0] }
0x23cf   :  { %2226 = vrot.lane.b32.xlu0 %v2224_v31, %s5785_s13  ;;  %v5190_v31 = vld [vmem:[%s7508_s1 + $0x94] sm:$0xf0] }
0x242a   :  { %v2264_v11 = vpop.permute.xlu1 %2263 }
0x242b   :  { %v6602_v13 = vadd.f32 %v2264_v11, %v2256_v33  ;;  %v6663_v33 = vor.u32 %v5197_v51, %v4976_v0  ;;  %v4945_v11 = vor.u32 %v5189_v10, %v4942_v18  ;;  %v2334_v51 = vperm.slane %v5751_v49, 2 }
0x242c   :  { %v2335_v0 = vperm.slane %v5751_v49, 6 }
0x242d   :  { %5484 = vtanh.f32 %v6602_v13  ;;  %2483 = vmatpush.bf16.msrb.mxu3 %v6663_v33  ;;  %v6768_v10 = vperm.slane %v2334_v51, 2 }
0x242e   :  { %v2339_v18 = vperm.slane %v2335_v0, 2 }
0x2433   :  { %v5485_v40 = vpop.eup %5484 }
0x2434   :  { %2269 = vrot.lane.b32.xlu0 %v5485_v40, %s5784_s0  ;;  %v4966_v40 = vld [vmem:[#allocation2 + $0x80] sm:$0xf] }
0x2441   :  { %v2227_v55 = vpop.permute.xlu0 %2226 }
0x2442   :  { %v6607_v43 = vadd.f32 %v2227_v55, %v2219_v42  ;;  %v5196_v42 = vld [vmem:[#allocation2 + $0x84] sm:$0xf0] }
0x2444   :  { %5486 = vtanh.f32 %v6607_v43 }
0x244a   :  { %v5487_v44 = vpop.eup %5486 }
0x244b   :  { %2232 = vrot.lane.b32.xlu2 %v5487_v44, %s5784_s0  ;;  %v6666_v44 = vor.u32 %v5196_v42, %v4966_v40 }
0x244d   :  { %2471 = vmatpush.bf16.msrb.mxu2 %v6666_v44 }
0x2450   :  { %4996 = vmatmul.msk.bf16.vlgmr.msrb.gmra.mxu2 %vm108_vm0, %v2420_v21 }
0x2451   :  { %2713 = vmatpush.bf16.msra.mxu2 %v6613_v56 }
0x2455   :  { %2714 = vmatpush.bf16.msra.mxu2 %v6631_v30 }
0x2459   :  { %2715 = vmatpush.bf16.msra.mxu2 %v6651_v22 }
0x245d   :  { %2716 = vmatpush.bf16.msra.mxu2 %v6666_v44 }
0x2461   :  { %2949 = vmatpush.bf16.msrb.mxu2 %v6613_v56 }
0x2465   :  { %2950 = vmatpush.bf16.msrb.mxu2 %v6631_v30 }
0x2469   :  { %2951 = vmatpush.bf16.msrb.mxu2 %v6651_v22 }
0x246d   :  { %2952 = vmatpush.bf16.msrb.mxu2 %v6666_v44 }
0x24a5   :  { %v2233_v5 = vpop.permute.xlu2 %2232 }
0x24a6   :  { %v2270_v20 = vpop.permute.xlu0 %2269  ;;  %v2235_v45 = vmul.f32 %v2233_v5, %v2216_v8  ;;  %v4940_v8 = vld [vmem:[%s7508_s1 + $0x90] sm:$0xf]  ;;  %v5195_v5 = vld [vmem:[#allocation2 + $0x84] sm:$0xf] }
0x24a7   :  { %v2272_v15 = vmul.f32 %v2270_v20, %v2253_v37  ;;  %v4950_v37 = vld [vmem:[%s7508_s1 + $0xa8] sm:$0xf0]  ;;  %v4941_v55 = vor.u32 %v5190_v31, %v4940_v8 }
0x24a8   :  { %2274 = vrot.lane.b32.xlu1 %v2235_v45, %s5785_s13  ;;  %v4953_v54 = vor.u32 %v5191_v2, %v4950_v37  ;;  %v4968_v20 = vld [vmem:[#allocation2 + $0x88] sm:$0xf0]  ;;  %v2301_v2 = vrot.slane %v2293_v27, 6 }
0x24a9   :  { %2278 = vrot.lane.b32.xlu2 %v2272_v15, %s5784_s0  ;;  %2389 = vmatpush.bf16.msrb.mxu0 %v4941_v55  ;;  %v6671_v45 = vor.u32 %v5195_v5, %v4968_v20  ;;  %v5187_v15 = vld [vmem:[%s7508_s1 + $0x84] sm:$0xf] }
0x24aa   :  { %2402 = vmatpush.bf16.msrb.mxu1 %v4953_v54  ;;  %v4937_v1 = vor.u32 %v5187_v15, %v4934_v6 }
0x24ab   :  { %2484 = vmatpush.bf16.msrb.mxu3 %v6671_v45 }
0x24ad   :  { %2390 = vmatpush.bf16.msrb.mxu0 %v4933_v9 }
0x24ae   :  { %2403 = vmatpush.bf16.msrb.mxu1 %v4945_v11  ;;  %4997 = vmatmul.msk.bf16.vlgmr.msrb.gmra.mxu3 %vm108_vm0, %v2420_v21 }
0x24af   :  { %2726 = vmatpush.bf16.msra.mxu3 %v6621_v57 }
0x24b1   :  { %2593 = vmatpush.bf16.msra.mxu0 %v6613_v56  ;;  %2516 = vrot.lane.b32.xlu2 %v2515_v16, %s5783_s10 }
0x24b2   :  { %2404 = vmatpush.bf16.msrb.mxu1 %v4937_v1 }
0x24b3   :  { %2727 = vmatpush.bf16.msra.mxu3 %v6633_v7 }
0x24b5   :  { %2594 = vmatpush.bf16.msra.mxu0 %v6631_v30 }
0x24b6   :  { %2606 = vmatpush.bf16.msra.mxu1 %v6621_v57 }
0x24b7   :  { %2728 = vmatpush.bf16.msra.mxu3 %v6663_v33 }
0x24b9   :  { %2595 = vmatpush.bf16.msra.mxu0 %v6651_v22 }
0x24ba   :  { %2607 = vmatpush.bf16.msra.mxu1 %v6633_v7 }
0x24bb   :  { %2729 = vmatpush.bf16.msra.mxu3 %v6671_v45 }
0x24bd   :  { %2596 = vmatpush.bf16.msra.mxu0 %v6666_v44 }
0x24be   :  { %2608 = vmatpush.bf16.msra.mxu1 %v6663_v33 }
0x24bf   :  { %2962 = vmatpush.bf16.msrb.mxu3 %v6621_v57 }
0x24c2   :  { %2609 = vmatpush.bf16.msra.mxu1 %v6671_v45 }
0x24c3   :  { %2963 = vmatpush.bf16.msrb.mxu3 %v6633_v7 }
0x24c7   :  { %2964 = vmatpush.bf16.msrb.mxu3 %v6663_v33 }
0x24cb   :  { %2965 = vmatpush.bf16.msrb.mxu3 %v6671_v45 }
0x2503   :  { %v6719_v48 = vpop.permute.xlu2 %2278 }
0x2504   :  { %v2292_v25 = vsel %vm312_vm9, %v6394_v17, %v6719_v48  ;;  %v2313_v17 = vrot.slane %v2298_v19, 4 }
0x2505   :  { %v2318_v35 = vsel %vm1181_vm10, %v2292_v25, %v2301_v2 }
0x2506   :  { %v2319_v36 = vsel %vm1183_vm11, %v2318_v35, %v2304_v58  ;;  %v2322_v53 = vsel %vm1183_vm11, %v2321_v39, %v2313_v17 }
0x2507   :  { %v2320_v34 = vsel %vm1185_vm12, %v2319_v36, %v2307_v28 }
0x251a   :  { %v6742_v37 = vpop.permute.xlu1 %2274 }
0x251b   :  { %v2299_v62 = vsel %vm312_vm9, %v6742_v37, %v6396_v32  ;;  %v2473_v32 = vpop.f32.mrf.mxu2 }
0x251c   :  { %v2316_v54 = vrot.slane %v2299_v62, 2 }
0x251e   :  { %v2323_v23 = vsel %vm1185_vm12, %v2322_v53, %v2316_v54 }
0x251f   :  { %v2324_v3 = vpack.c.bf16 %v2323_v23, %v2320_v34 }
0x2521   :  { %4962 = vmatmul.msk.bf16.vlgmr.msrb.gmra.mxu0 %vm108_vm0, %v2324_v3  ;;  %4963 = vmatmul.msk.bf16.vlgmr.msrb.gmra.mxu1 %vm108_vm0, %v2324_v3 }
0x2522   :  { %2845 = vmatpush.bf16.msrb.mxu1 %v6621_v57  ;;  %2832 = vmatpush.bf16.msrb.mxu0 %v6613_v56 }
0x2523   :  { %v2475_v61 = vpop.f32.mrf.mxu2 }
0x2526   :  { %2846 = vmatpush.bf16.msrb.mxu1 %v6633_v7  ;;  %2833 = vmatpush.bf16.msrb.mxu0 %v6631_v30 }
0x252a   :  { %2847 = vmatpush.bf16.msrb.mxu1 %v6663_v33  ;;  %2834 = vmatpush.bf16.msrb.mxu0 %v6651_v22 }
0x252e   :  { %2848 = vmatpush.bf16.msrb.mxu1 %v6671_v45  ;;  %2835 = vmatpush.bf16.msrb.mxu0 %v6666_v44 }
0x2531   :  { %v2486_v63 = vpop.f32.mrf.mxu3 }
0x2539   :  { %v2488_v4 = vpop.f32.mrf.mxu3 }
0x253a   :  { %v2517_v4 = vpop.permute.xlu2 %2516 }
0x259e   :  { %v2392_v8 = vpop.f32.mrf.mxu0  ;;  %v2406_v31 = vpop.f32.mrf.mxu1 }
0x259f   :  { %v6771_v11 = vadd.f32 %v2392_v8, %v6768_v10  ;;  %v6773_v40 = vadd.f32 %v2406_v31, %v2339_v18 }
0x25a1   :  { %v2490_v42 = vadd.f32 %v2473_v32, %v6771_v11 }
0x25a3   :  { %5488 = vtanh.f32 %v2490_v42  ;;  %v4998_v1 = vmul.f32 -1.442695, %v2490_v42 }
0x25a6   :  { %v2408_v55 = vpop.f32.mrf.mxu1 }
0x25a7   :  { %v6776_v5 = vadd.f32 %v2408_v55, %v2339_v18 }
0x25a9   :  { %v5489_v20 = vpop.eup %5488  ;;  %v2492_v15 = vrot.slane %v6776_v5, 6 }
0x25aa   :  { %2521 = vrot.lane.b32.xlu0 %v5489_v20, %s5784_s0 }
0x25ab   :  { %v2494_v6 = vadd.f32 %v2492_v15, %v2486_v63 }
0x25ad   :  { %5490 = vtanh.f32 %v2494_v6  ;;  %v4999_v14 = vmul.f32 -1.442695, %v2494_v6 }
0x25ae   :  { %5492 = vpow2.f32 %v4998_v1 }
0x25af   :  { %5494 = vpow2.f32 %v4999_v14 }
0x25b2   :  { %2556 = vrot.lane.b32.xlu0 %v2515_v16, %s5784_s0 }
0x25b3   :  { %v5491_v21 = vpop.eup %5490 }
0x25b4   :  { %2561 = vrot.lane.b32.xlu1 %v5491_v21, %s5784_s0  ;;  %v5493_v26 = vpop.eup %5492 }
0x25b5   :  { %v2498_v9 = vadd.f32 1.0, %v5493_v26  ;;  %v5495_v27 = vpop.eup %5494 }
0x25b6   :  { %v2539_v25 = vadd.f32 1.0, %v5495_v27 }
0x25b7   :  { %5496 = vrcp.f32 %v2498_v9  ;;  %v2510_v35 = vand.u32 2147483648, %v2498_v9  ;;  %vm2504_vm8 = vweird.f32 %v2498_v9  ;;  %v2508_v29 = vand.u32 2147483647, %v2498_v9 }
0x25b8   :  { %5498 = vrcp.f32 %v2539_v25  ;;  %v2551_v53 = vand.u32 2147483648, %v2539_v25  ;;  %vm2545_vm1 = vweird.f32 %v2539_v25  ;;  %v2549_v34 = vand.u32 2147483647, %v2539_v25 }
0x25b9   :  { %v2511_v24 = vor.u32 1.1754944e-38, %v2510_v35  ;;  %vm2509_vm14 = vcmp.eq.f32.partialorder %v2508_v29, 8.507059e+37 }
0x25ba   :  { %v2552_v3 = vor.u32 1.1754944e-38, %v2551_v53  ;;  %vm2550_vm3 = vcmp.eq.f32.partialorder %v2549_v34, 8.507059e+37 }
0x25bd   :  { %v5497_v59 = vpop.eup %5496 }
0x25be   :  { %v2500_v60 = vmul.f32 %v5497_v59, %v2498_v9  ;;  %v5499_v2 = vpop.eup %5498  ;;  %vm2505_vm7 = vweird.f32 %v5497_v59 }
0x25bf   :  { %v2541_v47 = vmul.f32 %v5499_v2, %v2539_v25  ;;  %vm2506_vm13 = vmor %vm2504_vm8, %vm2505_vm7  ;;  %vm2546_vm15 = vweird.f32 %v5499_v2  ;;  %v2616_v25 = vrot.slane %v6771_v11, 2 }
0x25c0   :  { %v2501_v19 = vsub.f32 1.0, %v2500_v60  ;;  %vm2547_vm2 = vmor %vm2545_vm1, %vm2546_vm15  ;;  %v2619_v60 = vrot.slane %v6776_v5, 4 }
0x25c1   :  { %v2542_v58 = vsub.f32 1.0, %v2541_v47 }
0x25c2   :  { %v2502_v12 = vmul.f32 %v5497_v59, %v2501_v19 }
0x25c3   :  { %v2543_v36 = vmul.f32 %v5499_v2, %v2542_v58 }
0x25c4   :  { %v2503_v16 = vadd.f32 %v5497_v59, %v2502_v12 }
0x25c5   :  { %v2544_v54 = vadd.f32 %v5499_v2, %v2543_v36 }
0x25c6   :  { %v2507_v17 = vsel %vm2506_vm13, %v5497_v59, %v2503_v16  ;;  %v6813_v59 = vpop.f32.mrf.mxu0 }
0x25c7   :  { %v2512_v62 = vsel %vm2509_vm14, %v2511_v24, %v2507_v17  ;;  %v2548_v23 = vsel %vm2547_vm2, %v5499_v2, %v2544_v54 }
0x25c8   :  { %v2553_v32 = vsel %vm2550_vm3, %v2552_v3, %v2548_v23  ;;  %v2519_v31 = vmul.f32 %v2517_v4, %v2512_v62 }
0x261c   :  { %v2522_v28 = vpop.permute.xlu0 %2521 }
0x261d   :  { %v2524_v39 = vmul.f32 %v2522_v28, %v2512_v62 }
0x261f   :  { %2526 = vrot.lane.b32.xlu1 %v2524_v39, %s5785_s13 }
0x2624   :  { %v2557_v49 = vpop.permute.xlu0 %2556 }
0x2625   :  { %v2559_v51 = vmul.f32 %v2557_v49, %v2553_v32 }
0x2626   :  { %v2562_v63 = vpop.permute.xlu1 %2561 }
0x2627   :  { %v2564_v61 = vmul.f32 %v2562_v63, %v2553_v32 }
0x2629   :  { %2566 = vrot.lane.b32.xlu2 %v2564_v61, %s5785_s13 }
0x2683   :  { %v2567_v0 = vpop.permute.xlu2 %2566 }
0x2684   :  { %v6786_v18 = vadd.f32 %v2567_v0, %v2559_v51 }
0x2686   :  { %5500 = vtanh.f32 %v6786_v18 }
0x268c   :  { %v5501_v8 = vpop.eup %5500 }
0x268d   :  { %2572 = vrot.lane.b32.xlu1 %v5501_v8, %s5784_s0 }
0x2691   :  { %v2527_v42 = vpop.permute.xlu1 %2526 }
0x2692   :  { %v6790_v55 = vadd.f32 %v2527_v42, %v2519_v31 }
0x2694   :  { %5502 = vtanh.f32 %v6790_v55 }
0x269a   :  { %v5503_v20 = vpop.eup %5502 }
0x269b   :  { %2532 = vrot.lane.b32.xlu0 %v5503_v20, %s5784_s0 }
0x26ff   :  { %v2573_v15 = vpop.permute.xlu1 %2572 }
0x2700   :  { %v2575_v6 = vmul.f32 %v2573_v15, %v2553_v32 }
0x2702   :  { %2581 = vrot.lane.b32.xlu0 %v2575_v6, %s5784_s0 }
0x270d   :  { %v2533_v21 = vpop.permute.xlu0 %2532 }
0x270e   :  { %v2535_v1 = vmul.f32 %v2533_v21, %v2512_v62 }
0x2710   :  { %2577 = vrot.lane.b32.xlu2 %v2535_v1, %s5785_s13 }
0x276a   :  { %v6796_v26 = vpop.permute.xlu2 %2577 }
0x2774   :  { %v6798_v14 = vpop.permute.xlu0 %2581 }
0x2775   :  { %v2584_v9 = vsel %vm312_vm9, %v6796_v26, %v6798_v14 }
0x2776   :  { %v2585_v27 = vpack.c.bf16 %v2584_v9, %v2584_v9 }
0x2778   :  { %5000 = vmatmul.msk.bf16.vlgmr.msra.gmra.mxu0 %vm108_vm0, %v2585_v27  ;;  %5001 = vmatmul.msk.bf16.vlgmr.msra.gmra.mxu1 %vm108_vm0, %v2585_v27 }
0x2779   :  { %3067 = vmatpush.bf16.msra.mxu0 %v6613_v56  ;;  %3080 = vmatpush.bf16.msra.mxu1 %v6621_v57 }
0x277d   :  { %3068 = vmatpush.bf16.msra.mxu0 %v6631_v30  ;;  %3081 = vmatpush.bf16.msra.mxu1 %v6633_v7 }
0x2781   :  { %3069 = vmatpush.bf16.msra.mxu0 %v6651_v22  ;;  %3082 = vmatpush.bf16.msra.mxu1 %v6663_v33 }
0x2785   :  { %3070 = vmatpush.bf16.msra.mxu0 %v6666_v44  ;;  %3083 = vmatpush.bf16.msra.mxu1 %v6671_v45 }
0x27f5   :  { %v2598_v19 = vpop.f32.mrf.mxu0  ;;  %v2611_v2 = vpop.f32.mrf.mxu1 }
0x27f6   :  { %v2618_v12 = vadd.f32 %v2616_v25, %v2598_v19  ;;  %v2621_v47 = vadd.f32 %v2619_v60, %v2611_v2 }
0x27f8   :  { %5504 = vtanh.f32 %v2618_v12  ;;  %v5003_v17 = vmul.f32 -1.442695, %v2621_v47  ;;  %v5002_v28 = vmul.f32 -1.442695, %v2618_v12 }
0x27f9   :  { %5506 = vtanh.f32 %v2621_v47 }
0x27fa   :  { %5508 = vpow2.f32 %v5003_v17 }
0x27fd   :  { %v2600_v16 = vpop.f32.mrf.mxu0  ;;  %v2613_v35 = vpop.f32.mrf.mxu1 }
0x27fe   :  { %v5505_v29 = vpop.eup %5504 }
0x27ff   :  { %v5507_v58 = vpop.eup %5506  ;;  %2644 = vrot.lane.b32.xlu1 %v5505_v29, %s5784_s0 }
0x2800   :  { %2681 = vrot.lane.b32.xlu2 %v5507_v58, %s5784_s0  ;;  %v5509_v24 = vpop.eup %5508 }
0x2801   :  { %v2662_v36 = vadd.f32 1.0, %v5509_v24 }
0x2803   :  { %5510 = vrcp.f32 %v2662_v36  ;;  %v2674_v32 = vand.u32 2147483648, %v2662_v36  ;;  %vm2668_vm5 = vweird.f32 %v2662_v36  ;;  %v2672_v63 = vand.u32 2147483647, %v2662_v36 }
0x2804   :  { %5512 = vpow2.f32 %v5002_v28 }
0x2805   :  { %v2675_v4 = vor.u32 1.1754944e-38, %v2674_v32  ;;  %vm2673_vm7 = vcmp.eq.f32.partialorder %v2672_v63, 8.507059e+37 }
0x2809   :  { %v5511_v62 = vpop.eup %5510 }
0x280a   :  { %v2664_v39 = vmul.f32 %v5511_v62, %v2662_v36  ;;  %v5513_v53 = vpop.eup %5512  ;;  %vm2669_vm4 = vweird.f32 %v5511_v62 }
0x280b   :  { %v2625_v23 = vadd.f32 1.0, %v5513_v53  ;;  %vm2670_vm6 = vmor %vm2668_vm5, %vm2669_vm4  ;;  %v2738_v53 = vrot.slane %v6776_v5, 2 }
0x280c   :  { %v2665_v54 = vsub.f32 1.0, %v2664_v39 }
0x280d   :  { %5514 = vrcp.f32 %v2625_v23  ;;  %v2637_v6 = vand.u32 2147483648, %v2625_v23  ;;  %vm2631_vm13 = vweird.f32 %v2625_v23  ;;  %v2635_v21 = vand.u32 2147483647, %v2625_v23 }
0x280e   :  { %v2666_v34 = vmul.f32 %v5511_v62, %v2665_v54  ;;  %v2735_v54 = vrot.slane %v6771_v11, 4 }
0x280f   :  { %v2638_v9 = vor.u32 1.1754944e-38, %v2637_v6  ;;  %vm2636_vm15 = vcmp.eq.f32.partialorder %v2635_v21, 8.507059e+37 }
0x2810   :  { %v2667_v3 = vadd.f32 %v5511_v62, %v2666_v34 }
0x2812   :  { %v2671_v61 = vsel %vm2670_vm6, %v5511_v62, %v2667_v3 }
0x2813   :  { %v2676_v51 = vsel %vm2673_vm7, %v2675_v4, %v2671_v61  ;;  %v5515_v0 = vpop.eup %5514 }
0x2814   :  { %v2627_v31 = vmul.f32 %v5515_v0, %v2625_v23  ;;  %vm2632_vm8 = vweird.f32 %v5515_v0  ;;  %v2679_v19 = vmul.f32 %v2676_v51, %v6786_v18 }
0x2815   :  { %vm2633_vm14 = vmor %vm2631_vm13, %vm2632_vm8 }
0x2816   :  { %v2628_v42 = vsub.f32 1.0, %v2627_v31 }
0x2818   :  { %v2629_v20 = vmul.f32 %v5515_v0, %v2628_v42 }
0x281a   :  { %v2630_v15 = vadd.f32 %v5515_v0, %v2629_v20 }
0x281c   :  { %v2634_v1 = vsel %vm2633_vm14, %v5515_v0, %v2630_v15 }
0x281d   :  { %v2639_v25 = vsel %vm2636_vm15, %v2638_v9, %v2634_v1 }
0x281e   :  { %v2642_v16 = vmul.f32 %v2639_v25, %v6790_v55 }
0x285a   :  { %v2682_v49 = vpop.permute.xlu2 %2681 }
0x285b   :  { %v2684_v8 = vmul.f32 %v2682_v49, %v2676_v51 }
0x285d   :  { %2686 = vrot.lane.b32.xlu1 %v2684_v8, %s5785_s13 }
0x2871   :  { %v2645_v27 = vpop.permute.xlu1 %2644 }
0x2872   :  { %v2647_v60 = vmul.f32 %v2645_v27, %v2639_v25 }
0x2874   :  { %2649 = vrot.lane.b32.xlu0 %v2647_v60, %s5785_s13 }
0x28cf   :  { %v2687_v2 = vpop.permute.xlu1 %2686 }
0x28d0   :  { %v6822_v12 = vadd.f32 %v2687_v2, %v2679_v19 }
0x28d2   :  { %5516 = vtanh.f32 %v6822_v12 }
0x28d8   :  { %v5517_v47 = vpop.eup %5516 }
0x28d9   :  { %2692 = vrot.lane.b32.xlu0 %v5517_v47, %s5784_s0 }
0x28e6   :  { %v2650_v35 = vpop.permute.xlu0 %2649 }
0x28e7   :  { %v6827_v29 = vadd.f32 %v2650_v35, %v2642_v16 }
0x28e9   :  { %5518 = vtanh.f32 %v6827_v29 }
0x28ef   :  { %v5519_v58 = vpop.eup %5518 }
0x28f0   :  { %2655 = vrot.lane.b32.xlu2 %v5519_v58, %s5784_s0 }
0x294a   :  { %v2656_v17 = vpop.permute.xlu2 %2655 }
0x294b   :  { %v2693_v18 = vpop.permute.xlu0 %2692  ;;  %v2658_v24 = vmul.f32 %v2656_v17, %v2639_v25 }
0x294c   :  { %v2695_v36 = vmul.f32 %v2693_v18, %v2676_v51 }
0x294d   :  { %2697 = vrot.lane.b32.xlu1 %v2658_v24, %s5785_s13 }
0x294e   :  { %2701 = vrot.lane.b32.xlu2 %v2695_v36, %s5784_s0 }
0x29a8   :  { %v6833_v62 = vpop.permute.xlu2 %2701 }
0x29bf   :  { %v6835_v28 = vpop.permute.xlu1 %2697 }
0x29c0   :  { %v2704_v55 = vsel %vm312_vm9, %v6835_v28, %v6833_v62 }
0x29c1   :  { %v2705_v39 = vpack.c.bf16 %v2704_v55, %v2704_v55 }
0x29c3   :  { %5004 = vmatmul.msk.bf16.vlgmr.msra.gmra.mxu2 %vm108_vm0, %v2705_v39  ;;  %5005 = vmatmul.msk.bf16.vlgmr.msra.gmra.mxu3 %vm108_vm0, %v2705_v39 }
0x29c4   :  { %3200 = vmatpush.bf16.msra.mxu3 %v6621_v57  ;;  %3187 = vmatpush.bf16.msra.mxu2 %v6613_v56 }
0x29c8   :  { %3201 = vmatpush.bf16.msra.mxu3 %v6633_v7  ;;  %3188 = vmatpush.bf16.msra.mxu2 %v6631_v30 }
0x29cc   :  { %3202 = vmatpush.bf16.msra.mxu3 %v6663_v33  ;;  %3189 = vmatpush.bf16.msra.mxu2 %v6651_v22 }
0x29d0   :  { %3203 = vmatpush.bf16.msra.mxu3 %v6671_v45  ;;  %3190 = vmatpush.bf16.msra.mxu2 %v6666_v44 }
0x2a46   :  { %v2718_v34 = vpop.f32.mrf.mxu2  ;;  %v2731_v23 = vpop.f32.mrf.mxu3 }
0x2a47   :  { %v2737_v3 = vadd.f32 %v2735_v54, %v2718_v34  ;;  %v2740_v32 = vadd.f32 %v2738_v53, %v2731_v23 }
0x2a49   :  { %5520 = vtanh.f32 %v2737_v3  ;;  %v5006_v51 = vmul.f32 -1.442695, %v2737_v3  ;;  %v5007_v0 = vmul.f32 -1.442695, %v2740_v32 }
0x2a4a   :  { %5522 = vtanh.f32 %v2740_v32 }
0x2a4b   :  { %5524 = vpow2.f32 %v5006_v51 }
0x2a4c   :  { %5526 = vpow2.f32 %v5007_v0 }
0x2a4e   :  { %v2720_v63 = vpop.f32.mrf.mxu2  ;;  %v2733_v61 = vpop.f32.mrf.mxu3 }
0x2a4f   :  { %v5521_v4 = vpop.eup %5520 }
0x2a50   :  { %v5523_v49 = vpop.eup %5522  ;;  %2763 = vrot.lane.b32.xlu0 %v5521_v4, %s5784_s0 }
0x2a51   :  { %2800 = vrot.lane.b32.xlu1 %v5523_v49, %s5784_s0  ;;  %v5525_v8 = vpop.eup %5524 }
0x2a52   :  { %v5527_v31 = vpop.eup %5526  ;;  %v2744_v42 = vadd.f32 1.0, %v5525_v8 }
0x2a53   :  { %v2781_v20 = vadd.f32 1.0, %v5527_v31 }
0x2a54   :  { %5528 = vrcp.f32 %v2744_v42  ;;  %v2756_v47 = vand.u32 2147483648, %v2744_v42  ;;  %vm2750_vm3 = vweird.f32 %v2744_v42  ;;  %v2754_v35 = vand.u32 2147483647, %v2744_v42 }
0x2a55   :  { %5530 = vrcp.f32 %v2781_v20  ;;  %v2793_v16 = vand.u32 2147483648, %v2781_v20  ;;  %vm2787_vm4 = vweird.f32 %v2781_v20  ;;  %v2791_v58 = vand.u32 2147483647, %v2781_v20 }
0x2a56   :  { %v2757_v24 = vor.u32 1.1754944e-38, %v2756_v47  ;;  %vm2755_vm7 = vcmp.eq.f32.partialorder %v2754_v35, 8.507059e+37 }
0x2a57   :  { %v2794_v36 = vor.u32 1.1754944e-38, %v2793_v16  ;;  %vm2792_vm8 = vcmp.eq.f32.partialorder %v2791_v58, 8.507059e+37 }
0x2a5a   :  { %v5529_v15 = vpop.eup %5528 }
0x2a5b   :  { %v5531_v6 = vpop.eup %5530  ;;  %v2746_v21 = vmul.f32 %v5529_v15, %v2744_v42  ;;  %vm2751_vm1 = vweird.f32 %v5529_v15 }
0x2a5c   :  { %v2783_v1 = vmul.f32 %v5531_v6, %v2781_v20  ;;  %vm2788_vm2 = vweird.f32 %v5531_v6  ;;  %vm2752_vm5 = vmor %vm2750_vm3, %vm2751_vm1 }
0x2a5d   :  { %v2747_v9 = vsub.f32 1.0, %v2746_v21  ;;  %vm2789_vm6 = vmor %vm2787_vm4, %vm2788_vm2  ;;  %v2854_v21 = vrot.slane %v6771_v11, 6 }
0x2a5e   :  { %v2784_v27 = vsub.f32 1.0, %v2783_v1 }
0x2a5f   :  { %v2748_v25 = vmul.f32 %v5529_v15, %v2747_v9 }
0x2a60   :  { %v2785_v60 = vmul.f32 %v5531_v6, %v2784_v27 }
0x2a61   :  { %v2749_v19 = vadd.f32 %v5529_v15, %v2748_v25 }
0x2a62   :  { %v2786_v2 = vadd.f32 %v5531_v6, %v2785_v60 }
0x2a63   :  { %v2753_v17 = vsel %vm2752_vm5, %v5529_v15, %v2749_v19 }
0x2a64   :  { %v2790_v18 = vsel %vm2789_vm6, %v5531_v6, %v2786_v2  ;;  %v2758_v39 = vsel %vm2755_vm7, %v2757_v24, %v2753_v17 }
0x2a65   :  { %v2795_v53 = vsel %vm2792_vm8, %v2794_v36, %v2790_v18  ;;  %v2761_v3 = vmul.f32 %v2758_v39, %v6827_v29 }
0x2a66   :  { %v2798_v4 = vmul.f32 %v2795_v53, %v6822_v12 }
0x2ac2   :  { %v2764_v55 = vpop.permute.xlu0 %2763 }
0x2ac3   :  { %v2801_v54 = vpop.permute.xlu1 %2800  ;;  %v2766_v34 = vmul.f32 %v2764_v55, %v2758_v39 }
0x2ac4   :  { %v2803_v23 = vmul.f32 %v2801_v54, %v2795_v53 }
0x2ac5   :  { %2768 = vrot.lane.b32.xlu2 %v2766_v34, %s5785_s13 }
0x2ac6   :  { %2805 = vrot.lane.b32.xlu0 %v2803_v23, %s5785_s13 }
0x2b1f   :  { %v2769_v32 = vpop.permute.xlu2 %2768 }
0x2b20   :  { %v6857_v63 = vadd.f32 %v2769_v32, %v2761_v3 }
0x2b22   :  { %5532 = vtanh.f32 %v6857_v63 }
0x2b28   :  { %v5533_v61 = vpop.eup %5532 }
0x2b29   :  { %2774 = vrot.lane.b32.xlu1 %v5533_v61, %s5784_s0 }
0x2b38   :  { %v2806_v49 = vpop.permute.xlu0 %2805 }
0x2b39   :  { %v6862_v51 = vadd.f32 %v2806_v49, %v2798_v4 }
0x2b3b   :  { %5534 = vtanh.f32 %v6862_v51 }
0x2b41   :  { %v5535_v0 = vpop.eup %5534 }
0x2b42   :  { %2811 = vrot.lane.b32.xlu2 %v5535_v0, %s5784_s0 }
0x2b9b   :  { %v2775_v8 = vpop.permute.xlu1 %2774 }
0x2b9c   :  { %v2812_v29 = vpop.permute.xlu2 %2811  ;;  %v2777_v31 = vmul.f32 %v2775_v8, %v2758_v39 }
0x2b9d   :  { %v2814_v42 = vmul.f32 %v2812_v29, %v2795_v53 }
0x2b9e   :  { %2816 = vrot.lane.b32.xlu0 %v2777_v31, %s5785_s13 }
0x2b9f   :  { %2820 = vrot.lane.b32.xlu1 %v2814_v42, %s5784_s0 }
0x2c10   :  { %v6868_v20 = vpop.permute.xlu0 %2816 }
0x2c11   :  { %v6870_v15 = vpop.permute.xlu1 %2820 }
0x2c12   :  { %v2823_v12 = vsel %vm312_vm9, %v6868_v20, %v6870_v15 }
0x2c13   :  { %v2824_v6 = vpack.c.bf16 %v2823_v12, %v2823_v12 }
0x2c15   :  { %5008 = vmatmul.msk.bf16.vlgmr.msrb.gmra.mxu0 %vm108_vm0, %v2824_v6  ;;  %5009 = vmatmul.msk.bf16.vlgmr.msrb.gmra.mxu1 %vm108_vm0, %v2824_v6 }
0x2c16   :  { %3306 = vmatpush.bf16.msrb.mxu0 %v6613_v56  ;;  %3319 = vmatpush.bf16.msrb.mxu1 %v6621_v57 }
0x2c1a   :  { %3307 = vmatpush.bf16.msrb.mxu0 %v6631_v30  ;;  %3320 = vmatpush.bf16.msrb.mxu1 %v6633_v7 }
0x2c1e   :  { %3308 = vmatpush.bf16.msrb.mxu0 %v6651_v22  ;;  %3321 = vmatpush.bf16.msrb.mxu1 %v6663_v33 }
0x2c22   :  { %3309 = vmatpush.bf16.msrb.mxu0 %v6666_v44  ;;  %3322 = vmatpush.bf16.msrb.mxu1 %v6671_v45 }
0x2c92   :  { %v2837_v1 = vpop.f32.mrf.mxu0  ;;  %v2850_v9 = vpop.f32.mrf.mxu1 }
0x2c93   :  { %v2856_v27 = vadd.f32 %v2854_v21, %v2837_v1  ;;  %v2857_v56 = vadd.f32 %v2850_v9, %v6776_v5 }
0x2c95   :  { %5536 = vtanh.f32 %v2856_v27  ;;  %v5010_v22 = vmul.f32 -1.442695, %v2856_v27  ;;  %v5011_v11 = vmul.f32 -1.442695, %v2857_v56 }
0x2c96   :  { %5538 = vtanh.f32 %v2857_v56 }
0x2c97   :  { %5540 = vpow2.f32 %v5010_v22  ;;  %v6914_v22 = vadd.f32 %v6813_v59, %v6768_v10 }
0x2c9a   :  { %v2839_v57 = vpop.f32.mrf.mxu0  ;;  %v2852_v30 = vpop.f32.mrf.mxu1 }
0x2c9b   :  { %v5537_v7 = vpop.eup %5536 }
0x2c9c   :  { %v5539_v25 = vpop.eup %5538  ;;  %2880 = vrot.lane.b32.xlu2 %v5537_v7, %s5784_s0 }
0x2c9d   :  { %2917 = vrot.lane.b32.xlu0 %v5539_v25, %s5784_s0  ;;  %v5541_v33 = vpop.eup %5540 }
0x2c9e   :  { %v2861_v44 = vadd.f32 1.0, %v5541_v33  ;;  %v2973_v33 = vrot.slane %v6773_v40, 6 }
0x2ca0   :  { %5542 = vrcp.f32 %v2861_v44  ;;  %v2873_v35 = vand.u32 2147483648, %v2861_v44  ;;  %vm2867_vm14 = vweird.f32 %v2861_v44  ;;  %v2871_v58 = vand.u32 2147483647, %v2861_v44 }
0x2ca1   :  { %5544 = vpow2.f32 %v5011_v11 }
0x2ca2   :  { %v2874_v18 = vor.u32 1.1754944e-38, %v2873_v35  ;;  %vm2872_vm1 = vcmp.eq.f32.partialorder %v2871_v58, 8.507059e+37 }
0x2ca6   :  { %v5543_v45 = vpop.eup %5542 }
0x2ca7   :  { %v2863_v60 = vmul.f32 %v5543_v45, %v2861_v44  ;;  %v5545_v2 = vpop.eup %5544  ;;  %vm2868_vm13 = vweird.f32 %v5543_v45 }
0x2ca8   :  { %v2898_v47 = vadd.f32 1.0, %v5545_v2  ;;  %vm2869_vm15 = vmor %vm2867_vm14, %vm2868_vm13 }
0x2ca9   :  { %v2864_v5 = vsub.f32 1.0, %v2863_v60 }
0x2caa   :  { %5546 = vrcp.f32 %v2898_v47  ;;  %v2910_v3 = vand.u32 2147483648, %v2898_v47  ;;  %vm2904_vm3 = vweird.f32 %v2898_v47  ;;  %v2908_v32 = vand.u32 2147483647, %v2898_v47 }
0x2cab   :  { %v2865_v19 = vmul.f32 %v5543_v45, %v2864_v5 }
0x2cac   :  { %v2911_v4 = vor.u32 1.1754944e-38, %v2910_v3  ;;  %vm2909_vm5 = vcmp.eq.f32.partialorder %v2908_v32, 8.507059e+37 }
0x2cad   :  { %v2866_v16 = vadd.f32 %v5543_v45, %v2865_v19 }
0x2caf   :  { %v2870_v17 = vsel %vm2869_vm15, %v5543_v45, %v2866_v16 }
0x2cb0   :  { %v2875_v36 = vsel %vm2872_vm1, %v2874_v18, %v2870_v17  ;;  %v5547_v39 = vpop.eup %5546 }
0x2cb1   :  { %v2900_v54 = vmul.f32 %v5547_v39, %v2898_v47  ;;  %vm2905_vm2 = vweird.f32 %v5547_v39  ;;  %v2878_v29 = vmul.f32 %v2875_v36, %v6857_v63 }
0x2cb2   :  { %vm2906_vm4 = vmor %vm2904_vm3, %vm2905_vm2 }
0x2cb3   :  { %v2901_v53 = vsub.f32 1.0, %v2900_v54 }
0x2cb5   :  { %v2902_v34 = vmul.f32 %v5547_v39, %v2901_v53 }
0x2cb7   :  { %v2903_v23 = vadd.f32 %v5547_v39, %v2902_v34 }
0x2cb9   :  { %v2907_v61 = vsel %vm2906_vm4, %v5547_v39, %v2903_v23 }
0x2cba   :  { %v2912_v0 = vsel %vm2909_vm5, %v2911_v4, %v2907_v61 }
0x2cbb   :  { %v2915_v31 = vmul.f32 %v2912_v0, %v6862_v51 }
0x2cf6   :  { %v2881_v24 = vpop.permute.xlu2 %2880 }
0x2cf7   :  { %v2883_v55 = vmul.f32 %v2881_v24, %v2875_v36 }
0x2cf9   :  { %2885 = vrot.lane.b32.xlu1 %v2883_v55, %s5785_s13 }
0x2d0f   :  { %v2918_v49 = vpop.permute.xlu0 %2917 }
0x2d10   :  { %v2920_v8 = vmul.f32 %v2918_v49, %v2912_v0 }
0x2d12   :  { %2922 = vrot.lane.b32.xlu2 %v2920_v8, %s5785_s13 }
0x2d6b   :  { %v2886_v42 = vpop.permute.xlu1 %2885 }
0x2d6c   :  { %v2923_v12 = vpop.permute.xlu2 %2922  ;;  %v6893_v6 = vadd.f32 %v2886_v42, %v2878_v29 }
0x2d6d   :  { %v6895_v21 = vadd.f32 %v2923_v12, %v2915_v31 }
0x2d6e   :  { %5548 = vtanh.f32 %v6893_v6 }
0x2d6f   :  { %5550 = vtanh.f32 %v6895_v21 }
0x2d74   :  { %v5549_v1 = vpop.eup %5548 }
0x2d75   :  { %v5551_v9 = vpop.eup %5550  ;;  %2891 = vrot.lane.b32.xlu0 %v5549_v1, %s5784_s0 }
0x2d76   :  { %2928 = vrot.lane.b32.xlu1 %v5551_v9, %s5784_s0 }
0x2de7   :  { %v2892_v27 = vpop.permute.xlu0 %2891 }
0x2de8   :  { %v2929_v63 = vpop.permute.xlu1 %2928  ;;  %v2894_v56 = vmul.f32 %v2892_v27, %v2875_v36 }
0x2de9   :  { %v2931_v51 = vmul.f32 %v2929_v63, %v2912_v0 }
0x2dea   :  { %2933 = vrot.lane.b32.xlu2 %v2894_v56, %s5785_s13 }
0x2deb   :  { %2937 = vrot.lane.b32.xlu0 %v2931_v51, %s5784_s0 }
0x2e44   :  { %v6903_v57 = vpop.permute.xlu2 %2933 }
0x2e5d   :  { %v6905_v30 = vpop.permute.xlu0 %2937 }
0x2e5e   :  { %v2940_v7 = vsel %vm312_vm9, %v6903_v57, %v6905_v30 }
0x2e5f   :  { %v2941_v25 = vpack.c.bf16 %v2940_v7, %v2940_v7 }
0x2e61   :  { %5012 = vmatmul.msk.bf16.vlgmr.msrb.gmra.mxu2 %vm108_vm0, %v2941_v25  ;;  %5013 = vmatmul.msk.bf16.vlgmr.msrb.gmra.mxu3 %vm108_vm0, %v2941_v25 }
0x2ee4   :  { %v2954_v44 = vpop.f32.mrf.mxu2  ;;  %v2967_v45 = vpop.f32.mrf.mxu3 }
0x2ee5   :  { %v2971_v11 = vadd.f32 %v2954_v44, %v6914_v22  ;;  %v2975_v60 = vadd.f32 %v2973_v33, %v2967_v45 }
0x2ee7   :  { %5552 = vtanh.f32 %v2971_v11  ;;  %v5015_v16 = vmul.f32 -1.442695, %v2975_v60  ;;  %v5014_v58 = vmul.f32 -1.442695, %v2971_v11 }
0x2ee8   :  { %5554 = vtanh.f32 %v2975_v60 }
0x2ee9   :  { %5556 = vpow2.f32 %v5015_v16 }
0x2eec   :  { %v2956_v5 = vpop.f32.mrf.mxu2  ;;  %v2969_v19 = vpop.f32.mrf.mxu3 }
0x2eed   :  { %v5553_v2 = vpop.eup %5552 }
0x2eee   :  { %v5555_v47 = vpop.eup %5554  ;;  %2998 = vrot.lane.b32.xlu1 %v5553_v2, %s5784_s0 }
0x2eef   :  { %3035 = vrot.lane.b32.xlu2 %v5555_v47, %s5784_s0  ;;  %v5557_v10 = vpop.eup %5556 }
0x2ef0   :  { %v3016_v59 = vadd.f32 1.0, %v5557_v10  ;;  %v3090_v10 = vrot.slane %v6914_v22, 2 }
0x2ef2   :  { %5558 = vrcp.f32 %v3016_v59  ;;  %v3028_v54 = vand.u32 2147483648, %v3016_v59  ;;  %vm3022_vm7 = vweird.f32 %v3016_v59  ;;  %v3026_v53 = vand.u32 2147483647, %v3016_v59 }
0x2ef3   :  { %5560 = vpow2.f32 %v5014_v58 }
0x2ef4   :  { %v3029_v23 = vor.u32 1.1754944e-38, %v3028_v54  ;;  %vm3027_vm13 = vcmp.eq.f32.partialorder %v3026_v53, 8.507059e+37 }
0x2ef8   :  { %v5559_v35 = vpop.eup %5558 }
0x2ef9   :  { %v3018_v17 = vmul.f32 %v5559_v35, %v3016_v59  ;;  %v5561_v24 = vpop.eup %5560  ;;  %vm3023_vm6 = vweird.f32 %v5559_v35  ;;  %v3093_v59 = vrot.slane %v6773_v40, 4 }
0x2efa   :  { %v2979_v55 = vadd.f32 1.0, %v5561_v24  ;;  %vm3024_vm8 = vmor %vm3022_vm7, %vm3023_vm6 }
0x2efb   :  { %v3019_v18 = vsub.f32 1.0, %v3018_v17 }
0x2efc   :  { %5562 = vrcp.f32 %v2979_v55  ;;  %v2991_v31 = vand.u32 2147483648, %v2979_v55  ;;  %vm2985_vm15 = vweird.f32 %v2979_v55  ;;  %v2989_v42 = vand.u32 2147483647, %v2979_v55 }
0x2efd   :  { %v3020_v36 = vmul.f32 %v5559_v35, %v3019_v18 }
0x2efe   :  { %v2992_v1 = vor.u32 1.1754944e-38, %v2991_v31  ;;  %vm2990_vm2 = vcmp.eq.f32.partialorder %v2989_v42, 8.507059e+37 }
0x2eff   :  { %v3021_v39 = vadd.f32 %v5559_v35, %v3020_v36 }
0x2f01   :  { %v3025_v34 = vsel %vm3024_vm8, %v5559_v35, %v3021_v39 }
0x2f02   :  { %v3030_v32 = vsel %vm3027_vm13, %v3029_v23, %v3025_v34  ;;  %v5563_v61 = vpop.eup %5562 }
0x2f03   :  { %v2981_v49 = vmul.f32 %v5563_v61, %v2979_v55  ;;  %vm2986_vm14 = vweird.f32 %v5563_v61  ;;  %v3033_v56 = vmul.f32 %v3030_v32, %v6895_v21 }
0x2f04   :  { %vm2987_vm1 = vmor %vm2985_vm15, %vm2986_vm14 }
0x2f05   :  { %v2982_v0 = vsub.f32 1.0, %v2981_v49 }
0x2f07   :  { %v2983_v8 = vmul.f32 %v5563_v61, %v2982_v0 }
0x2f09   :  { %v2984_v29 = vadd.f32 %v5563_v61, %v2983_v8 }
0x2f0b   :  { %v2988_v12 = vsel %vm2987_vm1, %v5563_v61, %v2984_v29 }
0x2f0c   :  { %v2993_v27 = vsel %vm2990_vm2, %v2992_v1, %v2988_v12 }
0x2f0d   :  { %v2996_v33 = vmul.f32 %v2993_v27, %v6893_v6 }
0x2f49   :  { %v3036_v3 = vpop.permute.xlu2 %3035 }
0x2f4a   :  { %v3038_v4 = vmul.f32 %v3036_v3, %v3030_v32 }
0x2f4c   :  { %3040 = vrot.lane.b32.xlu1 %v3038_v4, %s5785_s13 }
0x2f60   :  { %v2999_v9 = vpop.permute.xlu1 %2998 }
0x2f61   :  { %v3001_v63 = vmul.f32 %v2999_v9, %v2993_v27 }
0x2f63   :  { %3003 = vrot.lane.b32.xlu0 %v3001_v63, %s5785_s13 }
0x2fbe   :  { %v3041_v51 = vpop.permute.xlu1 %3040 }
0x2fbf   :  { %v6923_v7 = vadd.f32 %v3041_v51, %v3033_v56 }
0x2fc1   :  { %5564 = vtanh.f32 %v6923_v7 }
0x2fc7   :  { %v5565_v25 = vpop.eup %5564 }
0x2fc8   :  { %3046 = vrot.lane.b32.xlu0 %v5565_v25, %s5784_s0 }
0x2fd5   :  { %v3004_v44 = vpop.permute.xlu0 %3003 }
0x2fd6   :  { %v6928_v45 = vadd.f32 %v3004_v44, %v2996_v33 }
0x2fd8   :  { %5566 = vtanh.f32 %v6928_v45 }
0x2fde   :  { %v5567_v11 = vpop.eup %5566 }
0x2fdf   :  { %3009 = vrot.lane.b32.xlu2 %v5567_v11, %s5784_s0 }
0x3039   :  { %v3010_v60 = vpop.permute.xlu2 %3009 }
0x303a   :  { %v3047_v21 = vpop.permute.xlu0 %3046  ;;  %v3012_v5 = vmul.f32 %v3010_v60, %v2993_v27 }
0x303b   :  { %v3049_v19 = vmul.f32 %v3047_v21, %v3030_v32 }
0x303c   :  { %3051 = vrot.lane.b32.xlu1 %v3012_v5, %s5785_s13 }
0x303d   :  { %3055 = vrot.lane.b32.xlu2 %v3049_v19, %s5784_s0 }
0x3097   :  { %v6934_v2 = vpop.permute.xlu2 %3055 }
0x30ae   :  { %v6936_v47 = vpop.permute.xlu1 %3051 }
0x30af   :  { %v3058_v6 = vsel %vm312_vm9, %v6936_v47, %v6934_v2 }
0x30b0   :  { %v3059_v16 = vpack.c.bf16 %v3058_v6, %v3058_v6 }
0x30b2   :  { %5016 = vmatmul.msk.bf16.vlgmr.msra.gmra.mxu0 %vm108_vm0, %v3059_v16  ;;  %5017 = vmatmul.msk.bf16.vlgmr.msra.gmra.mxu1 %vm108_vm0, %v3059_v16 }
0x312f   :  { %v3072_v35 = vpop.f32.mrf.mxu0  ;;  %v3085_v58 = vpop.f32.mrf.mxu1 }
0x3130   :  { %v3092_v17 = vadd.f32 %v3090_v10, %v3072_v35  ;;  %v3095_v18 = vadd.f32 %v3093_v59, %v3085_v58 }
0x3132   :  { %5568 = vtanh.f32 %v3092_v17  ;;  %v5018_v54 = vmul.f32 -1.442695, %v3092_v17  ;;  %v5019_v53 = vmul.f32 -1.442695, %v3095_v18 }
0x3133   :  { %5570 = vtanh.f32 %v3095_v18 }
0x3134   :  { %5572 = vpow2.f32 %v5018_v54 }
0x3135   :  { %5574 = vpow2.f32 %v5019_v53 }
0x3137   :  { %v3074_v24 = vpop.f32.mrf.mxu0  ;;  %v3087_v36 = vpop.f32.mrf.mxu1 }
0x3138   :  { %v5569_v55 = vpop.eup %5568 }
0x3139   :  { %v5571_v39 = vpop.eup %5570  ;;  %3118 = vrot.lane.b32.xlu0 %v5569_v55, %s5784_s0 }
0x313a   :  { %3155 = vrot.lane.b32.xlu1 %v5571_v39, %s5784_s0  ;;  %v5573_v34 = vpop.eup %5572 }
0x313b   :  { %v5575_v23 = vpop.eup %5574  ;;  %v3099_v3 = vadd.f32 1.0, %v5573_v34 }
0x313c   :  { %v3136_v32 = vadd.f32 1.0, %v5575_v23  ;;  %v3209_v23 = vrot.slane %v6914_v22, 4 }
0x313d   :  { %5576 = vrcp.f32 %v3099_v3  ;;  %v3111_v9 = vand.u32 2147483648, %v3099_v3  ;;  %vm3105_vm5 = vweird.f32 %v3099_v3  ;;  %v3109_v63 = vand.u32 2147483647, %v3099_v3 }
0x313e   :  { %5578 = vrcp.f32 %v3136_v32  ;;  %v3148_v27 = vand.u32 2147483648, %v3136_v32  ;;  %vm3142_vm6 = vweird.f32 %v3136_v32  ;;  %v3146_v56 = vand.u32 2147483647, %v3136_v32 }
0x313f   :  { %v3112_v33 = vor.u32 1.1754944e-38, %v3111_v9  ;;  %vm3110_vm13 = vcmp.eq.f32.partialorder %v3109_v63, 8.507059e+37 }
0x3140   :  { %v3149_v44 = vor.u32 1.1754944e-38, %v3148_v27  ;;  %vm3147_vm14 = vcmp.eq.f32.partialorder %v3146_v56, 8.507059e+37 }
0x3143   :  { %v5577_v61 = vpop.eup %5576 }
0x3144   :  { %v5579_v4 = vpop.eup %5578  ;;  %v3101_v49 = vmul.f32 %v5577_v61, %v3099_v3  ;;  %vm3106_vm3 = vweird.f32 %v5577_v61  ;;  %v3212_v3 = vrot.slane %v6773_v40, 2 }
0x3145   :  { %v3138_v0 = vmul.f32 %v5579_v4, %v3136_v32  ;;  %vm3143_vm4 = vweird.f32 %v5579_v4  ;;  %vm3107_vm7 = vmor %vm3105_vm5, %vm3106_vm3 }
0x3146   :  { %v3102_v8 = vsub.f32 1.0, %v3101_v49  ;;  %vm3144_vm8 = vmor %vm3142_vm6, %vm3143_vm4 }
0x3147   :  { %v3139_v29 = vsub.f32 1.0, %v3138_v0 }
0x3148   :  { %v3103_v31 = vmul.f32 %v5577_v61, %v3102_v8 }
0x3149   :  { %v3140_v42 = vmul.f32 %v5579_v4, %v3139_v29 }
0x314a   :  { %v3104_v12 = vadd.f32 %v5577_v61, %v3103_v31 }
0x314b   :  { %v3141_v1 = vadd.f32 %v5579_v4, %v3140_v42 }
0x314c   :  { %v3108_v51 = vsel %vm3107_vm7, %v5577_v61, %v3104_v12 }
0x314d   :  { %v3145_v25 = vsel %vm3144_vm8, %v5579_v4, %v3141_v1  ;;  %v3113_v60 = vsel %vm3110_vm13, %v3112_v33, %v3108_v51 }
0x314e   :  { %v3150_v5 = vsel %vm3147_vm14, %v3149_v44, %v3145_v25  ;;  %v3116_v16 = vmul.f32 %v3113_v60, %v6928_v45 }
0x314f   :  { %v3153_v58 = vmul.f32 %v3150_v5, %v6923_v7 }
0x31ab   :  { %v3119_v11 = vpop.permute.xlu0 %3118 }
0x31ac   :  { %v3156_v21 = vpop.permute.xlu1 %3155  ;;  %v3121_v19 = vmul.f32 %v3119_v11, %v3113_v60 }
0x31ad   :  { %v3158_v6 = vmul.f32 %v3156_v21, %v3150_v5 }
0x31ae   :  { %3123 = vrot.lane.b32.xlu2 %v3121_v19, %s5785_s13 }
0x31af   :  { %3160 = vrot.lane.b32.xlu0 %v3158_v6, %s5785_s13 }
0x3208   :  { %v3124_v10 = vpop.permute.xlu2 %3123 }
0x3209   :  { %v6950_v59 = vadd.f32 %v3124_v10, %v3116_v16 }
0x320b   :  { %5580 = vtanh.f32 %v6950_v59 }
0x3211   :  { %v5581_v35 = vpop.eup %5580 }
0x3212   :  { %3129 = vrot.lane.b32.xlu1 %v5581_v35, %s5784_s0 }
0x3221   :  { %v3161_v17 = vpop.permute.xlu0 %3160 }
0x3222   :  { %v6955_v18 = vadd.f32 %v3161_v17, %v3153_v58 }
0x3224   :  { %5582 = vtanh.f32 %v6955_v18 }
0x322a   :  { %v5583_v24 = vpop.eup %5582 }
0x322b   :  { %3166 = vrot.lane.b32.xlu2 %v5583_v24, %s5784_s0 }
0x3284   :  { %v3130_v36 = vpop.permute.xlu1 %3129 }
0x3285   :  { %v3167_v45 = vpop.permute.xlu2 %3166  ;;  %v3132_v55 = vmul.f32 %v3130_v36, %v3113_v60 }
0x3286   :  { %v3169_v39 = vmul.f32 %v3167_v45, %v3150_v5 }
0x3287   :  { %3171 = vrot.lane.b32.xlu0 %v3132_v55, %s5785_s13 }
0x3288   :  { %3175 = vrot.lane.b32.xlu1 %v3169_v39, %s5784_s0 }
0x32f9   :  { %v6961_v54 = vpop.permute.xlu0 %3171 }
0x32fa   :  { %v6963_v53 = vpop.permute.xlu1 %3175 }
0x32fb   :  { %v3178_v7 = vsel %vm312_vm9, %v6961_v54, %v6963_v53 }
0x32fc   :  { %v3179_v34 = vpack.c.bf16 %v3178_v7, %v3178_v7 }
0x32fe   :  { %5020 = vmatmul.msk.bf16.vlgmr.msra.gmra.mxu2 %vm108_vm0, %v3179_v34  ;;  %5021 = vmatmul.msk.bf16.vlgmr.msra.gmra.mxu3 %vm108_vm0, %v3179_v34 }
0x3381   :  { %v3192_v32 = vpop.f32.mrf.mxu2  ;;  %v3205_v61 = vpop.f32.mrf.mxu3 }
0x3382   :  { %v3211_v4 = vadd.f32 %v3209_v23, %v3192_v32  ;;  %v3214_v49 = vadd.f32 %v3212_v3, %v3205_v61 }
0x3384   :  { %5584 = vtanh.f32 %v3211_v4  ;;  %v5022_v42 = vmul.f32 -1.442695, %v3211_v4  ;;  %v5023_v27 = vmul.f32 -1.442695, %v3214_v49 }
0x3385   :  { %5586 = vtanh.f32 %v3214_v49 }
0x3386   :  { %5588 = vpow2.f32 %v5022_v42 }
0x3389   :  { %v3194_v0 = vpop.f32.mrf.mxu2  ;;  %v3207_v8 = vpop.f32.mrf.mxu3 }
0x338a   :  { %v5585_v29 = vpop.eup %5584 }
0x338b   :  { %v5587_v31 = vpop.eup %5586  ;;  %3237 = vrot.lane.b32.xlu2 %v5585_v29, %s5784_s0 }
0x338c   :  { %3274 = vrot.lane.b32.xlu0 %v5587_v31, %s5784_s0  ;;  %v5589_v12 = vpop.eup %5588 }
0x338d   :  { %v3218_v1 = vadd.f32 1.0, %v5589_v12 }
0x338f   :  { %5590 = vrcp.f32 %v3218_v1  ;;  %v3230_v11 = vand.u32 2147483648, %v3218_v1  ;;  %vm3224_vm1 = vweird.f32 %v3218_v1  ;;  %v3228_v60 = vand.u32 2147483647, %v3218_v1 }
0x3390   :  { %5592 = vpow2.f32 %v5023_v27 }
0x3391   :  { %v3231_v5 = vor.u32 1.1754944e-38, %v3230_v11  ;;  %vm3229_vm3 = vcmp.eq.f32.partialorder %v3228_v60, 8.507059e+37 }
0x3395   :  { %v5591_v9 = vpop.eup %5590 }
0x3396   :  { %v3220_v63 = vmul.f32 %v5591_v9, %v3218_v1  ;;  %v5593_v25 = vpop.eup %5592  ;;  %vm3225_vm15 = vweird.f32 %v5591_v9 }
0x3397   :  { %v3255_v33 = vadd.f32 1.0, %v5593_v25  ;;  %vm3226_vm2 = vmor %vm3224_vm1, %vm3225_vm15 }
0x3398   :  { %v3221_v56 = vsub.f32 1.0, %v3220_v63  ;;  %v3328_v63 = vrot.slane %v6914_v22, 6 }
0x3399   :  { %5594 = vrcp.f32 %v3255_v33  ;;  %v3267_v36 = vand.u32 2147483648, %v3255_v33  ;;  %vm3261_vm5 = vweird.f32 %v3255_v33  ;;  %v3265_v45 = vand.u32 2147483647, %v3255_v33 }
0x339a   :  { %v3222_v51 = vmul.f32 %v5591_v9, %v3221_v56 }
0x339b   :  { %v3268_v39 = vor.u32 1.1754944e-38, %v3267_v36  ;;  %vm3266_vm7 = vcmp.eq.f32.partialorder %v3265_v45, 8.507059e+37 }
0x339c   :  { %v3223_v44 = vadd.f32 %v5591_v9, %v3222_v51 }
0x339e   :  { %v3227_v21 = vsel %vm3226_vm2, %v5591_v9, %v3223_v44 }
0x339f   :  { %v3232_v6 = vsel %vm3229_vm3, %v3231_v5, %v3227_v21  ;;  %v5595_v10 = vpop.eup %5594 }
0x33a0   :  { %v3257_v35 = vmul.f32 %v5595_v10, %v3255_v33  ;;  %vm3262_vm4 = vweird.f32 %v5595_v10  ;;  %v3235_v3 = vmul.f32 %v3232_v6, %v6950_v59 }
0x33a1   :  { %vm3263_vm6 = vmor %vm3261_vm5, %vm3262_vm4 }
0x33a2   :  { %v3258_v58 = vsub.f32 1.0, %v3257_v35 }
0x33a4   :  { %v3259_v17 = vmul.f32 %v5595_v10, %v3258_v58 }
0x33a6   :  { %v3260_v24 = vadd.f32 %v5595_v10, %v3259_v17 }
0x33a8   :  { %v3264_v55 = vsel %vm3263_vm6, %v5595_v10, %v3260_v24 }
0x33a9   :  { %v3269_v34 = vsel %vm3266_vm7, %v3268_v39, %v3264_v55 }
0x33aa   :  { %v3272_v32 = vmul.f32 %v3269_v34, %v6955_v18 }
0x33e5   :  { %v3238_v19 = vpop.permute.xlu2 %3237 }
0x33e6   :  { %v3240_v16 = vmul.f32 %v3238_v19, %v3232_v6 }
0x33e8   :  { %3242 = vrot.lane.b32.xlu1 %v3240_v16, %s5785_s13 }
0x33fe   :  { %v3275_v7 = vpop.permute.xlu0 %3274 }
0x33ff   :  { %v3277_v23 = vmul.f32 %v3275_v7, %v3269_v34 }
0x3401   :  { %3279 = vrot.lane.b32.xlu2 %v3277_v23, %s5785_s13 }
0x345a   :  { %v3243_v61 = vpop.permute.xlu1 %3242 }
0x345b   :  { %v3280_v4 = vpop.permute.xlu2 %3279  ;;  %v6978_v49 = vadd.f32 %v3243_v61, %v3235_v3 }
0x345c   :  { %v6980_v0 = vadd.f32 %v3280_v4, %v3272_v32 }
0x345d   :  { %5596 = vtanh.f32 %v6978_v49 }
0x345e   :  { %5598 = vtanh.f32 %v6980_v0 }
0x3463   :  { %v5597_v8 = vpop.eup %5596 }
0x3464   :  { %v5599_v29 = vpop.eup %5598  ;;  %3248 = vrot.lane.b32.xlu0 %v5597_v8, %s5784_s0 }
0x3465   :  { %3285 = vrot.lane.b32.xlu1 %v5599_v29, %s5784_s0 }
0x34d6   :  { %v3249_v31 = vpop.permute.xlu0 %3248 }
0x34d7   :  { %v3286_v59 = vpop.permute.xlu1 %3285  ;;  %v3251_v42 = vmul.f32 %v3249_v31, %v3232_v6 }
0x34d8   :  { %v3288_v18 = vmul.f32 %v3286_v59, %v3269_v34 }
0x34d9   :  { %3290 = vrot.lane.b32.xlu2 %v3251_v42, %s5785_s13 }
0x34da   :  { %3294 = vrot.lane.b32.xlu0 %v3288_v18, %s5784_s0 }
0x3533   :  { %v6988_v12 = vpop.permute.xlu2 %3290 }
0x354c   :  { %v6990_v1 = vpop.permute.xlu0 %3294 }
0x354d   :  { %v3297_v9 = vsel %vm312_vm9, %v6988_v12, %v6990_v1 }
0x354e   :  { %v3298_v27 = vpack.c.bf16 %v3297_v9, %v3297_v9 }
0x3550   :  { %5024 = vmatmul.msk.bf16.vlgmr.msrb.gmra.mxu0 %vm108_vm0, %v3298_v27  ;;  %5025 = vmatmul.msk.bf16.vlgmr.msrb.gmra.mxu1 %vm108_vm0, %v3298_v27 }
0x35cd   :  { %v3311_v56 = vpop.f32.mrf.mxu0  ;;  %v3324_v51 = vpop.f32.mrf.mxu1 }
0x35ce   :  { %v3330_v25 = vadd.f32 %v3328_v63, %v3311_v56  ;;  %v3331_v33 = vadd.f32 %v3324_v51, %v6773_v40 }
0x35d0   :  { %5600 = vtanh.f32 %v3330_v25  ;;  %v5027_v5 = vmul.f32 -1.442695, %v3331_v33  ;;  %v5026_v16 = vmul.f32 -1.442695, %v3330_v25 }
0x35d1   :  { %5602 = vtanh.f32 %v3331_v33 }
0x35d2   :  { %5604 = vpow2.f32 %v5027_v5 }
0x35d5   :  { %v3313_v44 = vpop.f32.mrf.mxu0  ;;  %v3326_v11 = vpop.f32.mrf.mxu1 }
0x35d6   :  { %v5601_v60 = vpop.eup %5600 }
0x35d7   :  { %v5603_v21 = vpop.eup %5602  ;;  %3354 = vrot.lane.b32.xlu1 %v5601_v60, %s5784_s0 }
0x35d8   :  { %3391 = vrot.lane.b32.xlu2 %v5603_v21, %s5784_s0  ;;  %v5605_v19 = vpop.eup %5604 }
0x35d9   :  { %v3372_v6 = vadd.f32 1.0, %v5605_v19 }
0x35db   :  { %5606 = vrcp.f32 %v3372_v6  ;;  %v3384_v36 = vand.u32 2147483648, %v3372_v6  ;;  %vm3378_vm13 = vweird.f32 %v3372_v6  ;;  %v3382_v45 = vand.u32 2147483647, %v3372_v6 }
0x35dc   :  { %5608 = vpow2.f32 %v5026_v16 }
0x35dd   :  { %v3385_v39 = vor.u32 1.1754944e-38, %v3384_v36  ;;  %vm3383_vm15 = vcmp.eq.f32.partialorder %v3382_v45, 8.507059e+37  ;;  %v5205_v45 = vld [vmem:[%s7508_s1 + $0xd4] sm:$0xf] }
0x35e1   :  { %v5607_v22 = vpop.eup %5606 }
0x35e2   :  { %v3374_v10 = vmul.f32 %v5607_v22, %v3372_v6  ;;  %v5609_v35 = vpop.eup %5608  ;;  %vm3379_vm8 = vweird.f32 %v5607_v22  ;;  %v5064_v6 = vld [vmem:[%s7508_s1 + $0xf8] sm:$0xf0] }
0x35e3   :  { %v3335_v17 = vadd.f32 1.0, %v5609_v35  ;;  %vm3380_vm14 = vmor %vm3378_vm13, %vm3379_vm8  ;;  %v5056_v35 = vld [vmem:[%s7508_s1 + $0xe8] sm:$0xf0] }
0x35e4   :  { %v3375_v40 = vsub.f32 1.0, %v3374_v10  ;;  %v5210_v10 = vld [vmem:[%s7508_s1 + $0xf4] sm:$0xf0] }
0x35e5   :  { %5610 = vrcp.f32 %v3335_v17  ;;  %v3347_v29 = vand.u32 2147483648, %v3335_v17  ;;  %vm3341_vm2 = vweird.f32 %v3335_v17  ;;  %v3345_v31 = vand.u32 2147483647, %v3335_v17 }
0x35e6   :  { %v3376_v58 = vmul.f32 %v5607_v22, %v3375_v40  ;;  %v5207_v40 = vld [vmem:[%s7508_s1 + $0xe4] sm:$0xf] }
0x35e7   :  { %v3348_v42 = vor.u32 1.1754944e-38, %v3347_v29  ;;  %vm3346_vm4 = vcmp.eq.f32.partialorder %v3345_v31, 8.507059e+37  ;;  %v5059_v36 = vor.u32 %v5207_v40, %v5056_v35  ;;  %v5098_v29 = vld [vmem:[#allocation2 + $0xf8] sm:$0xf0]  ;;  %v5211_v40 = vld [vmem:[#allocation2 + $0xc4] sm:$0xf] }
0x35e8   :  { %v3377_v24 = vadd.f32 %v5607_v22, %v3376_v58  ;;  %v5074_v35 = vld [vmem:[#allocation2 + $0xc8] sm:$0xf0] }
0x35ea   :  { %v3381_v55 = vsel %vm3380_vm14, %v5607_v22, %v3377_v24  ;;  %v5062_v22 = vld [vmem:[%s7508_s1 + $0xf0] sm:$0xf]  ;;  %v5208_v24 = vld [vmem:[%s7508_s1 + $0xe4] sm:$0xf0] }
0x35eb   :  { %v3386_v34 = vsel %vm3383_vm15, %v3385_v39, %v3381_v55  ;;  %v5611_v23 = vpop.eup %5610  ;;  %v5063_v58 = vor.u32 %v5210_v10, %v5062_v22  ;;  %v5048_v39 = vld [vmem:[%s7508_s1 + $0xd8] sm:$0xf0]  ;;  %v5072_v22 = vld [vmem:[#allocation2 + $0xc0] sm:$0xf]  ;;  %v5212_v10 = vld [vmem:[#allocation2 + $0xc4] sm:$0xf0] }
0x35ec   :  { %v3337_v32 = vmul.f32 %v5611_v23, %v3335_v17  ;;  %vm3342_vm1 = vweird.f32 %v5611_v23  ;;  %v3389_v63 = vmul.f32 %v3386_v34, %v6980_v0  ;;  %v5054_v17 = vld [vmem:[%s7508_s1 + $0xe0] sm:$0xf] }
0x35ed   :  { %vm3343_vm3 = vmor %vm3341_vm2, %vm3342_vm1  ;;  %3520 = vmatpush.bf16.msrb.mxu2 %v5063_v58  ;;  %v5055_v55 = vor.u32 %v5208_v24, %v5054_v17  ;;  %v7084_v58 = vld [vmem:[%s7511_s4] sm:$0xff]  ;;  %v7088_v24 = vor.u32 %v5212_v10, %v5072_v22 }
0x35ee   :  { %v3338_v61 = vsub.f32 1.0, %v3337_v32  ;;  %v3648_v17 = vrot.slane %v7084_v58, 6 }
0x35f0   :  { %v3339_v4 = vmul.f32 %v5611_v23, %v3338_v61  ;;  %v5051_v61 = vor.u32 %v5205_v45, %v5048_v39  ;;  %v3553_v45 = vrot.slane %v5921_v52, 3  ;;  %v3430_v39 = vsel %vm312_vm9, %v6961_v54, %v6870_v15 }
0x35f1   :  { %3521 = vmatpush.bf16.msrb.mxu2 %v5055_v55  ;;  %v3426_v55 = vsel %vm312_vm9, %v6835_v28, %v6990_v1  ;;  %v3431_v28 = vsel %vm312_vm9, %v6988_v12, %v6833_v62  ;;  %v3443_v15 = vrot.slane %v3430_v39, 6  ;;  %v3429_v62 = vsel %vm312_vm9, %v6936_v47, %v6905_v30 }
0x35f2   :  { %v3340_v8 = vadd.f32 %v5611_v23, %v3339_v4  ;;  %v3434_v1 = vrot.slane %v3426_v55, 6 }
0x35f4   :  { %v3344_v59 = vsel %vm3343_vm3, %v5611_v23, %v3340_v8  ;;  %v5046_v23 = vld [vmem:[%s7508_s1 + $0xd0] sm:$0xf]  ;;  %v5217_v8 = vld [vmem:[#allocation2 + $0xf4] sm:$0xf] }
0x35f5   :  { %v3349_v9 = vsel %vm3346_vm4, %v3348_v42, %v3344_v59  ;;  %v7054_v31 = vor.u32 %v5217_v8, %v5098_v29  ;;  %v5203_v59 = vld [vmem:[%s7508_s1 + $0xc4] sm:$0xf]  ;;  %v5040_v42 = vld [vmem:[%s7508_s1 + $0xc8] sm:$0xf0] }
0x35f6   :  { %v3352_v33 = vmul.f32 %v3349_v9, %v6978_v49  ;;  %v5209_v49 = vld [vmem:[%s7508_s1 + $0xf4] sm:$0xf] }
0x35f7   :  { %v5067_v16 = vor.u32 %v5209_v49, %v5064_v6  ;;  %3614 = vmatpush.bf16.msra.mxu1 %v7054_v31  ;;  %v5213_v49 = vld [vmem:[#allocation2 + $0xd4] sm:$0xf]  ;;  %v5082_v6 = vld [vmem:[#allocation2 + $0xd8] sm:$0xf0] }
0x35f9   :  { %3534 = vmatpush.bf16.msrb.mxu3 %v5067_v16  ;;  %v7078_v16 = vor.u32 %v5213_v49, %v5082_v6 }
0x35fd   :  { %3535 = vmatpush.bf16.msrb.mxu3 %v5059_v36  ;;  %v7091_v36 = vor.u32 %v5211_v40, %v5074_v35 }
0x3601   :  { %3536 = vmatpush.bf16.msrb.mxu3 %v5051_v61 }
0x3632   :  { %v3392_v7 = vpop.permute.xlu2 %3391 }
0x3633   :  { %v3394_v3 = vmul.f32 %v3392_v7, %v3386_v34  ;;  %v5096_v7 = vld [vmem:[#allocation2 + $0xf0] sm:$0xf] }
0x3635   :  { %3396 = vrot.lane.b32.xlu1 %v3394_v3, %s5785_s13  ;;  %v5206_v3 = vld [vmem:[%s7508_s1 + $0xd4] sm:$0xf0] }
0x3636   :  { %v5047_v4 = vor.u32 %v5206_v3, %v5046_v23 }
0x3638   :  { %3522 = vmatpush.bf16.msrb.mxu2 %v5047_v4  ;;  %v3454_v4 = vsel %vm1181_vm10, %v3429_v62, %v3443_v15 }
0x3649   :  { %v3355_v18 = vpop.permute.xlu1 %3354 }
0x364a   :  { %v3357_v27 = vmul.f32 %v3355_v18, %v3349_v9  ;;  %v5038_v18 = vld [vmem:[%s7508_s1 + $0xc0] sm:$0xf] }
0x364c   :  { %3359 = vrot.lane.b32.xlu0 %v3357_v27, %s5785_s13  ;;  %v5204_v27 = vld [vmem:[%s7508_s1 + $0xc4] sm:$0xf0] }
0x36a7   :  { %v3397_v56 = vpop.permute.xlu1 %3396 }
0x36a8   :  { %v7004_v51 = vadd.f32 %v3397_v56, %v3389_v63  ;;  %v5088_v63 = vld [vmem:[#allocation2 + $0xe0] sm:$0xf]  ;;  %v5216_v56 = vld [vmem:[#allocation2 + $0xe4] sm:$0xf0] }
0x36aa   :  { %5612 = vtanh.f32 %v7004_v51 }
0x36b0   :  { %v5613_v25 = vpop.eup %5612 }
0x36b1   :  { %3402 = vrot.lane.b32.xlu0 %v5613_v25, %s5784_s0  ;;  %v5039_v25 = vor.u32 %v5204_v27, %v5038_v18  ;;  %v5753_v18 = vld [vmem:[%s7510_s3] sm:$0xff] }
0x36b2   :  { %v3468_v27 = vperm.slane %v5753_v18, 7 }
0x36b3   :  { %3523 = vmatpush.bf16.msrb.mxu2 %v5039_v25 }
0x36be   :  { %v3360_v44 = vpop.permute.xlu0 %3359 }
0x36bf   :  { %v7009_v11 = vadd.f32 %v3360_v44, %v3352_v33  ;;  %v7069_v33 = vor.u32 %v5216_v56, %v5088_v63  ;;  %v5215_v44 = vld [vmem:[#allocation2 + $0xe4] sm:$0xf]  ;;  %v3472_v56 = vperm.slane %v3468_v27, 3 }
0x36c1   :  { %5614 = vtanh.f32 %v7009_v11 }
0x36c7   :  { %v5615_v60 = vpop.eup %5614 }
0x36c8   :  { %3365 = vrot.lane.b32.xlu2 %v5615_v60, %s5784_s0  ;;  %v5090_v60 = vld [vmem:[#allocation2 + $0xe8] sm:$0xf0] }
0x3722   :  { %v3366_v21 = vpop.permute.xlu2 %3365 }
0x3723   :  { %v3403_v0 = vpop.permute.xlu0 %3402  ;;  %v3368_v5 = vmul.f32 %v3366_v21, %v3349_v9  ;;  %v5043_v9 = vor.u32 %v5203_v59, %v5040_v42  ;;  %v7071_v21 = vor.u32 %v5215_v44, %v5090_v60 }
0x3724   :  { %v3405_v19 = vmul.f32 %v3403_v0, %v3386_v34  ;;  %v5218_v34 = vld [vmem:[#allocation2 + $0xf4] sm:$0xf0]  ;;  %v5080_v0 = vld [vmem:[#allocation2 + $0xd0] sm:$0xf] }
0x3725   :  { %3407 = vrot.lane.b32.xlu1 %v3368_v5, %s5785_s13  ;;  %v7051_v32 = vor.u32 %v5218_v34, %v5096_v7  ;;  %3537 = vmatpush.bf16.msrb.mxu3 %v5043_v9  ;;  %v5214_v5 = vld [vmem:[#allocation2 + $0xd4] sm:$0xf0]  ;;  %v3427_v34 = vsel %vm312_vm9, %v6868_v20, %v6963_v53  ;;  %v3446_v20 = vrot.slane %v3431_v28, 4  ;;  %v3467_v9 = vperm.slane %v5753_v18, 3 }
0x3726   :  { %3411 = vrot.lane.b32.xlu2 %v3405_v19, %s5784_s0  ;;  %3615 = vmatpush.bf16.msra.mxu1 %v7071_v21  ;;  %v7075_v19 = vor.u32 %v5214_v5, %v5080_v0  ;;  %v3437_v23 = vrot.slane %v3427_v34, 4 }
0x3727   :  { %3601 = vmatpush.bf16.msra.mxu0 %v7051_v32  ;;  %3726 = vmatpush.bf16.msra.mxu2 %v7051_v32  ;;  %v7170_v63 = vperm.slane %v3467_v9, 3 }
0x3729   :  { %3739 = vmatpush.bf16.msra.mxu3 %v7054_v31 }
0x372a   :  { %3616 = vmatpush.bf16.msra.mxu1 %v7078_v16 }
0x372b   :  { %3602 = vmatpush.bf16.msra.mxu0 %v7069_v33  ;;  %3727 = vmatpush.bf16.msra.mxu2 %v7069_v33 }
0x372d   :  { %3740 = vmatpush.bf16.msra.mxu3 %v7071_v21 }
0x372e   :  { %3649 = vrot.lane.b32.xlu2 %v3648_v17, %s5783_s10  ;;  %3617 = vmatpush.bf16.msra.mxu1 %v7091_v36 }
0x372f   :  { %3603 = vmatpush.bf16.msra.mxu0 %v7075_v19  ;;  %3728 = vmatpush.bf16.msra.mxu2 %v7075_v19 }
0x3731   :  { %3741 = vmatpush.bf16.msra.mxu3 %v7078_v16  ;;  %5103 = vmatmul.msk.bf16.vlgmr.msra.gmra.mxu1 %vm108_vm0, %v3553_v45 }
0x3732   :  { %3859 = vmatpush.bf16.msrb.mxu1 %v7054_v31 }
0x3733   :  { %3604 = vmatpush.bf16.msra.mxu0 %v7088_v24  ;;  %3729 = vmatpush.bf16.msra.mxu2 %v7088_v24 }
0x3735   :  { %3742 = vmatpush.bf16.msra.mxu3 %v7091_v36 }
0x3736   :  { %5102 = vmatmul.msk.bf16.vlgmr.msra.gmra.mxu0 %vm108_vm0, %v3553_v45  ;;  %3860 = vmatpush.bf16.msrb.mxu1 %v7071_v21 }
0x3737   :  { %3846 = vmatpush.bf16.msrb.mxu0 %v7051_v32 }
0x373a   :  { %3861 = vmatpush.bf16.msrb.mxu1 %v7078_v16 }
0x373b   :  { %3847 = vmatpush.bf16.msrb.mxu0 %v7069_v33 }
0x373e   :  { %3862 = vmatpush.bf16.msrb.mxu1 %v7091_v36 }
0x373f   :  { %3848 = vmatpush.bf16.msrb.mxu0 %v7075_v19 }
0x3742   :  { %4095 = vmatpush.bf16.msra.mxu1 %v7054_v31 }
0x3743   :  { %3849 = vmatpush.bf16.msrb.mxu0 %v7088_v24 }
0x3746   :  { %4096 = vmatpush.bf16.msra.mxu1 %v7071_v21 }
0x3747   :  { %4082 = vmatpush.bf16.msra.mxu0 %v7051_v32 }
0x374a   :  { %4097 = vmatpush.bf16.msra.mxu1 %v7078_v16 }
0x374b   :  { %4083 = vmatpush.bf16.msra.mxu0 %v7069_v33 }
0x374e   :  { %4098 = vmatpush.bf16.msra.mxu1 %v7091_v36 }
0x374f   :  { %4084 = vmatpush.bf16.msra.mxu0 %v7075_v19 }
0x3753   :  { %4085 = vmatpush.bf16.msra.mxu0 %v7088_v24 }
0x3780   :  { %v7112_v52 = vpop.permute.xlu2 %3411 }
0x3781   :  { %v3425_v7 = vsel %vm312_vm9, %v6796_v26, %v7112_v52  ;;  %v3428_v26 = vsel %vm312_vm9, %v6903_v57, %v6934_v2  ;;  %v3455_v2 = vsel %vm1183_vm11, %v3454_v4, %v3446_v20 }
0x3782   :  { %v3451_v54 = vsel %vm1181_vm10, %v3425_v7, %v3434_v1  ;;  %v3440_v61 = vrot.slane %v3428_v26, 2 }
0x3783   :  { %v3452_v12 = vsel %vm1183_vm11, %v3451_v54, %v3437_v23 }
0x3784   :  { %v3453_v8 = vsel %vm1185_vm12, %v3452_v12, %v3440_v61 }
0x3788   :  { %v3650_v27 = vpop.permute.xlu2 %3649 }
0x3797   :  { %v7138_v53 = vpop.permute.xlu1 %3407 }
0x3798   :  { %v3432_v3 = vsel %vm312_vm9, %v7138_v53, %v6798_v14 }
0x3799   :  { %v3449_v57 = vrot.slane %v3432_v3, 2 }
0x379b   :  { %v3456_v29 = vsel %vm1185_vm12, %v3455_v2, %v3449_v57 }
0x379c   :  { %v3457_v30 = vpack.c.bf16 %v3456_v29, %v3453_v8 }
0x379e   :  { %5068 = vmatmul.msk.bf16.vlgmr.msrb.gmra.mxu2 %vm108_vm0, %v3457_v30  ;;  %5069 = vmatmul.msk.bf16.vlgmr.msrb.gmra.mxu3 %vm108_vm0, %v3457_v30 }
0x379f   :  { %3978 = vmatpush.bf16.msrb.mxu3 %v7054_v31  ;;  %3965 = vmatpush.bf16.msrb.mxu2 %v7051_v32 }
0x37a3   :  { %3979 = vmatpush.bf16.msrb.mxu3 %v7071_v21  ;;  %3966 = vmatpush.bf16.msrb.mxu2 %v7069_v33 }
0x37a7   :  { %3980 = vmatpush.bf16.msrb.mxu3 %v7078_v16  ;;  %3967 = vmatpush.bf16.msrb.mxu2 %v7075_v19 }
0x37ab   :  { %3981 = vmatpush.bf16.msrb.mxu3 %v7091_v36  ;;  %3968 = vmatpush.bf16.msrb.mxu2 %v7088_v24 }
0x37ae   :  { %v3619_v47 = vpop.f32.mrf.mxu1 }
0x37b3   :  { %v3606_v14 = vpop.f32.mrf.mxu0 }
0x37b6   :  { %v3621_v42 = vpop.f32.mrf.mxu1 }
0x37bb   :  { %v3608_v59 = vpop.f32.mrf.mxu0 }
0x3821   :  { %v3525_v25 = vpop.f32.mrf.mxu2  ;;  %v3539_v44 = vpop.f32.mrf.mxu3 }
0x3822   :  { %v7173_v60 = vadd.f32 %v3525_v25, %v7170_v63  ;;  %v7175_v0 = vadd.f32 %v3539_v44, %v3472_v56 }
0x3824   :  { %v3623_v5 = vadd.f32 %v3606_v14, %v7173_v60 }
0x3826   :  { %5616 = vtanh.f32 %v3623_v5  ;;  %v5104_v45 = vmul.f32 -1.442695, %v3623_v5 }
0x3829   :  { %v3541_v49 = vpop.f32.mrf.mxu3 }
0x382a   :  { %v7178_v6 = vadd.f32 %v3541_v49, %v3472_v56 }
0x382c   :  { %v5617_v22 = vpop.eup %5616  ;;  %v3625_v10 = vrot.slane %v7178_v6, 6 }
0x382d   :  { %3654 = vrot.lane.b32.xlu0 %v5617_v22, %s5784_s0 }
0x382e   :  { %v3627_v40 = vadd.f32 %v3625_v10, %v3619_v47 }
0x3830   :  { %5618 = vtanh.f32 %v3627_v40  ;;  %v5105_v39 = vmul.f32 -1.442695, %v3627_v40 }
0x3831   :  { %5620 = vpow2.f32 %v5104_v45 }
0x3832   :  { %5622 = vpow2.f32 %v5105_v39 }
0x3835   :  { %3689 = vrot.lane.b32.xlu0 %v3648_v17, %s5784_s0 }
0x3836   :  { %v5619_v35 = vpop.eup %5618 }
0x3837   :  { %3694 = vrot.lane.b32.xlu1 %v5619_v35, %s5784_s0  ;;  %v5621_v55 = vpop.eup %5620 }
0x3838   :  { %v3631_v7 = vadd.f32 1.0, %v5621_v55  ;;  %v5623_v34 = vpop.eup %5622 }
0x3839   :  { %v3672_v1 = vadd.f32 1.0, %v5623_v34 }
0x383a   :  { %5624 = vrcp.f32 %v3631_v7  ;;  %v3643_v20 = vand.u32 2147483648, %v3631_v7  ;;  %vm3637_vm6 = vweird.f32 %v3631_v7  ;;  %v3641_v62 = vand.u32 2147483647, %v3631_v7 }
0x383b   :  { %5626 = vrcp.f32 %v3672_v1  ;;  %v3684_v30 = vand.u32 2147483648, %v3672_v1  ;;  %vm3678_vm14 = vweird.f32 %v3672_v1  ;;  %v3682_v14 = vand.u32 2147483647, %v3672_v1 }
0x383c   :  { %v3644_v61 = vor.u32 1.1754944e-38, %v3643_v20  ;;  %vm3642_vm8 = vcmp.eq.f32.partialorder %v3641_v62, 8.507059e+37 }
0x383d   :  { %v3685_v59 = vor.u32 1.1754944e-38, %v3684_v30  ;;  %vm3683_vm1 = vcmp.eq.f32.partialorder %v3682_v14, 8.507059e+37 }
0x3840   :  { %v5625_v28 = vpop.eup %5624 }
0x3841   :  { %v3633_v15 = vmul.f32 %v5625_v28, %v3631_v7  ;;  %v5627_v26 = vpop.eup %5626  ;;  %vm3638_vm5 = vweird.f32 %v5625_v28 }
0x3842   :  { %v3674_v58 = vmul.f32 %v5627_v26, %v3672_v1  ;;  %vm3639_vm7 = vmor %vm3637_vm6, %vm3638_vm5  ;;  %vm3679_vm13 = vweird.f32 %v5627_v26 }
0x3843   :  { %v3634_v54 = vsub.f32 1.0, %v3633_v15  ;;  %vm3680_vm15 = vmor %vm3678_vm14, %vm3679_vm13 }
0x3844   :  { %v3675_v12 = vsub.f32 1.0, %v3674_v58 }
0x3845   :  { %v3635_v23 = vmul.f32 %v5625_v28, %v3634_v54  ;;  %v7215_v54 = vpop.f32.mrf.mxu2 }
0x3846   :  { %v3676_v4 = vmul.f32 %v5627_v26, %v3675_v12 }
0x3847   :  { %v3636_v17 = vadd.f32 %v5625_v28, %v3635_v23  ;;  %v3752_v23 = vrot.slane %v7178_v6, 4 }
0x3848   :  { %v3677_v29 = vadd.f32 %v5627_v26, %v3676_v4 }
0x3849   :  { %v3640_v3 = vsel %vm3639_vm7, %v5625_v28, %v3636_v17 }
0x384a   :  { %v3645_v57 = vsel %vm3642_vm8, %v3644_v61, %v3640_v3  ;;  %v3681_v47 = vsel %vm3680_vm15, %v5627_v26, %v3677_v29  ;;  %v3749_v26 = vrot.slane %v7173_v60, 2 }
0x384b   :  { %v3686_v42 = vsel %vm3683_vm1, %v3685_v59, %v3681_v47  ;;  %v3652_v22 = vmul.f32 %v3650_v27, %v3645_v57 }
0x389f   :  { %v3655_v2 = vpop.permute.xlu0 %3654 }
0x38a0   :  { %v3657_v8 = vmul.f32 %v3655_v2, %v3645_v57 }
0x38a2   :  { %3659 = vrot.lane.b32.xlu1 %v3657_v8, %s5785_s13 }
0x38a7   :  { %v3690_v56 = vpop.permute.xlu0 %3689 }
0x38a8   :  { %v3692_v25 = vmul.f32 %v3690_v56, %v3686_v42 }
0x38a9   :  { %v3695_v18 = vpop.permute.xlu1 %3694 }
0x38aa   :  { %v3697_v9 = vmul.f32 %v3695_v18, %v3686_v42 }
0x38ac   :  { %3699 = vrot.lane.b32.xlu2 %v3697_v9, %s5785_s13 }
0x3906   :  { %v3700_v44 = vpop.permute.xlu2 %3699 }
0x3907   :  { %v7188_v5 = vadd.f32 %v3700_v44, %v3692_v25 }
0x3909   :  { %5628 = vtanh.f32 %v7188_v5 }
0x390f   :  { %v5629_v49 = vpop.eup %5628 }
0x3910   :  { %3705 = vrot.lane.b32.xlu1 %v5629_v49, %s5784_s0 }
0x3914   :  { %v3660_v10 = vpop.permute.xlu1 %3659 }
0x3915   :  { %v7192_v40 = vadd.f32 %v3660_v10, %v3652_v22 }
0x3917   :  { %5630 = vtanh.f32 %v7192_v40 }
0x391d   :  { %v5631_v35 = vpop.eup %5630 }
0x391e   :  { %3665 = vrot.lane.b32.xlu0 %v5631_v35, %s5784_s0 }
0x3982   :  { %v3706_v45 = vpop.permute.xlu1 %3705 }
0x3983   :  { %v3708_v55 = vmul.f32 %v3706_v45, %v3686_v42 }
0x3985   :  { %3714 = vrot.lane.b32.xlu0 %v3708_v55, %s5784_s0 }
0x3990   :  { %v3666_v39 = vpop.permute.xlu0 %3665 }
0x3991   :  { %v3668_v7 = vmul.f32 %v3666_v39, %v3645_v57 }
0x3993   :  { %3710 = vrot.lane.b32.xlu2 %v3668_v7, %s5785_s13 }
0x39ed   :  { %v7198_v34 = vpop.permute.xlu2 %3710 }
0x39f7   :  { %v7200_v28 = vpop.permute.xlu0 %3714 }
0x39f8   :  { %v3717_v1 = vsel %vm312_vm9, %v7198_v34, %v7200_v28 }
0x39f9   :  { %v3718_v15 = vpack.c.bf16 %v3717_v1, %v3717_v1 }
0x39fb   :  { %5106 = vmatmul.msk.bf16.vlgmr.msra.gmra.mxu2 %vm108_vm0, %v3718_v15  ;;  %5107 = vmatmul.msk.bf16.vlgmr.msra.gmra.mxu3 %vm108_vm0, %v3718_v15 }
0x39fc   :  { %4200 = vmatpush.bf16.msra.mxu2 %v7051_v32  ;;  %4213 = vmatpush.bf16.msra.mxu3 %v7054_v31 }
0x3a00   :  { %4201 = vmatpush.bf16.msra.mxu2 %v7069_v33  ;;  %4214 = vmatpush.bf16.msra.mxu3 %v7071_v21 }
0x3a04   :  { %4202 = vmatpush.bf16.msra.mxu2 %v7075_v19  ;;  %4215 = vmatpush.bf16.msra.mxu3 %v7078_v16 }
0x3a08   :  { %4203 = vmatpush.bf16.msra.mxu2 %v7088_v24  ;;  %4216 = vmatpush.bf16.msra.mxu3 %v7091_v36 }
0x3a7e   :  { %v3731_v58 = vpop.f32.mrf.mxu2  ;;  %v3744_v17 = vpop.f32.mrf.mxu3 }
0x3a7f   :  { %v3751_v20 = vadd.f32 %v3749_v26, %v3731_v58  ;;  %v3754_v62 = vadd.f32 %v3752_v23, %v3744_v17 }
0x3a81   :  { %5632 = vtanh.f32 %v3751_v20  ;;  %v5109_v57 = vmul.f32 -1.442695, %v3754_v62  ;;  %v5108_v30 = vmul.f32 -1.442695, %v3751_v20 }
0x3a82   :  { %5634 = vtanh.f32 %v3754_v62 }
0x3a83   :  { %5636 = vpow2.f32 %v5109_v57 }
0x3a86   :  { %v3733_v12 = vpop.f32.mrf.mxu2  ;;  %v3746_v3 = vpop.f32.mrf.mxu3 }
0x3a87   :  { %v5633_v61 = vpop.eup %5632 }
0x3a88   :  { %v5635_v4 = vpop.eup %5634  ;;  %3777 = vrot.lane.b32.xlu1 %v5633_v61, %s5784_s0 }
0x3a89   :  { %3814 = vrot.lane.b32.xlu2 %v5635_v4, %s5784_s0  ;;  %v5637_v2 = vpop.eup %5636 }
0x3a8a   :  { %v3795_v8 = vadd.f32 1.0, %v5637_v2 }
0x3a8c   :  { %5638 = vrcp.f32 %v3795_v8  ;;  %v3807_v27 = vand.u32 2147483648, %v3795_v8  ;;  %vm3801_vm3 = vweird.f32 %v3795_v8  ;;  %v3805_v56 = vand.u32 2147483647, %v3795_v8 }
0x3a8d   :  { %5640 = vpow2.f32 %v5108_v30 }
0x3a8e   :  { %v3808_v44 = vor.u32 1.1754944e-38, %v3807_v27  ;;  %vm3806_vm5 = vcmp.eq.f32.partialorder %v3805_v56, 8.507059e+37 }
0x3a92   :  { %v5639_v29 = vpop.eup %5638 }
0x3a93   :  { %v3797_v14 = vmul.f32 %v5639_v29, %v3795_v8  ;;  %v5641_v59 = vpop.eup %5640  ;;  %vm3802_vm2 = vweird.f32 %v5639_v29 }
0x3a94   :  { %v3758_v18 = vadd.f32 1.0, %v5641_v59  ;;  %vm3803_vm4 = vmor %vm3801_vm3, %vm3802_vm2 }
0x3a95   :  { %v3798_v47 = vsub.f32 1.0, %v3797_v14 }
0x3a96   :  { %5642 = vrcp.f32 %v3758_v18  ;;  %v3770_v1 = vand.u32 2147483648, %v3758_v18  ;;  %vm3764_vm7 = vweird.f32 %v3758_v18  ;;  %v3768_v15 = vand.u32 2147483647, %v3758_v18 }
0x3a97   :  { %v3799_v42 = vmul.f32 %v5639_v29, %v3798_v47 }
0x3a98   :  { %v3771_v23 = vor.u32 1.1754944e-38, %v3770_v1  ;;  %vm3769_vm13 = vcmp.eq.f32.partialorder %v3768_v15, 8.507059e+37 }
0x3a99   :  { %v3800_v9 = vadd.f32 %v5639_v29, %v3799_v42 }
0x3a9b   :  { %v3804_v25 = vsel %vm3803_vm4, %v5639_v29, %v3800_v9  ;;  %v3871_v9 = vrot.slane %v7178_v6, 2 }
0x3a9c   :  { %v3809_v22 = vsel %vm3806_vm5, %v3808_v44, %v3804_v25  ;;  %v5643_v10 = vpop.eup %5642 }
0x3a9d   :  { %v3760_v45 = vmul.f32 %v5643_v10, %v3758_v18  ;;  %vm3765_vm6 = vweird.f32 %v5643_v10  ;;  %v3812_v62 = vmul.f32 %v3809_v22, %v7188_v5  ;;  %v3868_v18 = vrot.slane %v7173_v60, 4 }
0x3a9e   :  { %vm3766_vm8 = vmor %vm3764_vm7, %vm3765_vm6 }
0x3a9f   :  { %v3761_v55 = vsub.f32 1.0, %v3760_v45 }
0x3aa1   :  { %v3762_v39 = vmul.f32 %v5643_v10, %v3761_v55 }
0x3aa3   :  { %v3763_v7 = vadd.f32 %v5643_v10, %v3762_v39 }
0x3aa5   :  { %v3767_v26 = vsel %vm3766_vm8, %v5643_v10, %v3763_v7 }
0x3aa6   :  { %v3772_v17 = vsel %vm3769_vm13, %v3771_v23, %v3767_v26 }
0x3aa7   :  { %v3775_v4 = vmul.f32 %v3772_v17, %v7192_v40 }
0x3ae3   :  { %v3815_v49 = vpop.permute.xlu2 %3814 }
0x3ae4   :  { %v3817_v35 = vmul.f32 %v3815_v49, %v3809_v22 }
0x3ae6   :  { %3819 = vrot.lane.b32.xlu1 %v3817_v35, %s5785_s13 }
0x3afa   :  { %v3778_v58 = vpop.permute.xlu1 %3777 }
0x3afb   :  { %v3780_v20 = vmul.f32 %v3778_v58, %v3772_v17 }
0x3afd   :  { %3782 = vrot.lane.b32.xlu0 %v3780_v20, %s5785_s13 }
0x3b58   :  { %v3820_v12 = vpop.permute.xlu1 %3819 }
0x3b59   :  { %v7224_v3 = vadd.f32 %v3820_v12, %v3812_v62 }
0x3b5b   :  { %5644 = vtanh.f32 %v7224_v3 }
0x3b61   :  { %v5645_v61 = vpop.eup %5644 }
0x3b62   :  { %3825 = vrot.lane.b32.xlu0 %v5645_v61, %s5784_s0 }
0x3b6f   :  { %v3783_v57 = vpop.permute.xlu0 %3782 }
0x3b70   :  { %v7229_v2 = vadd.f32 %v3783_v57, %v3775_v4 }
0x3b72   :  { %5646 = vtanh.f32 %v7229_v2 }
0x3b78   :  { %v5647_v8 = vpop.eup %5646 }
0x3b79   :  { %3788 = vrot.lane.b32.xlu2 %v5647_v8, %s5784_s0 }
0x3bd3   :  { %v3789_v29 = vpop.permute.xlu2 %3788 }
0x3bd4   :  { %v3826_v5 = vpop.permute.xlu0 %3825  ;;  %v3791_v30 = vmul.f32 %v3789_v29, %v3772_v17 }
0x3bd5   :  { %v3828_v14 = vmul.f32 %v3826_v5, %v3809_v22 }
0x3bd6   :  { %3830 = vrot.lane.b32.xlu1 %v3791_v30, %s5785_s13 }
0x3bd7   :  { %3834 = vrot.lane.b32.xlu2 %v3828_v14, %s5784_s0 }
0x3c31   :  { %v7235_v47 = vpop.permute.xlu2 %3834 }
0x3c48   :  { %v7237_v59 = vpop.permute.xlu1 %3830 }
0x3c49   :  { %v3837_v40 = vsel %vm312_vm9, %v7237_v59, %v7235_v47 }
0x3c4a   :  { %v3838_v42 = vpack.c.bf16 %v3837_v40, %v3837_v40 }
0x3c4c   :  { %5110 = vmatmul.msk.bf16.vlgmr.msrb.gmra.mxu0 %vm108_vm0, %v3838_v42  ;;  %5111 = vmatmul.msk.bf16.vlgmr.msrb.gmra.mxu1 %vm108_vm0, %v3838_v42 }
0x3c4d   :  { %4333 = vmatpush.bf16.msrb.mxu1 %v7054_v31  ;;  %4320 = vmatpush.bf16.msrb.mxu0 %v7051_v32 }
0x3c51   :  { %4334 = vmatpush.bf16.msrb.mxu1 %v7071_v21  ;;  %4321 = vmatpush.bf16.msrb.mxu0 %v7069_v33 }
0x3c55   :  { %4335 = vmatpush.bf16.msrb.mxu1 %v7078_v16  ;;  %4322 = vmatpush.bf16.msrb.mxu0 %v7075_v19 }
0x3c59   :  { %4336 = vmatpush.bf16.msrb.mxu1 %v7091_v36  ;;  %4323 = vmatpush.bf16.msrb.mxu0 %v7088_v24 }
0x3cc9   :  { %v3851_v27 = vpop.f32.mrf.mxu0  ;;  %v3864_v56 = vpop.f32.mrf.mxu1 }
0x3cca   :  { %v3870_v25 = vadd.f32 %v3868_v18, %v3851_v27  ;;  %v3873_v44 = vadd.f32 %v3871_v9, %v3864_v56 }
0x3ccc   :  { %5648 = vtanh.f32 %v3870_v25  ;;  %v5112_v45 = vmul.f32 -1.442695, %v3870_v25  ;;  %v5113_v55 = vmul.f32 -1.442695, %v3873_v44 }
0x3ccd   :  { %5650 = vtanh.f32 %v3873_v44 }
0x3cce   :  { %5652 = vpow2.f32 %v5112_v45 }
0x3ccf   :  { %5654 = vpow2.f32 %v5113_v55 }
0x3cd1   :  { %v3853_v49 = vpop.f32.mrf.mxu0  ;;  %v3866_v22 = vpop.f32.mrf.mxu1 }
0x3cd2   :  { %v5649_v10 = vpop.eup %5648 }
0x3cd3   :  { %v5651_v35 = vpop.eup %5650  ;;  %3896 = vrot.lane.b32.xlu0 %v5649_v10, %s5784_s0 }
0x3cd4   :  { %3933 = vrot.lane.b32.xlu1 %v5651_v35, %s5784_s0  ;;  %v5653_v39 = vpop.eup %5652 }
0x3cd5   :  { %v5655_v7 = vpop.eup %5654  ;;  %v3877_v1 = vadd.f32 1.0, %v5653_v39 }
0x3cd6   :  { %v3914_v15 = vadd.f32 1.0, %v5655_v7 }
0x3cd7   :  { %5656 = vrcp.f32 %v3877_v1  ;;  %v3889_v8 = vand.u32 2147483648, %v3877_v1  ;;  %vm3883_vm1 = vweird.f32 %v3877_v1  ;;  %v3887_v5 = vand.u32 2147483647, %v3877_v1 }
0x3cd8   :  { %5658 = vrcp.f32 %v3914_v15  ;;  %v3926_v29 = vand.u32 2147483648, %v3914_v15  ;;  %vm3920_vm2 = vweird.f32 %v3914_v15  ;;  %v3924_v30 = vand.u32 2147483647, %v3914_v15 }
0x3cd9   :  { %v3890_v42 = vor.u32 1.1754944e-38, %v3889_v8  ;;  %vm3888_vm5 = vcmp.eq.f32.partialorder %v3887_v5, 8.507059e+37 }
0x3cda   :  { %v3927_v18 = vor.u32 1.1754944e-38, %v3926_v29  ;;  %vm3925_vm6 = vcmp.eq.f32.partialorder %v3924_v30, 8.507059e+37 }
0x3cdd   :  { %v5657_v26 = vpop.eup %5656 }
0x3cde   :  { %v5659_v23 = vpop.eup %5658  ;;  %v3879_v58 = vmul.f32 %v5657_v26, %v3877_v1  ;;  %vm3884_vm14 = vweird.f32 %v5657_v26 }
0x3cdf   :  { %v3916_v17 = vmul.f32 %v5659_v23, %v3914_v15  ;;  %vm3921_vm15 = vweird.f32 %v5659_v23  ;;  %vm3885_vm3 = vmor %vm3883_vm1, %vm3884_vm14 }
0x3ce0   :  { %v3880_v20 = vsub.f32 1.0, %v3879_v58  ;;  %vm3922_vm4 = vmor %vm3920_vm2, %vm3921_vm15 }
0x3ce1   :  { %v3917_v62 = vsub.f32 1.0, %v3916_v17 }
0x3ce2   :  { %v3881_v12 = vmul.f32 %v5657_v26, %v3880_v20 }
0x3ce3   :  { %v3918_v61 = vmul.f32 %v5659_v23, %v3917_v62  ;;  %v3987_v62 = vrot.slane %v7173_v60, 6 }
0x3ce4   :  { %v3882_v4 = vadd.f32 %v5657_v26, %v3881_v12 }
0x3ce5   :  { %v3919_v57 = vadd.f32 %v5659_v23, %v3918_v61 }
0x3ce6   :  { %v3886_v14 = vsel %vm3885_vm3, %v5657_v26, %v3882_v4 }
0x3ce7   :  { %v3923_v40 = vsel %vm3922_vm4, %v5659_v23, %v3919_v57  ;;  %v3891_v27 = vsel %vm3888_vm5, %v3890_v42, %v3886_v14 }
0x3ce8   :  { %v3928_v25 = vsel %vm3925_vm6, %v3927_v18, %v3923_v40  ;;  %v3894_v22 = vmul.f32 %v3891_v27, %v7229_v2 }
0x3ce9   :  { %v3931_v55 = vmul.f32 %v3928_v25, %v7224_v3 }
0x3d45   :  { %v3897_v9 = vpop.permute.xlu0 %3896 }
0x3d46   :  { %v3934_v56 = vpop.permute.xlu1 %3933  ;;  %v3899_v44 = vmul.f32 %v3897_v9, %v3891_v27 }
0x3d47   :  { %v3936_v49 = vmul.f32 %v3934_v56, %v3928_v25 }
0x3d48   :  { %3901 = vrot.lane.b32.xlu2 %v3899_v44, %s5785_s13 }
0x3d49   :  { %3938 = vrot.lane.b32.xlu0 %v3936_v49, %s5785_s13 }
0x3da2   :  { %v3902_v10 = vpop.permute.xlu2 %3901 }
0x3da3   :  { %v7259_v35 = vadd.f32 %v3902_v10, %v3894_v22 }
0x3da5   :  { %5660 = vtanh.f32 %v7259_v35 }
0x3dab   :  { %v5661_v45 = vpop.eup %5660 }
0x3dac   :  { %3907 = vrot.lane.b32.xlu1 %v5661_v45, %s5784_s0 }
0x3dbb   :  { %v3939_v39 = vpop.permute.xlu0 %3938 }
0x3dbc   :  { %v7264_v7 = vadd.f32 %v3939_v39, %v3931_v55 }
0x3dbe   :  { %5662 = vtanh.f32 %v7264_v7 }
0x3dc4   :  { %v5663_v1 = vpop.eup %5662 }
0x3dc5   :  { %3944 = vrot.lane.b32.xlu2 %v5663_v1, %s5784_s0 }
0x3e1e   :  { %v3908_v15 = vpop.permute.xlu1 %3907 }
0x3e1f   :  { %v3945_v2 = vpop.permute.xlu2 %3944  ;;  %v3910_v26 = vmul.f32 %v3908_v15, %v3891_v27 }
0x3e20   :  { %v3947_v23 = vmul.f32 %v3945_v2, %v3928_v25 }
0x3e21   :  { %3949 = vrot.lane.b32.xlu0 %v3910_v26, %s5785_s13 }
0x3e22   :  { %3953 = vrot.lane.b32.xlu1 %v3947_v23, %s5784_s0 }
0x3e93   :  { %v7270_v58 = vpop.permute.xlu0 %3949 }
0x3e94   :  { %v7272_v17 = vpop.permute.xlu1 %3953 }
0x3e95   :  { %v3956_v3 = vsel %vm312_vm9, %v7270_v58, %v7272_v17 }
0x3e96   :  { %v3957_v20 = vpack.c.bf16 %v3956_v3, %v3956_v3 }
0x3e98   :  { %5114 = vmatmul.msk.bf16.vlgmr.msrb.gmra.mxu2 %vm108_vm0, %v3957_v20  ;;  %5115 = vmatmul.msk.bf16.vlgmr.msrb.gmra.mxu3 %vm108_vm0, %v3957_v20 }
0x3e99   :  { %4439 = vmatpush.bf16.msrb.mxu2 %v7051_v32  ;;  %4452 = vmatpush.bf16.msrb.mxu3 %v7054_v31 }
0x3e9d   :  { %4440 = vmatpush.bf16.msrb.mxu2 %v7069_v33  ;;  %4453 = vmatpush.bf16.msrb.mxu3 %v7071_v21 }
0x3ea1   :  { %4441 = vmatpush.bf16.msrb.mxu2 %v7075_v19  ;;  %4454 = vmatpush.bf16.msrb.mxu3 %v7078_v16 }
0x3ea5   :  { %4442 = vmatpush.bf16.msrb.mxu2 %v7088_v24  ;;  %4455 = vmatpush.bf16.msrb.mxu3 %v7091_v36 }
0x3f1b   :  { %v3970_v12 = vpop.f32.mrf.mxu2  ;;  %v3983_v61 = vpop.f32.mrf.mxu3 }
0x3f1c   :  { %v3989_v4 = vadd.f32 %v3987_v62, %v3970_v12  ;;  %v3990_v32 = vadd.f32 %v3983_v61, %v7178_v6 }
0x3f1e   :  { %5664 = vtanh.f32 %v3989_v4  ;;  %v5116_v19 = vmul.f32 -1.442695, %v3989_v4  ;;  %v5117_v60 = vmul.f32 -1.442695, %v3990_v32 }
0x3f1f   :  { %5666 = vtanh.f32 %v3990_v32 }
0x3f20   :  { %5668 = vpow2.f32 %v5116_v19 }
0x3f23   :  { %v3972_v31 = vpop.f32.mrf.mxu2  ;;  %v3985_v33 = vpop.f32.mrf.mxu3 }
0x3f24   :  { %v5665_v21 = vpop.eup %5664 }
0x3f25   :  { %v5667_v57 = vpop.eup %5666  ;;  %4013 = vrot.lane.b32.xlu2 %v5665_v21, %s5784_s0 }
0x3f26   :  { %4050 = vrot.lane.b32.xlu0 %v5667_v57, %s5784_s0  ;;  %v5669_v16 = vpop.eup %5668 }
0x3f27   :  { %v3994_v24 = vadd.f32 1.0, %v5669_v16 }
0x3f29   :  { %5670 = vrcp.f32 %v3994_v24  ;;  %v4006_v40 = vand.u32 2147483648, %v3994_v24  ;;  %vm4000_vm8 = vweird.f32 %v3994_v24  ;;  %v4004_v42 = vand.u32 2147483647, %v3994_v24 }
0x3f2a   :  { %5672 = vpow2.f32 %v5117_v60  ;;  %v4106_v60 = vrot.slane %v7175_v0, 6 }
0x3f2b   :  { %v4007_v9 = vor.u32 1.1754944e-38, %v4006_v40  ;;  %vm4005_vm14 = vcmp.eq.f32.partialorder %v4004_v42, 8.507059e+37 }
0x3f2f   :  { %v5671_v36 = vpop.eup %5670 }
0x3f30   :  { %v3996_v8 = vmul.f32 %v5671_v36, %v3994_v24  ;;  %v5673_v5 = vpop.eup %5672  ;;  %vm4001_vm7 = vweird.f32 %v5671_v36 }
0x3f31   :  { %v4031_v30 = vadd.f32 1.0, %v5673_v5  ;;  %vm4002_vm13 = vmor %vm4000_vm8, %vm4001_vm7 }
0x3f32   :  { %v3997_v6 = vsub.f32 1.0, %v3996_v8 }
0x3f33   :  { %5674 = vrcp.f32 %v4031_v30  ;;  %v4043_v55 = vand.u32 2147483648, %v4031_v30  ;;  %vm4037_vm1 = vweird.f32 %v4031_v30  ;;  %v4041_v39 = vand.u32 2147483647, %v4031_v30 }
0x3f34   :  { %v3998_v29 = vmul.f32 %v5671_v36, %v3997_v6 }
0x3f35   :  { %v4044_v15 = vor.u32 1.1754944e-38, %v4043_v55  ;;  %vm4042_vm3 = vcmp.eq.f32.partialorder %v4041_v39, 8.507059e+37 }
0x3f36   :  { %v3999_v14 = vadd.f32 %v5671_v36, %v3998_v29 }
0x3f38   :  { %v4003_v18 = vsel %vm4002_vm13, %v5671_v36, %v3999_v14  ;;  %v7316_v36 = vadd.f32 %v7215_v54, %v7170_v63 }
0x3f39   :  { %v4008_v56 = vsel %vm4005_vm14, %v4007_v9, %v4003_v18  ;;  %v5675_v44 = vpop.eup %5674 }
0x3f3a   :  { %v4033_v49 = vmul.f32 %v5675_v44, %v4031_v30  ;;  %vm4038_vm15 = vweird.f32 %v5675_v44  ;;  %v4011_v3 = vmul.f32 %v4008_v56, %v7259_v35 }
0x3f3b   :  { %vm4039_vm2 = vmor %vm4037_vm1, %vm4038_vm15 }
0x3f3c   :  { %v4034_v22 = vsub.f32 1.0, %v4033_v49 }
0x3f3e   :  { %v4035_v10 = vmul.f32 %v5675_v44, %v4034_v22 }
0x3f40   :  { %v4036_v45 = vadd.f32 %v5675_v44, %v4035_v10 }
0x3f42   :  { %v4040_v1 = vsel %vm4039_vm2, %v5675_v44, %v4036_v45 }
0x3f43   :  { %v4045_v26 = vsel %vm4042_vm3, %v4044_v15, %v4040_v1 }
0x3f44   :  { %v4048_v20 = vmul.f32 %v4045_v26, %v7264_v7 }
0x3f7f   :  { %v4014_v27 = vpop.permute.xlu2 %4013 }
0x3f80   :  { %v4016_v25 = vmul.f32 %v4014_v27, %v4008_v56 }
0x3f82   :  { %4018 = vrot.lane.b32.xlu1 %v4016_v25, %s5785_s13 }
0x3f98   :  { %v4051_v2 = vpop.permute.xlu0 %4050 }
0x3f99   :  { %v4053_v23 = vmul.f32 %v4051_v2, %v4045_v26 }
0x3f9b   :  { %4055 = vrot.lane.b32.xlu2 %v4053_v23, %s5785_s13 }
0x3ff4   :  { %v4019_v62 = vpop.permute.xlu1 %4018 }
0x3ff5   :  { %v4056_v12 = vpop.permute.xlu2 %4055  ;;  %v7295_v61 = vadd.f32 %v4019_v62, %v4011_v3 }
0x3ff6   :  { %v7297_v4 = vadd.f32 %v4056_v12, %v4048_v20 }
0x3ff7   :  { %5676 = vtanh.f32 %v7295_v61 }
0x3ff8   :  { %5678 = vtanh.f32 %v7297_v4 }
0x3ffd   :  { %v5677_v32 = vpop.eup %5676 }
0x3ffe   :  { %v5679_v31 = vpop.eup %5678  ;;  %4024 = vrot.lane.b32.xlu0 %v5677_v32, %s5784_s0 }
0x3fff   :  { %4061 = vrot.lane.b32.xlu1 %v5679_v31, %s5784_s0 }
0x4070   :  { %v4025_v33 = vpop.permute.xlu0 %4024 }
0x4071   :  { %v4062_v35 = vpop.permute.xlu1 %4061  ;;  %v4027_v21 = vmul.f32 %v4025_v33, %v4008_v56 }
0x4072   :  { %v4064_v7 = vmul.f32 %v4062_v35, %v4045_v26 }
0x4073   :  { %4066 = vrot.lane.b32.xlu2 %v4027_v21, %s5785_s13 }
0x4074   :  { %4070 = vrot.lane.b32.xlu0 %v4064_v7, %s5784_s0 }
0x40cd   :  { %v7305_v57 = vpop.permute.xlu2 %4066 }
0x40e6   :  { %v7307_v19 = vpop.permute.xlu0 %4070 }
0x40e7   :  { %v4073_v16 = vsel %vm312_vm9, %v7305_v57, %v7307_v19 }
0x40e8   :  { %v4074_v24 = vpack.c.bf16 %v4073_v16, %v4073_v16 }
0x40ea   :  { %5118 = vmatmul.msk.bf16.vlgmr.msra.gmra.mxu0 %vm108_vm0, %v4074_v24  ;;  %5119 = vmatmul.msk.bf16.vlgmr.msra.gmra.mxu1 %vm108_vm0, %v4074_v24 }
0x4167   :  { %v4087_v8 = vpop.f32.mrf.mxu0  ;;  %v4100_v6 = vpop.f32.mrf.mxu1 }
0x4168   :  { %v4104_v29 = vadd.f32 %v4087_v8, %v7316_v36  ;;  %v4108_v5 = vadd.f32 %v4106_v60, %v4100_v6 }
0x416a   :  { %5680 = vtanh.f32 %v4104_v29  ;;  %v5121_v18 = vmul.f32 -1.442695, %v4108_v5  ;;  %v5120_v27 = vmul.f32 -1.442695, %v4104_v29 }
0x416b   :  { %5682 = vtanh.f32 %v4108_v5 }
0x416c   :  { %5684 = vpow2.f32 %v5121_v18 }
0x416f   :  { %v4089_v30 = vpop.f32.mrf.mxu0  ;;  %v4102_v14 = vpop.f32.mrf.mxu1 }
0x4170   :  { %v5681_v40 = vpop.eup %5680 }
0x4171   :  { %v5683_v42 = vpop.eup %5682  ;;  %4131 = vrot.lane.b32.xlu1 %v5681_v40, %s5784_s0 }
0x4172   :  { %4168 = vrot.lane.b32.xlu2 %v5683_v42, %s5784_s0  ;;  %v5685_v63 = vpop.eup %5684 }
0x4173   :  { %v4149_v54 = vadd.f32 1.0, %v5685_v63 }
0x4175   :  { %5686 = vrcp.f32 %v4149_v54  ;;  %v4161_v45 = vand.u32 2147483648, %v4149_v54  ;;  %vm4155_vm5 = vweird.f32 %v4149_v54  ;;  %v4159_v55 = vand.u32 2147483647, %v4149_v54 }
0x4176   :  { %5688 = vpow2.f32 %v5120_v27  ;;  %v4223_v27 = vrot.slane %v7316_v36, 2 }
0x4177   :  { %v4162_v1 = vor.u32 1.1754944e-38, %v4161_v45  ;;  %vm4160_vm7 = vcmp.eq.f32.partialorder %v4159_v55, 8.507059e+37 }
0x417b   :  { %v5687_v9 = vpop.eup %5686 }
0x417c   :  { %v4151_v56 = vmul.f32 %v5687_v9, %v4149_v54  ;;  %v5689_v44 = vpop.eup %5688  ;;  %vm4156_vm4 = vweird.f32 %v5687_v9 }
0x417d   :  { %v4112_v22 = vadd.f32 1.0, %v5689_v44  ;;  %vm4157_vm6 = vmor %vm4155_vm5, %vm4156_vm4 }
0x417e   :  { %v4152_v25 = vsub.f32 1.0, %v4151_v56  ;;  %v4226_v56 = vrot.slane %v7175_v0, 4 }
0x417f   :  { %5690 = vrcp.f32 %v4112_v22  ;;  %v4124_v32 = vand.u32 2147483648, %v4112_v22  ;;  %vm4118_vm13 = vweird.f32 %v4112_v22  ;;  %v4122_v31 = vand.u32 2147483647, %v4112_v22 }
0x4180   :  { %v4153_v49 = vmul.f32 %v5687_v9, %v4152_v25 }
0x4181   :  { %v4125_v35 = vor.u32 1.1754944e-38, %v4124_v32  ;;  %vm4123_vm15 = vcmp.eq.f32.partialorder %v4122_v31, 8.507059e+37 }
0x4182   :  { %v4154_v10 = vadd.f32 %v5687_v9, %v4153_v49 }
0x4184   :  { %v4158_v39 = vsel %vm4157_vm6, %v5687_v9, %v4154_v10 }
0x4185   :  { %v4163_v2 = vsel %vm4160_vm7, %v4162_v1, %v4158_v39  ;;  %v5691_v26 = vpop.eup %5690 }
0x4186   :  { %v4114_v3 = vmul.f32 %v5691_v26, %v4112_v22  ;;  %vm4119_vm8 = vweird.f32 %v5691_v26  ;;  %v4166_v24 = vmul.f32 %v4163_v2, %v7297_v4 }
0x4187   :  { %vm4120_vm14 = vmor %vm4118_vm13, %vm4119_vm8 }
0x4188   :  { %v4115_v20 = vsub.f32 1.0, %v4114_v3 }
0x418a   :  { %v4116_v62 = vmul.f32 %v5691_v26, %v4115_v20 }
0x418c   :  { %v4117_v12 = vadd.f32 %v5691_v26, %v4116_v62 }
0x418e   :  { %v4121_v33 = vsel %vm4120_vm14, %v5691_v26, %v4117_v12 }
0x418f   :  { %v4126_v7 = vsel %vm4123_vm15, %v4125_v35, %v4121_v33 }
0x4190   :  { %v4129_v29 = vmul.f32 %v4126_v7, %v7295_v61 }
0x41cc   :  { %v4169_v15 = vpop.permute.xlu2 %4168 }
0x41cd   :  { %v4171_v23 = vmul.f32 %v4169_v15, %v4163_v2 }
0x41cf   :  { %4173 = vrot.lane.b32.xlu1 %v4171_v23, %s5785_s13 }
0x41e3   :  { %v4132_v21 = vpop.permute.xlu1 %4131 }
0x41e4   :  { %v4134_v16 = vmul.f32 %v4132_v21, %v4126_v7 }
0x41e6   :  { %4136 = vrot.lane.b32.xlu0 %v4134_v16, %s5785_s13 }
0x4241   :  { %v4174_v60 = vpop.permute.xlu1 %4173 }
0x4242   :  { %v7325_v8 = vadd.f32 %v4174_v60, %v4166_v24 }
0x4244   :  { %5692 = vtanh.f32 %v7325_v8 }
0x424a   :  { %v5693_v6 = vpop.eup %5692 }
0x424b   :  { %4179 = vrot.lane.b32.xlu0 %v5693_v6, %s5784_s0 }
0x4258   :  { %v4137_v5 = vpop.permute.xlu0 %4136 }
0x4259   :  { %v7330_v30 = vadd.f32 %v4137_v5, %v4129_v29 }
0x425b   :  { %5694 = vtanh.f32 %v7330_v30 }
0x4261   :  { %v5695_v14 = vpop.eup %5694 }
0x4262   :  { %4142 = vrot.lane.b32.xlu2 %v5695_v14, %s5784_s0 }
0x42bc   :  { %v4143_v40 = vpop.permute.xlu2 %4142 }
0x42bd   :  { %v4180_v4 = vpop.permute.xlu0 %4179  ;;  %v4145_v42 = vmul.f32 %v4143_v40, %v4126_v7 }
0x42be   :  { %v4182_v18 = vmul.f32 %v4180_v4, %v4163_v2 }
0x42bf   :  { %4184 = vrot.lane.b32.xlu1 %v4145_v42, %s5785_s13 }
0x42c0   :  { %4188 = vrot.lane.b32.xlu2 %v4182_v18, %s5784_s0 }
0x431a   :  { %v7336_v63 = vpop.permute.xlu2 %4188 }
0x4331   :  { %v7338_v54 = vpop.permute.xlu1 %4184 }
0x4332   :  { %v4191_v61 = vsel %vm312_vm9, %v7338_v54, %v7336_v63 }
0x4333   :  { %v4192_v9 = vpack.c.bf16 %v4191_v61, %v4191_v61 }
0x4335   :  { %5122 = vmatmul.msk.bf16.vlgmr.msra.gmra.mxu2 %vm108_vm0, %v4192_v9  ;;  %5123 = vmatmul.msk.bf16.vlgmr.msra.gmra.mxu3 %vm108_vm0, %v4192_v9 }
0x43b8   :  { %v4205_v25 = vpop.f32.mrf.mxu2  ;;  %v4218_v44 = vpop.f32.mrf.mxu3 }
0x43b9   :  { %v4225_v49 = vadd.f32 %v4223_v27, %v4205_v25  ;;  %v4228_v22 = vadd.f32 %v4226_v56, %v4218_v44 }
0x43bb   :  { %5696 = vtanh.f32 %v4225_v49  ;;  %v5124_v1 = vmul.f32 -1.442695, %v4225_v49  ;;  %v5125_v15 = vmul.f32 -1.442695, %v4228_v22 }
0x43bc   :  { %5698 = vtanh.f32 %v4228_v22 }
0x43bd   :  { %5700 = vpow2.f32 %v5124_v1 }
0x43be   :  { %5702 = vpow2.f32 %v5125_v15 }
0x43c0   :  { %v4207_v10 = vpop.f32.mrf.mxu2  ;;  %v4220_v45 = vpop.f32.mrf.mxu3 }
0x43c1   :  { %v5697_v55 = vpop.eup %5696 }
0x43c2   :  { %v5699_v39 = vpop.eup %5698  ;;  %4251 = vrot.lane.b32.xlu0 %v5697_v55, %s5784_s0 }
0x43c3   :  { %4288 = vrot.lane.b32.xlu1 %v5699_v39, %s5784_s0  ;;  %v5701_v2 = vpop.eup %5700 }
0x43c4   :  { %v5703_v26 = vpop.eup %5702  ;;  %v4232_v23 = vadd.f32 1.0, %v5701_v2 }
0x43c5   :  { %v4269_v3 = vadd.f32 1.0, %v5703_v26 }
0x43c6   :  { %5704 = vrcp.f32 %v4232_v23  ;;  %v4244_v24 = vand.u32 2147483648, %v4232_v23  ;;  %vm4238_vm3 = vweird.f32 %v4232_v23  ;;  %v4242_v6 = vand.u32 2147483647, %v4232_v23 }
0x43c7   :  { %5706 = vrcp.f32 %v4269_v3  ;;  %v4281_v60 = vand.u32 2147483648, %v4269_v3  ;;  %vm4275_vm4 = vweird.f32 %v4269_v3  ;;  %v4279_v29 = vand.u32 2147483647, %v4269_v3 }
0x43c8   :  { %v4245_v40 = vor.u32 1.1754944e-38, %v4244_v24  ;;  %vm4243_vm7 = vcmp.eq.f32.partialorder %v4242_v6, 8.507059e+37 }
0x43c9   :  { %v4282_v4 = vor.u32 1.1754944e-38, %v4281_v60  ;;  %vm4280_vm8 = vcmp.eq.f32.partialorder %v4279_v29, 8.507059e+37 }
0x43cc   :  { %v5705_v20 = vpop.eup %5704 }
0x43cd   :  { %v5707_v62 = vpop.eup %5706  ;;  %v4234_v12 = vmul.f32 %v5705_v20, %v4232_v23  ;;  %vm4239_vm1 = vweird.f32 %v5705_v20 }
0x43ce   :  { %v4271_v32 = vmul.f32 %v5707_v62, %v4269_v3  ;;  %vm4276_vm2 = vweird.f32 %v5707_v62  ;;  %vm4240_vm5 = vmor %vm4238_vm3, %vm4239_vm1 }
0x43cf   :  { %v4235_v31 = vsub.f32 1.0, %v4234_v12  ;;  %vm4277_vm6 = vmor %vm4275_vm4, %vm4276_vm2 }
0x43d0   :  { %v4272_v33 = vsub.f32 1.0, %v4271_v32 }
0x43d1   :  { %v4236_v35 = vmul.f32 %v5705_v20, %v4235_v31 }
0x43d2   :  { %v4273_v21 = vmul.f32 %v5707_v62, %v4272_v33 }
0x43d3   :  { %v4237_v7 = vadd.f32 %v5705_v20, %v4236_v35 }
0x43d4   :  { %v4274_v16 = vadd.f32 %v5707_v62, %v4273_v21 }
0x43d5   :  { %v4241_v5 = vsel %vm4240_vm5, %v5705_v20, %v4237_v7  ;;  %v4342_v20 = vrot.slane %v7316_v36, 4 }
0x43d6   :  { %v4278_v14 = vsel %vm4277_vm6, %v5707_v62, %v4274_v16  ;;  %v4246_v18 = vsel %vm4243_vm7, %v4245_v40, %v4241_v5  ;;  %v4345_v62 = vrot.slane %v7175_v0, 2 }
0x43d7   :  { %v4283_v9 = vsel %vm4280_vm8, %v4282_v4, %v4278_v14  ;;  %v4249_v25 = vmul.f32 %v4246_v18, %v7330_v30 }
0x43d8   :  { %v4286_v10 = vmul.f32 %v4283_v9, %v7325_v8 }
0x4434   :  { %v4252_v42 = vpop.permute.xlu0 %4251 }
0x4435   :  { %v4289_v61 = vpop.permute.xlu1 %4288  ;;  %v4254_v27 = vmul.f32 %v4252_v42, %v4246_v18 }
0x4436   :  { %v4291_v56 = vmul.f32 %v4289_v61, %v4283_v9 }
0x4437   :  { %4256 = vrot.lane.b32.xlu2 %v4254_v27, %s5785_s13 }
0x4438   :  { %4293 = vrot.lane.b32.xlu0 %v4291_v56, %s5785_s13 }
0x4491   :  { %v4257_v44 = vpop.permute.xlu2 %4256 }
0x4492   :  { %v7352_v49 = vadd.f32 %v4257_v44, %v4249_v25 }
0x4494   :  { %5708 = vtanh.f32 %v7352_v49 }
0x449a   :  { %v5709_v22 = vpop.eup %5708 }
0x449b   :  { %4262 = vrot.lane.b32.xlu1 %v5709_v22, %s5784_s0 }
0x44aa   :  { %v4294_v45 = vpop.permute.xlu0 %4293 }
0x44ab   :  { %v7357_v55 = vadd.f32 %v4294_v45, %v4286_v10 }
0x44ad   :  { %5710 = vtanh.f32 %v7357_v55 }
0x44b3   :  { %v5711_v39 = vpop.eup %5710 }
0x44b4   :  { %4299 = vrot.lane.b32.xlu2 %v5711_v39, %s5784_s0 }
0x450d   :  { %v4263_v1 = vpop.permute.xlu1 %4262 }
0x450e   :  { %v4300_v30 = vpop.permute.xlu2 %4299  ;;  %v4265_v15 = vmul.f32 %v4263_v1, %v4246_v18 }
0x450f   :  { %v4302_v2 = vmul.f32 %v4300_v30, %v4283_v9 }
0x4510   :  { %4304 = vrot.lane.b32.xlu0 %v4265_v15, %s5785_s13 }
0x4511   :  { %4308 = vrot.lane.b32.xlu1 %v4302_v2, %s5784_s0 }
0x4582   :  { %v7363_v26 = vpop.permute.xlu0 %4304 }
0x4583   :  { %v7365_v23 = vpop.permute.xlu1 %4308 }
0x4584   :  { %v4311_v8 = vsel %vm312_vm9, %v7363_v26, %v7365_v23 }
0x4585   :  { %v4312_v3 = vpack.c.bf16 %v4311_v8, %v4311_v8 }
0x4587   :  { %5126 = vmatmul.msk.bf16.vlgmr.msrb.gmra.mxu0 %vm108_vm0, %v4312_v3  ;;  %5127 = vmatmul.msk.bf16.vlgmr.msrb.gmra.mxu1 %vm108_vm0, %v4312_v3 }
0x4604   :  { %v4325_v12 = vpop.f32.mrf.mxu0  ;;  %v4338_v32 = vpop.f32.mrf.mxu1 }
0x4605   :  { %v4344_v31 = vadd.f32 %v4342_v20, %v4325_v12  ;;  %v4347_v33 = vadd.f32 %v4345_v62, %v4338_v32 }
0x4607   :  { %5712 = vtanh.f32 %v4344_v31  ;;  %v5128_v24 = vmul.f32 -1.442695, %v4344_v31  ;;  %v5129_v5 = vmul.f32 -1.442695, %v4347_v33 }
0x4608   :  { %5714 = vtanh.f32 %v4347_v33 }
0x4609   :  { %5716 = vpow2.f32 %v5128_v24 }
0x460c   :  { %v4327_v35 = vpop.f32.mrf.mxu0  ;;  %v4340_v21 = vpop.f32.mrf.mxu1 }
0x460d   :  { %v5713_v7 = vpop.eup %5712 }
0x460e   :  { %v5715_v16 = vpop.eup %5714  ;;  %4370 = vrot.lane.b32.xlu2 %v5713_v7, %s5784_s0 }
0x460f   :  { %4407 = vrot.lane.b32.xlu0 %v5715_v16, %s5784_s0  ;;  %v5717_v60 = vpop.eup %5716 }
0x4610   :  { %v4351_v6 = vadd.f32 1.0, %v5717_v60 }
0x4612   :  { %5718 = vrcp.f32 %v4351_v6  ;;  %v4363_v9 = vand.u32 2147483648, %v4351_v6  ;;  %vm4357_vm14 = vweird.f32 %v4351_v6  ;;  %v4361_v27 = vand.u32 2147483647, %v4351_v6 }
0x4613   :  { %5720 = vpow2.f32 %v5129_v5 }
0x4614   :  { %v4364_v25 = vor.u32 1.1754944e-38, %v4363_v9  ;;  %vm4362_vm1 = vcmp.eq.f32.partialorder %v4361_v27, 8.507059e+37 }
0x4618   :  { %v5719_v29 = vpop.eup %5718 }
0x4619   :  { %v4353_v14 = vmul.f32 %v5719_v29, %v4351_v6  ;;  %v5721_v42 = vpop.eup %5720  ;;  %vm4358_vm13 = vweird.f32 %v5719_v29 }
0x461a   :  { %v4388_v18 = vadd.f32 1.0, %v5721_v42  ;;  %vm4359_vm15 = vmor %vm4357_vm14, %vm4358_vm13  ;;  %v4461_v42 = vrot.slane %v7316_v36, 6 }
0x461b   :  { %v4354_v40 = vsub.f32 1.0, %v4353_v14 }
0x461c   :  { %5722 = vrcp.f32 %v4388_v18  ;;  %v4400_v2 = vand.u32 2147483648, %v4388_v18  ;;  %vm4394_vm3 = vweird.f32 %v4388_v18  ;;  %v4398_v8 = vand.u32 2147483647, %v4388_v18 }
0x461d   :  { %v4355_v4 = vmul.f32 %v5719_v29, %v4354_v40 }
0x461e   :  { %v4401_v20 = vor.u32 1.1754944e-38, %v4400_v2  ;;  %vm4399_vm5 = vcmp.eq.f32.partialorder %v4398_v8, 8.507059e+37 }
0x461f   :  { %v4356_v61 = vadd.f32 %v5719_v29, %v4355_v4 }
0x4621   :  { %v4360_v56 = vsel %vm4359_vm15, %v5719_v29, %v4356_v61 }
0x4622   :  { %v4365_v22 = vsel %vm4362_vm1, %v4364_v25, %v4360_v56  ;;  %v5723_v45 = vpop.eup %5722 }
0x4623   :  { %v4390_v39 = vmul.f32 %v5723_v45, %v4388_v18  ;;  %vm4395_vm2 = vweird.f32 %v5723_v45  ;;  %v4368_v31 = vmul.f32 %v4365_v22, %v7352_v49 }
0x4624   :  { %vm4396_vm4 = vmor %vm4394_vm3, %vm4395_vm2  ;;  %vm1153_vm3 = vcmask 785408  }
0x4625   :  { %v4391_v1 = vsub.f32 1.0, %v4390_v39 }
0x4627   :  { %v4392_v30 = vmul.f32 %v5723_v45, %v4391_v1 }
0x4629   :  { %v4393_v15 = vadd.f32 %v5723_v45, %v4392_v30 }
0x462b   :  { %v4397_v3 = vsel %vm4396_vm4, %v5723_v45, %v4393_v15 }
0x462c   :  { %v4402_v12 = vsel %vm4399_vm5, %v4401_v20, %v4397_v3 }
0x462d   :  { %v4405_v33 = vmul.f32 %v4402_v12, %v7357_v55 }
0x4668   :  { %v4371_v44 = vpop.permute.xlu2 %4370 }
0x4669   :  { %v4373_v10 = vmul.f32 %v4371_v44, %v4365_v22 }
0x466b   :  { %4375 = vrot.lane.b32.xlu1 %v4373_v10, %s5785_s13 }
0x4681   :  { %v4408_v62 = vpop.permute.xlu0 %4407 }
0x4682   :  { %v4410_v32 = vmul.f32 %v4408_v62, %v4402_v12 }
0x4684   :  { %4412 = vrot.lane.b32.xlu2 %v4410_v32, %s5785_s13 }
0x46dd   :  { %v4376_v35 = vpop.permute.xlu1 %4375 }
0x46de   :  { %v4413_v21 = vpop.permute.xlu2 %4412  ;;  %v7380_v7 = vadd.f32 %v4376_v35, %v4368_v31 }
0x46df   :  { %v7382_v16 = vadd.f32 %v4413_v21, %v4405_v33 }
0x46e0   :  { %5724 = vtanh.f32 %v7380_v7 }
0x46e1   :  { %5726 = vtanh.f32 %v7382_v16 }
0x46e6   :  { %v5725_v24 = vpop.eup %5724 }
0x46e7   :  { %v5727_v60 = vpop.eup %5726  ;;  %4381 = vrot.lane.b32.xlu0 %v5725_v24, %s5784_s0 }
0x46e8   :  { %4418 = vrot.lane.b32.xlu1 %v5727_v60, %s5784_s0 }
0x4759   :  { %v4382_v6 = vpop.permute.xlu0 %4381 }
0x475a   :  { %v4419_v49 = vpop.permute.xlu1 %4418  ;;  %v4384_v29 = vmul.f32 %v4382_v6, %v4365_v22 }
0x475b   :  { %v4421_v55 = vmul.f32 %v4419_v49, %v4402_v12 }
0x475c   :  { %4423 = vrot.lane.b32.xlu2 %v4384_v29, %s5785_s13 }
0x475d   :  { %4427 = vrot.lane.b32.xlu0 %v4421_v55, %s5784_s0 }
0x47b6   :  { %v7390_v5 = vpop.permute.xlu2 %4423 }
0x47cf   :  { %v7392_v14 = vpop.permute.xlu0 %4427 }
0x47d0   :  { %v4430_v40 = vsel %vm312_vm9, %v7390_v5, %v7392_v14 }
0x47d1   :  { %v4431_v4 = vpack.c.bf16 %v4430_v40, %v4430_v40 }
0x47d3   :  { %5130 = vmatmul.msk.bf16.vlgmr.msrb.gmra.mxu2 %vm108_vm0, %v4431_v4  ;;  %5131 = vmatmul.msk.bf16.vlgmr.msrb.gmra.mxu3 %vm108_vm0, %v4431_v4 }
0x4856   :  { %v4444_v18 = vpop.f32.mrf.mxu2  ;;  %v4457_v61 = vpop.f32.mrf.mxu3 }
0x4857   :  { %v4463_v9 = vadd.f32 %v4461_v42, %v4444_v18  ;;  %v4464_v27 = vadd.f32 %v4457_v61, %v7175_v0 }
0x4859   :  { %5728 = vtanh.f32 %v4463_v9  ;;  %v5133_v10 = vmul.f32 -1.442695, %v4464_v27  ;;  %v5132_v1 = vmul.f32 -1.442695, %v4463_v9 }
0x485a   :  { %5730 = vtanh.f32 %v4464_v27 }
0x485b   :  { %5732 = vpow2.f32 %v5133_v10 }
0x485e   :  { %v4446_v56 = vpop.f32.mrf.mxu2  ;;  %v4459_v25 = vpop.f32.mrf.mxu3 }
0x485f   :  { %v5729_v44 = vpop.eup %5728 }
0x4860   :  { %v5731_v22 = vpop.eup %5730  ;;  %4487 = vrot.lane.b32.xlu1 %v5729_v44, %s5784_s0 }
0x4861   :  { %4524 = vrot.lane.b32.xlu2 %v5731_v22, %s5784_s0  ;;  %v5733_v45 = vpop.eup %5732 }
0x4862   :  { %v4505_v39 = vadd.f32 1.0, %v5733_v45 }
0x4864   :  { %5734 = vrcp.f32 %v4505_v39  ;;  %v4517_v20 = vand.u32 2147483648, %v4505_v39  ;;  %vm4511_vm7 = vweird.f32 %v4505_v39  ;;  %v4515_v62 = vand.u32 2147483647, %v4505_v39 }
0x4865   :  { %5736 = vpow2.f32 %v5132_v1 }
0x4866   :  { %v4518_v32 = vor.u32 1.1754944e-38, %v4517_v20  ;;  %vm4516_vm13 = vcmp.eq.f32.partialorder %v4515_v62, 8.507059e+37 }
0x486a   :  { %v5735_v36 = vpop.eup %5734 }
0x486b   :  { %v4507_v30 = vmul.f32 %v5735_v36, %v4505_v39  ;;  %v5737_v15 = vpop.eup %5736  ;;  %vm4512_vm6 = vweird.f32 %v5735_v36 }
0x486c   :  { %v4468_v8 = vadd.f32 1.0, %v5737_v15  ;;  %vm4513_vm8 = vmor %vm4511_vm7, %vm4512_vm6  ;;  %v4560_v15 = vsel %vm312_vm9, %v7270_v58, %v7365_v23  ;;  %v4562_v58 = vsel %vm312_vm9, %v7338_v54, %v7307_v19  ;;  %v2289_v19 = vsel %vm312_vm9, %v6742_v37, %v6719_v48 }
0x486d   :  { %v4508_v0 = vsub.f32 1.0, %v4507_v30  ;;  %v4563_v30 = vsel %vm312_vm9, %v7363_v26, %v7272_v17  ;;  %v4561_v17 = vsel %vm312_vm9, %v7305_v57, %v7336_v63  ;;  %v4570_v26 = vrot.slane %v4560_v15, 4  ;;  %v4672_v15 = vld [vmem:[%s7514_s7 + $0x8] sm:$0xff] }
0x486e   :  { %5738 = vrcp.f32 %v4468_v8  ;;  %v4480_v29 = vand.u32 2147483648, %v4468_v8  ;;  %vm4474_vm15 = vweird.f32 %v4468_v8  ;;  %v4478_v55 = vand.u32 2147483647, %v4468_v8 }
0x486f   :  { %v4509_v2 = vmul.f32 %v5735_v36, %v4508_v0  ;;  %v4576_v20 = vrot.slane %v4563_v30, 6 }
0x4870   :  { %v4481_v4 = vor.u32 1.1754944e-38, %v4480_v29  ;;  %vm4479_vm2 = vcmp.eq.f32.partialorder %v4478_v55, 8.507059e+37  ;;  %v1151_v29 = vsel %vm312_vm9, %v6334_v46, %v6308_v41 }
0x4871   :  { %v4510_v3 = vadd.f32 %v5735_v36, %v4509_v2  ;;  %v4564_v2 = vsel %vm312_vm9, %v7390_v5, %v7235_v47  ;;  %v4573_v5 = vrot.slane %v4561_v17, 2  ;;  %v4587_v62 = vsel %vm1181_vm10, %v4562_v58, %v4576_v20 }
0x4873   :  { %v4514_v12 = vsel %vm4513_vm8, %v5735_v36, %v4510_v3 }
0x4874   :  { %v4519_v33 = vsel %vm4516_vm13, %v4518_v32, %v4514_v12  ;;  %v5739_v35 = vpop.eup %5738 }
0x4875   :  { %v4470_v24 = vmul.f32 %v5739_v35, %v4468_v8  ;;  %vm4475_vm14 = vweird.f32 %v5739_v35  ;;  %v4522_v9 = vmul.f32 %v4519_v33, %v7382_v16 }
0x4876   :  { %vm4476_vm1 = vmor %vm4474_vm15, %vm4475_vm14 }
0x4877   :  { %v4471_v60 = vsub.f32 1.0, %v4470_v24  ;;  %v3422_v24 = vsel %vm312_vm9, %v7138_v53, %v7112_v52 }
0x4879   :  { %v4472_v6 = vmul.f32 %v5739_v35, %v4471_v60 }
0x487b   :  { %v4473_v49 = vadd.f32 %v5739_v35, %v4472_v6 }
0x487d   :  { %v4477_v40 = vsel %vm4476_vm1, %v5739_v35, %v4473_v49 }
0x487e   :  { %v4482_v18 = vsel %vm4479_vm2, %v4481_v4, %v4477_v40 }
0x487f   :  { %v4485_v44 = vmul.f32 %v4482_v18, %v7380_v7 }
0x48bb   :  { %v4525_v31 = vpop.permute.xlu2 %4524 }
0x48bc   :  { %v4527_v21 = vmul.f32 %v4525_v31, %v4519_v33 }
0x48be   :  { %4529 = vrot.lane.b32.xlu1 %v4527_v21, %s5785_s13 }
0x48d2   :  { %v4488_v42 = vpop.permute.xlu1 %4487 }
0x48d3   :  { %v4490_v61 = vmul.f32 %v4488_v42, %v4482_v18 }
0x48d5   :  { %4492 = vrot.lane.b32.xlu0 %v4490_v61, %s5785_s13 }
0x4930   :  { %v4530_v27 = vpop.permute.xlu1 %4529 }
0x4931   :  { %v4532_v56 = vadd.f32 %v4530_v27, %v4522_v9  ;;  %v5231_v27 = vld [vmem:[%s7513_s6] ss:$0 sm:$0xff] }
0x4933   :  { %5740 = vtanh.f32 %v4532_v56 }
0x4939   :  { %v5741_v25 = vpop.eup %5740 }
0x493a   :  { %4535 = vrot.lane.b32.xlu0 %v5741_v25, %s5784_s0 }
0x4942   :  { %2282 = vrot.lane.b32.xlu0 %v6607_v43, %s5785_s13  ;;  %v5222_v43 = vld [vmem:[%s7512_s5 + $0x18] sm:$0xff] }
0x4943   :  { %4647 = vmatpush.bf16.msra.mxu0 %v5222_v43 }
0x4947   :  { %v4493_v22 = vpop.permute.xlu0 %4492 }
0x4948   :  { %v4495_v10 = vadd.f32 %v4493_v22, %v4485_v44 }
0x494a   :  { %5742 = vtanh.f32 %v4495_v10  ;;  %3419 = vrot.lane.b32.xlu0 %v7004_v51, %s5784_s0  ;;  %v5220_v51 = vld [vmem:[%s7512_s5 + $0x8] sm:$0xff] }
0x4950   :  { %v5743_v45 = vpop.eup %5742 }
0x4951   :  { %4498 = vrot.lane.b32.xlu2 %v5743_v45, %s5784_s0 }
0x4952   :  { %4552 = vrot.lane.b32.xlu0 %v4532_v56, %s5784_s0 }
0x49ab   :  { %v4499_v16 = vpop.permute.xlu2 %4498 }
0x49ac   :  { %v4536_v39 = vpop.permute.xlu0 %4535  ;;  %v4501_v36 = vmul.f32 %v4499_v16, %v4482_v18 }
0x49ad   :  { %v4538_v1 = vmul.f32 %v4536_v39, %v4519_v33 }
0x49ae   :  { %4540 = vrot.lane.b32.xlu1 %v4501_v36, %s5785_s13 }
0x49af   :  { %4544 = vrot.lane.b32.xlu2 %v4538_v1, %s5784_s0 }
0x49b4   :  { %v2283_v3 = vpop.permute.xlu0 %2282 }
0x49b5   :  { %v2290_v54 = vsel %vm108_vm0, %v2289_v19, %v2283_v3 }
0x49b6   :  { %2286 = vrot.lane.b32.xlu1 %v6602_v13, %s5784_s0  ;;  %v5221_v13 = vld [vmem:[%s7512_s5 + $0x10] sm:$0xff] }
0x49b7   :  { %3415 = vrot.lane.b32.xlu2 %v7009_v11, %s5785_s13  ;;  %4648 = vmatpush.bf16.msra.mxu0 %v5221_v13  ;;  %v4559_v11 = vsel %vm312_vm9, %v7237_v59, %v7392_v14  ;;  %v4579_v14 = vrot.slane %v4564_v2, 4 }
0x49b8   :  { %v4567_v8 = vrot.slane %v4559_v11, 6 }
0x49b9   :  { %v4588_v32 = vsel %vm1183_vm11, %v4587_v62, %v4579_v14 }
0x49bb   :  { %4649 = vmatpush.bf16.msra.mxu0 %v5220_v51 }
0x49bc   :  { %v3420_v35 = vpop.permute.xlu0 %3419 }
0x49be   :  { %4548 = vrot.lane.b32.xlu1 %v4495_v10, %s5785_s13 }
0x49bf   :  { %1144 = vrot.lane.b32.xlu2 %v6205_v50, %s5785_s13  ;;  %v5219_v50 = vld [vmem:[%s7512_s5] sm:$0xff] }
0x49c0   :  { %4650 = vmatpush.bf16.msra.mxu0 %v5219_v50 }
0x49c4   :  { %v4553_v42 = vpop.permute.xlu0 %4552 }
0x49c7   :  { %1148 = vrot.lane.b32.xlu2 %v6200_v38, %s5784_s0 }
0x4a09   :  { %v4545_v38 = vpop.permute.xlu2 %4544 }
0x4a0a   :  { %v4558_v0 = vsel %vm312_vm9, %v7198_v34, %v4545_v38 }
0x4a0b   :  { %v4584_v59 = vsel %vm1181_vm10, %v4558_v0, %v4567_v8 }
0x4a0c   :  { %v4585_v23 = vsel %vm1183_vm11, %v4584_v59, %v4570_v26 }
0x4a0d   :  { %v4586_v57 = vsel %vm1185_vm12, %v4585_v23, %v4573_v5 }
0x4a11   :  { %v3416_v7 = vpop.permute.xlu2 %3415 }
0x4a12   :  { %v3423_v60 = vsel %vm108_vm0, %v3422_v24, %v3416_v7 }
0x4a13   :  { %v3424_v48 = vsel %vm1153_vm3, %v3423_v60, %v3420_v35 }
0x4a14   :  { %v4594_v18 = vrot.slane %v3424_v48, 4 }
0x4a19   :  { %v1145_v31 = vpop.permute.xlu2 %1144 }
0x4a1a   :  { %v1152_v37 = vsel %vm108_vm0, %v1151_v29, %v1145_v31 }
0x4a20   :  { %v4541_v34 = vpop.permute.xlu1 %4540 }
0x4a21   :  { %v4565_v47 = vsel %vm312_vm9, %v4541_v34, %v7200_v28  ;;  %v1149_v6 = vpop.permute.xlu2 %1148  ;;  %v4555_v55 = vsel %vm312_vm9, %v4541_v34, %v4545_v38  ;;  %v4671_v38 = vld [vmem:[%s7514_s7] sm:$0xff] }
0x4a22   :  { %v4582_v12 = vrot.slane %v4565_v47, 2  ;;  %v1154_v40 = vsel %vm1153_vm3, %v1152_v37, %v1149_v6 }
0x4a24   :  { %v4589_v63 = vsel %vm1185_vm12, %v4588_v32, %v4582_v12 }
0x4a25   :  { %v4603_v33 = vpack.c.bf16 %v4589_v63, %v4586_v57 }
0x4a27   :  { %5150 = vmatmul.msk.bf16.vlgmr.msra.gmra.mxu0 %vm108_vm0, %v4603_v33 }
0x4a28   :  { %v2287_v28 = vpop.permute.xlu1 %2286 }
0x4a29   :  { %v2291_v21 = vsel %vm1153_vm3, %v2290_v54, %v2287_v28 }
0x4a2a   :  { %v4591_v49 = vrot.slane %v2291_v21, 6 }
0x4a2c   :  { %v4599_v52 = vsel %vm1181_vm10, %v1154_v40, %v4591_v49  ;;  %vm4706_vm10 = vcmask 392192  }
0x4a2d   :  { %v4600_v41 = vsel %vm1183_vm11, %v4599_v52, %v4594_v18 }
0x4a30   :  { %v4549_v4 = vpop.permute.xlu1 %4548 }
0x4a31   :  { %v4556_v53 = vsel %vm108_vm0, %v4555_v55, %v4549_v4  ;;  %vm4701_vm0 = vcmask 130048  }
0x4a32   :  { %v4557_v61 = vsel %vm1153_vm3, %v4556_v53, %v4553_v42 }
0x4a33   :  { %v4597_v9 = vrot.slane %v4557_v61, 2 }
0x4a35   :  { %v4601_v46 = vsel %vm1185_vm12, %v4600_v41, %v4597_v9 }
0x4a36   :  { %4602 = vst [vmem:[%s7516_s9] sm:$0xff] %v4601_v46  ;;  %s5787_s9 = smov 112  }
0x4aa4   :  { %v4652_v56 = vpop.f32.mrf.mxu0 }
0x4aa5   :  { %v4653_v25 = vadd.f32 %v5231_v27, %v4652_v56 }
0x4aa7   :  { %v5151_v44 = vclamps-f32 %v4653_v25, 100.0  ;;  %v5153_v22 = vclamps-f32 %v4653_v25, 20.0 }
0x4aa9   :  { %v4665_v10 = vmul.f32 0.5, %v5153_v22  ;;  %4687 = vrot.lane.b32.xlu1 %v5151_v44, %s5786_s26 }
0x4aab   :  { %v4667_v45 = vmul.f32 1.442695, %v4665_v10 }
0x4aac   :  { %v4654_v16 = vpop.f32.mrf.mxu0 }
0x4aad   :  { %5744 = vpow2.f32 %v4667_v45  ;;  %v4655_v39 = vadd.f32 %v5231_v27, %v4654_v16 }
0x4aaf   :  { %v5152_v36 = vclamps-f32 %v4655_v39, 100.0  ;;  %v5154_v1 = vclamps-f32 %v4655_v39, 20.0 }
0x4ab1   :  { %v4666_v43 = vmul.f32 0.5, %v5154_v1  ;;  %4689 = vrot.lane.b32.xlu2 %v5152_v36, %s5786_s26 }
0x4ab3   :  { %v5745_v13 = vpop.eup %5744  ;;  %v4669_v51 = vmul.f32 1.442695, %v4666_v43 }
0x4ab4   :  { %4675 = vrot.lane.b32.xlu0 %v5745_v13, %s5787_s9 }
0x4ab5   :  { %5746 = vpow2.f32 %v4669_v51 }
0x4abb   :  { %v5747_v50 = vpop.eup %5746 }
0x4abc   :  { %4695 = vrot.lane.b32.xlu0 %v5153_v22, %s5786_s26  ;;  %4677 = vrot.lane.b32.xlu1 %v5747_v50, %s5787_s9 }
0x4ac4   :  { %4697 = vrot.lane.b32.xlu1 %v5154_v1, %s5786_s26 }
0x4b0b   :  { %v4690_v26 = vpop.permute.xlu2 %4689 }
0x4b1b   :  { %v4688_v11 = vpop.permute.xlu1 %4687 }
0x4b26   :  { %v4676_v7 = vpop.permute.xlu0 %4675 }
0x4b27   :  { %v4681_v30 = vmul.f32 %v4676_v7, %v4671_v38 }
0x4b29   :  { %v4683_v0 = vadd.f32 %v5151_v44, %v4681_v30 }
0x4b2b   :  { %v4702_v8 = vsel %vm4701_vm0, %v4683_v0, %v4688_v11 }
0x4b2e   :  { %v4696_v2 = vpop.permute.xlu0 %4695  ;;  %v4678_v3 = vpop.permute.xlu1 %4677 }
0x4b2f   :  { %v4704_v20 = vsel %vm312_vm9, %v4702_v8, %v4696_v2  ;;  %v4682_v59 = vmul.f32 %v4678_v3, %v4672_v15 }
0x4b30   :  { %4707 = vst.msk [vmem:[%s7515_s8] sm:$0xff] %vm4706_vm10, %v4704_v20 }
0x4b31   :  { %v4684_v17 = vadd.f32 %v5152_v36, %v4682_v59 }
0x4b33   :  { %v4703_v14 = vsel %vm4701_vm0, %v4684_v17, %v4690_v26 }
0x4b36   :  { %v4698_v34 = vpop.permute.xlu1 %4697 }
0x4b37   :  { %v4705_v58 = vsel %vm312_vm9, %v4703_v14, %v4698_v34 }
0x4b38   :  { %4708 = vst.msk [vmem:[%s7515_s8 + $0x8] sm:$0xff] %vm4706_vm10, %v4705_v58 }
0x4b39   :  { %4717 = vsyncpa [#allocation3], 1 }

</bundles_post_ra>
